<compile_context>
chip_gen: v7x
topology: tpu7x:2x2x1
jax: 0.10.0
libtpu: 0.0.40
codegen_flags: <defaults>
</compile_context>

<pallas_src>
import functools

import jax
import jax.numpy as jnp
from jax.experimental import pallas as pl
from jax.experimental.pallas import tpu as pltpu

EPS = 1e-5
LRELU_SLOPE = 0.2
CPAD = 128            # lane-dense channel padding carried through the whole net
KSIZE = 4
M_BLOCK = 256         # row tile for the gridded (BN-free) layers

_VMEM_LIMIT = 32 * 1024 * 1024   # explicit so v7x's smaller VMEM never surprises us


# ------------------------------ Pallas kernels -------------------------------

def _fused_conv_kernel(p_ref, w_ref, b_ref, *rest, has_bn, act):
    """im2col-GEMM + bias [+ BatchNorm(train)] [+ activation] in one pass.

    p_ref : (M, K)  bf16 im2col patches
    w_ref : (K, C)  bf16 GEMM-layout weight
    b_ref : (1, C)  f32  bias
    rest  : (gamma, beta, out) if has_bn else (out,)
    """
    if has_bn:
        g_ref, be_ref, o_ref = rest
    else:
        (o_ref,) = rest

    acc = jnp.dot(p_ref[...], w_ref[...], preferred_element_type=jnp.float32)
    acc = acc + b_ref[...]

    if has_bn:
        # Training-mode BatchNorm2d: per-channel (lane) mean / biased variance
        # over all N*H*W rows of this layer, then affine.
        r = acc.shape[0]
        mean = jnp.sum(acc, axis=0, keepdims=True) * (1.0 / r)
        cen = acc - mean
        var = jnp.sum(cen * cen, axis=0, keepdims=True) * (1.0 / r)
        acc = cen * jax.lax.rsqrt(var + EPS) * g_ref[...] + be_ref[...]

    if act == "lrelu":
        acc = jnp.where(acc > 0, acc, jnp.float32(LRELU_SLOPE) * acc)
    elif act == "sigmoid":          # only taken when use_sigmoid=True
        acc = 1.0 / (1.0 + jnp.exp(-acc))
    # act == "none": raw patch logits (use_sigmoid=False default)

    o_ref[...] = acc.astype(o_ref.dtype)


def fused_conv_layer(patches, w, b, gamma=None, beta=None, *, act, out_dtype):
    """One Conv2d(+BN)(+act) layer as a single pallas_call over (M, K) patches."""
    M, K = patches.shape
    C = w.shape[1]
    has_bn = gamma is not None

    if (not has_bn) and M % M_BLOCK == 0 and M > M_BLOCK:
        # Lane-dense, row-tiled GEMM.  "parallel" lets v7x split rows across its
        # two TensorCores; it is a no-op on single-core v5e / v6e.
        kern = functools.partial(_fused_conv_kernel, has_bn=False, act=act)
        return pl.pallas_call(
            kern,
            out_shape=jax.ShapeDtypeStruct((M, C), out_dtype),
            grid=(M // M_BLOCK,),
            in_specs=[
                pl.BlockSpec((M_BLOCK, K), lambda i: (i, 0)),
                pl.BlockSpec((K, C), lambda i: (0, 0)),
                pl.BlockSpec((1, C), lambda i: (0, 0)),
            ],
            out_specs=pl.BlockSpec((M_BLOCK, C), lambda i: (i, 0)),
            compiler_params=pltpu.CompilerParams(
                dimension_semantics=("parallel",),
                vmem_limit_bytes=_VMEM_LIMIT),
        )(patches, w, b)

    # BatchNorm needs batch statistics over every row -> whole-array block.
    kern = functools.partial(_fused_conv_kernel, has_bn=has_bn, act=act)
    ins = [patches, w, b] + ([gamma, beta] if has_bn else [])
    return pl.pallas_call(
        kern,
        out_shape=jax.ShapeDtypeStruct((M, C), out_dtype),
        in_specs=[pl.BlockSpec(memory_space=pltpu.MemorySpace.VMEM)] * len(ins),
        out_specs=pl.BlockSpec(memory_space=pltpu.MemorySpace.VMEM),
        compiler_params=pltpu.CompilerParams(vmem_limit_bytes=_VMEM_LIMIT),
    )(*ins)


# ----------------------------- im2col (channels-last) ------------------------

def _im2col_nhwc(x, k, stride, pad):
    """NHWC -> (N*OH*OW, k*k*C) patches, tap-major (kh, kw) then channel.

    Channels-last means every concat chunk is a lane-aligned (..., CPAD) slab
    and no 6-D transpose is needed.
    """
    N, H, W, C = x.shape
    xp = jnp.pad(x, ((0, 0), (pad, pad), (pad, pad), (0, 0)))
    OH = (H + 2 * pad - k) // stride + 1
    OW = (W + 2 * pad - k) // stride + 1
    cols = [xp[:, i:i + stride * OH:stride, j:j + stride * OW:stride, :]
            for i in range(k) for j in range(k)]
    patches = jnp.concatenate(cols, axis=-1).reshape(N * OH * OW, k * k * C)
    return patches, OH, OW


# ------------------------- parameters (GEMM layout, bf16) ---------------------

def _gemm_weight(w_oihw):
    """PyTorch (out_c, in_c, kh, kw) -> lane-padded GEMM weight (k*k*CPAD, CPAD) bf16."""
    out_c, in_c, k, _ = w_oihw.shape
    wpad = jnp.zeros((CPAD, CPAD, k, k), jnp.float32).at[:out_c, :in_c].set(w_oihw)
    wmat = jnp.transpose(wpad, (2, 3, 1, 0)).reshape(k * k * CPAD, CPAD)
    return wmat.astype(jnp.bfloat16)


def _pad_vec(v):
    out = jnp.zeros((1, CPAD), jnp.float32)
    if v is not None:
        out = out.at[0, :v.shape[0]].set(v.astype(jnp.float32))
    return out


def build_params(key, input_nc, ndf, n_layers, scale=0.05):
    """Parameters for NLayerDiscriminator(input_nc, ndf, n_layers, BatchNorm2d,
    use_sigmoid=False).  Returns (params: list of array-only dicts,
    layer_cfgs: static tuple of (stride, has_bn, act)) — static config is kept
    OUT of the jit arguments (fixes the previous jit-with-string failure)."""
    # (in_c, out_c, stride, use_bias, use_bn) for every conv in the nn.Sequential
    convs = [(input_nc, ndf, 2, True, False)]                 # conv + LeakyReLU
    nf_mult = 1
    for n in range(1, n_layers):
        nf_prev, nf_mult = nf_mult, min(2 ** n, 8)
        convs.append((ndf * nf_prev, ndf * nf_mult, 2, False, True))  # conv+BN+LReLU
    convs.append((ndf * nf_mult, 1, 1, True, False))          # final conv (no sigmoid)

    params, cfgs = [], []
    keys = jax.random.split(key, 2 * len(convs))
    for idx, (in_c, out_c, stride, use_bias, use_bn) in enumerate(convs):
        w = scale * jax.random.normal(keys[2 * idx], (out_c, in_c, KSIZE, KSIZE),
                                      jnp.float32)
        b = (scale * jax.random.normal(keys[2 * idx + 1], (out_c,), jnp.float32)
             if use_bias else None)
        p = {"w": _gemm_weight(w), "b": _pad_vec(b)}
        if use_bn:
            p["gamma"] = _pad_vec(jnp.ones((out_c,), jnp.float32))
            p["beta"] = _pad_vec(jnp.zeros((out_c,), jnp.float32))
        params.append(p)
        is_last = idx == len(convs) - 1
        cfgs.append((stride, use_bn, "none" if is_last else "lrelu"))
        # TODO(synk): use_sigmoid=True would set the final act to "sigmoid";
        # default (False) matches the PyTorch constructor defaults.
    return params, tuple(cfgs)


# ----------------------------------- forward ----------------------------------

def make_forward(layer_cfgs, out_channels=1):
    def forward(params, x_nchw):
        x = jnp.transpose(x_nchw, (0, 2, 3, 1)).astype(jnp.float32)   # NHWC, once
        N, _, _, C = x.shape
        x = jnp.pad(x, ((0, 0), (0, 0), (0, 0), (0, CPAD - C))).astype(jnp.bfloat16)
        n_layers = len(layer_cfgs)
        for idx, ((stride, has_bn, act), p) in enumerate(zip(layer_cfgs, params)):
            patches, OH, OW = _im2col_nhwc(x, KSIZE, stride, 1)
            is_last = idx == n_layers - 1
            y = fused_conv_layer(
                patches, p["w"], p["b"], p.get("gamma"), p.get("beta"),
                act=act,
                out_dtype=jnp.float32 if is_last else jnp.bfloat16)
            x = y.reshape(N, OH, OW, CPAD)
        out = x[..., :out_channels]
        return jnp.transpose(out, (0, 3, 1, 2))                        # NCHW, once
    return forward
    # TODO(synk): BatchNorm running-stat (momentum) updates are not modelled —
    # the forward uses train-mode batch statistics only.


# ------------------------------------ main ------------------------------------

if __name__ == "__main__":
    INPUT_NC, NDF, N_LAYERS = 3, 8, 3
    N, H, W = 2, 32, 32            # 32 -> 16 -> 8 -> 4 (s=2 convs), final s=1 -> 3

    key = jax.random.PRNGKey(0)
    kp, kx = jax.random.split(key)
    params, cfgs = build_params(kp, INPUT_NC, NDF, N_LAYERS)
    x = jax.random.normal(kx, (N, INPUT_NC, H, W), jnp.float32)

    fwd = jax.jit(make_forward(cfgs))
    out = jax.block_until_ready(fwd(params, x))

    assert out.shape == (N, 1, 3, 3), out.shape
    assert out.dtype == jnp.float32
    assert bool(jnp.all(jnp.isfinite(out)))
    print("KERNEL_OK")
</pallas_src>

<mosaic_0001>
module attributes {stable_mosaic.version = 11 : i64} {
  func.func @_fused_conv_kernel(%arg0: i32, %arg1: memref<256x2048xbf16, #tpu.memory_space<vmem>>, %arg2: memref<2048x128xbf16, #tpu.memory_space<vmem>>, %arg3: memref<1x128xf32, #tpu.memory_space<vmem>>, %arg4: memref<256x128xbf16, #tpu.memory_space<vmem>>) attributes {dimension_semantics = [#tpu.dimension_semantics<parallel>], iteration_bounds = array<i64: 2>, scalar_prefetch = 0 : i64, scratch_operands = 0 : i64, tpu.core_type = #tpu.core_type<tc>, window_params = [{transform_indices = @transform_0, window_bounds = array<i64: 256, 2048>}, {pipeline_mode = #tpu.pipeline_mode<synchronous>, transform_indices = @transform_1, window_bounds = array<i64: 2048, 128>}, {pipeline_mode = #tpu.pipeline_mode<synchronous>, transform_indices = @transform_2, window_bounds = array<i64: 1, 128>}, {transform_indices = @transform_3, window_bounds = array<i64: 256, 128>}]} {
    %c0 = arith.constant 0 : index
    %c0_0 = arith.constant 0 : index
    %0 = vector.load %arg1[%c0, %c0_0] : memref<256x2048xbf16, #tpu.memory_space<vmem>>, vector<256x2048xbf16>
    %c0_1 = arith.constant 0 : index
    %c0_2 = arith.constant 0 : index
    %1 = vector.load %arg2[%c0_1, %c0_2] : memref<2048x128xbf16, #tpu.memory_space<vmem>>, vector<2048x128xbf16>
    %cst = arith.constant dense<0.000000e+00> : vector<256x128xf32>
    %2 = tpu.matmul %0, %1, %cst {dimension_numbers = #tpu.dot_dimension_numbers<[1], [0], [0], [1], [0, 0, 1, 1], [], []>} : vector<256x2048xbf16>, vector<2048x128xbf16>, vector<256x128xf32> -> vector<256x128xf32>
    %c0_3 = arith.constant 0 : index
    %c0_4 = arith.constant 0 : index
    %3 = vector.load %arg3[%c0_3, %c0_4] : memref<1x128xf32, #tpu.memory_space<vmem>>, vector<1x128xf32>
    %4 = vector.broadcast %3 : vector<1x128xf32> to vector<256x128xf32>
    %5 = arith.addf %2, %4 : vector<256x128xf32>
    %cst_5 = arith.constant 0.000000e+00 : f32
    %6 = vector.broadcast %cst_5 : f32 to vector<256x128xf32>
    %7 = arith.cmpf ogt, %5, %6 : vector<256x128xf32>
    %cst_6 = arith.constant 2.000000e-01 : f32
    %8 = vector.broadcast %cst_6 : f32 to vector<256x128xf32>
    %9 = arith.mulf %8, %5 : vector<256x128xf32>
    %10 = arith.select %7, %5, %9 : vector<256x128xi1>, vector<256x128xf32>
    %11 = arith.truncf %10 : vector<256x128xf32> to vector<256x128xbf16>
    %c0_7 = arith.constant 0 : index
    %c0_8 = arith.constant 0 : index
    %12 = vector.load %arg4[%c0_7, %c0_8] : memref<256x128xbf16, #tpu.memory_space<vmem>>, vector<256x128xbf16>
    tpu.vector_store %arg4[%c0_7, %c0_8], %11 {strides = array<i32>} : memref<256x128xbf16, #tpu.memory_space<vmem>>, vector<256x128xbf16>,
    return
  }
  func.func @transform_0(%arg0: i32) -> (i32, i32) {
    %c0_i32 = arith.constant 0 : i32
    %c0_i32_0 = arith.constant 0 : i32
    return %arg0, %c0_i32 : i32, i32
  }
  func.func @transform_1(%arg0: i32) -> (i32, i32) {
    %c0_i32 = arith.constant 0 : i32
    %c0_i32_0 = arith.constant 0 : i32
    %c0_i32_1 = arith.constant 0 : i32
    return %c0_i32, %c0_i32_0 : i32, i32
  }
  func.func @transform_2(%arg0: i32) -> (i32, i32) {
    %c0_i32 = arith.constant 0 : i32
    %c0_i32_0 = arith.constant 0 : i32
    %c0_i32_1 = arith.constant 0 : i32
    return %c0_i32, %c0_i32_0 : i32, i32
  }
  func.func @transform_3(%arg0: i32) -> (i32, i32) {
    %c0_i32 = arith.constant 0 : i32
    %c0_i32_0 = arith.constant 0 : i32
    return %arg0, %c0_i32 : i32, i32
  }
}

module attributes {stable_mosaic.version = 11 : i64} {
  func.func @_fused_conv_kernel(%arg0: memref<128x2048xbf16, #tpu.memory_space<vmem>>, %arg1: memref<2048x128xbf16, #tpu.memory_space<vmem>>, %arg2: memref<1x128xf32, #tpu.memory_space<vmem>>, %arg3: memref<1x128xf32, #tpu.memory_space<vmem>>, %arg4: memref<1x128xf32, #tpu.memory_space<vmem>>, %arg5: memref<128x128xbf16, #tpu.memory_space<vmem>>) attributes {dimension_semantics = [], scalar_prefetch = 0 : i64, scratch_operands = 0 : i64, tpu.core_type = #tpu.core_type<tc>} {
    %c0 = arith.constant 0 : index
    %c0_0 = arith.constant 0 : index
    %0 = vector.load %arg0[%c0, %c0_0] : memref<128x2048xbf16, #tpu.memory_space<vmem>>, vector<128x2048xbf16>
    %c0_1 = arith.constant 0 : index
    %c0_2 = arith.constant 0 : index
    %1 = vector.load %arg1[%c0_1, %c0_2] : memref<2048x128xbf16, #tpu.memory_space<vmem>>, vector<2048x128xbf16>
    %cst = arith.constant dense<0.000000e+00> : vector<128x128xf32>
    %2 = tpu.matmul %0, %1, %cst {dimension_numbers = #tpu.dot_dimension_numbers<[1], [0], [0], [1], [0, 0, 1, 1], [], []>} : vector<128x2048xbf16>, vector<2048x128xbf16>, vector<128x128xf32> -> vector<128x128xf32>
    %c0_3 = arith.constant 0 : index
    %c0_4 = arith.constant 0 : index
    %3 = vector.load %arg2[%c0_3, %c0_4] : memref<1x128xf32, #tpu.memory_space<vmem>>, vector<1x128xf32>
    %4 = vector.broadcast %3 : vector<1x128xf32> to vector<128x128xf32>
    %5 = arith.addf %2, %4 : vector<128x128xf32>
    %cst_5 = arith.constant dense<0.000000e+00> : vector<128xf32>
    %6 = vector.multi_reduction <add>, %5, %cst_5 [0] : vector<128x128xf32> to vector<128xf32>
    %7 = vector.shape_cast %6 : vector<128xf32> to vector<1x128xf32>
    %cst_6 = arith.constant 7.812500e-03 : f32
    %8 = vector.broadcast %cst_6 : f32 to vector<1x128xf32>
    %9 = arith.mulf %7, %8 : vector<1x128xf32>
    %10 = vector.broadcast %9 : vector<1x128xf32> to vector<128x128xf32>
    %11 = arith.subf %5, %10 : vector<128x128xf32>
    %12 = arith.mulf %11, %11 : vector<128x128xf32>
    %cst_7 = arith.constant dense<0.000000e+00> : vector<128xf32>
    %13 = vector.multi_reduction <add>, %12, %cst_7 [0] : vector<128x128xf32> to vector<128xf32>
    %14 = vector.shape_cast %13 : vector<128xf32> to vector<1x128xf32>
    %cst_8 = arith.constant 7.812500e-03 : f32
    %15 = vector.broadcast %cst_8 : f32 to vector<1x128xf32>
    %16 = arith.mulf %14, %15 : vector<1x128xf32>
    %cst_9 = arith.constant 9.99999974E-6 : f32
    %17 = vector.broadcast %cst_9 : f32 to vector<1x128xf32>
    %18 = arith.addf %16, %17 : vector<1x128xf32>
    %19 = math.rsqrt %18 : vector<1x128xf32>
    %20 = vector.broadcast %19 : vector<1x128xf32> to vector<128x128xf32>
    %21 = arith.mulf %11, %20 : vector<128x128xf32>
    %c0_10 = arith.constant 0 : index
    %c0_11 = arith.constant 0 : index
    %22 = vector.load %arg3[%c0_10, %c0_11] : memref<1x128xf32, #tpu.memory_space<vmem>>, vector<1x128xf32>
    %23 = vector.broadcast %22 : vector<1x128xf32> to vector<128x128xf32>
    %24 = arith.mulf %21, %23 : vector<128x128xf32>
    %c0_12 = arith.constant 0 : index
    %c0_13 = arith.constant 0 : index
    %25 = vector.load %arg4[%c0_12, %c0_13] : memref<1x128xf32, #tpu.memory_space<vmem>>, vector<1x128xf32>
    %26 = vector.broadcast %25 : vector<1x128xf32> to vector<128x128xf32>
    %27 = arith.addf %24, %26 : vector<128x128xf32>
    %cst_14 = arith.constant 0.000000e+00 : f32
    %28 = vector.broadcast %cst_14 : f32 to vector<128x128xf32>
    %29 = arith.cmpf ogt, %27, %28 : vector<128x128xf32>
    %cst_15 = arith.constant 2.000000e-01 : f32
    %30 = vector.broadcast %cst_15 : f32 to vector<128x128xf32>
    %31 = arith.mulf %30, %27 : vector<128x128xf32>
    %32 = arith.select %29, %27, %31 : vector<128x128xi1>, vector<128x128xf32>
    %33 = arith.truncf %32 : vector<128x128xf32> to vector<128x128xbf16>
    %c0_16 = arith.constant 0 : index
    %c0_17 = arith.constant 0 : index
    %34 = vector.load %arg5[%c0_16, %c0_17] : memref<128x128xbf16, #tpu.memory_space<vmem>>, vector<128x128xbf16>
    tpu.vector_store %arg5[%c0_16, %c0_17], %33 {strides = array<i32>} : memref<128x128xbf16, #tpu.memory_space<vmem>>, vector<128x128xbf16>,
    return
  }
}

module attributes {stable_mosaic.version = 11 : i64} {
  func.func @_fused_conv_kernel(%arg0: memref<32x2048xbf16, #tpu.memory_space<vmem>>, %arg1: memref<2048x128xbf16, #tpu.memory_space<vmem>>, %arg2: memref<1x128xf32, #tpu.memory_space<vmem>>, %arg3: memref<1x128xf32, #tpu.memory_space<vmem>>, %arg4: memref<1x128xf32, #tpu.memory_space<vmem>>, %arg5: memref<32x128xbf16, #tpu.memory_space<vmem>>) attributes {dimension_semantics = [], scalar_prefetch = 0 : i64, scratch_operands = 0 : i64, tpu.core_type = #tpu.core_type<tc>} {
    %c0 = arith.constant 0 : index
    %c0_0 = arith.constant 0 : index
    %0 = vector.load %arg0[%c0, %c0_0] : memref<32x2048xbf16, #tpu.memory_space<vmem>>, vector<32x2048xbf16>
    %c0_1 = arith.constant 0 : index
    %c0_2 = arith.constant 0 : index
    %1 = vector.load %arg1[%c0_1, %c0_2] : memref<2048x128xbf16, #tpu.memory_space<vmem>>, vector<2048x128xbf16>
    %cst = arith.constant dense<0.000000e+00> : vector<32x128xf32>
    %2 = tpu.matmul %0, %1, %cst {dimension_numbers = #tpu.dot_dimension_numbers<[1], [0], [0], [1], [0, 0, 1, 1], [], []>} : vector<32x2048xbf16>, vector<2048x128xbf16>, vector<32x128xf32> -> vector<32x128xf32>
    %c0_3 = arith.constant 0 : index
    %c0_4 = arith.constant 0 : index
    %3 = vector.load %arg2[%c0_3, %c0_4] : memref<1x128xf32, #tpu.memory_space<vmem>>, vector<1x128xf32>
    %4 = vector.broadcast %3 : vector<1x128xf32> to vector<32x128xf32>
    %5 = arith.addf %2, %4 : vector<32x128xf32>
    %cst_5 = arith.constant dense<0.000000e+00> : vector<128xf32>
    %6 = vector.multi_reduction <add>, %5, %cst_5 [0] : vector<32x128xf32> to vector<128xf32>
    %7 = vector.shape_cast %6 : vector<128xf32> to vector<1x128xf32>
    %cst_6 = arith.constant 3.125000e-02 : f32
    %8 = vector.broadcast %cst_6 : f32 to vector<1x128xf32>
    %9 = arith.mulf %7, %8 : vector<1x128xf32>
    %10 = vector.broadcast %9 : vector<1x128xf32> to vector<32x128xf32>
    %11 = arith.subf %5, %10 : vector<32x128xf32>
    %12 = arith.mulf %11, %11 : vector<32x128xf32>
    %cst_7 = arith.constant dense<0.000000e+00> : vector<128xf32>
    %13 = vector.multi_reduction <add>, %12, %cst_7 [0] : vector<32x128xf32> to vector<128xf32>
    %14 = vector.shape_cast %13 : vector<128xf32> to vector<1x128xf32>
    %cst_8 = arith.constant 3.125000e-02 : f32
    %15 = vector.broadcast %cst_8 : f32 to vector<1x128xf32>
    %16 = arith.mulf %14, %15 : vector<1x128xf32>
    %cst_9 = arith.constant 9.99999974E-6 : f32
    %17 = vector.broadcast %cst_9 : f32 to vector<1x128xf32>
    %18 = arith.addf %16, %17 : vector<1x128xf32>
    %19 = math.rsqrt %18 : vector<1x128xf32>
    %20 = vector.broadcast %19 : vector<1x128xf32> to vector<32x128xf32>
    %21 = arith.mulf %11, %20 : vector<32x128xf32>
    %c0_10 = arith.constant 0 : index
    %c0_11 = arith.constant 0 : index
    %22 = vector.load %arg3[%c0_10, %c0_11] : memref<1x128xf32, #tpu.memory_space<vmem>>, vector<1x128xf32>
    %23 = vector.broadcast %22 : vector<1x128xf32> to vector<32x128xf32>
    %24 = arith.mulf %21, %23 : vector<32x128xf32>
    %c0_12 = arith.constant 0 : index
    %c0_13 = arith.constant 0 : index
    %25 = vector.load %arg4[%c0_12, %c0_13] : memref<1x128xf32, #tpu.memory_space<vmem>>, vector<1x128xf32>
    %26 = vector.broadcast %25 : vector<1x128xf32> to vector<32x128xf32>
    %27 = arith.addf %24, %26 : vector<32x128xf32>
    %cst_14 = arith.constant 0.000000e+00 : f32
    %28 = vector.broadcast %cst_14 : f32 to vector<32x128xf32>
    %29 = arith.cmpf ogt, %27, %28 : vector<32x128xf32>
    %cst_15 = arith.constant 2.000000e-01 : f32
    %30 = vector.broadcast %cst_15 : f32 to vector<32x128xf32>
    %31 = arith.mulf %30, %27 : vector<32x128xf32>
    %32 = arith.select %29, %27, %31 : vector<32x128xi1>, vector<32x128xf32>
    %33 = arith.truncf %32 : vector<32x128xf32> to vector<32x128xbf16>
    %c0_16 = arith.constant 0 : index
    %c0_17 = arith.constant 0 : index
    %34 = vector.load %arg5[%c0_16, %c0_17] : memref<32x128xbf16, #tpu.memory_space<vmem>>, vector<32x128xbf16>
    tpu.vector_store %arg5[%c0_16, %c0_17], %33 {strides = array<i32>} : memref<32x128xbf16, #tpu.memory_space<vmem>>, vector<32x128xbf16>,
    return
  }
}

module attributes {stable_mosaic.version = 11 : i64} {
  func.func @_fused_conv_kernel(%arg0: memref<18x2048xbf16, #tpu.memory_space<vmem>>, %arg1: memref<2048x128xbf16, #tpu.memory_space<vmem>>, %arg2: memref<1x128xf32, #tpu.memory_space<vmem>>, %arg3: memref<18x128xf32, #tpu.memory_space<vmem>>) attributes {dimension_semantics = [], scalar_prefetch = 0 : i64, scratch_operands = 0 : i64, tpu.core_type = #tpu.core_type<tc>} {
    %c0 = arith.constant 0 : index
    %c0_0 = arith.constant 0 : index
    %0 = vector.load %arg0[%c0, %c0_0] : memref<18x2048xbf16, #tpu.memory_space<vmem>>, vector<18x2048xbf16>
    %c0_1 = arith.constant 0 : index
    %c0_2 = arith.constant 0 : index
    %1 = vector.load %arg1[%c0_1, %c0_2] : memref<2048x128xbf16, #tpu.memory_space<vmem>>, vector<2048x128xbf16>
    %cst = arith.constant dense<0.000000e+00> : vector<18x128xf32>
    %2 = tpu.matmul %0, %1, %cst {dimension_numbers = #tpu.dot_dimension_numbers<[1], [0], [0], [1], [0, 0, 1, 1], [], []>} : vector<18x2048xbf16>, vector<2048x128xbf16>, vector<18x128xf32> -> vector<18x128xf32>
    %c0_3 = arith.constant 0 : index
    %c0_4 = arith.constant 0 : index
    %3 = vector.load %arg2[%c0_3, %c0_4] : memref<1x128xf32, #tpu.memory_space<vmem>>, vector<1x128xf32>
    %4 = vector.broadcast %3 : vector<1x128xf32> to vector<18x128xf32>
    %5 = arith.addf %2, %4 : vector<18x128xf32>
    %c0_5 = arith.constant 0 : index
    %c0_6 = arith.constant 0 : index
    %6 = vector.load %arg3[%c0_5, %c0_6] : memref<18x128xf32, #tpu.memory_space<vmem>>, vector<18x128xf32>
    tpu.vector_store %arg3[%c0_5, %c0_6], %5 {strides = array<i32>} : memref<18x128xf32, #tpu.memory_space<vmem>>, vector<18x128xf32>,
    return
  }
}

</mosaic_0001>

<bundles_post_ra>
// kernel: forward.4
= control target key start
LH: loop header
LB: loop body
LE: loop exit
PB: predicated region body
PF: predicated region fallthrough
CT: control target
= control target key end

     0   :  { %s5962_s12 = smov 0   ;;  %s7034_s0 = inlined_call_operand.vmem [shape: bf16[512,2048], index: 0, kind: input, shape index: {}]   ;;  %s7035_s1 = inlined_call_operand.vmem [shape: bf16[2048,128], index: 1, kind: input, shape index: {}]   ;;  %s7036_s2 = inlined_call_operand.vmem [shape: f32[1,128], index: 2, kind: input, shape index: {}]   ;;  %s7037_s3 = inlined_call_operand.vmem [shape: bf16[512,128], index: 3, kind: output, shape index: {}]  }
   0x1 LB: > { %s4345_s13 = sadd.s32 4294967295, %s5940_s12   ;;  %p4349_p0 = scmp.ge.s32.totalorder %s5940_s12, 1  ;;  %s5940_s12 = sphi %s5962_s12, %s13_s12  }
   0x2   : > { %p139_p1 = scmp.lt.s32.totalorder %s5940_s12, 3 }
   0x4   : > { %p140_p2 = pnand %p4349_p0, %p139_p1 }
   0x5   : > { %v5806_v0 = vld [vmem:[%s7035_s1 + $0x40] sm:$0xff] (!%p140_p2)   ;;  %v5810_v4 = vld [vmem:[%s7035_s1 + $0x48] sm:$0xff] (!%p140_p2)   ;;  %v5814_v8 = vld [vmem:[%s7035_s1 + $0x50] sm:$0xff] (!%p140_p2)   ;;  %s4350_s21 = sshll.u32 (!%p140_p2), %s4345_s13, 5 }
   0x6   : > { %143 = sbr.rel (%p140_p2) target bundleno = 770 (0x302), region = 32  ;;  %v5807_v1 = vld [vmem:[%s7035_s1 + $0xc0] sm:$0xff] (!%p140_p2)   ;;  %4902 = vmatprep.subr.bf16.mxu0 (!%p140_p2), %v5806_v0  ;;  %v5811_v5 = vld [vmem:[%s7035_s1 + $0xc8] sm:$0xff] (!%p140_p2)   ;;  %v5815_v9 = vld [vmem:[%s7035_s1 + $0xd0] sm:$0xff] (!%p140_p2)   ;;  %p165_p3 = scmp.lt.s32.totalorder (!%p140_p2), %s4350_s21, 63 }
   0x7   : > { %v5808_v2 = vld [vmem:[%s7035_s1] sm:$0xff] (!%p140_p2)   ;;  %5014 = vmatprep.subr.bf16.mxu1 (!%p140_p2), %v5807_v1  ;;  %v5812_v6 = vld [vmem:[%s7035_s1 + $0x8] sm:$0xff] (!%p140_p2)   ;;  %v5816_v10 = vld [vmem:[%s7035_s1 + $0x10] sm:$0xff] (!%p140_p2)  }
   0x8   : > { %v5809_v3 = vld [vmem:[%s7035_s1 + $0x80] sm:$0xff] (!%p140_p2)   ;;  %4903 = vmatpush3.bf16.msra.mxu0 (!%p140_p2), %v5808_v2  ;;  %v5813_v7 = vld [vmem:[%s7035_s1 + $0x88] sm:$0xff] (!%p140_p2)   ;;  %v5817_v11 = vld [vmem:[%s7035_s1 + $0x90] sm:$0xff] (!%p140_p2)  }
   0x9   : > { %5015 = vmatpush3.bf16.msra.mxu1 (!%p140_p2), %v5809_v3  ;;  %4904 = vmatprep.subr.bf16.mxu0 (!%p140_p2), %v5810_v4  ;;  %v5818_v12 = vld [vmem:[%s7035_s1 + $0x58] sm:$0xff] (!%p140_p2)   ;;  %v5822_v16 = vld [vmem:[%s7035_s1 + $0x60] sm:$0xff] (!%p140_p2)   ;;  %v5826_v20 = vld [vmem:[%s7035_s1 + $0x68] sm:$0xff] (!%p140_p2)  }
   0xa   : > { %5016 = vmatprep.subr.bf16.mxu1 (!%p140_p2), %v5811_v5  ;;  %v5819_v13 = vld [vmem:[%s7035_s1 + $0xd8] sm:$0xff] (!%p140_p2)   ;;  %v5823_v17 = vld [vmem:[%s7035_s1 + $0xe0] sm:$0xff] (!%p140_p2)   ;;  %v5827_v21 = vld [vmem:[%s7035_s1 + $0xe8] sm:$0xff] (!%p140_p2)  }
   0xb   : > { %v5820_v14 = vld [vmem:[%s7035_s1 + $0x18] sm:$0xff] (!%p140_p2)   ;;  %v5824_v18 = vld [vmem:[%s7035_s1 + $0x20] sm:$0xff] (!%p140_p2)   ;;  %v5828_v22 = vld [vmem:[%s7035_s1 + $0x28] sm:$0xff] (!%p140_p2)  }
   0xc   : > { %4905 = vmatpush3.bf16.msra.mxu0 (!%p140_p2), %v5812_v6  ;;  %v5821_v15 = vld [vmem:[%s7035_s1 + $0x98] sm:$0xff] (!%p140_p2)   ;;  %v5825_v19 = vld [vmem:[%s7035_s1 + $0xa0] sm:$0xff] (!%p140_p2)   ;;  %v5829_v23 = vld [vmem:[%s7035_s1 + $0xa8] sm:$0xff] (!%p140_p2)  }
   0xd   : > { %5017 = vmatpush3.bf16.msra.mxu1 %v5813_v7  ;;  %4906 = vmatprep.subr.bf16.mxu0 %v5814_v8  ;;  %s7039_s21 = smov (!%p165_p3, %s4350_s21), 63  ;;  %v5830_v24 = vld [vmem:[%s7035_s1 + $0x70] sm:$0xff]   ;;  %v5834_v28 = vld [vmem:[%s7035_s1 + $0x78] sm:$0xff]   ;;  %v5838_v40 = vld [vmem:[%s7035_s1 + $0x140] sm:$0xff]  }
   0xe   : > { %5018 = vmatprep.subr.bf16.mxu1 %v5815_v9  ;;  %v5831_v25 = vld [vmem:[%s7035_s1 + $0xf0] sm:$0xff]   ;;  %s4774_s18 = sshll.u32 %s7039_s21, 6  ;;  %v5835_v29 = vld [vmem:[%s7035_s1 + $0xf8] sm:$0xff]   ;;  %v5839_v41 = vld [vmem:[%s7035_s1 + $0x100] sm:$0xff]  }
   0xf   : > { %v5832_v26 = vld [vmem:[%s7035_s1 + $0x30] sm:$0xff]   ;;  %s6068_s28 = scalar_lea.vmem %s7034_s0, %s4774_s18  ;;  %v5836_v30 = vld [vmem:[%s7035_s1 + $0x38] sm:$0xff]   ;;  %v5840_v42 = vld [vmem:[%s7035_s1 + $0x1c0] sm:$0xff]  }
  0x10   : > { %4907 = vmatpush3.bf16.msra.mxu0 %v5816_v10  ;;  %v5833_v27 = vld [vmem:[%s7035_s1 + $0xb0] sm:$0xff]   ;;  %v5837_v31 = vld [vmem:[%s7035_s1 + $0xb8] sm:$0xff]   ;;  %v178_v32 = vld [vmem:[%s6068_s28] sm:$0xff] }
  0x11   : > { %5019 = vmatpush3.bf16.msra.mxu1 %v5817_v11  ;;  %4908 = vmatprep.subr.bf16.mxu0 %v5818_v12  ;;  %v186_v33 = vld [vmem:[%s6068_s28 + $0x40] sm:$0xff]  ;;  %v179_v34 = vld [vmem:[%s6068_s28 + $0x8] sm:$0xff]  ;;  %v5846_v2 = vld [vmem:[%s7035_s1 + $0x150] sm:$0xff]  }
  0x12   : > { %5020 = vmatprep.subr.bf16.mxu1 %v5819_v13  ;;  %v4356_v35 = vcombine.low %v178_v32, %v186_v33  ;;  %v4357_v36 = vcombine.high %v178_v32, %v186_v33  ;;  %v187_v37 = vld [vmem:[%s6068_s28 + $0x48] sm:$0xff]  ;;  %v5841_v43 = vld [vmem:[%s7035_s1 + $0x180] sm:$0xff]   ;;  %v5847_v4 = vld [vmem:[%s7035_s1 + $0x110] sm:$0xff]  }
  0x13   : > { %v4358_v38 = vcombine.low %v179_v34, %v187_v37  ;;  %v4359_v39 = vcombine.high %v179_v34, %v187_v37  ;;  %v194_v44 = vld [vmem:[%s6068_s28 + $0x80] sm:$0xff]  ;;  %v195_v47 = vld [vmem:[%s6068_s28 + $0x88] sm:$0xff]  ;;  %v5848_v7 = vld [vmem:[%s7035_s1 + $0x1d0] sm:$0xff]  }
  0x14   : > { %4909 = vmatpush3.bf16.msra.mxu0 %v5820_v14  ;;  %2777 = vmatprep.mubr.bf16.mxu0 %v4357_v36  ;;  %v202_v45 = vld [vmem:[%s6068_s28 + $0xc0] sm:$0xff]  ;;  %v203_v48 = vld [vmem:[%s6068_s28 + $0xc8] sm:$0xff]  ;;  %v5849_v9 = vld [vmem:[%s7035_s1 + $0x190] sm:$0xff]  }
  0x15   : > { %5021 = vmatpush3.bf16.msra.mxu1 %v5821_v15  ;;  %4910 = vmatprep.subr.bf16.mxu0 %v5822_v16  ;;  %v4373_v46 = vcombine.high %v194_v44, %v202_v45  ;;  %v210_v49 = vld [vmem:[%s6068_s28 + $0x100] sm:$0xff]  ;;  %v4375_v50 = vcombine.high %v195_v47, %v203_v48  ;;  %v211_v52 = vld [vmem:[%s6068_s28 + $0x108] sm:$0xff]  ;;  %v4372_v54 = vcombine.low %v194_v44, %v202_v45  ;;  %v5850_v14 = vld [vmem:[%s7035_s1 + $0x158] sm:$0xff]  }
  0x16   : > { %5022 = vmatprep.subr.bf16.mxu1 %v5823_v17  ;;  %2938 = vmatprep.mubr.bf16.mxu1 %v4359_v39  ;;  %v218_v51 = vld [vmem:[%s6068_s28 + $0x140] sm:$0xff]  ;;  %v219_v53 = vld [vmem:[%s6068_s28 + $0x148] sm:$0xff]  ;;  %v4374_v56 = vcombine.low %v195_v47, %v203_v48  ;;  %v5851_v15 = vld [vmem:[%s7035_s1 + $0x118] sm:$0xff]  }
  0x17   : > { %v5842_v55 = vld [vmem:[%s7035_s1 + $0x148] sm:$0xff]   ;;  %v4389_v57 = vcombine.high %v210_v49, %v218_v51  ;;  %v4391_v59 = vcombine.high %v211_v52, %v219_v53  ;;  %v226_v62 = vld [vmem:[%s6068_s28 + $0x180] sm:$0xff]  ;;  %v4388_v3 = vcombine.low %v210_v49, %v218_v51  ;;  %v4390_v5 = vcombine.low %v211_v52, %v219_v53  ;;  %v5852_v17 = vld [vmem:[%s7035_s1 + $0x1d8] sm:$0xff]  }
  0x18   : > { %4911 = vmatpush3.bf16.msra.mxu0 %v5824_v18  ;;  %v5843_v58 = vld [vmem:[%s7035_s1 + $0x108] sm:$0xff]   ;;  %v234_v63 = vld [vmem:[%s6068_s28 + $0x1c0] sm:$0xff]  ;;  %v5863_v47 = vld [vmem:[%s7035_s1 + $0x130] sm:$0xff]  }
  0x19   : > { %5023 = vmatpush3.bf16.msra.mxu1 %v5825_v19  ;;  %4912 = vmatprep.subr.bf16.mxu0 %v5826_v20  ;;  %v5844_v60 = vld [vmem:[%s7035_s1 + $0x1c8] sm:$0xff]   ;;  %v4405_v6 = vcombine.high %v226_v62, %v234_v63  ;;  %v242_v10 = vld [vmem:[%s6068_s28 + $0x200] sm:$0xff]  ;;  %v4404_v16 = vcombine.low %v226_v62, %v234_v63  ;;  %v5853_v20 = vld [vmem:[%s7035_s1 + $0x198] sm:$0xff]  }
  0x1a   : > { %5024 = vmatprep.subr.bf16.mxu1 %v5827_v21  ;;  %v5845_v61 = vld [vmem:[%s7035_s1 + $0x188] sm:$0xff]   ;;  %v250_v11 = vld [vmem:[%s6068_s28 + $0x240] sm:$0xff]  ;;  %v5864_v48 = vld [vmem:[%s7035_s1 + $0x1f0] sm:$0xff]  }
  0x1b   : > { %v227_v0 = vld [vmem:[%s6068_s28 + $0x188] sm:$0xff]  ;;  %v4421_v19 = vcombine.high %v242_v10, %v250_v11  ;;  %v5865_v49 = vld [vmem:[%s7035_s1 + $0x1b0] sm:$0xff]   ;;  %v298_v51 = vld [vmem:[%s6068_s28 + $0x3c0] sm:$0xff] }
  0x1c   : > { %4913 = vmatpush3.bf16.msra.mxu0 %v5828_v22  ;;  %v235_v1 = vld [vmem:[%s6068_s28 + $0x1c8] sm:$0xff]  ;;  %v258_v22 = vld [vmem:[%s6068_s28 + $0x280] sm:$0xff] }
  0x1d   : > { %5025 = vmatpush3.bf16.msra.mxu1 %v5829_v23  ;;  %4914 = vmatprep.subr.bf16.mxu0 %v5830_v24  ;;  %v4407_v8 = vcombine.high %v227_v0, %v235_v1  ;;  %v243_v12 = vld [vmem:[%s6068_s28 + $0x208] sm:$0xff]  ;;  %v4406_v18 = vcombine.low %v227_v0, %v235_v1  ;;  %v266_v23 = vld [vmem:[%s6068_s28 + $0x2c0] sm:$0xff] }
  0x1e   : > { %5026 = vmatprep.subr.bf16.mxu1 %v5831_v25  ;;  %v251_v13 = vld [vmem:[%s6068_s28 + $0x248] sm:$0xff]  ;;  %v5854_v24 = vld [vmem:[%s7035_s1 + $0x160] sm:$0xff]   ;;  %v4437_v32 = vcombine.high %v258_v22, %v266_v23 }
  0x1f   : > { %v4423_v21 = vcombine.high %v243_v12, %v251_v13  ;;  %v259_v25 = vld [vmem:[%s6068_s28 + $0x288] sm:$0xff]  ;;  %v306_v62 = vld [vmem:[%s6068_s28 + $0x400] sm:$0xff] }
  0x20   : > { %4915 = vmatpush3.bf16.msra.mxu0 %v5832_v26  ;;  %v267_v26 = vld [vmem:[%s6068_s28 + $0x2c8] sm:$0xff]  ;;  %v314_v63 = vld [vmem:[%s6068_s28 + $0x440] sm:$0xff] }
  0x21   : > { %5027 = vmatpush3.bf16.msra.mxu1 %v5833_v27  ;;  %4916 = vmatprep.subr.bf16.mxu0 %v5834_v28  ;;  %v5855_v27 = vld [vmem:[%s7035_s1 + $0x120] sm:$0xff]   ;;  %v4439_v33 = vcombine.high %v259_v25, %v267_v26  ;;  %v5858_v34 = vld [vmem:[%s7035_s1 + $0x168] sm:$0xff]  }
  0x22   : > { %5028 = vmatprep.subr.bf16.mxu1 %v5835_v29  ;;  %v5856_v28 = vld [vmem:[%s7035_s1 + $0x1e0] sm:$0xff]   ;;  %v5859_v36 = vld [vmem:[%s7035_s1 + $0x128] sm:$0xff]  }
  0x23   : > { %v5857_v29 = vld [vmem:[%s7035_s1 + $0x1a0] sm:$0xff]   ;;  %v5860_v37 = vld [vmem:[%s7035_s1 + $0x1e8] sm:$0xff]  }
  0x24   : > { %4917 = vmatpush3.bf16.msra.mxu0 %v5836_v30  ;;  %v4420_v30 = vcombine.low %v242_v10, %v250_v11  ;;  %v5861_v39 = vld [vmem:[%s7035_s1 + $0x1a8] sm:$0xff]  }
  0x25   : > { %5029 = vmatpush3.bf16.msra.mxu1 %v5837_v31  ;;  %5126 = vmatprep.subr.bf16.mxu0 %v5838_v40  ;;  %v4422_v31 = vcombine.low %v243_v12, %v251_v13  ;;  %v275_v40 = vld [vmem:[%s6068_s28 + $0x308] sm:$0xff]  ;;  %v4484_v12 = vcombine.low %v306_v62, %v314_v63 }
  0x26   : > { %5238 = vmatprep.subr.bf16.mxu1 %v5840_v42  ;;  %v4436_v42 = vcombine.low %v258_v22, %v266_v23  ;;  %v291_v52 = vld [vmem:[%s6068_s28 + $0x388] sm:$0xff] }
  0x27   : > { %2778 = vmatmul.mubr.bf16.vlgmr.msra.gmra.mrb[0].mxu0 %v4356_v35  ;;  %v274_v35 = vld [vmem:[%s6068_s28 + $0x300] sm:$0xff]  ;;  %v299_v53 = vld [vmem:[%s6068_s28 + $0x3c8] sm:$0xff] }
  0x28   : > { %2939 = vmatmul.mubr.bf16.vlgmr.msra.gmra.mrb[0].mxu1 %v4358_v38  ;;  %5127 = vmatpush3.bf16.msra.mxu0 %v5839_v41  ;;  %v282_v38 = vld [vmem:[%s6068_s28 + $0x340] sm:$0xff]  ;;  %v283_v41 = vld [vmem:[%s6068_s28 + $0x348] sm:$0xff] }
  0x29   : > { %5239 = vmatpush3.bf16.msra.mxu1 %v5841_v43  ;;  %2785 = vmatprep.mubr.bf16.mxu0 %v4373_v46  ;;  %v4438_v43 = vcombine.low %v259_v25, %v267_v26  ;;  %v4453_v44 = vcombine.high %v274_v35, %v282_v38  ;;  %v4455_v45 = vcombine.high %v275_v40, %v283_v41  ;;  %v5862_v46 = vld [vmem:[%s7035_s1 + $0x170] sm:$0xff]   ;;  %v307_v0 = vld [vmem:[%s6068_s28 + $0x408] sm:$0xff]  ;;  %v362_v25 = vld [vmem:[%s6068_s28 + $0x5c0] sm:$0xff] }
  0x2a   : > { %2946 = vmatprep.mubr.bf16.mxu1 %v4375_v50  ;;  %5128 = vmatprep.subr.bf16.mxu0 %v5842_v55  ;;  %v290_v50 = vld [vmem:[%s6068_s28 + $0x380] sm:$0xff]  ;;  %v5866_v55 = vld [vmem:[%s7035_s1 + $0x178] sm:$0xff]   ;;  %v315_v1 = vld [vmem:[%s6068_s28 + $0x448] sm:$0xff] }
  0x2b   : > { %5240 = vmatprep.subr.bf16.mxu1 %v5844_v60  ;;  %v5868_v60 = vld [vmem:[%s7035_s1 + $0x1f8] sm:$0xff]   ;;  %v323_v10 = vld [vmem:[%s6068_s28 + $0x488] sm:$0xff]  ;;  %v4486_v13 = vcombine.low %v307_v0, %v315_v1 }
  0x2c   : > { %5129 = vmatpush3.bf16.msra.mxu0 %v5843_v58  ;;  %v5867_v58 = vld [vmem:[%s7035_s1 + $0x138] sm:$0xff]   ;;  %v331_v11 = vld [vmem:[%s6068_s28 + $0x4c8] sm:$0xff] }
  0x2d   : > { %5241 = vmatpush3.bf16.msra.mxu1 %v5845_v61  ;;  %5130 = vmatprep.subr.bf16.mxu0 %v5846_v2  ;;  %v5869_v61 = vld [vmem:[%s7035_s1 + $0x1b8] sm:$0xff]   ;;  %v5870_v2 = vld [vmem:[%s7035_s1 + $0x240] sm:$0xff]   ;;  %v355_v26 = vld [vmem:[%s6068_s28 + $0x588] sm:$0xff] }
  0x2e   : > { %5242 = vmatprep.subr.bf16.mxu1 %v5848_v7  ;;  %v4487_v7 = vcombine.high %v307_v0, %v315_v1  ;;  %v180_v0 = vld [vmem:[%s6068_s28 + $0x10] sm:$0xff] }
  0x2f   : > { %2786 = vmatmul.mubr.bf16.gmra.mrb[4].mxu0 %v4372_v54  ;;  %v4452_v54 = vcombine.low %v274_v35, %v282_v38  ;;  %v379_v35 = vld [vmem:[%s6068_s28 + $0x648] sm:$0xff]  ;;  %v188_v1 = vld [vmem:[%s6068_s28 + $0x50] sm:$0xff] }
  0x30   : > { %2947 = vmatmul.mubr.bf16.gmra.mrb[4].mxu1 %v4374_v56  ;;  %2793 = vmatprep.mubr.bf16.mxu0 %v4389_v57  ;;  %v4454_v56 = vcombine.low %v275_v40, %v283_v41  ;;  %v4469_v57 = vcombine.high %v290_v50, %v298_v51  ;;  %v386_v40 = vld [vmem:[%s6068_s28 + $0x680] sm:$0xff] }
  0x31   : > { %2954 = vmatprep.mubr.bf16.mxu1 %v4391_v59  ;;  %5131 = vmatpush3.bf16.msra.mxu0 %v5847_v4  ;;  %v4471_v59 = vcombine.high %v291_v52, %v299_v53  ;;  %v4470_v4 = vcombine.low %v291_v52, %v299_v53  ;;  %v394_v41 = vld [vmem:[%s6068_s28 + $0x6c0] sm:$0xff] }
  0x32   : > { %5243 = vmatpush3.bf16.msra.mxu1 %v5849_v9  ;;  %5132 = vmatprep.subr.bf16.mxu0 %v5850_v14  ;;  %v330_v9 = vld [vmem:[%s6068_s28 + $0x4c0] sm:$0xff]  ;;  %v4564_v52 = vcombine.low %v386_v40, %v394_v41 }
  0x33   : > { %5244 = vmatprep.subr.bf16.mxu1 %v5852_v17  ;;  %v346_v17 = vld [vmem:[%s6068_s28 + $0x540] sm:$0xff] }
  0x35   : > { %5133 = vmatpush3.bf16.msra.mxu0 %v5851_v15  ;;  %v4503_v15 = vcombine.high %v323_v10, %v331_v11 }
  0x36   : > { %5245 = vmatpush3.bf16.msra.mxu1 %v5853_v20  ;;  %5134 = vmatprep.subr.bf16.mxu0 %v5854_v24  ;;  %v354_v24 = vld [vmem:[%s6068_s28 + $0x580] sm:$0xff] }
  0x37   : > { %2794 = vmatmul.mubr.bf16.gmra.mrb[8].mxu0 %v4388_v3  ;;  %5246 = vmatprep.subr.bf16.mxu1 %v5856_v28  ;;  %v4468_v3 = vcombine.low %v290_v50, %v298_v51  ;;  %v403_v50 = vld [vmem:[%s6068_s28 + $0x708] sm:$0xff] }
  0x38   : > { %2955 = vmatmul.mubr.bf16.gmra.mrb[8].mxu1 %v4390_v5  ;;  %2801 = vmatprep.mubr.bf16.mxu0 %v4405_v6  ;;  %v4485_v5 = vcombine.high %v306_v62, %v314_v63  ;;  %v5872_v6 = vld [vmem:[%s7035_s1 + $0x2c0] sm:$0xff]   ;;  %v411_v51 = vld [vmem:[%s6068_s28 + $0x748] sm:$0xff] }
  0x39   : > { %2962 = vmatprep.mubr.bf16.mxu1 %v4407_v8  ;;  %5135 = vmatpush3.bf16.msra.mxu0 %v5855_v27  ;;  %v322_v8 = vld [vmem:[%s6068_s28 + $0x480] sm:$0xff]  ;;  %v363_v27 = vld [vmem:[%s6068_s28 + $0x5c8] sm:$0xff] }
  0x3a   : > { %5247 = vmatpush3.bf16.msra.mxu1 %v5857_v29  ;;  %5136 = vmatprep.subr.bf16.mxu0 %v5858_v34  ;;  %v4501_v14 = vcombine.high %v322_v8, %v330_v9  ;;  %v4500_v20 = vcombine.low %v322_v8, %v330_v9  ;;  %v371_v34 = vld [vmem:[%s6068_s28 + $0x608] sm:$0xff]  ;;  %v196_v8 = vld [vmem:[%s6068_s28 + $0x90] sm:$0xff] }
  0x3b   : > { %5248 = vmatprep.subr.bf16.mxu1 %v5860_v37  ;;  %v4534_v37 = vcombine.low %v355_v26, %v363_v27  ;;  %v204_v9 = vld [vmem:[%s6068_s28 + $0xd0] sm:$0xff] }
  0x3d   : > { %5137 = vmatpush3.bf16.msra.mxu0 %v5859_v36  ;;  %v4532_v36 = vcombine.low %v354_v24, %v362_v25 }
  0x3e   : > { %5249 = vmatpush3.bf16.msra.mxu1 %v5861_v39  ;;  %5138 = vmatprep.subr.bf16.mxu0 %v5862_v46  ;;  %v4551_v39 = vcombine.high %v371_v34, %v379_v35  ;;  %v4565_v46 = vcombine.high %v386_v40, %v394_v41  ;;  %v237_v40 = vld [vmem:[%s6068_s28 + $0x1d8] sm:$0xff] }
  0x3f   : > { %2802 = vmatmul.mubr.bf16.gmra.mrb[12].mxu0 %v4404_v16  ;;  %5250 = vmatprep.subr.bf16.mxu1 %v5864_v48  ;;  %v338_v16 = vld [vmem:[%s6068_s28 + $0x500] sm:$0xff]  ;;  %v5885_v41 = vld [vmem:[%s7035_s1 + $0x298] sm:$0xff]  }
  0x40   : > { %2963 = vmatmul.mubr.bf16.gmra.mrb[12].mxu1 %v4406_v18  ;;  %2809 = vmatprep.mubr.bf16.mxu0 %v4421_v19  ;;  %v339_v18 = vld [vmem:[%s6068_s28 + $0x508] sm:$0xff]  ;;  %v4517_v22 = vcombine.high %v338_v16, %v346_v17  ;;  %v4516_v28 = vcombine.low %v338_v16, %v346_v17  ;;  %v402_v48 = vld [vmem:[%s6068_s28 + $0x700] sm:$0xff]  ;;  %v4377_v16 = vcombine.high %v196_v8, %v204_v9 }
  0x41   : > { %2970 = vmatprep.mubr.bf16.mxu1 %v4423_v21  ;;  %5139 = vmatpush3.bf16.msra.mxu0 %v5863_v47  ;;  %v347_v19 = vld [vmem:[%s6068_s28 + $0x548] sm:$0xff]  ;;  %v4502_v21 = vcombine.low %v323_v10, %v331_v11  ;;  %v4360_v10 = vcombine.low %v180_v0, %v188_v1  ;;  %v197_v11 = vld [vmem:[%s6068_s28 + $0x98] sm:$0xff] }
  0x42   : > { %5251 = vmatpush3.bf16.msra.mxu1 %v5865_v49  ;;  %5140 = vmatprep.subr.bf16.mxu0 %v5866_v55  ;;  %v4519_v23 = vcombine.high %v339_v18, %v347_v19  ;;  %v4518_v29 = vcombine.low %v339_v18, %v347_v19  ;;  %v410_v49 = vld [vmem:[%s6068_s28 + $0x740] sm:$0xff]  ;;  %v4583_v55 = vcombine.high %v403_v50, %v411_v51  ;;  %v5874_v18 = vld [vmem:[%s7035_s1 + $0x248] sm:$0xff]  }
  0x43   : > { %5252 = vmatprep.subr.bf16.mxu1 %v5868_v60  ;;  %v4580_v60 = vcombine.low %v402_v48, %v410_v49  ;;  %v5876_v19 = vld [vmem:[%s7035_s1 + $0x2c8] sm:$0xff]  }
  0x45   : > { %5141 = vmatpush3.bf16.msra.mxu0 %v5867_v58  ;;  %v419_v58 = vld [vmem:[%s6068_s28 + $0x788] sm:$0xff] }
  0x46   : > { %5253 = vmatpush3.bf16.msra.mxu1 %v5869_v61  ;;  %5350 = vmatprep.subr.bf16.mxu0 %v5870_v2  ;;  %v4582_v61 = vcombine.low %v403_v50, %v411_v51  ;;  %v181_v2 = vld [vmem:[%s6068_s28 + $0x18] sm:$0xff]  ;;  %v5890_v50 = vld [vmem:[%s7035_s1 + $0x268] sm:$0xff]  }
  0x47   : > { %2810 = vmatmul.mubr.bf16.gmra.mrb[16].mxu0 %v4420_v30  ;;  %5462 = vmatprep.subr.bf16.mxu1 %v5872_v6  ;;  %v4533_v30 = vcombine.high %v354_v24, %v362_v25  ;;  %v4361_v6 = vcombine.high %v180_v0, %v188_v1  ;;  %v5878_v24 = vld [vmem:[%s7035_s1 + $0x250] sm:$0xff]   ;;  %v213_v25 = vld [vmem:[%s6068_s28 + $0x118] sm:$0xff]  ;;  %v5892_v51 = vld [vmem:[%s7035_s1 + $0x2e8] sm:$0xff]  }
  0x48   : > { %2971 = vmatmul.mubr.bf16.gmra.mrb[16].mxu1 %v4422_v31  ;;  %2817 = vmatprep.mubr.bf16.mxu0 %v4437_v32  ;;  %v4535_v31 = vcombine.high %v355_v26, %v363_v27  ;;  %v370_v32 = vld [vmem:[%s6068_s28 + $0x600] sm:$0xff]  ;;  %v221_v26 = vld [vmem:[%s6068_s28 + $0x158] sm:$0xff]  ;;  %v5880_v27 = vld [vmem:[%s7035_s1 + $0x2d0] sm:$0xff]  }
  0x49   : > { %2978 = vmatprep.mubr.bf16.mxu1 %v4439_v33  ;;  %v378_v33 = vld [vmem:[%s6068_s28 + $0x640] sm:$0xff]  ;;  %v5895_v0 = vld [vmem:[%s7035_s1 + $0x230] sm:$0xff]  }
  0x4a   : > { %v4549_v38 = vcombine.high %v370_v32, %v378_v33  ;;  %v5897_v1 = vld [vmem:[%s7035_s1 + $0x2b0] sm:$0xff]  }
  0x4f   : > { %2818 = vmatmul.mubr.bf16.gmra.mrb[20].mxu0 %v4436_v42  ;;  %v387_v42 = vld [vmem:[%s6068_s28 + $0x688] sm:$0xff] }
  0x50   : > { %2979 = vmatmul.mubr.bf16.gmra.mrb[20].mxu1 %v4438_v43  ;;  %2825 = vmatprep.mubr.bf16.mxu0 %v4453_v44  ;;  %v395_v43 = vld [vmem:[%s6068_s28 + $0x6c8] sm:$0xff]  ;;  %v4548_v44 = vcombine.low %v370_v32, %v378_v33  ;;  %v5879_v32 = vld [vmem:[%s7035_s1 + $0x210] sm:$0xff]  }
  0x51   : > { %2986 = vmatprep.mubr.bf16.mxu1 %v4455_v45  ;;  %v4550_v45 = vcombine.low %v371_v34, %v379_v35  ;;  %v4567_v47 = vcombine.high %v387_v42, %v395_v43  ;;  %v4566_v53 = vcombine.low %v387_v42, %v395_v43  ;;  %v5881_v33 = vld [vmem:[%s7035_s1 + $0x290] sm:$0xff]   ;;  %v5882_v34 = vld [vmem:[%s7035_s1 + $0x258] sm:$0xff]   ;;  %v5886_v42 = vld [vmem:[%s7035_s1 + $0x260] sm:$0xff]  }
  0x52   : > { %v5884_v35 = vld [vmem:[%s7035_s1 + $0x2d8] sm:$0xff]  }
  0x57   : > { %2826 = vmatmul.mubr.bf16.gmra.mrb[24].mxu0 %v4452_v54  ;;  %v4581_v54 = vcombine.high %v402_v48, %v410_v49  ;;  %v5887_v48 = vld [vmem:[%s7035_s1 + $0x220] sm:$0xff]  }
  0x58   : > { %2987 = vmatmul.mubr.bf16.gmra.mrb[24].mxu1 %v4454_v56  ;;  %2833 = vmatprep.mubr.bf16.mxu0 %v4469_v57  ;;  %v418_v56 = vld [vmem:[%s6068_s28 + $0x780] sm:$0xff] }
  0x59   : > { %2994 = vmatprep.mubr.bf16.mxu1 %v4471_v59  ;;  %v426_v57 = vld [vmem:[%s6068_s28 + $0x7c0] sm:$0xff]  ;;  %v427_v59 = vld [vmem:[%s6068_s28 + $0x7c8] sm:$0xff] }
  0x5a   : > { %v4597_v62 = vcombine.high %v418_v56, %v426_v57  ;;  %v4599_v63 = vcombine.high %v419_v58, %v427_v59  ;;  %v5889_v49 = vld [vmem:[%s7035_s1 + $0x2a0] sm:$0xff]  }
  0x5f   : > { %2834 = vmatmul.mubr.bf16.gmra.mrb[28].mxu0 %v4468_v3  ;;  %v189_v3 = vld [vmem:[%s6068_s28 + $0x58] sm:$0xff] }
  0x60   : > { %2995 = vmatmul.mubr.bf16.gmra.mrb[28].mxu1 %v4470_v4  ;;  %2841 = vmatprep.mubr.bf16.mxu0 %v4485_v5  ;;  %v4596_v4 = vcombine.low %v418_v56, %v426_v57  ;;  %v4598_v5 = vcombine.low %v419_v58, %v427_v59  ;;  %v253_v56 = vld [vmem:[%s6068_s28 + $0x258] sm:$0xff]  ;;  %v5893_v57 = vld [vmem:[%s7035_s1 + $0x2a8] sm:$0xff]   ;;  %v5894_v58 = vld [vmem:[%s7035_s1 + $0x270] sm:$0xff]  }
  0x61   : > { %3002 = vmatprep.mubr.bf16.mxu1 %v4487_v7  ;;  %v4363_v7 = vcombine.high %v181_v2, %v189_v3 }
  0x67   : > { %2842 = vmatmul.mubr.bf16.gmra.mrb[32].mxu0 %v4484_v12  ;;  %v205_v12 = vld [vmem:[%s6068_s28 + $0xd8] sm:$0xff] }
  0x68   : > { %3003 = vmatmul.mubr.bf16.gmra.mrb[32].mxu1 %v4486_v13  ;;  %2849 = vmatprep.mubr.bf16.mxu0 %v4501_v14  ;;  %v4362_v13 = vcombine.low %v181_v2, %v189_v3  ;;  %v5871_v14 = vld [vmem:[%s7035_s1 + $0x200] sm:$0xff]   ;;  %v4379_v17 = vcombine.high %v197_v11, %v205_v12  ;;  %v5898_v2 = vld [vmem:[%s7035_s1 + $0x278] sm:$0xff]  }
  0x69   : > { %3010 = vmatprep.mubr.bf16.mxu1 %v4503_v15  ;;  %v5873_v15 = vld [vmem:[%s7035_s1 + $0x280] sm:$0xff]   ;;  %v5900_v3 = vld [vmem:[%s7035_s1 + $0x2f8] sm:$0xff]  }
  0x6f   : > { %2850 = vmatmul.mubr.bf16.gmra.mrb[36].mxu0 %v4500_v20  ;;  %v212_v20 = vld [vmem:[%s6068_s28 + $0x110] sm:$0xff] }
  0x70   : > { %3011 = vmatmul.mubr.bf16.gmra.mrb[36].mxu1 %v4502_v21  ;;  %2857 = vmatprep.mubr.bf16.mxu0 %v4517_v22  ;;  %v5875_v21 = vld [vmem:[%s7035_s1 + $0x208] sm:$0xff]   ;;  %v220_v22 = vld [vmem:[%s6068_s28 + $0x150] sm:$0xff] }
  0x71   : > { %3018 = vmatprep.mubr.bf16.mxu1 %v4519_v23  ;;  %v5877_v23 = vld [vmem:[%s7035_s1 + $0x288] sm:$0xff]   ;;  %v4392_v43 = vcombine.low %v212_v20, %v220_v22 }
  0x77   : > { %2858 = vmatmul.mubr.bf16.gmra.mrb[40].mxu0 %v4516_v28  ;;  %v4376_v28 = vcombine.low %v196_v8, %v204_v9  ;;  %v269_v8 = vld [vmem:[%s6068_s28 + $0x2d8] sm:$0xff] }
  0x78   : > { %3019 = vmatmul.mubr.bf16.gmra.mrb[40].mxu1 %v4518_v29  ;;  %2865 = vmatprep.mubr.bf16.mxu0 %v4533_v30  ;;  %v4378_v29 = vcombine.low %v197_v11, %v205_v12  ;;  %v4393_v30 = vcombine.high %v212_v20, %v220_v22  ;;  %v5901_v9 = vld [vmem:[%s7035_s1 + $0x2b8] sm:$0xff]   ;;  %v5904_v12 = vld [vmem:[%s7035_s1 + $0x3c0] sm:$0xff]  }
  0x79   : > { %3026 = vmatprep.mubr.bf16.mxu1 %v4535_v31  ;;  %v4395_v31 = vcombine.high %v213_v25, %v221_v26 }
  0x7f   : > { %2866 = vmatmul.mubr.bf16.gmra.mrb[44].mxu0 %v4532_v36  ;;  %v228_v36 = vld [vmem:[%s6068_s28 + $0x190] sm:$0xff] }
  0x80   : > { %3027 = vmatmul.mubr.bf16.gmra.mrb[44].mxu1 %v4534_v37  ;;  %2873 = vmatprep.mubr.bf16.mxu0 %v4549_v38  ;;  %v236_v37 = vld [vmem:[%s6068_s28 + $0x1d0] sm:$0xff]  ;;  %v229_v38 = vld [vmem:[%s6068_s28 + $0x198] sm:$0xff] }
  0x81   : > { %3034 = vmatprep.mubr.bf16.mxu1 %v4551_v39  ;;  %v5883_v39 = vld [vmem:[%s7035_s1 + $0x218] sm:$0xff]   ;;  %v4408_v59 = vcombine.low %v228_v36, %v236_v37 }
  0x87   : > { %2874 = vmatmul.mubr.bf16.gmra.mrb[48].mxu0 %v4548_v44  ;;  %v5888_v44 = vld [vmem:[%s7035_s1 + $0x2e0] sm:$0xff]  }
  0x88   : > { %3035 = vmatmul.mubr.bf16.gmra.mrb[48].mxu1 %v4550_v45  ;;  %2881 = vmatprep.mubr.bf16.mxu0 %v4565_v46  ;;  %v4394_v45 = vcombine.low %v213_v25, %v221_v26  ;;  %v4409_v46 = vcombine.high %v228_v36, %v236_v37  ;;  %v300_v25 = vld [vmem:[%s6068_s28 + $0x3d0] sm:$0xff]  ;;  %v293_v26 = vld [vmem:[%s6068_s28 + $0x398] sm:$0xff] }
  0x89   : > { %3042 = vmatprep.mubr.bf16.mxu1 %v4567_v47  ;;  %v4411_v47 = vcombine.high %v229_v38, %v237_v40 }
  0x8f   : > { %2882 = vmatmul.mubr.bf16.gmra.mrb[52].mxu0 %v4564_v52  ;;  %v244_v52 = vld [vmem:[%s6068_s28 + $0x210] sm:$0xff] }
  0x90   : > { %3043 = vmatmul.mubr.bf16.gmra.mrb[52].mxu1 %v4566_v53  ;;  %2889 = vmatprep.mubr.bf16.mxu0 %v4581_v54  ;;  %v252_v53 = vld [vmem:[%s6068_s28 + $0x250] sm:$0xff]  ;;  %v245_v54 = vld [vmem:[%s6068_s28 + $0x218] sm:$0xff] }
  0x91   : > { %3050 = vmatprep.mubr.bf16.mxu1 %v4583_v55  ;;  %v5891_v55 = vld [vmem:[%s7035_s1 + $0x228] sm:$0xff]   ;;  %v4424_v11 = vcombine.low %v244_v52, %v252_v53 }
  0x97   : > { %2890 = vmatmul.mubr.bf16.gmra.mrb[56].mxu0 %v4580_v60  ;;  %v5896_v60 = vld [vmem:[%s7035_s1 + $0x2f0] sm:$0xff]  }
  0x98   : > { %3051 = vmatmul.mubr.bf16.gmra.mrb[56].mxu1 %v4582_v61  ;;  %2897 = vmatprep.mubr.bf16.mxu0 %v4597_v62  ;;  %v4410_v61 = vcombine.low %v229_v38, %v237_v40  ;;  %v4425_v62 = vcombine.high %v244_v52, %v252_v53  ;;  %v324_v40 = vld [vmem:[%s6068_s28 + $0x490] sm:$0xff] }
  0x99   : > { %3058 = vmatprep.mubr.bf16.mxu1 %v4599_v63  ;;  %v4427_v63 = vcombine.high %v245_v54, %v253_v56 }
  0x9f   : > { %2898 = vmatmul.mubr.bf16.gmra.mrb[60].mxu0 %v4596_v4  ;;  %v260_v4 = vld [vmem:[%s6068_s28 + $0x290] sm:$0xff] }
  0xa0   : > { %3059 = vmatmul.mubr.bf16.gmra.mrb[60].mxu1 %v4598_v5  ;;  %3099 = vmatprep.mubr.bf16.mxu0 %v4361_v6  ;;  %v268_v5 = vld [vmem:[%s6068_s28 + $0x2d0] sm:$0xff]  ;;  %v261_v6 = vld [vmem:[%s6068_s28 + $0x298] sm:$0xff] }
  0xa1   : > { %3260 = vmatprep.mubr.bf16.mxu1 %v4363_v7  ;;  %v5899_v7 = vld [vmem:[%s7035_s1 + $0x238] sm:$0xff]   ;;  %v4440_v20 = vcombine.low %v260_v4, %v268_v5 }
  0xa7   : > { %3100 = vmatmul.mubr.bf16.vlgmr.msra.gmra.mrb[64].mxu0 %v4360_v10  ;;  %v5902_v10 = vld [vmem:[%s7035_s1 + $0x340] sm:$0xff]  }
  0xa8   : > { %3261 = vmatmul.mubr.bf16.vlgmr.msra.gmra.mrb[64].mxu1 %v4362_v13  ;;  %5351 = vmatpush3.bf16.msra.mxu0 %v5871_v14  ;;  %v4426_v13 = vcombine.low %v245_v54, %v253_v56  ;;  %v4441_v14 = vcombine.high %v260_v4, %v268_v5  ;;  %v356_v56 = vld [vmem:[%s6068_s28 + $0x590] sm:$0xff]  ;;  %v381_v4 = vld [vmem:[%s6068_s28 + $0x658] sm:$0xff] }
  0xa9   : > { %5463 = vmatpush3.bf16.msra.mxu1 %v5873_v15  ;;  %3107 = vmatprep.mubr.bf16.mxu0 %v4377_v16  ;;  %v4443_v15 = vcombine.high %v261_v6, %v269_v8  ;;  %v276_v16 = vld [vmem:[%s6068_s28 + $0x310] sm:$0xff] }
  0xaa   : > { %3268 = vmatprep.mubr.bf16.mxu1 %v4379_v17  ;;  %5352 = vmatprep.subr.bf16.mxu0 %v5874_v18  ;;  %v284_v17 = vld [vmem:[%s6068_s28 + $0x350] sm:$0xff]  ;;  %v277_v18 = vld [vmem:[%s6068_s28 + $0x318] sm:$0xff] }
  0xab   : > { %5464 = vmatprep.subr.bf16.mxu1 %v5876_v19  ;;  %v285_v19 = vld [vmem:[%s6068_s28 + $0x358] sm:$0xff]  ;;  %v4457_v22 = vcombine.high %v276_v16, %v284_v17 }
  0xac   : > { %5353 = vmatpush3.bf16.msra.mxu0 %v5875_v21  ;;  %v4442_v21 = vcombine.low %v261_v6, %v269_v8  ;;  %v6393_v6 = vld [vmem:[%s7036_s2] ss:$0 sm:$0xff] }
  0xad   : > { %5465 = vmatpush3.bf16.msra.mxu1 %v5877_v23  ;;  %5354 = vmatprep.subr.bf16.mxu0 %v5878_v24  ;;  %v4459_v23 = vcombine.high %v277_v18, %v285_v19  ;;  %v292_v24 = vld [vmem:[%s6068_s28 + $0x390] sm:$0xff] }
  0xae   : > { %5466 = vmatprep.subr.bf16.mxu1 %v5880_v27  ;;  %v301_v27 = vld [vmem:[%s6068_s28 + $0x3d8] sm:$0xff]  ;;  %v4472_v36 = vcombine.low %v292_v24, %v300_v25 }
  0xaf   : > { %3108 = vmatmul.mubr.bf16.gmra.mrb[68].mxu0 %v4376_v28  ;;  %v4456_v28 = vcombine.low %v276_v16, %v284_v17  ;;  %v4474_v37 = vcombine.low %v293_v26, %v301_v27 }
  0xb0   : > { %3269 = vmatmul.mubr.bf16.gmra.mrb[68].mxu1 %v4378_v29  ;;  %3115 = vmatprep.mubr.bf16.mxu0 %v4393_v30  ;;  %v4458_v29 = vcombine.low %v277_v18, %v285_v19  ;;  %v4473_v30 = vcombine.high %v292_v24, %v300_v25  ;;  %v388_v24 = vld [vmem:[%s6068_s28 + $0x690] sm:$0xff] }
  0xb1   : > { %3276 = vmatprep.mubr.bf16.mxu1 %v4395_v31  ;;  %5355 = vmatpush3.bf16.msra.mxu0 %v5879_v32  ;;  %v4475_v31 = vcombine.high %v293_v26, %v301_v27  ;;  %v308_v32 = vld [vmem:[%s6068_s28 + $0x410] sm:$0xff] }
  0xb2   : > { %5467 = vmatpush3.bf16.msra.mxu1 %v5881_v33  ;;  %5356 = vmatprep.subr.bf16.mxu0 %v5882_v34  ;;  %v316_v33 = vld [vmem:[%s6068_s28 + $0x450] sm:$0xff]  ;;  %v309_v34 = vld [vmem:[%s6068_s28 + $0x418] sm:$0xff] }
  0xb3   : > { %5468 = vmatprep.subr.bf16.mxu1 %v5884_v35  ;;  %v317_v35 = vld [vmem:[%s6068_s28 + $0x458] sm:$0xff]  ;;  %v4489_v38 = vcombine.high %v308_v32, %v316_v33  ;;  %v396_v25 = vld [vmem:[%s6068_s28 + $0x6d0] sm:$0xff] }
  0xb5   : > { %5357 = vmatpush3.bf16.msra.mxu0 %v5883_v39  ;;  %v4491_v39 = vcombine.high %v309_v34, %v317_v35 }
  0xb6   : > { %5469 = vmatpush3.bf16.msra.mxu1 %v5885_v41  ;;  %5358 = vmatprep.subr.bf16.mxu0 %v5886_v42  ;;  %v332_v41 = vld [vmem:[%s6068_s28 + $0x4d0] sm:$0xff]  ;;  %v325_v42 = vld [vmem:[%s6068_s28 + $0x498] sm:$0xff] }
  0xb7   : > { %3116 = vmatmul.mubr.bf16.gmra.mrb[72].mxu0 %v4392_v43  ;;  %5470 = vmatprep.subr.bf16.mxu1 %v5888_v44  ;;  %v333_v43 = vld [vmem:[%s6068_s28 + $0x4d8] sm:$0xff]  ;;  %v4488_v44 = vcombine.low %v308_v32, %v316_v33  ;;  %v4504_v52 = vcombine.low %v324_v40, %v332_v41 }
  0xb8   : > { %3277 = vmatmul.mubr.bf16.gmra.mrb[72].mxu1 %v4394_v45  ;;  %3123 = vmatprep.mubr.bf16.mxu0 %v4409_v46  ;;  %v4490_v45 = vcombine.low %v309_v34, %v317_v35  ;;  %v4505_v46 = vcombine.high %v324_v40, %v332_v41  ;;  %v4506_v53 = vcombine.low %v325_v42, %v333_v43 }
  0xb9   : > { %3284 = vmatprep.mubr.bf16.mxu1 %v4411_v47  ;;  %5359 = vmatpush3.bf16.msra.mxu0 %v5887_v48  ;;  %v4507_v47 = vcombine.high %v325_v42, %v333_v43  ;;  %v340_v48 = vld [vmem:[%s6068_s28 + $0x510] sm:$0xff] }
  0xba   : > { %5471 = vmatpush3.bf16.msra.mxu1 %v5889_v49  ;;  %5360 = vmatprep.subr.bf16.mxu0 %v5890_v50  ;;  %v348_v49 = vld [vmem:[%s6068_s28 + $0x550] sm:$0xff]  ;;  %v341_v50 = vld [vmem:[%s6068_s28 + $0x518] sm:$0xff] }
  0xbb   : > { %5472 = vmatprep.subr.bf16.mxu1 %v5892_v51  ;;  %v349_v51 = vld [vmem:[%s6068_s28 + $0x558] sm:$0xff]  ;;  %v4521_v54 = vcombine.high %v340_v48, %v348_v49 }
  0xbd   : > { %5361 = vmatpush3.bf16.msra.mxu0 %v5891_v55  ;;  %v4523_v55 = vcombine.high %v341_v50, %v349_v51 }
  0xbe   : > { %5473 = vmatpush3.bf16.msra.mxu1 %v5893_v57  ;;  %5362 = vmatprep.subr.bf16.mxu0 %v5894_v58  ;;  %v364_v57 = vld [vmem:[%s6068_s28 + $0x5d0] sm:$0xff]  ;;  %v357_v58 = vld [vmem:[%s6068_s28 + $0x598] sm:$0xff] }
  0xbf   : > { %3124 = vmatmul.mubr.bf16.gmra.mrb[76].mxu0 %v4408_v59  ;;  %5474 = vmatprep.subr.bf16.mxu1 %v5896_v60  ;;  %v365_v59 = vld [vmem:[%s6068_s28 + $0x5d8] sm:$0xff]  ;;  %v4520_v60 = vcombine.low %v340_v48, %v348_v49  ;;  %v4536_v8 = vcombine.low %v356_v56, %v364_v57  ;;  %v404_v48 = vld [vmem:[%s6068_s28 + $0x710] sm:$0xff] }
  0xc0   : > { %3285 = vmatmul.mubr.bf16.gmra.mrb[76].mxu1 %v4410_v61  ;;  %3131 = vmatprep.mubr.bf16.mxu0 %v4425_v62  ;;  %v4522_v61 = vcombine.low %v341_v50, %v349_v51  ;;  %v4537_v62 = vcombine.high %v356_v56, %v364_v57  ;;  %v412_v49 = vld [vmem:[%s6068_s28 + $0x750] sm:$0xff]  ;;  %v4568_v56 = vcombine.low %v388_v24, %v396_v25 }
  0xc1   : > { %3292 = vmatprep.mubr.bf16.mxu1 %v4427_v63  ;;  %5363 = vmatpush3.bf16.msra.mxu0 %v5895_v0  ;;  %v4539_v63 = vcombine.high %v357_v58, %v365_v59  ;;  %v372_v0 = vld [vmem:[%s6068_s28 + $0x610] sm:$0xff] }
  0xc2   : > { %5475 = vmatpush3.bf16.msra.mxu1 %v5897_v1  ;;  %5364 = vmatprep.subr.bf16.mxu0 %v5898_v2  ;;  %v380_v1 = vld [vmem:[%s6068_s28 + $0x650] sm:$0xff] }
  0xc3   : > { %5476 = vmatprep.subr.bf16.mxu1 %v5900_v3  ;;  %v373_v3 = vld [vmem:[%s6068_s28 + $0x618] sm:$0xff]  ;;  %v4552_v32 = vcombine.low %v372_v0, %v380_v1 }
  0xc4   : > { %v4555_v17 = vcombine.high %v373_v3, %v381_v4 }
  0xc5   : > { %5365 = vmatpush3.bf16.msra.mxu0 %v5899_v7 }
  0xc6   : > { %5477 = vmatpush3.bf16.msra.mxu1 %v5901_v9  ;;  %5574 = vmatprep.subr.bf16.mxu0 %v5902_v10 }
  0xc7   : > { %3132 = vmatmul.mubr.bf16.gmra.mrb[80].mxu0 %v4424_v11  ;;  %5686 = vmatprep.subr.bf16.mxu1 %v5904_v12  ;;  %v4538_v12 = vcombine.low %v357_v58, %v365_v59 }
  0xc8   : > { %3293 = vmatmul.mubr.bf16.gmra.mrb[80].mxu1 %v4426_v13  ;;  %3139 = vmatprep.mubr.bf16.mxu0 %v4441_v14  ;;  %v4553_v13 = vcombine.high %v372_v0, %v380_v1 }
  0xc9   : > { %3300 = vmatprep.mubr.bf16.mxu1 %v4443_v15 }
  0xcf   : > { %3140 = vmatmul.mubr.bf16.gmra.mrb[84].mxu0 %v4440_v20 }
  0xd0   : > { %3301 = vmatmul.mubr.bf16.gmra.mrb[84].mxu1 %v4442_v21  ;;  %3147 = vmatprep.mubr.bf16.mxu0 %v4457_v22 }
  0xd1   : > { %3308 = vmatprep.mubr.bf16.mxu1 %v4459_v23 }
  0xd7   : > { %3148 = vmatmul.mubr.bf16.gmra.mrb[88].mxu0 %v4456_v28  ;;  %v389_v28 = vld [vmem:[%s6068_s28 + $0x698] sm:$0xff] }
  0xd8   : > { %3309 = vmatmul.mubr.bf16.gmra.mrb[88].mxu1 %v4458_v29  ;;  %3155 = vmatprep.mubr.bf16.mxu0 %v4473_v30  ;;  %v397_v29 = vld [vmem:[%s6068_s28 + $0x6d8] sm:$0xff] }
  0xd9   : > { %3316 = vmatprep.mubr.bf16.mxu1 %v4475_v31  ;;  %v4571_v41 = vcombine.high %v389_v28, %v397_v29 }
  0xdf   : > { %3156 = vmatmul.mubr.bf16.gmra.mrb[92].mxu0 %v4472_v36  ;;  %v4554_v36 = vcombine.low %v373_v3, %v381_v4 }
  0xe0   : > { %3317 = vmatmul.mubr.bf16.gmra.mrb[92].mxu1 %v4474_v37  ;;  %3163 = vmatprep.mubr.bf16.mxu0 %v4489_v38  ;;  %v4569_v37 = vcombine.high %v388_v24, %v396_v25 }
  0xe1   : > { %3324 = vmatprep.mubr.bf16.mxu1 %v4491_v39 }
  0xe7   : > { %3164 = vmatmul.mubr.bf16.gmra.mrb[96].mxu0 %v4488_v44 }
  0xe8   : > { %3325 = vmatmul.mubr.bf16.gmra.mrb[96].mxu1 %v4490_v45  ;;  %3171 = vmatprep.mubr.bf16.mxu0 %v4505_v46 }
  0xe9   : > { %3332 = vmatprep.mubr.bf16.mxu1 %v4507_v47 }
  0xef   : > { %3172 = vmatmul.mubr.bf16.gmra.mrb[100].mxu0 %v4504_v52  ;;  %v405_v52 = vld [vmem:[%s6068_s28 + $0x718] sm:$0xff] }
  0xf0   : > { %3333 = vmatmul.mubr.bf16.gmra.mrb[100].mxu1 %v4506_v53  ;;  %3179 = vmatprep.mubr.bf16.mxu0 %v4521_v54  ;;  %v413_v53 = vld [vmem:[%s6068_s28 + $0x758] sm:$0xff] }
  0xf1   : > { %3340 = vmatprep.mubr.bf16.mxu1 %v4523_v55  ;;  %v4587_v1 = vcombine.high %v405_v52, %v413_v53 }
  0xf7   : > { %3180 = vmatmul.mubr.bf16.gmra.mrb[104].mxu0 %v4520_v60  ;;  %v4570_v60 = vcombine.low %v389_v28, %v397_v29 }
  0xf8   : > { %3341 = vmatmul.mubr.bf16.gmra.mrb[104].mxu1 %v4522_v61  ;;  %3187 = vmatprep.mubr.bf16.mxu0 %v4537_v62  ;;  %v4585_v61 = vcombine.high %v404_v48, %v412_v49 }
  0xf9   : > { %3348 = vmatprep.mubr.bf16.mxu1 %v4539_v63 }
  0xfa   : > { %v4918_v2 = vpop.f32.mrb[0].mxu0 }
  0xfb   : > { %v5030_v5 = vpop.f32.mrb[0].mxu1  ;;  %v4919_v7 = vpop.f32.mrb[1].mxu0 }
  0xfc   : > { %v4920_v9 = vadd.f32 %v4919_v7, %v4918_v2  ;;  %v5031_v10 = vpop.f32.mrb[1].mxu1  ;;  %v4921_v11 = vpop.f32.mrb[2].mxu0 }
  0xfd   : > { %v5032_v14 = vadd.f32 %v5031_v10, %v5030_v5  ;;  %v5033_v15 = vpop.f32.mrb[2].mxu1  ;;  %v4922_v16 = vpop.f32.mrb[3].mxu0  ;;  %v428_v10 = vld [vmem:[%s6068_s28 + $0x7d0] sm:$0xff] }
  0xfe   : > { %v2780_v18 = vadd.f32 %v4920_v9, %v6393_v6  ;;  %v4923_v19 = vadd.f32 %v4922_v16, %v4921_v11  ;;  %v5034_v20 = vpop.f32.mrb[3].mxu1  ;;  %v420_v9 = vld [vmem:[%s6068_s28 + $0x790] sm:$0xff] }
  0xff   : > { %v5035_v21 = vadd.f32 %v5034_v20, %v5033_v15  ;;  %3188 = vmatmul.mubr.bf16.gmra.mrb[108].mxu0 %v4536_v8 }
 0x100   : > { %v6396_v22 = vadd.f32 %v5032_v14, %v2780_v18  ;;  %v2783_v23 = vadd.f32 %v4923_v19, %v6393_v6  ;;  %3349 = vmatmul.mubr.bf16.gmra.mrb[108].mxu1 %v4538_v12  ;;  %3195 = vmatprep.mubr.bf16.mxu0 %v4553_v13  ;;  %v421_v13 = vld [vmem:[%s6068_s28 + $0x798] sm:$0xff] }
 0x101   : > { %3356 = vmatprep.mubr.bf16.mxu1 %v4555_v17  ;;  %v429_v14 = vld [vmem:[%s6068_s28 + $0x7d8] sm:$0xff]  ;;  %v4584_v17 = vcombine.low %v404_v48, %v412_v49 }
 0x102   : > { %v6401_v26 = vadd.f32 %v5035_v21, %v2783_v23  ;;  %v4924_v27 = vpop.f32.mrb[4].mxu0  ;;  %v4586_v21 = vcombine.low %v405_v52, %v413_v53  ;;  %v4601_v23 = vcombine.high %v420_v9, %v428_v10  ;;  %v4603_v28 = vcombine.high %v421_v13, %v429_v14 }
 0x103   : > { %v5036_v30 = vpop.f32.mrb[4].mxu1  ;;  %v4925_v31 = vpop.f32.mrb[5].mxu0  ;;  %v4602_v48 = vcombine.low %v421_v13, %v429_v14  ;;  %v5903_v13 = vld [vmem:[%s7035_s1 + $0x300] sm:$0xff]  }
 0x104   : > { %v4926_v33 = vadd.f32 %v4925_v31, %v4924_v27  ;;  %v5037_v34 = vpop.f32.mrb[5].mxu1  ;;  %v4927_v35 = vpop.f32.mrb[6].mxu0 }
 0x105   : > { %v5038_v38 = vadd.f32 %v5037_v34, %v5036_v30  ;;  %v5039_v39 = vpop.f32.mrb[6].mxu1  ;;  %v4928_v40 = vpop.f32.mrb[7].mxu0 }
 0x106   : > { %v2788_v42 = vadd.f32 %v4926_v33, %v6393_v6  ;;  %v4929_v43 = vadd.f32 %v4928_v40, %v4927_v35  ;;  %v5040_v44 = vpop.f32.mrb[7].mxu1  ;;  %v182_v35 = vld [vmem:[%s6068_s28 + $0x20] sm:$0xff]  ;;  %v191_v40 = vld [vmem:[%s6068_s28 + $0x68] sm:$0xff] }
 0x107   : > { %v5041_v45 = vadd.f32 %v5040_v44, %v5039_v39  ;;  %3196 = vmatmul.mubr.bf16.gmra.mrb[112].mxu0 %v4552_v32  ;;  %v183_v39 = vld [vmem:[%s6068_s28 + $0x28] sm:$0xff] }
 0x108   : > { %v6406_v46 = vadd.f32 %v5038_v38, %v2788_v42  ;;  %v2791_v47 = vadd.f32 %v4929_v43, %v6393_v6  ;;  %3357 = vmatmul.mubr.bf16.gmra.mrb[112].mxu1 %v4554_v36  ;;  %3203 = vmatprep.mubr.bf16.mxu0 %v4569_v37  ;;  %v190_v36 = vld [vmem:[%s6068_s28 + $0x60] sm:$0xff]  ;;  %v4600_v43 = vcombine.low %v420_v9, %v428_v10 }
 0x109   : > { %3364 = vmatprep.mubr.bf16.mxu1 %v4571_v41  ;;  %v4365_v49 = vcombine.high %v182_v35, %v190_v36 }
 0x10a   : > { %v6411_v50 = vadd.f32 %v5041_v45, %v2791_v47  ;;  %v4930_v51 = vpop.f32.mrb[8].mxu0 }
 0x10b   : > { %v5042_v54 = vpop.f32.mrb[8].mxu1  ;;  %v4931_v55 = vpop.f32.mrb[9].mxu0 }
 0x10c   : > { %v4932_v57 = vadd.f32 %v4931_v55, %v4930_v51  ;;  %v5043_v58 = vpop.f32.mrb[9].mxu1  ;;  %v4933_v59 = vpop.f32.mrb[10].mxu0 }
 0x10d   : > { %v5044_v62 = vadd.f32 %v5043_v58, %v5042_v54  ;;  %v5045_v63 = vpop.f32.mrb[10].mxu1  ;;  %v4934_v0 = vpop.f32.mrb[11].mxu0  ;;  %v4367_v54 = vcombine.high %v183_v39, %v191_v40 }
 0x10e   : > { %v2796_v2 = vadd.f32 %v4932_v57, %v6393_v6  ;;  %v4935_v3 = vadd.f32 %v4934_v0, %v4933_v59  ;;  %v5046_v4 = vpop.f32.mrb[11].mxu1  ;;  %v6445_v0 = vld [vmem:[%s6068_s28 + $0xe0] sm:$0xff] }
 0x10f   : > { %v5047_v5 = vadd.f32 %v5046_v4, %v5045_v63  ;;  %3204 = vmatmul.mubr.bf16.gmra.mrb[116].mxu0 %v4568_v56  ;;  %v6442_v63 = vld [vmem:[%s6068_s28 + $0xa0] sm:$0xff]  ;;  %v6448_v4 = vld [vmem:[%s6068_s28 + $0xa8] sm:$0xff] }
 0x110   : > { %v6416_v7 = vadd.f32 %v5044_v62, %v2796_v2  ;;  %v2799_v8 = vadd.f32 %v4935_v3, %v6393_v6  ;;  %3365 = vmatmul.mubr.bf16.gmra.mrb[116].mxu1 %v4570_v60  ;;  %3211 = vmatprep.mubr.bf16.mxu0 %v4585_v61  ;;  %v4364_v3 = vcombine.low %v182_v35, %v190_v36  ;;  %v5910_v35 = vld [vmem:[%s7035_s1 + $0x350] sm:$0xff]  }
 0x111   : > { %3372 = vmatprep.mubr.bf16.mxu1 %v4587_v1 }
 0x112   : > { %v6421_v11 = vadd.f32 %v5047_v5, %v2799_v8  ;;  %v4936_v12 = vpop.f32.mrb[12].mxu0  ;;  %v6451_v5 = vld [vmem:[%s6068_s28 + $0xe8] sm:$0xff] }
 0x113   : > { %v5048_v15 = vpop.f32.mrb[12].mxu1  ;;  %v4937_v16 = vpop.f32.mrb[13].mxu0 }
 0x114   : > { %v4938_v18 = vadd.f32 %v4937_v16, %v4936_v12  ;;  %v5049_v19 = vpop.f32.mrb[13].mxu1  ;;  %v4939_v20 = vpop.f32.mrb[14].mxu0  ;;  %v4366_v12 = vcombine.low %v183_v39, %v191_v40  ;;  %v6491_v39 = vld [vmem:[%s6068_s28 + $0x128] sm:$0xff] }
 0x115   : > { %v5050_v24 = vadd.f32 %v5049_v19, %v5048_v15  ;;  %v5051_v25 = vpop.f32.mrb[14].mxu1  ;;  %v4940_v27 = vpop.f32.mrb[15].mxu0  ;;  %v6494_v40 = vld [vmem:[%s6068_s28 + $0x168] sm:$0xff] }
 0x116   : > { %v2804_v29 = vadd.f32 %v4938_v18, %v6393_v6  ;;  %v4941_v30 = vadd.f32 %v4940_v27, %v4939_v20  ;;  %v5052_v31 = vpop.f32.mrb[15].mxu1  ;;  %v4381_v18 = vcombine.high %v6442_v63, %v6445_v0  ;;  %v5908_v27 = vld [vmem:[%s7035_s1 + $0x3c8] sm:$0xff]  }
 0x117   : > { %v5053_v32 = vadd.f32 %v5052_v31, %v5051_v25  ;;  %3212 = vmatmul.mubr.bf16.gmra.mrb[120].mxu0 %v4584_v17  ;;  %v5905_v17 = vld [vmem:[%s7035_s1 + $0x380] sm:$0xff]   ;;  %v5907_v31 = vld [vmem:[%s7035_s1 + $0x308] sm:$0xff]  }
 0x118   : > { %v6426_v33 = vadd.f32 %v5050_v24, %v2804_v29  ;;  %v2807_v34 = vadd.f32 %v4941_v30, %v6393_v6  ;;  %3373 = vmatmul.mubr.bf16.gmra.mrb[120].mxu1 %v4586_v21  ;;  %3219 = vmatprep.mubr.bf16.mxu0 %v4601_v23  ;;  %v4383_v23 = vcombine.high %v6448_v4, %v6451_v5  ;;  %v5906_v24 = vld [vmem:[%s7035_s1 + $0x348] sm:$0xff]   ;;  %v6474_v30 = vld [vmem:[%s6068_s28 + $0x120] sm:$0xff] }
 0x119   : > { %3380 = vmatprep.mubr.bf16.mxu1 %v4603_v28 }
 0x11a   : > { %v6431_v37 = vadd.f32 %v5053_v32, %v2807_v34  ;;  %v4942_v38 = vpop.f32.mrb[16].mxu0  ;;  %v6480_v32 = vld [vmem:[%s6068_s28 + $0x160] sm:$0xff]  ;;  %v5909_v34 = vld [vmem:[%s7035_s1 + $0x388] sm:$0xff]  }
 0x11b   : > { %v5054_v41 = vpop.f32.mrb[16].mxu1  ;;  %v4943_v42 = vpop.f32.mrb[17].mxu0 }
 0x11c   : > { %v4944_v44 = vadd.f32 %v4943_v42, %v4942_v38  ;;  %v5055_v45 = vpop.f32.mrb[17].mxu1  ;;  %v4945_v47 = vpop.f32.mrb[18].mxu0 }
 0x11d   : > { %v5056_v51 = vadd.f32 %v5055_v45, %v5054_v41  ;;  %v5057_v52 = vpop.f32.mrb[18].mxu1  ;;  %v4946_v53 = vpop.f32.mrb[19].mxu0  ;;  %v5912_v41 = vld [vmem:[%s7035_s1 + $0x3d0] sm:$0xff]  }
 0x11e   : > { %v2812_v55 = vadd.f32 %v4944_v44, %v6393_v6  ;;  %v4947_v56 = vadd.f32 %v4946_v53, %v4945_v47  ;;  %v5058_v57 = vpop.f32.mrb[19].mxu1  ;;  %v4380_v44 = vcombine.low %v6442_v63, %v6445_v0  ;;  %v5914_v63 = vld [vmem:[%s7035_s1 + $0x358] sm:$0xff]  }
 0x11f   : > { %v5059_v58 = vadd.f32 %v5058_v57, %v5057_v52  ;;  %3220 = vmatmul.mubr.bf16.gmra.mrb[124].mxu0 %v4600_v43 }
 0x120   : > { %v6436_v59 = vadd.f32 %v5056_v51, %v2812_v55  ;;  %v2815_v60 = vadd.f32 %v4947_v56, %v6393_v6  ;;  %3381 = vmatmul.mubr.bf16.gmra.mrb[124].mxu1 %v4602_v48  ;;  %3421 = vmatprep.mubr.bf16.mxu0 %v4365_v49  ;;  %v4382_v49 = vcombine.low %v6448_v4, %v6451_v5  ;;  %v5911_v56 = vld [vmem:[%s7035_s1 + $0x310] sm:$0xff]   ;;  %v6524_v4 = vld [vmem:[%s6068_s28 + $0x1a0] sm:$0xff] }
 0x121   : > { %3582 = vmatprep.mubr.bf16.mxu1 %v4367_v54  ;;  %v4397_v51 = vcombine.high %v6474_v30, %v6480_v32  ;;  %v4399_v55 = vcombine.high %v6491_v39, %v6494_v40  ;;  %v6527_v5 = vld [vmem:[%s6068_s28 + $0x1e0] sm:$0xff] }
 0x122   : > { %v6439_v61 = vadd.f32 %v5059_v58, %v2815_v60  ;;  %v4948_v62 = vpop.f32.mrb[20].mxu0 }
 0x123   : > { %v5060_v1 = vpop.f32.mrb[20].mxu1  ;;  %v4949_v2 = vpop.f32.mrb[21].mxu0 }
 0x124   : > { %v4950_v8 = vadd.f32 %v4949_v2, %v4948_v62  ;;  %v5061_v9 = vpop.f32.mrb[21].mxu1  ;;  %v4951_v10 = vpop.f32.mrb[22].mxu0  ;;  %v5913_v62 = vld [vmem:[%s7035_s1 + $0x390] sm:$0xff]  }
 0x125   : > { %v5062_v14 = vadd.f32 %v5061_v9, %v5060_v1  ;;  %v5063_v15 = vpop.f32.mrb[22].mxu1  ;;  %v4952_v16 = vpop.f32.mrb[23].mxu0  ;;  %v5916_v1 = vld [vmem:[%s7035_s1 + $0x3d8] sm:$0xff]  }
 0x126   : > { %v2820_v19 = vadd.f32 %v4950_v8, %v6393_v6  ;;  %v4953_v20 = vadd.f32 %v4952_v16, %v4951_v10  ;;  %v5064_v21 = vpop.f32.mrb[23].mxu1  ;;  %v6530_v8 = vld [vmem:[%s6068_s28 + $0x1a8] sm:$0xff]  ;;  %v5915_v9 = vld [vmem:[%s7035_s1 + $0x318] sm:$0xff]  }
 0x127   : > { %v5065_v25 = vadd.f32 %v5064_v21, %v5063_v15  ;;  %3422 = vmatmul.mubr.bf16.vlgmr.msra.gmra.mrb[128].mxu0 %v4364_v3  ;;  %v5918_v15 = vld [vmem:[%s7035_s1 + $0x360] sm:$0xff]  }
 0x128   : > { %v6470_v28 = vadd.f32 %v5062_v14, %v2820_v19  ;;  %v2823_v29 = vadd.f32 %v4953_v20, %v6393_v6  ;;  %3583 = vmatmul.mubr.bf16.vlgmr.msra.gmra.mrb[128].mxu1 %v4366_v12  ;;  %5575 = vmatpush3.bf16.msra.mxu0 %v5903_v13  ;;  %v6538_v13 = vld [vmem:[%s6068_s28 + $0x1e8] sm:$0xff]  ;;  %v5917_v14 = vld [vmem:[%s7035_s1 + $0x398] sm:$0xff]   ;;  %v5920_v19 = vld [vmem:[%s7035_s1 + $0x3e0] sm:$0xff]  }
 0x129   : > { %5687 = vmatpush3.bf16.msra.mxu1 %v5905_v17  ;;  %3429 = vmatprep.mubr.bf16.mxu0 %v4381_v18  ;;  %v4396_v18 = vcombine.low %v6474_v30, %v6480_v32  ;;  %v4415_v30 = vcombine.high %v6530_v8, %v6538_v13  ;;  %v5919_v32 = vld [vmem:[%s7035_s1 + $0x320] sm:$0xff]  }
 0x12a   : > { %v6488_v36 = vadd.f32 %v5065_v25, %v2823_v29  ;;  %v4954_v38 = vpop.f32.mrb[24].mxu0  ;;  %3590 = vmatprep.mubr.bf16.mxu1 %v4383_v23  ;;  %5576 = vmatprep.subr.bf16.mxu0 %v5906_v24  ;;  %v4398_v24 = vcombine.low %v6491_v39, %v6494_v40  ;;  %v4413_v25 = vcombine.high %v6524_v4, %v6527_v5  ;;  %v5921_v39 = vld [vmem:[%s7035_s1 + $0x3a0] sm:$0xff]   ;;  %v5922_v40 = vld [vmem:[%s7035_s1 + $0x368] sm:$0xff]  }
 0x12b   : > { %v5066_v42 = vpop.f32.mrb[24].mxu1  ;;  %v4955_v43 = vpop.f32.mrb[25].mxu0  ;;  %5688 = vmatprep.subr.bf16.mxu1 %v5908_v27 }
 0x12c   : > { %v4956_v45 = vadd.f32 %v4955_v43, %v4954_v38  ;;  %v5067_v47 = vpop.f32.mrb[25].mxu1  ;;  %v4957_v48 = vpop.f32.mrb[26].mxu0  ;;  %5577 = vmatpush3.bf16.msra.mxu0 %v5907_v31 }
 0x12d   : > { %v5068_v52 = vadd.f32 %v5067_v47, %v5066_v42  ;;  %v5069_v53 = vpop.f32.mrb[26].mxu1  ;;  %v4958_v54 = vpop.f32.mrb[27].mxu0  ;;  %5689 = vmatpush3.bf16.msra.mxu1 %v5909_v34  ;;  %5578 = vmatprep.subr.bf16.mxu0 %v5910_v35  ;;  %v5924_v42 = vld [vmem:[%s7035_s1 + $0x3e8] sm:$0xff]   ;;  %v6577_v47 = vld [vmem:[%s6068_s28 + $0x260] sm:$0xff] }
 0x12e   : > { %v2828_v57 = vadd.f32 %v4956_v45, %v6393_v6  ;;  %v4959_v58 = vadd.f32 %v4958_v54, %v4957_v48  ;;  %v5070_v60 = vpop.f32.mrb[27].mxu1  ;;  %5690 = vmatprep.subr.bf16.mxu1 %v5912_v41  ;;  %v6574_v45 = vld [vmem:[%s6068_s28 + $0x220] sm:$0xff]  ;;  %v6580_v48 = vld [vmem:[%s6068_s28 + $0x228] sm:$0xff] }
 0x12f   : > { %v5071_v0 = vadd.f32 %v5070_v60, %v5069_v53  ;;  %3430 = vmatmul.mubr.bf16.gmra.mrb[132].mxu0 %v4380_v44  ;;  %v6588_v53 = vld [vmem:[%s6068_s28 + $0x268] sm:$0xff]  ;;  %v5928_v60 = vld [vmem:[%s7035_s1 + $0x3f0] sm:$0xff]  }
 0x130   : > { %v6520_v2 = vadd.f32 %v5068_v52, %v2828_v57  ;;  %v2831_v3 = vadd.f32 %v4959_v58, %v6393_v6  ;;  %3591 = vmatmul.mubr.bf16.gmra.mrb[132].mxu1 %v4382_v49  ;;  %3437 = vmatprep.mubr.bf16.mxu0 %v4397_v51  ;;  %v5923_v49 = vld [vmem:[%s7035_s1 + $0x328] sm:$0xff]   ;;  %v4412_v58 = vcombine.low %v6524_v4, %v6527_v5  ;;  %v5927_v5 = vld [vmem:[%s7035_s1 + $0x330] sm:$0xff]  }
 0x131   : > { %3598 = vmatprep.mubr.bf16.mxu1 %v4399_v55  ;;  %5579 = vmatpush3.bf16.msra.mxu0 %v5911_v56  ;;  %v5925_v54 = vld [vmem:[%s7035_s1 + $0x3a8] sm:$0xff]   ;;  %v5926_v55 = vld [vmem:[%s7035_s1 + $0x370] sm:$0xff]   ;;  %v4431_v4 = vcombine.high %v6580_v48, %v6588_v53 }
 0x132   : > { %v6535_v10 = vadd.f32 %v5071_v0, %v2831_v3  ;;  %v4960_v12 = vpop.f32.mrb[28].mxu0  ;;  %5691 = vmatpush3.bf16.msra.mxu1 %v5913_v62  ;;  %5580 = vmatprep.subr.bf16.mxu0 %v5914_v63  ;;  %v4429_v3 = vcombine.high %v6574_v45, %v6577_v47 }
 0x133   : > { %v5072_v16 = vpop.f32.mrb[28].mxu1  ;;  %v4961_v17 = vpop.f32.mrb[29].mxu0  ;;  %5692 = vmatprep.subr.bf16.mxu1 %v5916_v1  ;;  %v4414_v1 = vcombine.low %v6530_v8, %v6538_v13  ;;  %v5929_v13 = vld [vmem:[%s7035_s1 + $0x3b0] sm:$0xff]  }
 0x134   : > { %v4962_v20 = vadd.f32 %v4961_v17, %v4960_v12  ;;  %v5073_v21 = vpop.f32.mrb[29].mxu1  ;;  %v4963_v23 = vpop.f32.mrb[30].mxu0  ;;  %v5930_v17 = vld [vmem:[%s7035_s1 + $0x378] sm:$0xff]  }
 0x135   : > { %v5074_v27 = vadd.f32 %v5073_v21, %v5072_v16  ;;  %v5075_v29 = vpop.f32.mrb[30].mxu1  ;;  %v4964_v31 = vpop.f32.mrb[31].mxu0  ;;  %5581 = vmatpush3.bf16.msra.mxu0 %v5915_v9 }
 0x136   : > { %v2836_v34 = vadd.f32 %v4962_v20, %v6393_v6  ;;  %v4965_v35 = vadd.f32 %v4964_v31, %v4963_v23  ;;  %v5076_v38 = vpop.f32.mrb[31].mxu1  ;;  %5693 = vmatpush3.bf16.msra.mxu1 %v5917_v14  ;;  %5582 = vmatprep.subr.bf16.mxu0 %v5918_v15  ;;  %v262_v23 = vld [vmem:[%s6068_s28 + $0x2a0] sm:$0xff]  ;;  %v263_v31 = vld [vmem:[%s6068_s28 + $0x2a8] sm:$0xff] }
 0x137   : > { %v5077_v41 = vadd.f32 %v5076_v38, %v5075_v29  ;;  %3438 = vmatmul.mubr.bf16.gmra.mrb[136].mxu0 %v4396_v18  ;;  %5694 = vmatprep.subr.bf16.mxu1 %v5920_v19  ;;  %v5932_v19 = vld [vmem:[%s7035_s1 + $0x3f8] sm:$0xff]   ;;  %v4428_v38 = vcombine.low %v6574_v45, %v6577_v47 }
 0x138   : > { %v6570_v43 = vadd.f32 %v5074_v27, %v2836_v34  ;;  %v2839_v44 = vadd.f32 %v4965_v35, %v6393_v6  ;;  %3599 = vmatmul.mubr.bf16.gmra.mrb[136].mxu1 %v4398_v24  ;;  %3445 = vmatprep.mubr.bf16.mxu0 %v4413_v25  ;;  %v270_v24 = vld [vmem:[%s6068_s28 + $0x2e0] sm:$0xff]  ;;  %v5931_v25 = vld [vmem:[%s7035_s1 + $0x338] sm:$0xff]  }
 0x139   : > { %3606 = vmatprep.mubr.bf16.mxu1 %v4415_v30  ;;  %5583 = vmatpush3.bf16.msra.mxu0 %v5919_v32  ;;  %v271_v30 = vld [vmem:[%s6068_s28 + $0x2e8] sm:$0xff]  ;;  %v5933_v32 = vld [vmem:[%s7035_s1 + $0x3b8] sm:$0xff]  }
 0x13a   : > { %v6585_v51 = vadd.f32 %v5077_v41, %v2839_v44  ;;  %v4966_v52 = vpop.f32.mrb[32].mxu0  ;;  %5695 = vmatpush3.bf16.msra.mxu1 %v5921_v39  ;;  %5584 = vmatprep.subr.bf16.mxu0 %v5922_v40  ;;  %v4445_v44 = vcombine.high %v262_v23, %v270_v24 }
 0x13b   : > { %v5078_v56 = vpop.f32.mrb[32].mxu1  ;;  %v4967_v57 = vpop.f32.mrb[33].mxu0  ;;  %5696 = vmatprep.subr.bf16.mxu1 %v5924_v42  ;;  %v4430_v42 = vcombine.low %v6580_v48, %v6588_v53  ;;  %v278_v53 = vld [vmem:[%s6068_s28 + $0x320] sm:$0xff] }
 0x13c   : > { %v4968_v62 = vadd.f32 %v4967_v57, %v4966_v52  ;;  %v5079_v63 = vpop.f32.mrb[33].mxu1  ;;  %v4969_v0 = vpop.f32.mrb[34].mxu0 }
 0x13d   : > { %v5080_v9 = vadd.f32 %v5079_v63, %v5078_v56  ;;  %v5081_v12 = vpop.f32.mrb[34].mxu1  ;;  %v4970_v14 = vpop.f32.mrb[35].mxu0  ;;  %5585 = vmatpush3.bf16.msra.mxu0 %v5923_v49 }
 0x13e   : > { %v2844_v15 = vadd.f32 %v4968_v62, %v6393_v6  ;;  %v4971_v16 = vadd.f32 %v4970_v14, %v4969_v0  ;;  %v5082_v8 = vpop.f32.mrb[35].mxu1  ;;  %5697 = vmatpush3.bf16.msra.mxu1 %v5925_v54  ;;  %5586 = vmatprep.subr.bf16.mxu0 %v5926_v55  ;;  %v4447_v55 = vcombine.high %v263_v31, %v271_v30  ;;  %v279_v0 = vld [vmem:[%s6068_s28 + $0x328] sm:$0xff] }
 0x13f   : > { %v5083_v18 = vadd.f32 %v5082_v8, %v5081_v12  ;;  %3446 = vmatmul.mubr.bf16.gmra.mrb[140].mxu0 %v4412_v58  ;;  %5698 = vmatprep.subr.bf16.mxu1 %v5928_v60  ;;  %v286_v60 = vld [vmem:[%s6068_s28 + $0x360] sm:$0xff]  ;;  %v4444_v12 = vcombine.low %v262_v23, %v270_v24 }
 0x140   : > { %v6620_v20 = vadd.f32 %v5080_v9, %v2844_v15  ;;  %v2847_v21 = vadd.f32 %v4971_v16, %v6393_v6  ;;  %3607 = vmatmul.mubr.bf16.gmra.mrb[140].mxu1 %v4414_v1  ;;  %3453 = vmatprep.mubr.bf16.mxu0 %v4429_v3  ;;  %v287_v1 = vld [vmem:[%s6068_s28 + $0x368] sm:$0xff]  ;;  %v4446_v15 = vcombine.low %v263_v31, %v271_v30  ;;  %v294_v31 = vld [vmem:[%s6068_s28 + $0x3a0] sm:$0xff] }
 0x141   : > { %3614 = vmatprep.mubr.bf16.mxu1 %v4431_v4  ;;  %5587 = vmatpush3.bf16.msra.mxu0 %v5927_v5  ;;  %v4461_v16 = vcombine.high %v278_v53, %v286_v60  ;;  %v302_v30 = vld [vmem:[%s6068_s28 + $0x3e0] sm:$0xff] }
 0x142   : > { %v6628_v27 = vadd.f32 %v5083_v18, %v2847_v21  ;;  %v4972_v29 = vpop.f32.mrb[36].mxu0  ;;  %5699 = vmatpush3.bf16.msra.mxu1 %v5929_v13  ;;  %5588 = vmatprep.subr.bf16.mxu0 %v5930_v17  ;;  %v4463_v18 = vcombine.high %v279_v0, %v287_v1 }
 0x143   : > { %v5084_v34 = vpop.f32.mrb[36].mxu1  ;;  %v4973_v35 = vpop.f32.mrb[37].mxu0  ;;  %5700 = vmatprep.subr.bf16.mxu1 %v5932_v19 }
 0x144   : > { %v4974_v39 = vadd.f32 %v4973_v35, %v4972_v29  ;;  %v5085_v40 = vpop.f32.mrb[37].mxu1  ;;  %v4975_v41 = vpop.f32.mrb[38].mxu0  ;;  %v295_v35 = vld [vmem:[%s6068_s28 + $0x3a8] sm:$0xff] }
 0x145   : > { %v5086_v49 = vadd.f32 %v5085_v40, %v5084_v34  ;;  %v5087_v52 = vpop.f32.mrb[38].mxu1  ;;  %v4976_v54 = vpop.f32.mrb[39].mxu0  ;;  %5589 = vmatpush3.bf16.msra.mxu0 %v5931_v25 }
 0x146   : > { %v2852_v56 = vadd.f32 %v4974_v39, %v6393_v6  ;;  %v4977_v45 = vadd.f32 %v4976_v54, %v4975_v41  ;;  %v5088_v47 = vpop.f32.mrb[39].mxu1  ;;  %5701 = vmatpush3.bf16.msra.mxu1 %v5933_v32  ;;  %v4460_v41 = vcombine.low %v278_v53, %v286_v60  ;;  %v4477_v54 = vcombine.high %v294_v31, %v302_v30 }
 0x147   : > { %v5089_v57 = vadd.f32 %v5088_v47, %v5087_v52  ;;  %3454 = vmatmul.mubr.bf16.gmra.mrb[144].mxu0 %v4428_v38  ;;  %v303_v38 = vld [vmem:[%s6068_s28 + $0x3e8] sm:$0xff]  ;;  %v4462_v52 = vcombine.low %v279_v0, %v287_v1  ;;  %v310_v0 = vld [vmem:[%s6068_s28 + $0x420] sm:$0xff] }
 0x148   : > { %v6640_v58 = vadd.f32 %v5086_v49, %v2852_v56  ;;  %v2855_v48 = vadd.f32 %v4977_v45, %v6393_v6  ;;  %3615 = vmatmul.mubr.bf16.gmra.mrb[144].mxu1 %v4430_v42  ;;  %3461 = vmatprep.mubr.bf16.mxu0 %v4445_v44  ;;  %v4479_v47 = vcombine.high %v295_v35, %v303_v38  ;;  %v318_v1 = vld [vmem:[%s6068_s28 + $0x460] sm:$0xff] }
 0x149   : > { %3622 = vmatprep.mubr.bf16.mxu1 %v4447_v55 }
 0x14a   : > { %v6645_v62 = vadd.f32 %v5089_v57, %v2855_v48  ;;  %v4978_v63 = vpop.f32.mrb[40].mxu0 }
 0x14b   : > { %v5090_v3 = vpop.f32.mrb[40].mxu1  ;;  %v4979_v9 = vpop.f32.mrb[41].mxu0 }
 0x14c   : > { %v4980_v14 = vadd.f32 %v4979_v9, %v4978_v63  ;;  %v5091_v4 = vpop.f32.mrb[41].mxu1  ;;  %v4981_v5 = vpop.f32.mrb[42].mxu0 }
 0x14d   : > { %v5092_v8 = vadd.f32 %v5091_v4, %v5090_v3  ;;  %v5093_v13 = vpop.f32.mrb[42].mxu1  ;;  %v4982_v17 = vpop.f32.mrb[43].mxu0  ;;  %v319_v4 = vld [vmem:[%s6068_s28 + $0x468] sm:$0xff] }
 0x14e   : > { %v2860_v19 = vadd.f32 %v4980_v14, %v6393_v6  ;;  %v4983_v21 = vadd.f32 %v4982_v17, %v4981_v5  ;;  %v5094_v25 = vpop.f32.mrb[43].mxu1  ;;  %v311_v14 = vld [vmem:[%s6068_s28 + $0x428] sm:$0xff] }
 0x14f   : > { %v5095_v29 = vadd.f32 %v5094_v25, %v5093_v13  ;;  %3462 = vmatmul.mubr.bf16.gmra.mrb[148].mxu0 %v4444_v12 }
 0x150   : > { %v6650_v23 = vadd.f32 %v5092_v8, %v2860_v19  ;;  %v2863_v24 = vadd.f32 %v4983_v21, %v6393_v6  ;;  %3623 = vmatmul.mubr.bf16.gmra.mrb[148].mxu1 %v4446_v15  ;;  %3469 = vmatprep.mubr.bf16.mxu0 %v4461_v16  ;;  %v4476_v16 = vcombine.low %v294_v31, %v302_v30 }
 0x151   : > { %3630 = vmatprep.mubr.bf16.mxu1 %v4463_v18  ;;  %v4478_v18 = vcombine.low %v295_v35, %v303_v38  ;;  %v4493_v19 = vcombine.high %v310_v0, %v318_v1  ;;  %v326_v35 = vld [vmem:[%s6068_s28 + $0x4a0] sm:$0xff] }
 0x152   : > { %v6655_v32 = vadd.f32 %v5095_v29, %v2863_v24  ;;  %v4984_v34 = vpop.f32.mrb[44].mxu0  ;;  %v4495_v24 = vcombine.high %v311_v14, %v319_v4  ;;  %v334_v38 = vld [vmem:[%s6068_s28 + $0x4e0] sm:$0xff] }
 0x153   : > { %v5096_v39 = vpop.f32.mrb[44].mxu1  ;;  %v4985_v40 = vpop.f32.mrb[45].mxu0 }
 0x154   : > { %v4986_v42 = vadd.f32 %v4985_v40, %v4984_v34  ;;  %v5097_v44 = vpop.f32.mrb[45].mxu1  ;;  %v4987_v49 = vpop.f32.mrb[46].mxu0 }
 0x155   : > { %v5098_v55 = vadd.f32 %v5097_v44, %v5096_v39  ;;  %v5099_v56 = vpop.f32.mrb[46].mxu1  ;;  %v4988_v45 = vpop.f32.mrb[47].mxu0 }
 0x156   : > { %v2868_v57 = vadd.f32 %v4986_v42, %v6393_v6  ;;  %v4989_v48 = vadd.f32 %v4988_v45, %v4987_v49  ;;  %v5100_v63 = vpop.f32.mrb[47].mxu1  ;;  %v327_v49 = vld [vmem:[%s6068_s28 + $0x4a8] sm:$0xff] }
 0x157   : > { %v5101_v3 = vadd.f32 %v5100_v63, %v5099_v56  ;;  %3470 = vmatmul.mubr.bf16.gmra.mrb[152].mxu0 %v4460_v41  ;;  %v4492_v56 = vcombine.low %v310_v0, %v318_v1  ;;  %v4509_v63 = vcombine.high %v326_v35, %v334_v38 }
 0x158   : > { %v6660_v53 = vadd.f32 %v5098_v55, %v2868_v57  ;;  %v2871_v60 = vadd.f32 %v4989_v48, %v6393_v6  ;;  %3631 = vmatmul.mubr.bf16.gmra.mrb[152].mxu1 %v4462_v52  ;;  %3477 = vmatprep.mubr.bf16.mxu0 %v4477_v54  ;;  %v335_v52 = vld [vmem:[%s6068_s28 + $0x4e8] sm:$0xff]  ;;  %v4494_v48 = vcombine.low %v311_v14, %v319_v4  ;;  %v342_v14 = vld [vmem:[%s6068_s28 + $0x520] sm:$0xff] }
 0x159   : > { %3638 = vmatprep.mubr.bf16.mxu1 %v4479_v47  ;;  %v350_v4 = vld [vmem:[%s6068_s28 + $0x560] sm:$0xff] }
 0x15a   : > { %v6665_v9 = vadd.f32 %v5101_v3, %v2871_v60  ;;  %v4990_v12 = vpop.f32.mrb[48].mxu0 }
 0x15b   : > { %v5102_v5 = vpop.f32.mrb[48].mxu1  ;;  %v4991_v15 = vpop.f32.mrb[49].mxu0 }
 0x15c   : > { %v4992_v8 = vadd.f32 %v4991_v15, %v4990_v12  ;;  %v5103_v13 = vpop.f32.mrb[49].mxu1  ;;  %v4993_v17 = vpop.f32.mrb[50].mxu0 }
 0x15d   : > { %v5104_v21 = vadd.f32 %v5103_v13, %v5102_v5  ;;  %v5105_v25 = vpop.f32.mrb[50].mxu1  ;;  %v4994_v29 = vpop.f32.mrb[51].mxu0  ;;  %v4511_v5 = vcombine.high %v327_v49, %v335_v52 }
 0x15e   : > { %v2876_v34 = vadd.f32 %v4992_v8, %v6393_v6  ;;  %v4995_v39 = vadd.f32 %v4994_v29, %v4993_v17  ;;  %v5106_v40 = vpop.f32.mrb[51].mxu1 }
 0x15f   : > { %v5107_v41 = vadd.f32 %v5106_v40, %v5105_v25  ;;  %3478 = vmatmul.mubr.bf16.gmra.mrb[156].mxu0 %v4476_v16 }
 0x160   : > { %v6670_v31 = vadd.f32 %v5104_v21, %v2876_v34  ;;  %v2879_v30 = vadd.f32 %v4995_v39, %v6393_v6  ;;  %3639 = vmatmul.mubr.bf16.gmra.mrb[156].mxu1 %v4478_v18  ;;  %3485 = vmatprep.mubr.bf16.mxu0 %v4493_v19  ;;  %v343_v19 = vld [vmem:[%s6068_s28 + $0x528] sm:$0xff] }
 0x161   : > { %3646 = vmatprep.mubr.bf16.mxu1 %v4495_v24  ;;  %v351_v21 = vld [vmem:[%s6068_s28 + $0x568] sm:$0xff]  ;;  %v4508_v24 = vcombine.low %v326_v35, %v334_v38 }
 0x162   : > { %v6675_v42 = vadd.f32 %v5107_v41, %v2879_v30  ;;  %v4996_v44 = vpop.f32.mrb[52].mxu0  ;;  %v4510_v41 = vcombine.low %v327_v49, %v335_v52  ;;  %v4525_v30 = vcombine.high %v342_v14, %v350_v4  ;;  %v358_v49 = vld [vmem:[%s6068_s28 + $0x5a0] sm:$0xff] }
 0x163   : > { %v5108_v54 = vpop.f32.mrb[52].mxu1  ;;  %v4997_v55 = vpop.f32.mrb[53].mxu0  ;;  %v366_v52 = vld [vmem:[%s6068_s28 + $0x5e0] sm:$0xff] }
 0x164   : > { %v4998_v45 = vadd.f32 %v4997_v55, %v4996_v44  ;;  %v5109_v47 = vpop.f32.mrb[53].mxu1  ;;  %v4999_v57 = vpop.f32.mrb[54].mxu0 }
 0x165   : > { %v5110_v3 = vadd.f32 %v5109_v47, %v5108_v54  ;;  %v5111_v60 = vpop.f32.mrb[54].mxu1  ;;  %v5000_v12 = vpop.f32.mrb[55].mxu0 }
 0x166   : > { %v2884_v15 = vadd.f32 %v4998_v45, %v6393_v6  ;;  %v5001_v16 = vadd.f32 %v5000_v12, %v4999_v57  ;;  %v5112_v8 = vpop.f32.mrb[55].mxu1  ;;  %v367_v12 = vld [vmem:[%s6068_s28 + $0x5e8] sm:$0xff] }
 0x167   : > { %v5113_v13 = vadd.f32 %v5112_v8, %v5111_v60  ;;  %3486 = vmatmul.mubr.bf16.gmra.mrb[160].mxu0 %v4492_v56  ;;  %v4527_v56 = vcombine.high %v343_v19, %v351_v21  ;;  %v359_v60 = vld [vmem:[%s6068_s28 + $0x5a8] sm:$0xff] }
 0x168   : > { %v6680_v0 = vadd.f32 %v5110_v3, %v2884_v15  ;;  %v2887_v1 = vadd.f32 %v5001_v16, %v6393_v6  ;;  %3647 = vmatmul.mubr.bf16.gmra.mrb[160].mxu1 %v4494_v48  ;;  %3493 = vmatprep.mubr.bf16.mxu0 %v4509_v63  ;;  %v4524_v16 = vcombine.low %v342_v14, %v350_v4 }
 0x169   : > { %3654 = vmatprep.mubr.bf16.mxu1 %v4511_v5 }
 0x16a   : > { %v6685_v17 = vadd.f32 %v5113_v13, %v2887_v1  ;;  %v5002_v18 = vpop.f32.mrb[56].mxu0 }
 0x16b   : > { %v5114_v25 = vpop.f32.mrb[56].mxu1  ;;  %v5003_v29 = vpop.f32.mrb[57].mxu0 }
 0x16c   : > { %v5004_v34 = vadd.f32 %v5003_v29, %v5002_v18  ;;  %v5115_v39 = vpop.f32.mrb[57].mxu1  ;;  %v5005_v40 = vpop.f32.mrb[58].mxu0  ;;  %v4526_v18 = vcombine.low %v343_v19, %v351_v21  ;;  %v374_v19 = vld [vmem:[%s6068_s28 + $0x620] sm:$0xff] }
 0x16d   : > { %v5116_v44 = vadd.f32 %v5115_v39, %v5114_v25  ;;  %v5117_v54 = vpop.f32.mrb[58].mxu1  ;;  %v5006_v55 = vpop.f32.mrb[59].mxu0  ;;  %v4541_v25 = vcombine.high %v358_v49, %v366_v52  ;;  %v4543_v39 = vcombine.high %v359_v60, %v367_v12  ;;  %v382_v21 = vld [vmem:[%s6068_s28 + $0x660] sm:$0xff] }
 0x16e   : > { %v2892_v45 = vadd.f32 %v5004_v34, %v6393_v6  ;;  %v5007_v47 = vadd.f32 %v5006_v55, %v5005_v40  ;;  %v5118_v57 = vpop.f32.mrb[59].mxu1 }
 0x16f   : > { %v5119_v48 = vadd.f32 %v5118_v57, %v5117_v54  ;;  %3494 = vmatmul.mubr.bf16.gmra.mrb[164].mxu0 %v4508_v24 }
 0x170   : > { %v6690_v35 = vadd.f32 %v5116_v44, %v2892_v45  ;;  %v2895_v38 = vadd.f32 %v5007_v47, %v6393_v6  ;;  %3655 = vmatmul.mubr.bf16.gmra.mrb[164].mxu1 %v4510_v41  ;;  %3501 = vmatprep.mubr.bf16.mxu0 %v4525_v30  ;;  %v383_v45 = vld [vmem:[%s6068_s28 + $0x668] sm:$0xff] }
 0x171   : > { %3662 = vmatprep.mubr.bf16.mxu1 %v4527_v56  ;;  %v375_v56 = vld [vmem:[%s6068_s28 + $0x628] sm:$0xff] }
 0x172   : > { %v6695_v63 = vadd.f32 %v5119_v48, %v2895_v38  ;;  %v5008_v3 = vpop.f32.mrb[60].mxu0  ;;  %v4540_v48 = vcombine.low %v358_v49, %v366_v52 }
 0x173   : > { %v5120_v5 = vpop.f32.mrb[60].mxu1  ;;  %v5009_v15 = vpop.f32.mrb[61].mxu0 }
 0x174   : > { %v5010_v8 = vadd.f32 %v5009_v15, %v5008_v3  ;;  %v5121_v13 = vpop.f32.mrb[61].mxu1  ;;  %v5011_v1 = vpop.f32.mrb[62].mxu0  ;;  %v4542_v15 = vcombine.low %v359_v60, %v367_v12  ;;  %v390_v60 = vld [vmem:[%s6068_s28 + $0x6a0] sm:$0xff] }
 0x175   : > { %v5122_v29 = vadd.f32 %v5121_v13, %v5120_v5  ;;  %v5123_v24 = vpop.f32.mrb[62].mxu1  ;;  %v5012_v34 = vpop.f32.mrb[63].mxu0  ;;  %v398_v12 = vld [vmem:[%s6068_s28 + $0x6e0] sm:$0xff] }
 0x176   : > { %v2900_v40 = vadd.f32 %v5010_v8, %v6393_v6  ;;  %v5013_v41 = vadd.f32 %v5012_v34, %v5011_v1  ;;  %v5124_v30 = vpop.f32.mrb[63].mxu1  ;;  %v4559_v1 = vcombine.high %v375_v56, %v383_v45 }
 0x177   : > { %v5125_v44 = vadd.f32 %v5124_v30, %v5123_v24  ;;  %3502 = vmatmul.mubr.bf16.gmra.mrb[168].mxu0 %v4524_v16  ;;  %v4557_v16 = vcombine.high %v374_v19, %v382_v21 }
 0x178   : > { %v6700_v14 = vadd.f32 %v5122_v29, %v2900_v40  ;;  %v2903_v4 = vadd.f32 %v5013_v41, %v6393_v6  ;;  %3663 = vmatmul.mubr.bf16.gmra.mrb[168].mxu1 %v4526_v18  ;;  %3509 = vmatprep.mubr.bf16.mxu0 %v4541_v25  ;;  %v391_v40 = vld [vmem:[%s6068_s28 + $0x6a8] sm:$0xff] }
 0x179   : > { %3670 = vmatprep.mubr.bf16.mxu1 %v4543_v39  ;;  %v399_v41 = vld [vmem:[%s6068_s28 + $0x6e8] sm:$0xff] }
 0x17a   : > { %v6705_v54 = vadd.f32 %v5125_v44, %v2903_v4  ;;  %v5142_v55 = vpop.f32.mrb[64].mxu0  ;;  %v4556_v44 = vcombine.low %v374_v19, %v382_v21 }
 0x17b   : > { %v5254_v47 = vpop.f32.mrb[64].mxu1  ;;  %v5143_v57 = vpop.f32.mrb[65].mxu0 }
 0x17c   : > { %v5144_v38 = vadd.f32 %v5143_v57, %v5142_v55  ;;  %v5255_v3 = vpop.f32.mrb[65].mxu1  ;;  %v5145_v5 = vpop.f32.mrb[66].mxu0  ;;  %v4558_v57 = vcombine.low %v375_v56, %v383_v45  ;;  %v406_v56 = vld [vmem:[%s6068_s28 + $0x720] sm:$0xff] }
 0x17d   : > { %v5256_v6 = vadd.f32 %v5255_v3, %v5254_v47  ;;  %v5257_v8 = vpop.f32.mrb[66].mxu1  ;;  %v5146_v13 = vpop.f32.mrb[67].mxu0  ;;  %v414_v45 = vld [vmem:[%s6068_s28 + $0x760] sm:$0xff] }
 0x17e   : > { %v3102_v18 = vadd.f32 %v5144_v38, %v6396_v22  ;;  %v5147_v25 = vadd.f32 %v5146_v13, %v5145_v5  ;;  %v5258_v29 = vpop.f32.mrb[67].mxu1  ;;  %v4575_v5 = vcombine.high %v391_v40, %v399_v41 }
 0x17f   : > { %v5259_v24 = vadd.f32 %v5258_v29, %v5257_v8  ;;  %3510 = vmatmul.mubr.bf16.gmra.mrb[172].mxu0 %v4540_v48  ;;  %v4573_v48 = vcombine.high %v390_v60, %v398_v12 }
 0x180   : > { %v6710_v49 = vadd.f32 %v5256_v6, %v3102_v18  ;;  %v3105_v52 = vadd.f32 %v5147_v25, %v6401_v26  ;;  %3671 = vmatmul.mubr.bf16.gmra.mrb[172].mxu1 %v4542_v15  ;;  %3517 = vmatprep.mubr.bf16.mxu0 %v4557_v16  ;;  %v407_v18 = vld [vmem:[%s6068_s28 + $0x728] sm:$0xff] }
 0x181   : > { %3678 = vmatprep.mubr.bf16.mxu1 %v4559_v1  ;;  %v415_v25 = vld [vmem:[%s6068_s28 + $0x768] sm:$0xff] }
 0x182   : > { %v6715_v34 = vadd.f32 %v5259_v24, %v3105_v52  ;;  %v5148_v39 = vpop.f32.mrb[68].mxu0  ;;  %v4572_v24 = vcombine.low %v390_v60, %v398_v12 }
 0x183   : > { %v5260_v30 = vpop.f32.mrb[68].mxu1  ;;  %v5149_v22 = vpop.f32.mrb[69].mxu0 }
 0x184   : > { %v5150_v4 = vadd.f32 %v5149_v22, %v5148_v39  ;;  %v5261_v55 = vpop.f32.mrb[69].mxu1  ;;  %v5151_v47 = vpop.f32.mrb[70].mxu0  ;;  %v4574_v22 = vcombine.low %v391_v40, %v399_v41  ;;  %v422_v40 = vld [vmem:[%s6068_s28 + $0x7a0] sm:$0xff] }
 0x185   : > { %v5262_v26 = vadd.f32 %v5261_v55, %v5260_v30  ;;  %v5263_v38 = vpop.f32.mrb[70].mxu1  ;;  %v5152_v3 = vpop.f32.mrb[71].mxu0  ;;  %v430_v41 = vld [vmem:[%s6068_s28 + $0x7e0] sm:$0xff] }
 0x186   : > { %v3110_v15 = vadd.f32 %v5150_v4, %v6406_v46  ;;  %v5153_v16 = vadd.f32 %v5152_v3, %v5151_v47  ;;  %v5264_v6 = vpop.f32.mrb[71].mxu1  ;;  %v4591_v47 = vcombine.high %v407_v18, %v415_v25 }
 0x187   : > { %v5265_v8 = vadd.f32 %v5264_v6, %v5263_v38  ;;  %3518 = vmatmul.mubr.bf16.gmra.mrb[176].mxu0 %v4556_v44  ;;  %v4589_v44 = vcombine.high %v406_v56, %v414_v45 }
 0x188   : > { %v6720_v19 = vadd.f32 %v5262_v26, %v3110_v15  ;;  %v3113_v21 = vadd.f32 %v5153_v16, %v6411_v50  ;;  %3679 = vmatmul.mubr.bf16.gmra.mrb[176].mxu1 %v4558_v57  ;;  %3525 = vmatprep.mubr.bf16.mxu0 %v4573_v48  ;;  %v423_v15 = vld [vmem:[%s6068_s28 + $0x7a8] sm:$0xff] }
 0x189   : > { %3686 = vmatprep.mubr.bf16.mxu1 %v4575_v5  ;;  %v431_v16 = vld [vmem:[%s6068_s28 + $0x7e8] sm:$0xff] }
 0x18a   : > { %v6725_v13 = vadd.f32 %v5265_v8, %v3113_v21  ;;  %v5154_v1 = vpop.f32.mrb[72].mxu0  ;;  %v4588_v8 = vcombine.low %v406_v56, %v414_v45 }
 0x18b   : > { %v5266_v29 = vpop.f32.mrb[72].mxu1  ;;  %v5155_v46 = vpop.f32.mrb[73].mxu0 }
 0x18c   : > { %v5156_v52 = vadd.f32 %v5155_v46, %v5154_v1  ;;  %v5267_v39 = vpop.f32.mrb[73].mxu1  ;;  %v5157_v30 = vpop.f32.mrb[74].mxu0  ;;  %v4590_v46 = vcombine.low %v407_v18, %v415_v25  ;;  %v184_v18 = vld [vmem:[%s6068_s28 + $0x30] sm:$0xff] }
 0x18d   : > { %v5268_v50 = vadd.f32 %v5267_v39, %v5266_v29  ;;  %v5269_v4 = vpop.f32.mrb[74].mxu1  ;;  %v5158_v55 = vpop.f32.mrb[75].mxu0  ;;  %v192_v25 = vld [vmem:[%s6068_s28 + $0x70] sm:$0xff] }
 0x18e   : > { %v3118_v57 = vadd.f32 %v5156_v52, %v6416_v7  ;;  %v5159_v48 = vadd.f32 %v5158_v55, %v5157_v30  ;;  %v5270_v26 = vpop.f32.mrb[75].mxu1  ;;  %v4607_v30 = vcombine.high %v423_v15, %v431_v16 }
 0x18f   : > { %v5271_v38 = vadd.f32 %v5270_v26, %v5269_v4  ;;  %3526 = vmatmul.mubr.bf16.gmra.mrb[180].mxu0 %v4572_v24  ;;  %v4605_v24 = vcombine.high %v422_v40, %v430_v41 }
 0x190   : > { %v6730_v60 = vadd.f32 %v5268_v50, %v3118_v57  ;;  %v3121_v12 = vadd.f32 %v5159_v48, %v6421_v11  ;;  %3687 = vmatmul.mubr.bf16.gmra.mrb[180].mxu1 %v4574_v22  ;;  %3533 = vmatprep.mubr.bf16.mxu0 %v4589_v44  ;;  %v185_v57 = vld [vmem:[%s6068_s28 + $0x38] sm:$0xff] }
 0x191   : > { %3694 = vmatprep.mubr.bf16.mxu1 %v4591_v47  ;;  %v193_v48 = vld [vmem:[%s6068_s28 + $0x78] sm:$0xff] }
 0x192   : > { %v6735_v3 = vadd.f32 %v5271_v38, %v3121_v12  ;;  %v5160_v5 = vpop.f32.mrb[76].mxu0  ;;  %v4604_v38 = vcombine.low %v422_v40, %v430_v41 }
 0x193   : > { %v5272_v6 = vpop.f32.mrb[76].mxu1  ;;  %v5161_v7 = vpop.f32.mrb[77].mxu0 }
 0x194   : > { %v5162_v21 = vadd.f32 %v5161_v7, %v5160_v5  ;;  %v5273_v1 = vpop.f32.mrb[77].mxu1  ;;  %v5163_v29 = vpop.f32.mrb[78].mxu0  ;;  %v4606_v7 = vcombine.low %v423_v15, %v431_v16  ;;  %v200_v15 = vld [vmem:[%s6068_s28 + $0xb0] sm:$0xff] }
 0x195   : > { %v5274_v11 = vadd.f32 %v5273_v1, %v5272_v6  ;;  %v5275_v52 = vpop.f32.mrb[78].mxu1  ;;  %v5164_v39 = vpop.f32.mrb[79].mxu0  ;;  %v208_v16 = vld [vmem:[%s6068_s28 + $0xf0] sm:$0xff] }
 0x196   : > { %v3126_v22 = vadd.f32 %v5162_v21, %v6426_v33  ;;  %v5165_v44 = vadd.f32 %v5164_v39, %v5163_v29  ;;  %v5276_v50 = vpop.f32.mrb[79].mxu1  ;;  %v4371_v29 = vcombine.high %v185_v57, %v193_v48 }
 0x197   : > { %v5277_v4 = vadd.f32 %v5276_v50, %v5275_v52  ;;  %3534 = vmatmul.mubr.bf16.gmra.mrb[184].mxu0 %v4588_v8  ;;  %v4369_v8 = vcombine.high %v184_v18, %v192_v25 }
 0x198   : > { %v6740_v56 = vadd.f32 %v5274_v11, %v3126_v22  ;;  %v3129_v45 = vadd.f32 %v5165_v44, %v6431_v37  ;;  %3695 = vmatmul.mubr.bf16.gmra.mrb[184].mxu1 %v4590_v46  ;;  %3541 = vmatprep.mubr.bf16.mxu0 %v4605_v24  ;;  %v201_v22 = vld [vmem:[%s6068_s28 + $0xb8] sm:$0xff] }
 0x199   : > { %3702 = vmatprep.mubr.bf16.mxu1 %v4607_v30  ;;  %v209_v44 = vld [vmem:[%s6068_s28 + $0xf8] sm:$0xff] }
 0x19a   : > { %v6745_v55 = vadd.f32 %v5277_v4, %v3129_v45  ;;  %v5166_v47 = vpop.f32.mrb[80].mxu0  ;;  %v4368_v4 = vcombine.low %v184_v18, %v192_v25 }
 0x19b   : > { %v5278_v26 = vpop.f32.mrb[80].mxu1  ;;  %v5167_v33 = vpop.f32.mrb[81].mxu0 }
 0x19c   : > { %v5168_v12 = vadd.f32 %v5167_v33, %v5166_v47  ;;  %v5279_v5 = vpop.f32.mrb[81].mxu1  ;;  %v5169_v6 = vpop.f32.mrb[82].mxu0  ;;  %v4370_v33 = vcombine.low %v185_v57, %v193_v48  ;;  %v216_v57 = vld [vmem:[%s6068_s28 + $0x130] sm:$0xff] }
 0x19d   : > { %v5280_v37 = vadd.f32 %v5279_v5, %v5278_v26  ;;  %v5281_v21 = vpop.f32.mrb[82].mxu1  ;;  %v5170_v1 = vpop.f32.mrb[83].mxu0  ;;  %v224_v48 = vld [vmem:[%s6068_s28 + $0x170] sm:$0xff] }
 0x19e   : > { %v3134_v46 = vadd.f32 %v5168_v12, %v6436_v59  ;;  %v5171_v24 = vadd.f32 %v5170_v1, %v5169_v6  ;;  %v5282_v11 = vpop.f32.mrb[83].mxu1  ;;  %v4387_v6 = vcombine.high %v201_v22, %v209_v44 }
 0x19f   : > { %v5283_v52 = vadd.f32 %v5282_v11, %v5281_v21  ;;  %3542 = vmatmul.mubr.bf16.gmra.mrb[188].mxu0 %v4604_v38  ;;  %v4385_v38 = vcombine.high %v200_v15, %v208_v16 }
 0x1a0   : > { %v6750_v40 = vadd.f32 %v5280_v37, %v3134_v46  ;;  %v3137_v41 = vadd.f32 %v5171_v24, %v6439_v61  ;;  %3703 = vmatmul.mubr.bf16.gmra.mrb[188].mxu1 %v4606_v7  ;;  %3743 = vmatprep.mubr.bf16.mxu0 %v4369_v8  ;;  %v217_v46 = vld [vmem:[%s6068_s28 + $0x138] sm:$0xff] }
 0x1a1   : > { %3904 = vmatprep.mubr.bf16.mxu1 %v4371_v29  ;;  %v225_v24 = vld [vmem:[%s6068_s28 + $0x178] sm:$0xff] }
 0x1a2   : > { %v6755_v39 = vadd.f32 %v5283_v52, %v3137_v41  ;;  %v5172_v30 = vpop.f32.mrb[84].mxu0  ;;  %v4384_v52 = vcombine.low %v200_v15, %v208_v16 }
 0x1a3   : > { %v5284_v50 = vpop.f32.mrb[84].mxu1  ;;  %v5173_v59 = vpop.f32.mrb[85].mxu0 }
 0x1a4   : > { %v5174_v45 = vadd.f32 %v5173_v59, %v5172_v30  ;;  %v5285_v47 = vpop.f32.mrb[85].mxu1  ;;  %v5175_v26 = vpop.f32.mrb[86].mxu0  ;;  %v4386_v59 = vcombine.low %v201_v22, %v209_v44  ;;  %v232_v22 = vld [vmem:[%s6068_s28 + $0x1b0] sm:$0xff] }
 0x1a5   : > { %v5286_v61 = vadd.f32 %v5285_v47, %v5284_v50  ;;  %v5287_v12 = vpop.f32.mrb[86].mxu1  ;;  %v5176_v5 = vpop.f32.mrb[87].mxu0  ;;  %v240_v44 = vld [vmem:[%s6068_s28 + $0x1f0] sm:$0xff] }
 0x1a6   : > { %v3142_v7 = vadd.f32 %v5174_v45, %v6470_v28  ;;  %v5177_v8 = vadd.f32 %v5176_v5, %v5175_v26  ;;  %v5288_v37 = vpop.f32.mrb[87].mxu1  ;;  %v4403_v26 = vcombine.high %v217_v46, %v225_v24 }
 0x1a7   : > { %v5289_v21 = vadd.f32 %v5288_v37, %v5287_v12  ;;  %3744 = vmatmul.mubr.bf16.vlgmr.msra.gmra.mrb[192].mxu0 %v4368_v4  ;;  %v4401_v4 = vcombine.high %v216_v57, %v224_v48 }
 0x1a8   : > { %v6760_v18 = vadd.f32 %v5286_v61, %v3142_v7  ;;  %v3145_v25 = vadd.f32 %v5177_v8, %v6488_v36  ;;  %3905 = vmatmul.mubr.bf16.vlgmr.msra.gmra.mrb[192].mxu1 %v4370_v33  ;;  %3751 = vmatprep.mubr.bf16.mxu0 %v4385_v38  ;;  %v233_v7 = vld [vmem:[%s6068_s28 + $0x1b8] sm:$0xff] }
 0x1a9   : > { %3912 = vmatprep.mubr.bf16.mxu1 %v4387_v6  ;;  %v241_v8 = vld [vmem:[%s6068_s28 + $0x1f8] sm:$0xff] }
 0x1aa   : > { %v6765_v1 = vadd.f32 %v5289_v21, %v3145_v25  ;;  %v5178_v29 = vpop.f32.mrb[88].mxu0  ;;  %v4400_v21 = vcombine.low %v216_v57, %v224_v48 }
 0x1ab   : > { %v5290_v11 = vpop.f32.mrb[88].mxu1  ;;  %v5179_v28 = vpop.f32.mrb[89].mxu0 }
 0x1ac   : > { %v5180_v41 = vadd.f32 %v5179_v28, %v5178_v29  ;;  %v5291_v30 = vpop.f32.mrb[89].mxu1  ;;  %v5181_v50 = vpop.f32.mrb[90].mxu0  ;;  %v4402_v28 = vcombine.low %v217_v46, %v225_v24  ;;  %v248_v46 = vld [vmem:[%s6068_s28 + $0x230] sm:$0xff] }
 0x1ad   : > { %v5292_v36 = vadd.f32 %v5291_v30, %v5290_v11  ;;  %v5293_v45 = vpop.f32.mrb[90].mxu1  ;;  %v5182_v47 = vpop.f32.mrb[91].mxu0  ;;  %v256_v24 = vld [vmem:[%s6068_s28 + $0x270] sm:$0xff] }
 0x1ae   : > { %v3150_v33 = vadd.f32 %v5180_v41, %v6520_v2  ;;  %v5183_v38 = vadd.f32 %v5182_v47, %v5181_v50  ;;  %v5294_v61 = vpop.f32.mrb[91].mxu1  ;;  %v4419_v50 = vcombine.high %v233_v7, %v241_v8 }
 0x1af   : > { %v5295_v12 = vadd.f32 %v5294_v61, %v5293_v45  ;;  %3752 = vmatmul.mubr.bf16.gmra.mrb[196].mxu0 %v4384_v52  ;;  %v4417_v52 = vcombine.high %v232_v22, %v240_v44 }
 0x1b0   : > { %v6770_v15 = vadd.f32 %v5292_v36, %v3150_v33  ;;  %v3153_v16 = vadd.f32 %v5183_v38, %v6535_v10  ;;  %3913 = vmatmul.mubr.bf16.gmra.mrb[196].mxu1 %v4386_v59  ;;  %3759 = vmatprep.mubr.bf16.mxu0 %v4401_v4  ;;  %v249_v33 = vld [vmem:[%s6068_s28 + $0x238] sm:$0xff] }
 0x1b1   : > { %3920 = vmatprep.mubr.bf16.mxu1 %v4403_v26  ;;  %v257_v38 = vld [vmem:[%s6068_s28 + $0x278] sm:$0xff] }
 0x1b2   : > { %v6775_v5 = vadd.f32 %v5295_v12, %v3153_v16  ;;  %v5184_v6 = vpop.f32.mrb[92].mxu0  ;;  %v4416_v12 = vcombine.low %v232_v22, %v240_v44 }
 0x1b3   : > { %v5296_v37 = vpop.f32.mrb[92].mxu1  ;;  %v5185_v2 = vpop.f32.mrb[93].mxu0 }
 0x1b4   : > { %v5186_v25 = vadd.f32 %v5185_v2, %v5184_v6  ;;  %v5297_v29 = vpop.f32.mrb[93].mxu1  ;;  %v5187_v11 = vpop.f32.mrb[94].mxu0  ;;  %v4418_v2 = vcombine.low %v233_v7, %v241_v8  ;;  %v264_v7 = vld [vmem:[%s6068_s28 + $0x2b0] sm:$0xff] }
 0x1b5   : > { %v5298_v10 = vadd.f32 %v5297_v29, %v5296_v37  ;;  %v5299_v41 = vpop.f32.mrb[94].mxu1  ;;  %v5188_v30 = vpop.f32.mrb[95].mxu0  ;;  %v272_v8 = vld [vmem:[%s6068_s28 + $0x2f0] sm:$0xff] }
 0x1b6   : > { %v3158_v59 = vadd.f32 %v5186_v25, %v6570_v43  ;;  %v5189_v4 = vadd.f32 %v5188_v30, %v5187_v11  ;;  %v5300_v36 = vpop.f32.mrb[95].mxu1  ;;  %v4435_v11 = vcombine.high %v249_v33, %v257_v38 }
 0x1b7   : > { %v5301_v45 = vadd.f32 %v5300_v36, %v5299_v41  ;;  %3760 = vmatmul.mubr.bf16.gmra.mrb[200].mxu0 %v4400_v21  ;;  %v4433_v21 = vcombine.high %v248_v46, %v256_v24 }
 0x1b8   : > { %v6780_v57 = vadd.f32 %v5298_v10, %v3158_v59  ;;  %v3161_v48 = vadd.f32 %v5189_v4, %v6585_v51  ;;  %3921 = vmatmul.mubr.bf16.gmra.mrb[200].mxu1 %v4402_v28  ;;  %3767 = vmatprep.mubr.bf16.mxu0 %v4417_v52  ;;  %v265_v59 = vld [vmem:[%s6068_s28 + $0x2b8] sm:$0xff] }
 0x1b9   : > { %3928 = vmatprep.mubr.bf16.mxu1 %v4419_v50  ;;  %v273_v4 = vld [vmem:[%s6068_s28 + $0x2f8] sm:$0xff] }
 0x1ba   : > { %v6785_v47 = vadd.f32 %v5301_v45, %v3161_v48  ;;  %v5190_v26 = vpop.f32.mrb[96].mxu0  ;;  %v4432_v45 = vcombine.low %v248_v46, %v256_v24 }
 0x1bb   : > { %v5302_v61 = vpop.f32.mrb[96].mxu1  ;;  %v5191_v43 = vpop.f32.mrb[97].mxu0 }
 0x1bc   : > { %v5192_v16 = vadd.f32 %v5191_v43, %v5190_v26  ;;  %v5303_v6 = vpop.f32.mrb[97].mxu1  ;;  %v5193_v37 = vpop.f32.mrb[98].mxu0  ;;  %v4434_v43 = vcombine.low %v249_v33, %v257_v38  ;;  %v280_v33 = vld [vmem:[%s6068_s28 + $0x330] sm:$0xff] }
 0x1bd   : > { %v5304_v51 = vadd.f32 %v5303_v6, %v5302_v61  ;;  %v5305_v25 = vpop.f32.mrb[98].mxu1  ;;  %v5194_v29 = vpop.f32.mrb[99].mxu0  ;;  %v288_v38 = vld [vmem:[%s6068_s28 + $0x370] sm:$0xff] }
 0x1be   : > { %v3166_v28 = vadd.f32 %v5192_v16, %v6620_v20  ;;  %v5195_v52 = vadd.f32 %v5194_v29, %v5193_v37  ;;  %v5306_v10 = vpop.f32.mrb[99].mxu1  ;;  %v4451_v37 = vcombine.high %v265_v59, %v273_v4 }
 0x1bf   : > { %v5307_v41 = vadd.f32 %v5306_v10, %v5305_v25  ;;  %3768 = vmatmul.mubr.bf16.gmra.mrb[204].mxu0 %v4416_v12  ;;  %v4449_v12 = vcombine.high %v264_v7, %v272_v8 }
 0x1c0   : > { %v6790_v22 = vadd.f32 %v5304_v51, %v3166_v28  ;;  %v3169_v44 = vadd.f32 %v5195_v52, %v6628_v27  ;;  %3929 = vmatmul.mubr.bf16.gmra.mrb[204].mxu1 %v4418_v2  ;;  %3775 = vmatprep.mubr.bf16.mxu0 %v4433_v21  ;;  %v281_v28 = vld [vmem:[%s6068_s28 + $0x338] sm:$0xff] }
 0x1c1   : > { %3936 = vmatprep.mubr.bf16.mxu1 %v4435_v11  ;;  %v289_v52 = vld [vmem:[%s6068_s28 + $0x378] sm:$0xff] }
 0x1c2   : > { %v6795_v30 = vadd.f32 %v5307_v41, %v3169_v44  ;;  %v5196_v50 = vpop.f32.mrb[100].mxu0  ;;  %v4448_v41 = vcombine.low %v264_v7, %v272_v8 }
 0x1c3   : > { %v5308_v36 = vpop.f32.mrb[100].mxu1  ;;  %v5197_v20 = vpop.f32.mrb[101].mxu0 }
 0x1c4   : > { %v5198_v48 = vadd.f32 %v5197_v20, %v5196_v50  ;;  %v5309_v26 = vpop.f32.mrb[101].mxu1  ;;  %v5199_v61 = vpop.f32.mrb[102].mxu0  ;;  %v4450_v20 = vcombine.low %v265_v59, %v273_v4  ;;  %v296_v59 = vld [vmem:[%s6068_s28 + $0x3b0] sm:$0xff] }
 0x1c5   : > { %v5310_v27 = vadd.f32 %v5309_v26, %v5308_v36  ;;  %v5311_v16 = vpop.f32.mrb[102].mxu1  ;;  %v5200_v6 = vpop.f32.mrb[103].mxu0  ;;  %v304_v4 = vld [vmem:[%s6068_s28 + $0x3f0] sm:$0xff] }
 0x1c6   : > { %v3174_v2 = vadd.f32 %v5198_v48, %v6640_v58  ;;  %v5201_v21 = vadd.f32 %v5200_v6, %v5199_v61  ;;  %v5312_v51 = vpop.f32.mrb[103].mxu1  ;;  %v4467_v61 = vcombine.high %v281_v28, %v289_v52 }
 0x1c7   : > { %v5313_v25 = vadd.f32 %v5312_v51, %v5311_v16  ;;  %3776 = vmatmul.mubr.bf16.gmra.mrb[208].mxu0 %v4432_v45  ;;  %v4465_v45 = vcombine.high %v280_v33, %v288_v38 }
 0x1c8   : > { %v6800_v46 = vadd.f32 %v5310_v27, %v3174_v2  ;;  %v3177_v24 = vadd.f32 %v5201_v21, %v6645_v62  ;;  %3937 = vmatmul.mubr.bf16.gmra.mrb[208].mxu1 %v4434_v43  ;;  %3783 = vmatprep.mubr.bf16.mxu0 %v4449_v12  ;;  %v297_v2 = vld [vmem:[%s6068_s28 + $0x3b8] sm:$0xff] }
 0x1c9   : > { %3944 = vmatprep.mubr.bf16.mxu1 %v4451_v37  ;;  %v305_v21 = vld [vmem:[%s6068_s28 + $0x3f8] sm:$0xff] }
 0x1ca   : > { %v6805_v29 = vadd.f32 %v5313_v25, %v3177_v24  ;;  %v5202_v11 = vpop.f32.mrb[104].mxu0  ;;  %v4464_v25 = vcombine.low %v280_v33, %v288_v38 }
 0x1cb   : > { %v5314_v10 = vpop.f32.mrb[104].mxu1  ;;  %v5203_v58 = vpop.f32.mrb[105].mxu0 }
 0x1cc   : > { %v5204_v44 = vadd.f32 %v5203_v58, %v5202_v11  ;;  %v5315_v50 = vpop.f32.mrb[105].mxu1  ;;  %v5205_v36 = vpop.f32.mrb[106].mxu0  ;;  %v4466_v58 = vcombine.low %v281_v28, %v289_v52  ;;  %v312_v28 = vld [vmem:[%s6068_s28 + $0x430] sm:$0xff] }
 0x1cd   : > { %v5316_v62 = vadd.f32 %v5315_v50, %v5314_v10  ;;  %v5317_v48 = vpop.f32.mrb[106].mxu1  ;;  %v5206_v26 = vpop.f32.mrb[107].mxu0  ;;  %v320_v52 = vld [vmem:[%s6068_s28 + $0x470] sm:$0xff] }
 0x1ce   : > { %v3182_v43 = vadd.f32 %v5204_v44, %v6650_v23  ;;  %v5207_v12 = vadd.f32 %v5206_v26, %v5205_v36  ;;  %v5318_v27 = vpop.f32.mrb[107].mxu1  ;;  %v4483_v36 = vcombine.high %v297_v2, %v305_v21 }
 0x1cf   : > { %v5319_v16 = vadd.f32 %v5318_v27, %v5317_v48  ;;  %3784 = vmatmul.mubr.bf16.gmra.mrb[212].mxu0 %v4448_v41  ;;  %v4481_v41 = vcombine.high %v296_v59, %v304_v4 }
 0x1d0   : > { %v6810_v7 = vadd.f32 %v5316_v62, %v3182_v43  ;;  %v3185_v8 = vadd.f32 %v5207_v12, %v6655_v32  ;;  %3945 = vmatmul.mubr.bf16.gmra.mrb[212].mxu1 %v4450_v20  ;;  %3791 = vmatprep.mubr.bf16.mxu0 %v4465_v45  ;;  %v313_v43 = vld [vmem:[%s6068_s28 + $0x438] sm:$0xff] }
 0x1d1   : > { %3952 = vmatprep.mubr.bf16.mxu1 %v4467_v61  ;;  %v321_v12 = vld [vmem:[%s6068_s28 + $0x478] sm:$0xff] }
 0x1d2   : > { %v6815_v6 = vadd.f32 %v5319_v16, %v3185_v8  ;;  %v5208_v37 = vpop.f32.mrb[108].mxu0  ;;  %v4480_v16 = vcombine.low %v296_v59, %v304_v4 }
 0x1d3   : > { %v5320_v51 = vpop.f32.mrb[108].mxu1  ;;  %v5209_v23 = vpop.f32.mrb[109].mxu0 }
 0x1d4   : > { %v5210_v24 = vadd.f32 %v5209_v23, %v5208_v37  ;;  %v5321_v11 = vpop.f32.mrb[109].mxu1  ;;  %v5211_v10 = vpop.f32.mrb[110].mxu0  ;;  %v4482_v23 = vcombine.low %v297_v2, %v305_v21  ;;  %v328_v2 = vld [vmem:[%s6068_s28 + $0x4b0] sm:$0xff] }
 0x1d5   : > { %v5322_v32 = vadd.f32 %v5321_v11, %v5320_v51  ;;  %v5323_v44 = vpop.f32.mrb[110].mxu1  ;;  %v5212_v50 = vpop.f32.mrb[111].mxu0  ;;  %v336_v21 = vld [vmem:[%s6068_s28 + $0x4f0] sm:$0xff] }
 0x1d6   : > { %v3190_v20 = vadd.f32 %v5210_v24, %v6660_v53  ;;  %v5213_v45 = vadd.f32 %v5212_v50, %v5211_v10  ;;  %v5324_v62 = vpop.f32.mrb[111].mxu1  ;;  %v4499_v10 = vcombine.high %v313_v43, %v321_v12 }
 0x1d7   : > { %v5325_v48 = vadd.f32 %v5324_v62, %v5323_v44  ;;  %3792 = vmatmul.mubr.bf16.gmra.mrb[216].mxu0 %v4464_v25  ;;  %v4497_v25 = vcombine.high %v312_v28, %v320_v52 }
 0x1d8   : > { %v6820_v33 = vadd.f32 %v5322_v32, %v3190_v20  ;;  %v3193_v38 = vadd.f32 %v5213_v45, %v6665_v9  ;;  %3953 = vmatmul.mubr.bf16.gmra.mrb[216].mxu1 %v4466_v58  ;;  %3799 = vmatprep.mubr.bf16.mxu0 %v4481_v41  ;;  %v329_v20 = vld [vmem:[%s6068_s28 + $0x4b8] sm:$0xff] }
 0x1d9   : > { %3960 = vmatprep.mubr.bf16.mxu1 %v4483_v36  ;;  %v337_v45 = vld [vmem:[%s6068_s28 + $0x4f8] sm:$0xff] }
 0x1da   : > { %v6825_v26 = vadd.f32 %v5325_v48, %v3193_v38  ;;  %v5214_v61 = vpop.f32.mrb[112].mxu0  ;;  %v4496_v48 = vcombine.low %v312_v28, %v320_v52 }
 0x1db   : > { %v5326_v27 = vpop.f32.mrb[112].mxu1  ;;  %v5215_v53 = vpop.f32.mrb[113].mxu0 }
 0x1dc   : > { %v5216_v8 = vadd.f32 %v5215_v53, %v5214_v61  ;;  %v5327_v37 = vpop.f32.mrb[113].mxu1  ;;  %v5217_v51 = vpop.f32.mrb[114].mxu0  ;;  %v4498_v53 = vcombine.low %v313_v43, %v321_v12  ;;  %v344_v43 = vld [vmem:[%s6068_s28 + $0x530] sm:$0xff] }
 0x1dd   : > { %v5328_v9 = vadd.f32 %v5327_v37, %v5326_v27  ;;  %v5329_v24 = vpop.f32.mrb[114].mxu1  ;;  %v5218_v11 = vpop.f32.mrb[115].mxu0  ;;  %v352_v12 = vld [vmem:[%s6068_s28 + $0x570] sm:$0xff] }
 0x1de   : > { %v3198_v58 = vadd.f32 %v5216_v8, %v6670_v31  ;;  %v5219_v41 = vadd.f32 %v5218_v11, %v5217_v51  ;;  %v5330_v32 = vpop.f32.mrb[115].mxu1  ;;  %v4515_v51 = vcombine.high %v329_v20, %v337_v45 }
 0x1df   : > { %v5331_v44 = vadd.f32 %v5330_v32, %v5329_v24  ;;  %3800 = vmatmul.mubr.bf16.gmra.mrb[220].mxu0 %v4480_v16  ;;  %v4513_v16 = vcombine.high %v328_v2, %v336_v21 }
 0x1e0   : > { %v6830_v59 = vadd.f32 %v5328_v9, %v3198_v58  ;;  %v3201_v4 = vadd.f32 %v5219_v41, %v6675_v42  ;;  %3961 = vmatmul.mubr.bf16.gmra.mrb[220].mxu1 %v4482_v23  ;;  %3807 = vmatprep.mubr.bf16.mxu0 %v4497_v25  ;;  %v345_v58 = vld [vmem:[%s6068_s28 + $0x538] sm:$0xff] }
 0x1e1   : > { %3968 = vmatprep.mubr.bf16.mxu1 %v4499_v10  ;;  %v353_v41 = vld [vmem:[%s6068_s28 + $0x578] sm:$0xff] }
 0x1e2   : > { %v6835_v50 = vadd.f32 %v5331_v44, %v3201_v4  ;;  %v5220_v36 = vpop.f32.mrb[116].mxu0  ;;  %v4512_v44 = vcombine.low %v328_v2, %v336_v21 }
 0x1e3   : > { %v5332_v62 = vpop.f32.mrb[116].mxu1  ;;  %v5221_v31 = vpop.f32.mrb[117].mxu0 }
 0x1e4   : > { %v5222_v38 = vadd.f32 %v5221_v31, %v5220_v36  ;;  %v5333_v61 = vpop.f32.mrb[117].mxu1  ;;  %v5223_v27 = vpop.f32.mrb[118].mxu0  ;;  %v4514_v31 = vcombine.low %v329_v20, %v337_v45  ;;  %v360_v20 = vld [vmem:[%s6068_s28 + $0x5b0] sm:$0xff] }
 0x1e5   : > { %v5334_v42 = vadd.f32 %v5333_v61, %v5332_v62  ;;  %v5335_v8 = vpop.f32.mrb[118].mxu1  ;;  %v5224_v37 = vpop.f32.mrb[119].mxu0  ;;  %v368_v45 = vld [vmem:[%s6068_s28 + $0x5f0] sm:$0xff] }
 0x1e6   : > { %v3206_v23 = vadd.f32 %v5222_v38, %v6680_v0  ;;  %v5225_v25 = vadd.f32 %v5224_v37, %v5223_v27  ;;  %v5336_v9 = vpop.f32.mrb[119].mxu1  ;;  %v4531_v27 = vcombine.high %v345_v58, %v353_v41 }
 0x1e7   : > { %v5337_v24 = vadd.f32 %v5336_v9, %v5335_v8  ;;  %3808 = vmatmul.mubr.bf16.gmra.mrb[224].mxu0 %v4496_v48  ;;  %v4529_v48 = vcombine.high %v344_v43, %v352_v12 }
 0x1e8   : > { %v6840_v28 = vadd.f32 %v5334_v42, %v3206_v23  ;;  %v3209_v52 = vadd.f32 %v5225_v25, %v6685_v17  ;;  %3969 = vmatmul.mubr.bf16.gmra.mrb[224].mxu1 %v4498_v53  ;;  %3815 = vmatprep.mubr.bf16.mxu0 %v4513_v16  ;;  %v361_v23 = vld [vmem:[%s6068_s28 + $0x5b8] sm:$0xff] }
 0x1e9   : > { %3976 = vmatprep.mubr.bf16.mxu1 %v4515_v51  ;;  %v369_v25 = vld [vmem:[%s6068_s28 + $0x5f8] sm:$0xff] }
 0x1ea   : > { %v6845_v11 = vadd.f32 %v5337_v24, %v3209_v52  ;;  %v5226_v10 = vpop.f32.mrb[120].mxu0  ;;  %v4528_v24 = vcombine.low %v344_v43, %v352_v12 }
 0x1eb   : > { %v5338_v32 = vpop.f32.mrb[120].mxu1  ;;  %v5227_v0 = vpop.f32.mrb[121].mxu0 }
 0x1ec   : > { %v5228_v4 = vadd.f32 %v5227_v0, %v5226_v10  ;;  %v5339_v36 = vpop.f32.mrb[121].mxu1  ;;  %v5229_v62 = vpop.f32.mrb[122].mxu0  ;;  %v4530_v0 = vcombine.low %v345_v58, %v353_v41  ;;  %v376_v58 = vld [vmem:[%s6068_s28 + $0x630] sm:$0xff] }
 0x1ed   : > { %v5340_v17 = vadd.f32 %v5339_v36, %v5338_v32  ;;  %v5341_v38 = vpop.f32.mrb[122].mxu1  ;;  %v5230_v61 = vpop.f32.mrb[123].mxu0  ;;  %v384_v41 = vld [vmem:[%s6068_s28 + $0x670] sm:$0xff] }
 0x1ee   : > { %v3214_v53 = vadd.f32 %v5228_v4, %v6690_v35  ;;  %v5231_v16 = vadd.f32 %v5230_v61, %v5229_v62  ;;  %v5342_v42 = vpop.f32.mrb[123].mxu1  ;;  %v4547_v62 = vcombine.high %v361_v23, %v369_v25 }
 0x1ef   : > { %v5343_v8 = vadd.f32 %v5342_v42, %v5341_v38  ;;  %3816 = vmatmul.mubr.bf16.gmra.mrb[228].mxu0 %v4512_v44  ;;  %v4545_v44 = vcombine.high %v360_v20, %v368_v45 }
 0x1f0   : > { %v6850_v2 = vadd.f32 %v5340_v17, %v3214_v53  ;;  %v3217_v21 = vadd.f32 %v5231_v16, %v6695_v63  ;;  %3977 = vmatmul.mubr.bf16.gmra.mrb[228].mxu1 %v4514_v31  ;;  %3823 = vmatprep.mubr.bf16.mxu0 %v4529_v48  ;;  %v377_v53 = vld [vmem:[%s6068_s28 + $0x638] sm:$0xff] }
 0x1f1   : > { %3984 = vmatprep.mubr.bf16.mxu1 %v4531_v27  ;;  %v385_v16 = vld [vmem:[%s6068_s28 + $0x678] sm:$0xff] }
 0x1f2   : > { %v6855_v37 = vadd.f32 %v5343_v8, %v3217_v21  ;;  %v5232_v51 = vpop.f32.mrb[124].mxu0  ;;  %v4544_v8 = vcombine.low %v360_v20, %v368_v45 }
 0x1f3   : > { %v5344_v9 = vpop.f32.mrb[124].mxu1  ;;  %v5233_v35 = vpop.f32.mrb[125].mxu0 }
 0x1f4   : > { %v5234_v52 = vadd.f32 %v5233_v35, %v5232_v51  ;;  %v5345_v10 = vpop.f32.mrb[125].mxu1  ;;  %v5235_v32 = vpop.f32.mrb[126].mxu0  ;;  %v4546_v35 = vcombine.low %v361_v23, %v369_v25  ;;  %v392_v23 = vld [vmem:[%s6068_s28 + $0x6b0] sm:$0xff] }
 0x1f5   : > { %v5346_v63 = vadd.f32 %v5345_v10, %v5344_v9  ;;  %v5347_v4 = vpop.f32.mrb[126].mxu1  ;;  %v5236_v36 = vpop.f32.mrb[127].mxu0  ;;  %v400_v25 = vld [vmem:[%s6068_s28 + $0x6f0] sm:$0xff] }
 0x1f6   : > { %v3222_v31 = vadd.f32 %v5234_v52, %v6700_v14  ;;  %v5237_v48 = vadd.f32 %v5236_v36, %v5235_v32  ;;  %v5348_v17 = vpop.f32.mrb[127].mxu1  ;;  %v4563_v32 = vcombine.high %v377_v53, %v385_v16 }
 0x1f7   : > { %v5349_v38 = vadd.f32 %v5348_v17, %v5347_v4  ;;  %3824 = vmatmul.mubr.bf16.gmra.mrb[232].mxu0 %v4528_v24  ;;  %v4561_v24 = vcombine.high %v376_v58, %v384_v41 }
 0x1f8   : > { %v6860_v43 = vadd.f32 %v5346_v63, %v3222_v31  ;;  %v3225_v12 = vadd.f32 %v5237_v48, %v6705_v54  ;;  %3985 = vmatmul.mubr.bf16.gmra.mrb[232].mxu1 %v4530_v0  ;;  %3831 = vmatprep.mubr.bf16.mxu0 %v4545_v44  ;;  %v393_v31 = vld [vmem:[%s6068_s28 + $0x6b8] sm:$0xff] }
 0x1f9   : > { %3992 = vmatprep.mubr.bf16.mxu1 %v4547_v62  ;;  %v401_v48 = vld [vmem:[%s6068_s28 + $0x6f8] sm:$0xff] }
 0x1fa   : > { %v6865_v61 = vadd.f32 %v5349_v38, %v3225_v12  ;;  %v5366_v27 = vpop.f32.mrb[128].mxu0  ;;  %v4560_v38 = vcombine.low %v376_v58, %v384_v41 }
 0x1fb   : > { %v5478_v42 = vpop.f32.mrb[128].mxu1  ;;  %v5367_v14 = vpop.f32.mrb[129].mxu0 }
 0x1fc   : > { %v5368_v21 = vadd.f32 %v5367_v14, %v5366_v27  ;;  %v5479_v51 = vpop.f32.mrb[129].mxu1  ;;  %v5369_v9 = vpop.f32.mrb[130].mxu0  ;;  %v4562_v14 = vcombine.low %v377_v53, %v385_v16  ;;  %v408_v53 = vld [vmem:[%s6068_s28 + $0x730] sm:$0xff] }
 0x1fd   : > { %v5480_v54 = vadd.f32 %v5479_v51, %v5478_v42  ;;  %v5481_v52 = vpop.f32.mrb[130].mxu1  ;;  %v5370_v10 = vpop.f32.mrb[131].mxu0  ;;  %v416_v16 = vld [vmem:[%s6068_s28 + $0x770] sm:$0xff] }
 0x1fe   : > { %v3424_v0 = vadd.f32 %v5368_v21, %v6710_v49  ;;  %v5371_v44 = vadd.f32 %v5370_v10, %v5369_v9  ;;  %v5482_v63 = vpop.f32.mrb[131].mxu1  ;;  %v4579_v9 = vcombine.high %v393_v31, %v401_v48 }
 0x1ff   : > { %v5483_v4 = vadd.f32 %v5482_v63, %v5481_v52  ;;  %3832 = vmatmul.mubr.bf16.gmra.mrb[236].mxu0 %v4544_v8  ;;  %v4577_v8 = vcombine.high %v392_v23, %v400_v25 }
 0x200   : > { %v6870_v20 = vadd.f32 %v5480_v54, %v3424_v0  ;;  %v3427_v45 = vadd.f32 %v5371_v44, %v6715_v34  ;;  %3993 = vmatmul.mubr.bf16.gmra.mrb[236].mxu1 %v4546_v35  ;;  %3839 = vmatprep.mubr.bf16.mxu0 %v4561_v24  ;;  %v409_v0 = vld [vmem:[%s6068_s28 + $0x738] sm:$0xff] }
 0x201   : > { %4000 = vmatprep.mubr.bf16.mxu1 %v4563_v32  ;;  %v417_v44 = vld [vmem:[%s6068_s28 + $0x778] sm:$0xff] }
 0x202   : > { %v6875_v36 = vadd.f32 %v5483_v4, %v3427_v45  ;;  %v5372_v62 = vpop.f32.mrb[132].mxu0  ;;  %v4576_v4 = vcombine.low %v392_v23, %v400_v25 }
 0x203   : > { %v5484_v17 = vpop.f32.mrb[132].mxu1  ;;  %v5373_v49 = vpop.f32.mrb[133].mxu0 }
 0x204   : > { %v5374_v12 = vadd.f32 %v5373_v49, %v5372_v62  ;;  %v5485_v27 = vpop.f32.mrb[133].mxu1  ;;  %v5375_v42 = vpop.f32.mrb[134].mxu0  ;;  %v4578_v49 = vcombine.low %v393_v31, %v401_v48  ;;  %v424_v31 = vld [vmem:[%s6068_s28 + $0x7b0] sm:$0xff] }
 0x205   : > { %v5486_v34 = vadd.f32 %v5485_v27, %v5484_v17  ;;  %v5487_v21 = vpop.f32.mrb[134].mxu1  ;;  %v5376_v51 = vpop.f32.mrb[135].mxu0  ;;  %v432_v48 = vld [vmem:[%s6068_s28 + $0x7f0] sm:$0xff] }
 0x206   : > { %v3432_v35 = vadd.f32 %v5374_v12, %v6720_v19  ;;  %v5377_v24 = vadd.f32 %v5376_v51, %v5375_v42  ;;  %v5488_v54 = vpop.f32.mrb[135].mxu1  ;;  %v4595_v42 = vcombine.high %v409_v0, %v417_v44 }
 0x207   : > { %v5489_v52 = vadd.f32 %v5488_v54, %v5487_v21  ;;  %3840 = vmatmul.mubr.bf16.gmra.mrb[240].mxu0 %v4560_v38  ;;  %v4593_v38 = vcombine.high %v408_v53, %v416_v16 }
 0x208   : > { %v6880_v58 = vadd.f32 %v5486_v34, %v3432_v35  ;;  %v3435_v41 = vadd.f32 %v5377_v24, %v6725_v13  ;;  %4001 = vmatmul.mubr.bf16.gmra.mrb[240].mxu1 %v4562_v14  ;;  %3847 = vmatprep.mubr.bf16.mxu0 %v4577_v8  ;;  %v425_v35 = vld [vmem:[%s6068_s28 + $0x7b8] sm:$0xff] }
 0x209   : > { %4008 = vmatprep.mubr.bf16.mxu1 %v4579_v9  ;;  %v433_v24 = vld [vmem:[%s6068_s28 + $0x7f8] sm:$0xff]  ;;  %s4354_s28 = sshll.u32 %s7039_s21, 2 }
 0x20a   : > { %v6885_v10 = vadd.f32 %v5489_v52, %v3435_v41  ;;  %v5378_v32 = vpop.f32.mrb[136].mxu0  ;;  %v4592_v52 = vcombine.low %v408_v53, %v416_v16  ;;  %s6983_s9 = scalar_lea.vmem %s7037_s3, %s4354_s28 }
 0x20b   : > { %v5490_v63 = vpop.f32.mrb[136].mxu1  ;;  %v5379_v19 = vpop.f32.mrb[137].mxu0 }
 0x20c   : > { %v5380_v45 = vadd.f32 %v5379_v19, %v5378_v32  ;;  %v5491_v62 = vpop.f32.mrb[137].mxu1  ;;  %v5381_v17 = vpop.f32.mrb[138].mxu0  ;;  %v4594_v19 = vcombine.low %v409_v0, %v417_v44 }
 0x20d   : > { %v5492_v13 = vadd.f32 %v5491_v62, %v5490_v63  ;;  %v5493_v12 = vpop.f32.mrb[138].mxu1  ;;  %v5382_v27 = vpop.f32.mrb[139].mxu0 }
 0x20e   : > { %v3440_v14 = vadd.f32 %v5380_v45, %v6730_v60  ;;  %v5383_v8 = vadd.f32 %v5382_v27, %v5381_v17  ;;  %v5494_v34 = vpop.f32.mrb[139].mxu1  ;;  %v4611_v17 = vcombine.high %v425_v35, %v433_v24 }
 0x20f   : > { %v5495_v21 = vadd.f32 %v5494_v34, %v5493_v12  ;;  %3848 = vmatmul.mubr.bf16.gmra.mrb[244].mxu0 %v4576_v4  ;;  %v4609_v4 = vcombine.high %v424_v31, %v432_v48 }
 0x210   : > { %v6890_v23 = vadd.f32 %v5492_v13, %v3440_v14  ;;  %v3443_v25 = vadd.f32 %v5383_v8, %v6735_v3  ;;  %4009 = vmatmul.mubr.bf16.gmra.mrb[244].mxu1 %v4578_v49  ;;  %3855 = vmatprep.mubr.bf16.mxu0 %v4593_v38  ;;  %v4608_v14 = vcombine.low %v424_v31, %v432_v48 }
 0x211   : > { %4016 = vmatprep.mubr.bf16.mxu1 %v4595_v42 }
 0x212   : > { %v6895_v51 = vadd.f32 %v5495_v21, %v3443_v25  ;;  %v5384_v9 = vpop.f32.mrb[140].mxu0  ;;  %v4610_v21 = vcombine.low %v425_v35, %v433_v24 }
 0x213   : > { %v5496_v54 = vpop.f32.mrb[140].mxu1  ;;  %v5385_v60 = vpop.f32.mrb[141].mxu0 }
 0x214   : > { %v5386_v41 = vadd.f32 %v5385_v60, %v5384_v9  ;;  %v5497_v32 = vpop.f32.mrb[141].mxu1  ;;  %v5387_v63 = vpop.f32.mrb[142].mxu0 }
 0x215   : > { %v5498_v45 = vadd.f32 %v5497_v32, %v5496_v54  ;;  %v5499_v3 = vpop.f32.mrb[142].mxu1  ;;  %v5388_v62 = vpop.f32.mrb[143].mxu0 }
 0x216   : > { %v3448_v49 = vadd.f32 %v5386_v41, %v6740_v56  ;;  %v5389_v38 = vadd.f32 %v5388_v62, %v5387_v63  ;;  %v5500_v13 = vpop.f32.mrb[143].mxu1 }
 0x217   : > { %v5501_v12 = vadd.f32 %v5500_v13, %v5499_v3  ;;  %3856 = vmatmul.mubr.bf16.gmra.mrb[248].mxu0 %v4592_v52 }
 0x218   : > { %v6900_v27 = vadd.f32 %v5498_v45, %v3448_v49  ;;  %v3451_v42 = vadd.f32 %v5389_v38, %v6745_v55  ;;  %4017 = vmatmul.mubr.bf16.gmra.mrb[248].mxu1 %v4594_v19  ;;  %3863 = vmatprep.mubr.bf16.mxu0 %v4609_v4 }
 0x219   : > { %4024 = vmatprep.mubr.bf16.mxu1 %v4611_v17 }
 0x21a   : > { %v6903_v53 = vadd.f32 %v5501_v12, %v3451_v42  ;;  %v5390_v16 = vpop.f32.mrb[144].mxu0 }
 0x21b   : > { %v5502_v0 = vpop.f32.mrb[144].mxu1  ;;  %v5391_v44 = vpop.f32.mrb[145].mxu0 }
 0x21c   : > { %v5392_v8 = vadd.f32 %v5391_v44, %v5390_v16  ;;  %v5503_v34 = vpop.f32.mrb[145].mxu1  ;;  %v5393_v56 = vpop.f32.mrb[146].mxu0 }
 0x21d   : > { %v5504_v25 = vadd.f32 %v5503_v34, %v5502_v0  ;;  %v5505_v9 = vpop.f32.mrb[146].mxu1  ;;  %v5394_v54 = vpop.f32.mrb[147].mxu0 }
 0x21e   : > { %v3456_v60 = vadd.f32 %v5392_v8, %v6750_v40  ;;  %v5395_v52 = vadd.f32 %v5394_v54, %v5393_v56  ;;  %v5506_v55 = vpop.f32.mrb[147].mxu1 }
 0x21f   : > { %v5507_v41 = vadd.f32 %v5506_v55, %v5505_v9  ;;  %3864 = vmatmul.mubr.bf16.gmra.mrb[252].mxu0 %v4608_v14 }
 0x220   : > { %v6906_v32 = vadd.f32 %v5504_v25, %v3456_v60  ;;  %v3459_v63 = vadd.f32 %v5395_v52, %v6755_v39  ;;  %4025 = vmatmul.mubr.bf16.gmra.mrb[252].mxu1 %v4610_v21 }
 0x222   : > { %v6909_v19 = vadd.f32 %v5507_v41, %v3459_v63  ;;  %v5396_v31 = vpop.f32.mrb[148].mxu0 }
 0x223   : > { %v5508_v48 = vpop.f32.mrb[148].mxu1  ;;  %v5397_v4 = vpop.f32.mrb[149].mxu0 }
 0x224   : > { %v5398_v35 = vadd.f32 %v5397_v4, %v5396_v31  ;;  %v5509_v24 = vpop.f32.mrb[149].mxu1  ;;  %v5399_v45 = vpop.f32.mrb[150].mxu0 }
 0x225   : > { %v5510_v3 = vadd.f32 %v5509_v24, %v5508_v48  ;;  %v5511_v62 = vpop.f32.mrb[150].mxu1  ;;  %v5400_v40 = vpop.f32.mrb[151].mxu0 }
 0x226   : > { %v3464_v17 = vadd.f32 %v5398_v35, %v6760_v18  ;;  %v5401_v49 = vadd.f32 %v5400_v40, %v5399_v45  ;;  %v5512_v38 = vpop.f32.mrb[151].mxu1 }
 0x227   : > { %v5513_v13 = vadd.f32 %v5512_v38, %v5511_v62 }
 0x228   : > { %v6912_v12 = vadd.f32 %v5510_v3, %v3464_v17  ;;  %v3467_v39 = vadd.f32 %v5401_v49, %v6765_v1 }
 0x22a   : > { %v6915_v42 = vadd.f32 %v5513_v13, %v3467_v39  ;;  %v5402_v16 = vpop.f32.mrb[152].mxu0 }
 0x22b   : > { %v5514_v0 = vpop.f32.mrb[152].mxu1  ;;  %v5403_v44 = vpop.f32.mrb[153].mxu0 }
 0x22c   : > { %v5404_v14 = vadd.f32 %v5403_v44, %v5402_v16  ;;  %v5515_v8 = vpop.f32.mrb[153].mxu1  ;;  %v5405_v34 = vpop.f32.mrb[154].mxu0 }
 0x22d   : > { %v5516_v56 = vadd.f32 %v5515_v8, %v5514_v0  ;;  %v5517_v21 = vpop.f32.mrb[154].mxu1  ;;  %v5406_v25 = vpop.f32.mrb[155].mxu0 }
 0x22e   : > { %v3472_v18 = vadd.f32 %v5404_v14, %v6770_v15  ;;  %v5407_v9 = vadd.f32 %v5406_v25, %v5405_v34  ;;  %v5518_v54 = vpop.f32.mrb[155].mxu1 }
 0x22f   : > { %v5519_v60 = vadd.f32 %v5518_v54, %v5517_v21 }
 0x230   : > { %v6918_v52 = vadd.f32 %v5516_v56, %v3472_v18  ;;  %v3475_v1 = vadd.f32 %v5407_v9, %v6775_v5 }
 0x232   : > { %v6921_v55 = vadd.f32 %v5519_v60, %v3475_v1  ;;  %v5408_v41 = vpop.f32.mrb[156].mxu0 }
 0x233   : > { %v5520_v63 = vpop.f32.mrb[156].mxu1  ;;  %v5409_v31 = vpop.f32.mrb[157].mxu0 }
 0x234   : > { %v5410_v48 = vadd.f32 %v5409_v31, %v5408_v41  ;;  %v5521_v4 = vpop.f32.mrb[157].mxu1  ;;  %v5411_v35 = vpop.f32.mrb[158].mxu0 }
 0x235   : > { %v5522_v24 = vadd.f32 %v5521_v4, %v5520_v63  ;;  %v5523_v45 = vpop.f32.mrb[158].mxu1  ;;  %v5412_v3 = vpop.f32.mrb[159].mxu0 }
 0x236   : > { %v3480_v15 = vadd.f32 %v5410_v48, %v6780_v57  ;;  %v5413_v62 = vadd.f32 %v5412_v3, %v5411_v35  ;;  %v5524_v40 = vpop.f32.mrb[159].mxu1 }
 0x237   : > { %v5525_v17 = vadd.f32 %v5524_v40, %v5523_v45 }
 0x238   : > { %v6924_v49 = vadd.f32 %v5522_v24, %v3480_v15  ;;  %v3483_v5 = vadd.f32 %v5413_v62, %v6785_v47 }
 0x23a   : > { %v6927_v38 = vadd.f32 %v5525_v17, %v3483_v5  ;;  %v5414_v13 = vpop.f32.mrb[160].mxu0 }
 0x23b   : > { %v5526_v39 = vpop.f32.mrb[160].mxu1  ;;  %v5415_v16 = vpop.f32.mrb[161].mxu0 }
 0x23c   : > { %v5416_v0 = vadd.f32 %v5415_v16, %v5414_v13  ;;  %v5527_v44 = vpop.f32.mrb[161].mxu1  ;;  %v5417_v14 = vpop.f32.mrb[162].mxu0 }
 0x23d   : > { %v5528_v8 = vadd.f32 %v5527_v44, %v5526_v39  ;;  %v5529_v34 = vpop.f32.mrb[162].mxu1  ;;  %v5418_v56 = vpop.f32.mrb[163].mxu0 }
 0x23e   : > { %v3488_v57 = vadd.f32 %v5416_v0, %v6790_v22  ;;  %v5419_v21 = vadd.f32 %v5418_v56, %v5417_v14  ;;  %v5530_v25 = vpop.f32.mrb[163].mxu1 }
 0x23f   : > { %v5531_v18 = vadd.f32 %v5530_v25, %v5529_v34 }
 0x240   : > { %v6930_v9 = vadd.f32 %v5528_v8, %v3488_v57  ;;  %v3491_v47 = vadd.f32 %v5419_v21, %v6795_v30 }
 0x242   : > { %v6933_v54 = vadd.f32 %v5531_v18, %v3491_v47  ;;  %v5420_v60 = vpop.f32.mrb[164].mxu0 }
 0x243   : > { %v5532_v1 = vpop.f32.mrb[164].mxu1  ;;  %v5421_v41 = vpop.f32.mrb[165].mxu0 }
 0x244   : > { %v5422_v63 = vadd.f32 %v5421_v41, %v5420_v60  ;;  %v5533_v31 = vpop.f32.mrb[165].mxu1  ;;  %v5423_v48 = vpop.f32.mrb[166].mxu0 }
 0x245   : > { %v5534_v4 = vadd.f32 %v5533_v31, %v5532_v1  ;;  %v5535_v35 = vpop.f32.mrb[166].mxu1  ;;  %v5424_v24 = vpop.f32.mrb[167].mxu0 }
 0x246   : > { %v3496_v22 = vadd.f32 %v5422_v63, %v6800_v46  ;;  %v5425_v45 = vadd.f32 %v5424_v24, %v5423_v48  ;;  %v5536_v3 = vpop.f32.mrb[167].mxu1 }
 0x247   : > { %v5537_v15 = vadd.f32 %v5536_v3, %v5535_v35 }
 0x248   : > { %v6936_v62 = vadd.f32 %v5534_v4, %v3496_v22  ;;  %v3499_v30 = vadd.f32 %v5425_v45, %v6805_v29 }
 0x24a   : > { %v6939_v40 = vadd.f32 %v5537_v15, %v3499_v30  ;;  %v5426_v17 = vpop.f32.mrb[168].mxu0 }
 0x24b   : > { %v5538_v5 = vpop.f32.mrb[168].mxu1  ;;  %v5427_v13 = vpop.f32.mrb[169].mxu0 }
 0x24c   : > { %v5428_v39 = vadd.f32 %v5427_v13, %v5426_v17  ;;  %v5539_v16 = vpop.f32.mrb[169].mxu1  ;;  %v5429_v0 = vpop.f32.mrb[170].mxu0 }
 0x24d   : > { %v5540_v44 = vadd.f32 %v5539_v16, %v5538_v5  ;;  %v5541_v14 = vpop.f32.mrb[170].mxu1  ;;  %v5430_v8 = vpop.f32.mrb[171].mxu0 }
 0x24e   : > { %v3504_v46 = vadd.f32 %v5428_v39, %v6810_v7  ;;  %v5431_v34 = vadd.f32 %v5430_v8, %v5429_v0  ;;  %v5542_v56 = vpop.f32.mrb[171].mxu1 }
 0x24f   : > { %v5543_v57 = vadd.f32 %v5542_v56, %v5541_v14 }
 0x250   : > { %v6942_v21 = vadd.f32 %v5540_v44, %v3504_v46  ;;  %v3507_v29 = vadd.f32 %v5431_v34, %v6815_v6 }
 0x252   : > { %v6945_v25 = vadd.f32 %v5543_v57, %v3507_v29  ;;  %v5432_v18 = vpop.f32.mrb[172].mxu0 }
 0x253   : > { %v5544_v47 = vpop.f32.mrb[172].mxu1  ;;  %v5433_v60 = vpop.f32.mrb[173].mxu0 }
 0x254   : > { %v5434_v1 = vadd.f32 %v5433_v60, %v5432_v18  ;;  %v5545_v41 = vpop.f32.mrb[173].mxu1  ;;  %v5435_v63 = vpop.f32.mrb[174].mxu0 }
 0x255   : > { %v5546_v31 = vadd.f32 %v5545_v41, %v5544_v47  ;;  %v5547_v48 = vpop.f32.mrb[174].mxu1  ;;  %v5436_v4 = vpop.f32.mrb[175].mxu0 }
 0x256   : > { %v3512_v7 = vadd.f32 %v5434_v1, %v6820_v33  ;;  %v5437_v35 = vadd.f32 %v5436_v4, %v5435_v63  ;;  %v5548_v24 = vpop.f32.mrb[175].mxu1 }
 0x257   : > { %v5549_v22 = vadd.f32 %v5548_v24, %v5547_v48 }
 0x258   : > { %v6948_v45 = vadd.f32 %v5546_v31, %v3512_v7  ;;  %v3515_v6 = vadd.f32 %v5437_v35, %v6825_v26 }
 0x25a   : > { %v6951_v3 = vadd.f32 %v5549_v22, %v3515_v6  ;;  %v5438_v15 = vpop.f32.mrb[176].mxu0 }
 0x25b   : > { %v5550_v30 = vpop.f32.mrb[176].mxu1  ;;  %v5439_v17 = vpop.f32.mrb[177].mxu0 }
 0x25c   : > { %v5440_v5 = vadd.f32 %v5439_v17, %v5438_v15  ;;  %v5551_v13 = vpop.f32.mrb[177].mxu1  ;;  %v5441_v39 = vpop.f32.mrb[178].mxu0 }
 0x25d   : > { %v5552_v16 = vadd.f32 %v5551_v13, %v5550_v30  ;;  %v5553_v0 = vpop.f32.mrb[178].mxu1  ;;  %v5442_v44 = vpop.f32.mrb[179].mxu0 }
 0x25e   : > { %v3520_v33 = vadd.f32 %v5440_v5, %v6830_v59  ;;  %v5443_v14 = vadd.f32 %v5442_v44, %v5441_v39  ;;  %v5554_v8 = vpop.f32.mrb[179].mxu1 }
 0x25f   : > { %v5555_v46 = vadd.f32 %v5554_v8, %v5553_v0 }
 0x260   : > { %v6954_v34 = vadd.f32 %v5552_v16, %v3520_v33  ;;  %v3523_v26 = vadd.f32 %v5443_v14, %v6835_v50 }
 0x262   : > { %v6957_v56 = vadd.f32 %v5555_v46, %v3523_v26  ;;  %v5444_v57 = vpop.f32.mrb[180].mxu0 }
 0x263   : > { %v5556_v29 = vpop.f32.mrb[180].mxu1  ;;  %v5445_v18 = vpop.f32.mrb[181].mxu0 }
 0x264   : > { %v5446_v47 = vadd.f32 %v5445_v18, %v5444_v57  ;;  %v5557_v60 = vpop.f32.mrb[181].mxu1  ;;  %v5447_v1 = vpop.f32.mrb[182].mxu0 }
 0x265   : > { %v5558_v41 = vadd.f32 %v5557_v60, %v5556_v29  ;;  %v5559_v63 = vpop.f32.mrb[182].mxu1  ;;  %v5448_v31 = vpop.f32.mrb[183].mxu0 }
 0x266   : > { %v3528_v59 = vadd.f32 %v5446_v47, %v6840_v28  ;;  %v5449_v48 = vadd.f32 %v5448_v31, %v5447_v1  ;;  %v5560_v4 = vpop.f32.mrb[183].mxu1 }
 0x267   : > { %v5561_v7 = vadd.f32 %v5560_v4, %v5559_v63 }
 0x268   : > { %v6960_v35 = vadd.f32 %v5558_v41, %v3528_v59  ;;  %v3531_v50 = vadd.f32 %v5449_v48, %v6845_v11 }
 0x26a   : > { %v6963_v24 = vadd.f32 %v5561_v7, %v3531_v50  ;;  %v5450_v22 = vpop.f32.mrb[184].mxu0 }
 0x26b   : > { %v5562_v6 = vpop.f32.mrb[184].mxu1  ;;  %v5451_v15 = vpop.f32.mrb[185].mxu0 }
 0x26c   : > { %v5452_v30 = vadd.f32 %v5451_v15, %v5450_v22  ;;  %v5563_v17 = vpop.f32.mrb[185].mxu1  ;;  %v5453_v5 = vpop.f32.mrb[186].mxu0 }
 0x26d   : > { %v5564_v13 = vadd.f32 %v5563_v17, %v5562_v6  ;;  %v5565_v39 = vpop.f32.mrb[186].mxu1  ;;  %v5454_v16 = vpop.f32.mrb[187].mxu0 }
 0x26e   : > { %v3536_v28 = vadd.f32 %v5452_v30, %v6850_v2  ;;  %v5455_v0 = vadd.f32 %v5454_v16, %v5453_v5  ;;  %v5566_v44 = vpop.f32.mrb[187].mxu1 }
 0x26f   : > { %v5567_v33 = vadd.f32 %v5566_v44, %v5565_v39 }
 0x270   : > { %v6966_v14 = vadd.f32 %v5564_v13, %v3536_v28  ;;  %v3539_v11 = vadd.f32 %v5455_v0, %v6855_v37 }
 0x272   : > { %v6969_v8 = vadd.f32 %v5567_v33, %v3539_v11  ;;  %v5456_v46 = vpop.f32.mrb[188].mxu0 }
 0x273   : > { %v5568_v26 = vpop.f32.mrb[188].mxu1  ;;  %v5457_v57 = vpop.f32.mrb[189].mxu0 }
 0x274   : > { %v5458_v29 = vadd.f32 %v5457_v57, %v5456_v46  ;;  %v5569_v18 = vpop.f32.mrb[189].mxu1  ;;  %v5459_v47 = vpop.f32.mrb[190].mxu0 }
 0x275   : > { %v5570_v60 = vadd.f32 %v5569_v18, %v5568_v26  ;;  %v5571_v1 = vpop.f32.mrb[190].mxu1  ;;  %v5460_v41 = vpop.f32.mrb[191].mxu0 }
 0x276   : > { %v3544_v2 = vadd.f32 %v5458_v29, %v6860_v43  ;;  %v5461_v63 = vadd.f32 %v5460_v41, %v5459_v47  ;;  %v5572_v31 = vpop.f32.mrb[191].mxu1 }
 0x277   : > { %v5573_v59 = vadd.f32 %v5572_v31, %v5571_v1 }
 0x278   : > { %v6972_v48 = vadd.f32 %v5570_v60, %v3544_v2  ;;  %v3547_v37 = vadd.f32 %v5461_v63, %v6865_v61 }
 0x27a   : > { %v6975_v4 = vadd.f32 %v5573_v59, %v3547_v37  ;;  %v5590_v7 = vpop.f32.mrb[192].mxu0 }
 0x27b   : > { %v5702_v50 = vpop.f32.mrb[192].mxu1  ;;  %v5591_v22 = vpop.f32.mrb[193].mxu0 }
 0x27c   : > { %v5592_v6 = vadd.f32 %v5591_v22, %v5590_v7  ;;  %v5703_v15 = vpop.f32.mrb[193].mxu1  ;;  %v5593_v30 = vpop.f32.mrb[194].mxu0 }
 0x27d   : > { %v5704_v17 = vadd.f32 %v5703_v15, %v5702_v50  ;;  %v5705_v5 = vpop.f32.mrb[194].mxu1  ;;  %v5594_v13 = vpop.f32.mrb[195].mxu0 }
 0x27e   : > { %v3746_v43 = vadd.f32 %v5592_v6, %v6870_v20  ;;  %v5595_v39 = vadd.f32 %v5594_v13, %v5593_v30  ;;  %v5706_v16 = vpop.f32.mrb[195].mxu1 }
 0x27f   : > { %v5707_v28 = vadd.f32 %v5706_v16, %v5705_v5 }
 0x280   : > { %v3907_v0 = vadd.f32 %v5704_v17, %v3746_v43  ;;  %v3749_v61 = vadd.f32 %v5595_v39, %v6875_v36 }
 0x282   : > { %v4065_v44 = vmul.f32 0.2, %v3907_v0  ;;  %v3910_v33 = vadd.f32 %v5707_v28, %v3749_v61  ;;  %v5596_v11 = vpop.f32.mrb[196].mxu0  ;;  %vm4033_vm0 = vcmp.gt.f32.partialorder %v3907_v0, 0.0 }
 0x283   : > { %v5708_v46 = vpop.f32.mrb[196].mxu1  ;;  %v5597_v26 = vpop.f32.mrb[197].mxu0 }
 0x284   : > { %vm4034_vm1 = vcmp.gt.f32.partialorder %v3910_v33, 0.0  ;;  %v4066_v57 = vmul.f32 0.2, %v3910_v33  ;;  %v5598_v29 = vadd.f32 %v5597_v26, %v5596_v11  ;;  %v5709_v18 = vpop.f32.mrb[197].mxu1  ;;  %v5599_v47 = vpop.f32.mrb[198].mxu0  ;;  %v4097_v41 = vsel %vm4033_vm0, %v3907_v0, %v4065_v44 }
 0x285   : > { %v5710_v60 = vadd.f32 %v5709_v18, %v5708_v46  ;;  %v5711_v20 = vpop.f32.mrb[198].mxu1  ;;  %v5600_v1 = vpop.f32.mrb[199].mxu0 }
 0x286   : > { %v4098_v36 = vsel %vm4034_vm1, %v3910_v33, %v4066_v57  ;;  %v3754_v2 = vadd.f32 %v5598_v29, %v6880_v58  ;;  %v5601_v63 = vadd.f32 %v5600_v1, %v5599_v47  ;;  %v5712_v31 = vpop.f32.mrb[199].mxu1 }
 0x287   : > { %v4810_v59 = vpack.c.bf16 %v4098_v36, %v4097_v41  ;;  %v5713_v37 = vadd.f32 %v5712_v31, %v5711_v20 }
 0x288   : > { %v3915_v7 = vadd.f32 %v5710_v60, %v3754_v2  ;;  %v3757_v50 = vadd.f32 %v5601_v63, %v6885_v10 }
 0x289   : > { %4811 = vst [vmem:[%s6983_s9] sm:$0xff] %v4810_v59  }
 0x28a   : > { %v4067_v22 = vmul.f32 0.2, %v3915_v7  ;;  %v3918_v6 = vadd.f32 %v5713_v37, %v3757_v50  ;;  %v5602_v15 = vpop.f32.mrb[200].mxu0  ;;  %vm4035_vm2 = vcmp.gt.f32.partialorder %v3915_v7, 0.0 }
 0x28b   : > { %v5714_v30 = vpop.f32.mrb[200].mxu1  ;;  %v5603_v17 = vpop.f32.mrb[201].mxu0 }
 0x28c   : > { %vm4036_vm3 = vcmp.gt.f32.partialorder %v3918_v6, 0.0  ;;  %v4068_v5 = vmul.f32 0.2, %v3918_v6  ;;  %v5604_v13 = vadd.f32 %v5603_v17, %v5602_v15  ;;  %v5715_v43 = vpop.f32.mrb[201].mxu1  ;;  %v5605_v58 = vpop.f32.mrb[202].mxu0  ;;  %v4099_v0 = vsel %vm4035_vm2, %v3915_v7, %v4067_v22 }
 0x28d   : > { %v5716_v39 = vadd.f32 %v5715_v43, %v5714_v30  ;;  %v5717_v16 = vpop.f32.mrb[202].mxu1  ;;  %v5606_v28 = vpop.f32.mrb[203].mxu0 }
 0x28e   : > { %v4100_v61 = vsel %vm4036_vm3, %v3918_v6, %v4068_v5  ;;  %v3762_v10 = vadd.f32 %v5604_v13, %v6890_v23  ;;  %v5607_v44 = vadd.f32 %v5606_v28, %v5605_v58  ;;  %v5718_v33 = vpop.f32.mrb[203].mxu1 }
 0x28f   : > { %v4815_v11 = vpack.c.bf16 %v4100_v61, %v4099_v0  ;;  %v5719_v46 = vadd.f32 %v5718_v33, %v5717_v16 }
 0x290   : > { %v3923_v26 = vadd.f32 %v5716_v39, %v3762_v10  ;;  %v3765_v57 = vadd.f32 %v5607_v44, %v6895_v51 }
 0x291   : > { %4887 = vst [vmem:[%s6983_s9 + $0x8] sm:$0xff] %v4815_v11  }
 0x292   : > { %v4069_v29 = vmul.f32 0.2, %v3923_v26  ;;  %v3926_v18 = vadd.f32 %v5719_v46, %v3765_v57  ;;  %v5608_v47 = vpop.f32.mrb[204].mxu0  ;;  %vm4037_vm4 = vcmp.gt.f32.partialorder %v3923_v26, 0.0 }
 0x293   : > { %v5720_v60 = vpop.f32.mrb[204].mxu1  ;;  %v5609_v20 = vpop.f32.mrb[205].mxu0 }
 0x294   : > { %vm4038_vm5 = vcmp.gt.f32.partialorder %v3926_v18, 0.0  ;;  %v4070_v1 = vmul.f32 0.2, %v3926_v18  ;;  %v5610_v41 = vadd.f32 %v5609_v20, %v5608_v47  ;;  %v5721_v36 = vpop.f32.mrb[205].mxu1  ;;  %v5611_v23 = vpop.f32.mrb[206].mxu0  ;;  %v4101_v59 = vsel %vm4037_vm4, %v3923_v26, %v4069_v29 }
 0x295   : > { %v5722_v2 = vadd.f32 %v5721_v36, %v5720_v60  ;;  %v5723_v63 = vpop.f32.mrb[206].mxu1  ;;  %v5612_v31 = vpop.f32.mrb[207].mxu0 }
 0x296   : > { %v4102_v37 = vsel %vm4038_vm5, %v3926_v18, %v4070_v1  ;;  %v3770_v51 = vadd.f32 %v5610_v41, %v6900_v27  ;;  %v5613_v7 = vadd.f32 %v5612_v31, %v5611_v23  ;;  %v5724_v50 = vpop.f32.mrb[207].mxu1 }
 0x297   : > { %v4820_v22 = vpack.c.bf16 %v4102_v37, %v4101_v59  ;;  %v5725_v6 = vadd.f32 %v5724_v50, %v5723_v63 }
 0x298   : > { %v3931_v15 = vadd.f32 %v5722_v2, %v3770_v51  ;;  %v3773_v30 = vadd.f32 %v5613_v7, %v6903_v53 }
 0x299   : > { %4888 = vst [vmem:[%s6983_s9 + $0x10] sm:$0xff] %v4820_v22  }
 0x29a   : > { %v4071_v17 = vmul.f32 0.2, %v3931_v15  ;;  %v3934_v5 = vadd.f32 %v5725_v6, %v3773_v30  ;;  %v5614_v13 = vpop.f32.mrb[208].mxu0  ;;  %vm4039_vm6 = vcmp.gt.f32.partialorder %v3931_v15, 0.0 }
 0x29b   : > { %v5726_v43 = vpop.f32.mrb[208].mxu1  ;;  %v5615_v58 = vpop.f32.mrb[209].mxu0 }
 0x29c   : > { %vm4040_vm7 = vcmp.gt.f32.partialorder %v3934_v5, 0.0  ;;  %v4072_v39 = vmul.f32 0.2, %v3934_v5  ;;  %v5616_v16 = vadd.f32 %v5615_v58, %v5614_v13  ;;  %v5727_v28 = vpop.f32.mrb[209].mxu1  ;;  %v5617_v27 = vpop.f32.mrb[210].mxu0  ;;  %v4103_v44 = vsel %vm4039_vm6, %v3931_v15, %v4071_v17 }
 0x29d   : > { %v5728_v0 = vadd.f32 %v5727_v28, %v5726_v43  ;;  %v5729_v61 = vpop.f32.mrb[210].mxu1  ;;  %v5618_v10 = vpop.f32.mrb[211].mxu0 }
 0x29e   : > { %v4104_v33 = vsel %vm4040_vm7, %v3934_v5, %v4072_v39  ;;  %v3778_v53 = vadd.f32 %v5616_v16, %v6906_v32  ;;  %v5619_v11 = vadd.f32 %v5618_v10, %v5617_v27  ;;  %v5730_v46 = vpop.f32.mrb[211].mxu1 }
 0x29f   : > { %v4825_v26 = vpack.c.bf16 %v4104_v33, %v4103_v44  ;;  %v5731_v57 = vadd.f32 %v5730_v46, %v5729_v61 }
 0x2a0   : > { %v3939_v29 = vadd.f32 %v5728_v0, %v3778_v53  ;;  %v3781_v18 = vadd.f32 %v5619_v11, %v6909_v19 }
 0x2a1   : > { %4889 = vst [vmem:[%s6983_s9 + $0x18] sm:$0xff] %v4825_v26  }
 0x2a2   : > { %v4073_v47 = vmul.f32 0.2, %v3939_v29  ;;  %v3942_v60 = vadd.f32 %v5731_v57, %v3781_v18  ;;  %v5620_v20 = vpop.f32.mrb[212].mxu0  ;;  %vm4041_vm8 = vcmp.gt.f32.partialorder %v3939_v29, 0.0 }
 0x2a3   : > { %v5732_v1 = vpop.f32.mrb[212].mxu1  ;;  %v5621_v41 = vpop.f32.mrb[213].mxu0 }
 0x2a4   : > { %vm4042_vm9 = vcmp.gt.f32.partialorder %v3942_v60, 0.0  ;;  %v4074_v36 = vmul.f32 0.2, %v3942_v60  ;;  %v5622_v23 = vadd.f32 %v5621_v41, %v5620_v20  ;;  %v5733_v2 = vpop.f32.mrb[213].mxu1  ;;  %v5623_v32 = vpop.f32.mrb[214].mxu0  ;;  %v4105_v37 = vsel %vm4041_vm8, %v3939_v29, %v4073_v47 }
 0x2a5   : > { %v5734_v63 = vadd.f32 %v5733_v2, %v5732_v1  ;;  %v5735_v31 = vpop.f32.mrb[214].mxu1  ;;  %v5624_v59 = vpop.f32.mrb[215].mxu0 }
 0x2a6   : > { %v4106_v51 = vsel %vm4042_vm9, %v3942_v60, %v4074_v36  ;;  %v3786_v19 = vadd.f32 %v5622_v23, %v6912_v12  ;;  %v5625_v7 = vadd.f32 %v5624_v59, %v5623_v32  ;;  %v5736_v50 = vpop.f32.mrb[215].mxu1 }
 0x2a7   : > { %v4830_v22 = vpack.c.bf16 %v4106_v51, %v4105_v37  ;;  %v5737_v6 = vadd.f32 %v5736_v50, %v5735_v31 }
 0x2a8   : > { %v3947_v15 = vadd.f32 %v5734_v63, %v3786_v19  ;;  %v3789_v30 = vadd.f32 %v5625_v7, %v6915_v42 }
 0x2a9   : > { %4890 = vst [vmem:[%s6983_s9 + $0x20] sm:$0xff] %v4830_v22  }
 0x2aa   : > { %v4075_v17 = vmul.f32 0.2, %v3947_v15  ;;  %v3950_v5 = vadd.f32 %v5737_v6, %v3789_v30  ;;  %v5626_v13 = vpop.f32.mrb[216].mxu0  ;;  %vm4043_vm10 = vcmp.gt.f32.partialorder %v3947_v15, 0.0 }
 0x2ab   : > { %v5738_v43 = vpop.f32.mrb[216].mxu1  ;;  %v5627_v58 = vpop.f32.mrb[217].mxu0 }
 0x2ac   : > { %vm4044_vm11 = vcmp.gt.f32.partialorder %v3950_v5, 0.0  ;;  %v4076_v39 = vmul.f32 0.2, %v3950_v5  ;;  %v5628_v16 = vadd.f32 %v5627_v58, %v5626_v13  ;;  %v5739_v28 = vpop.f32.mrb[217].mxu1  ;;  %v5629_v12 = vpop.f32.mrb[218].mxu0  ;;  %v4107_v10 = vsel %vm4043_vm10, %v3947_v15, %v4075_v17 }
 0x2ad   : > { %v5740_v27 = vadd.f32 %v5739_v28, %v5738_v43  ;;  %v5741_v0 = vpop.f32.mrb[218].mxu1  ;;  %v5630_v61 = vpop.f32.mrb[219].mxu0 }
 0x2ae   : > { %v4108_v44 = vsel %vm4044_vm11, %v3950_v5, %v4076_v39  ;;  %v3794_v42 = vadd.f32 %v5628_v16, %v6918_v52  ;;  %v5631_v33 = vadd.f32 %v5630_v61, %v5629_v12  ;;  %v5742_v53 = vpop.f32.mrb[219].mxu1 }
 0x2af   : > { %v4835_v11 = vpack.c.bf16 %v4108_v44, %v4107_v10  ;;  %v5743_v46 = vadd.f32 %v5742_v53, %v5741_v0 }
 0x2b0   : > { %v3955_v26 = vadd.f32 %v5740_v27, %v3794_v42  ;;  %v3797_v57 = vadd.f32 %v5631_v33, %v6921_v55 }
 0x2b1   : > { %4891 = vst [vmem:[%s6983_s9 + $0x28] sm:$0xff] %v4835_v11  }
 0x2b2   : > { %v4077_v29 = vmul.f32 0.2, %v3955_v26  ;;  %v3958_v18 = vadd.f32 %v5743_v46, %v3797_v57  ;;  %v5632_v47 = vpop.f32.mrb[220].mxu0  ;;  %vm4045_vm12 = vcmp.gt.f32.partialorder %v3955_v26, 0.0 }
 0x2b3   : > { %v5744_v60 = vpop.f32.mrb[220].mxu1  ;;  %v5633_v20 = vpop.f32.mrb[221].mxu0 }
 0x2b4   : > { %vm4046_vm13 = vcmp.gt.f32.partialorder %v3958_v18, 0.0  ;;  %v4078_v1 = vmul.f32 0.2, %v3958_v18  ;;  %v5634_v41 = vadd.f32 %v5633_v20, %v5632_v47  ;;  %v5745_v36 = vpop.f32.mrb[221].mxu1  ;;  %v5635_v52 = vpop.f32.mrb[222].mxu0  ;;  %v4109_v63 = vsel %vm4045_vm12, %v3955_v26, %v4077_v29 }
 0x2b5   : > { %v5746_v23 = vadd.f32 %v5745_v36, %v5744_v60  ;;  %v5747_v2 = vpop.f32.mrb[222].mxu1  ;;  %v5636_v32 = vpop.f32.mrb[223].mxu0 }
 0x2b6   : > { %v4110_v31 = vsel %vm4046_vm13, %v3958_v18, %v4078_v1  ;;  %v3802_v55 = vadd.f32 %v5634_v41, %v6924_v49  ;;  %v5637_v59 = vadd.f32 %v5636_v32, %v5635_v52  ;;  %v5748_v37 = vpop.f32.mrb[223].mxu1 }
 0x2b7   : > { %v4840_v51 = vpack.c.bf16 %v4110_v31, %v4109_v63  ;;  %v5749_v19 = vadd.f32 %v5748_v37, %v5747_v2 }
 0x2b8   : > { %v3963_v7 = vadd.f32 %v5746_v23, %v3802_v55  ;;  %v3805_v50 = vadd.f32 %v5637_v59, %v6927_v38 }
 0x2b9   : > { %4892 = vst [vmem:[%s6983_s9 + $0x30] sm:$0xff] %v4840_v51  }
 0x2ba   : > { %v4079_v22 = vmul.f32 0.2, %v3963_v7  ;;  %v3966_v6 = vadd.f32 %v5749_v19, %v3805_v50  ;;  %v5638_v15 = vpop.f32.mrb[224].mxu0  ;;  %vm4047_vm14 = vcmp.gt.f32.partialorder %v3963_v7, 0.0 }
 0x2bb   : > { %v5750_v30 = vpop.f32.mrb[224].mxu1  ;;  %v5639_v17 = vpop.f32.mrb[225].mxu0 }
 0x2bc   : > { %vm4048_vm15 = vcmp.gt.f32.partialorder %v3966_v6, 0.0  ;;  %v4080_v5 = vmul.f32 0.2, %v3966_v6  ;;  %v5640_v13 = vadd.f32 %v5639_v17, %v5638_v15  ;;  %v5751_v43 = vpop.f32.mrb[225].mxu1  ;;  %v5641_v49 = vpop.f32.mrb[226].mxu0  ;;  %v4111_v28 = vsel %vm4047_vm14, %v3963_v7, %v4079_v22 }
 0x2bd   : > { %v5752_v58 = vadd.f32 %v5751_v43, %v5750_v30  ;;  %v5753_v39 = vpop.f32.mrb[226].mxu1  ;;  %v5642_v16 = vpop.f32.mrb[227].mxu0 }
 0x2be   : > { %v4112_v12 = vsel %vm4048_vm15, %v3966_v6, %v4080_v5  ;;  %v3810_v38 = vadd.f32 %v5640_v13, %v6930_v9  ;;  %v5643_v27 = vadd.f32 %v5642_v16, %v5641_v49  ;;  %v5754_v0 = vpop.f32.mrb[227].mxu1 }
 0x2bf   : > { %v4845_v61 = vpack.c.bf16 %v4112_v12, %v4111_v28  ;;  %v5755_v10 = vadd.f32 %v5754_v0, %v5753_v39 }
 0x2c0   : > { %v3971_v44 = vadd.f32 %v5752_v58, %v3810_v38  ;;  %v3813_v42 = vadd.f32 %v5643_v27, %v6933_v54 }
 0x2c1   : > { %4893 = vst [vmem:[%s6983_s9 + $0x38] sm:$0xff] %v4845_v61  }
 0x2c2   : > { %v4081_v33 = vmul.f32 0.2, %v3971_v44  ;;  %v3974_v53 = vadd.f32 %v5755_v10, %v3813_v42  ;;  %v5644_v11 = vpop.f32.mrb[228].mxu0  ;;  %vm4049_vm0 = vcmp.gt.f32.partialorder %v3971_v44, 0.0 }
 0x2c3   : > { %v5756_v46 = vpop.f32.mrb[228].mxu1  ;;  %v5645_v26 = vpop.f32.mrb[229].mxu0 }
 0x2c4   : > { %vm4050_vm1 = vcmp.gt.f32.partialorder %v3974_v53, 0.0  ;;  %v4082_v57 = vmul.f32 0.2, %v3974_v53  ;;  %v5646_v29 = vadd.f32 %v5645_v26, %v5644_v11  ;;  %v5757_v18 = vpop.f32.mrb[229].mxu1  ;;  %v5647_v9 = vpop.f32.mrb[230].mxu0  ;;  %v4113_v1 = vsel %vm4049_vm0, %v3971_v44, %v4081_v33 }
 0x2c5   : > { %v5758_v47 = vadd.f32 %v5757_v18, %v5756_v46  ;;  %v5759_v60 = vpop.f32.mrb[230].mxu1  ;;  %v5648_v20 = vpop.f32.mrb[231].mxu0 }
 0x2c6   : > { %v4114_v41 = vsel %vm4050_vm1, %v3974_v53, %v4082_v57  ;;  %v3818_v54 = vadd.f32 %v5646_v29, %v6936_v62  ;;  %v5649_v36 = vadd.f32 %v5648_v20, %v5647_v9  ;;  %v5760_v52 = vpop.f32.mrb[231].mxu1 }
 0x2c7   : > { %v4850_v23 = vpack.c.bf16 %v4114_v41, %v4113_v1  ;;  %v5761_v2 = vadd.f32 %v5760_v52, %v5759_v60 }
 0x2c8   : > { %v3979_v32 = vadd.f32 %v5758_v47, %v3818_v54  ;;  %v3821_v63 = vadd.f32 %v5649_v36, %v6939_v40 }
 0x2c9   : > { %4894 = vst [vmem:[%s6983_s9 + $0x40] sm:$0xff] %v4850_v23  }
 0x2ca   : > { %v4083_v31 = vmul.f32 0.2, %v3979_v32  ;;  %v3982_v55 = vadd.f32 %v5761_v2, %v3821_v63  ;;  %v5650_v59 = vpop.f32.mrb[232].mxu0  ;;  %vm4051_vm2 = vcmp.gt.f32.partialorder %v3979_v32, 0.0 }
 0x2cb   : > { %v5762_v37 = vpop.f32.mrb[232].mxu1  ;;  %v5651_v51 = vpop.f32.mrb[233].mxu0 }
 0x2cc   : > { %vm4052_vm3 = vcmp.gt.f32.partialorder %v3982_v55, 0.0  ;;  %v4084_v19 = vmul.f32 0.2, %v3982_v55  ;;  %v5652_v7 = vadd.f32 %v5651_v51, %v5650_v59  ;;  %v5763_v50 = vpop.f32.mrb[233].mxu1  ;;  %v5653_v62 = vpop.f32.mrb[234].mxu0  ;;  %v4115_v30 = vsel %vm4051_vm2, %v3979_v32, %v4083_v31 }
 0x2cd   : > { %v5764_v22 = vadd.f32 %v5763_v50, %v5762_v37  ;;  %v5765_v6 = vpop.f32.mrb[234].mxu1  ;;  %v5654_v15 = vpop.f32.mrb[235].mxu0 }
 0x2ce   : > { %v4116_v17 = vsel %vm4052_vm3, %v3982_v55, %v4084_v19  ;;  %v3826_v40 = vadd.f32 %v5652_v7, %v6942_v21  ;;  %v5655_v5 = vadd.f32 %v5654_v15, %v5653_v62  ;;  %v5766_v13 = vpop.f32.mrb[235].mxu1 }
 0x2cf   : > { %v4855_v43 = vpack.c.bf16 %v4116_v17, %v4115_v30  ;;  %v5767_v49 = vadd.f32 %v5766_v13, %v5765_v6 }
 0x2d0   : > { %v3987_v58 = vadd.f32 %v5764_v22, %v3826_v40  ;;  %v3829_v39 = vadd.f32 %v5655_v5, %v6945_v25 }
 0x2d1   : > { %4895 = vst [vmem:[%s6983_s9 + $0x48] sm:$0xff] %v4855_v43  }
 0x2d2   : > { %v4085_v16 = vmul.f32 0.2, %v3987_v58  ;;  %v3990_v28 = vadd.f32 %v5767_v49, %v3829_v39  ;;  %v5656_v12 = vpop.f32.mrb[236].mxu0  ;;  %vm4053_vm4 = vcmp.gt.f32.partialorder %v3987_v58, 0.0 }
 0x2d3   : > { %v5768_v38 = vpop.f32.mrb[236].mxu1  ;;  %v5657_v27 = vpop.f32.mrb[237].mxu0 }
 0x2d4   : > { %vm4054_vm5 = vcmp.gt.f32.partialorder %v3990_v28, 0.0  ;;  %v4086_v0 = vmul.f32 0.2, %v3990_v28  ;;  %v5658_v61 = vadd.f32 %v5657_v27, %v5656_v12  ;;  %v5769_v10 = vpop.f32.mrb[237].mxu1  ;;  %v5659_v21 = vpop.f32.mrb[238].mxu0  ;;  %v4117_v53 = vsel %vm4053_vm4, %v3987_v58, %v4085_v16 }
 0x2d5   : > { %v5770_v44 = vadd.f32 %v5769_v10, %v5768_v38  ;;  %v5771_v42 = vpop.f32.mrb[238].mxu1  ;;  %v5660_v33 = vpop.f32.mrb[239].mxu0 }
 0x2d6   : > { %v4118_v11 = vsel %vm4054_vm5, %v3990_v28, %v4086_v0  ;;  %v3834_v25 = vadd.f32 %v5658_v61, %v6948_v45  ;;  %v5661_v46 = vadd.f32 %v5660_v33, %v5659_v21  ;;  %v5772_v26 = vpop.f32.mrb[239].mxu1 }
 0x2d7   : > { %v4860_v57 = vpack.c.bf16 %v4118_v11, %v4117_v53  ;;  %v5773_v29 = vadd.f32 %v5772_v26, %v5771_v42 }
 0x2d8   : > { %v3995_v18 = vadd.f32 %v5770_v44, %v3834_v25  ;;  %v3837_v9 = vadd.f32 %v5661_v46, %v6951_v3 }
 0x2d9   : > { %4896 = vst [vmem:[%s6983_s9 + $0x50] sm:$0xff] %v4860_v57  }
 0x2da   : > { %v4087_v47 = vmul.f32 0.2, %v3995_v18  ;;  %v3998_v60 = vadd.f32 %v5773_v29, %v3837_v9  ;;  %v5662_v20 = vpop.f32.mrb[240].mxu0  ;;  %vm4055_vm6 = vcmp.gt.f32.partialorder %v3995_v18, 0.0 }
 0x2db   : > { %v5774_v1 = vpop.f32.mrb[240].mxu1  ;;  %v5663_v41 = vpop.f32.mrb[241].mxu0 }
 0x2dc   : > { %vm4056_vm7 = vcmp.gt.f32.partialorder %v3998_v60, 0.0  ;;  %v4088_v54 = vmul.f32 0.2, %v3998_v60  ;;  %v5664_v36 = vadd.f32 %v5663_v41, %v5662_v20  ;;  %v5775_v52 = vpop.f32.mrb[241].mxu1  ;;  %v5665_v45 = vpop.f32.mrb[242].mxu0  ;;  %v4119_v63 = vsel %vm4055_vm6, %v3995_v18, %v4087_v47 }
 0x2dd   : > { %v5776_v23 = vadd.f32 %v5775_v52, %v5774_v1  ;;  %v5777_v2 = vpop.f32.mrb[242].mxu1  ;;  %v5666_v32 = vpop.f32.mrb[243].mxu0 }
 0x2de   : > { %v4120_v31 = vsel %vm4056_vm7, %v3998_v60, %v4088_v54  ;;  %v3842_v3 = vadd.f32 %v5664_v36, %v6954_v34  ;;  %v5667_v55 = vadd.f32 %v5666_v32, %v5665_v45  ;;  %v5778_v59 = vpop.f32.mrb[243].mxu1 }
 0x2df   : > { %v4865_v37 = vpack.c.bf16 %v4120_v31, %v4119_v63  ;;  %v5779_v51 = vadd.f32 %v5778_v59, %v5777_v2 }
 0x2e0   : > { %v4003_v19 = vadd.f32 %v5776_v23, %v3842_v3  ;;  %v3845_v7 = vadd.f32 %v5667_v55, %v6957_v56 }
 0x2e1   : > { %4897 = vst [vmem:[%s6983_s9 + $0x58] sm:$0xff] %v4865_v37  }
 0x2e2   : > { %v4089_v50 = vmul.f32 0.2, %v4003_v19  ;;  %v4006_v62 = vadd.f32 %v5779_v51, %v3845_v7  ;;  %v5668_v22 = vpop.f32.mrb[244].mxu0  ;;  %vm4057_vm8 = vcmp.gt.f32.partialorder %v4003_v19, 0.0 }
 0x2e3   : > { %v5780_v6 = vpop.f32.mrb[244].mxu1  ;;  %v5669_v15 = vpop.f32.mrb[245].mxu0 }
 0x2e4   : > { %vm4058_vm9 = vcmp.gt.f32.partialorder %v4006_v62, 0.0  ;;  %v4090_v30 = vmul.f32 0.2, %v4006_v62  ;;  %v5670_v17 = vadd.f32 %v5669_v15, %v5668_v22  ;;  %v5781_v40 = vpop.f32.mrb[245].mxu1  ;;  %v5671_v34 = vpop.f32.mrb[246].mxu0  ;;  %v4121_v49 = vsel %vm4057_vm8, %v4003_v19, %v4089_v50 }
 0x2e5   : > { %v5782_v5 = vadd.f32 %v5781_v40, %v5780_v6  ;;  %v5783_v13 = vpop.f32.mrb[246].mxu1  ;;  %v5672_v43 = vpop.f32.mrb[247].mxu0 }
 0x2e6   : > { %v4122_v58 = vsel %vm4058_vm9, %v4006_v62, %v4090_v30  ;;  %v3850_v56 = vadd.f32 %v5670_v17, %v6960_v35  ;;  %v5673_v39 = vadd.f32 %v5672_v43, %v5671_v34  ;;  %v5784_v16 = vpop.f32.mrb[247].mxu1 }
 0x2e7   : > { %v4870_v28 = vpack.c.bf16 %v4122_v58, %v4121_v49  ;;  %v5785_v12 = vadd.f32 %v5784_v16, %v5783_v13 }
 0x2e8   : > { %v4011_v38 = vadd.f32 %v5782_v5, %v3850_v56  ;;  %v3853_v27 = vadd.f32 %v5673_v39, %v6963_v24 }
 0x2e9   : > { %4898 = vst [vmem:[%s6983_s9 + $0x60] sm:$0xff] %v4870_v28  }
 0x2ea   : > { %v4091_v0 = vmul.f32 0.2, %v4011_v38  ;;  %v4014_v61 = vadd.f32 %v5785_v12, %v3853_v27  ;;  %v5674_v10 = vpop.f32.mrb[248].mxu0  ;;  %vm4059_vm10 = vcmp.gt.f32.partialorder %v4011_v38, 0.0 }
 0x2eb   : > { %v5786_v21 = vpop.f32.mrb[248].mxu1  ;;  %v5675_v44 = vpop.f32.mrb[249].mxu0 }
 0x2ec   : > { %vm4060_vm11 = vcmp.gt.f32.partialorder %v4014_v61, 0.0  ;;  %v4092_v42 = vmul.f32 0.2, %v4014_v61  ;;  %v5676_v33 = vadd.f32 %v5675_v44, %v5674_v10  ;;  %v5787_v53 = vpop.f32.mrb[249].mxu1  ;;  %v5677_v35 = vpop.f32.mrb[250].mxu0  ;;  %v4123_v26 = vsel %vm4059_vm10, %v4011_v38, %v4091_v0 }
 0x2ed   : > { %v5788_v11 = vadd.f32 %v5787_v53, %v5786_v21  ;;  %v5789_v25 = vpop.f32.mrb[250].mxu1  ;;  %v5678_v46 = vpop.f32.mrb[251].mxu0 }
 0x2ee   : > { %v4124_v57 = vsel %vm4060_vm11, %v4014_v61, %v4092_v42  ;;  %v3858_v24 = vadd.f32 %v5676_v33, %v6966_v14  ;;  %v5679_v29 = vadd.f32 %v5678_v46, %v5677_v35  ;;  %v5790_v18 = vpop.f32.mrb[251].mxu1 }
 0x2ef   : > { %v4875_v9 = vpack.c.bf16 %v4124_v57, %v4123_v26  ;;  %v5791_v47 = vadd.f32 %v5790_v18, %v5789_v25 }
 0x2f0   : > { %v4019_v60 = vadd.f32 %v5788_v11, %v3858_v24  ;;  %v3861_v20 = vadd.f32 %v5679_v29, %v6969_v8 }
 0x2f1   : > { %4899 = vst [vmem:[%s6983_s9 + $0x68] sm:$0xff] %v4875_v9  }
 0x2f2   : > { %v4093_v1 = vmul.f32 0.2, %v4019_v60  ;;  %v4022_v41 = vadd.f32 %v5791_v47, %v3861_v20  ;;  %v5680_v54 = vpop.f32.mrb[252].mxu0  ;;  %vm4061_vm12 = vcmp.gt.f32.partialorder %v4019_v60, 0.0 }
 0x2f3   : > { %v5792_v36 = vpop.f32.mrb[252].mxu1  ;;  %v5681_v52 = vpop.f32.mrb[253].mxu0 }
 0x2f4   : > { %vm4062_vm13 = vcmp.gt.f32.partialorder %v4022_v41, 0.0  ;;  %v4094_v45 = vmul.f32 0.2, %v4022_v41  ;;  %v5682_v23 = vadd.f32 %v5681_v52, %v5680_v54  ;;  %v5793_v2 = vpop.f32.mrb[253].mxu1  ;;  %v5683_v14 = vpop.f32.mrb[254].mxu0  ;;  %v4125_v3 = vsel %vm4061_vm12, %v4019_v60, %v4093_v1 }
 0x2f5   : > { %v5794_v32 = vadd.f32 %v5793_v2, %v5792_v36  ;;  %v5795_v63 = vpop.f32.mrb[254].mxu1  ;;  %v5684_v31 = vpop.f32.mrb[255].mxu0 }
 0x2f6   : > { %v4126_v55 = vsel %vm4062_vm13, %v4022_v41, %v4094_v45  ;;  %v3866_v8 = vadd.f32 %v5682_v23, %v6972_v48  ;;  %v5685_v59 = vadd.f32 %v5684_v31, %v5683_v14  ;;  %v5796_v37 = vpop.f32.mrb[255].mxu1 }
 0x2f7   : > { %v4880_v51 = vpack.c.bf16 %v4126_v55, %v4125_v3  ;;  %v5797_v19 = vadd.f32 %v5796_v37, %v5795_v63 }
 0x2f8   : > { %v4027_v7 = vadd.f32 %v5794_v32, %v3866_v8  ;;  %v3869_v50 = vadd.f32 %v5685_v59, %v6975_v4 }
 0x2f9   : > { %4900 = vst [vmem:[%s6983_s9 + $0x70] sm:$0xff] %v4880_v51  }
 0x2fa   : > { %v4095_v62 = vmul.f32 0.2, %v4027_v7  ;;  %v4030_v22 = vadd.f32 %v5797_v19, %v3869_v50  ;;  %vm4063_vm14 = vcmp.gt.f32.partialorder %v4027_v7, 0.0 }
 0x2fc   : > { %vm4064_vm15 = vcmp.gt.f32.partialorder %v4030_v22, 0.0  ;;  %v4096_v6 = vmul.f32 0.2, %v4030_v22  ;;  %v4127_v15 = vsel %vm4063_vm14, %v4027_v7, %v4095_v62 }
 0x2fe   : > { %v4128_v30 = vsel %vm4064_vm15, %v4030_v22, %v4096_v6 }
 0x2ff   : > { %v4885_v17 = vpack.c.bf16 %v4128_v30, %v4127_v15 }
 0x301   : > { %4901 = vst [vmem:[%s6983_s9 + $0x78] sm:$0xff] %v4885_v17  }
 0x302 PF: > { %s13_s12 = sadd.s32 1, %s5940_s12  }
 0x303   : > { %p10_p4 = scmp.ge.s32.totalorder %s13_s12, 4  }
 0x305   :  { %12 = sbr.rel (!%p10_p4) target bundleno = 1 (0x1), region = 62 }

// kernel: forward.5
= control target key start
LH: loop header
LB: loop body
LE: loop exit
PB: predicated region body
PF: predicated region fallthrough
CT: control target
= control target key end

     0   :  { %s4897_s1 = inlined_call_operand.vmem [shape: bf16[2048,128], index: 1, kind: input, shape index: {}]   ;;  %s4898_s0 = inlined_call_operand.vmem [shape: bf16[128,2048], index: 0, kind: input, shape index: {}]   ;;  %s4899_s2 = inlined_call_operand.vmem [shape: f32[1,128], index: 2, kind: input, shape index: {}]   ;;  %s4900_s3 = inlined_call_operand.vmem [shape: f32[1,128], index: 3, kind: input, shape index: {}]   ;;  %s4901_s4 = inlined_call_operand.vmem [shape: f32[1,128], index: 4, kind: input, shape index: {}]   ;;  %s4902_s5 = inlined_call_operand.vmem [shape: bf16[128,128], index: 5, kind: output, shape index: {}]  }
   0x1   :  { %v3718_v0 = vld [vmem:[%s4897_s1 + $0x40] sm:$0xff]   ;;  %v3722_v4 = vld [vmem:[%s4897_s1 + $0x48] sm:$0xff]   ;;  %v3726_v8 = vld [vmem:[%s4897_s1 + $0x50] sm:$0xff]  }
   0x2   :  { %v3719_v1 = vld [vmem:[%s4897_s1 + $0xc0] sm:$0xff]   ;;  %3206 = vmatprep.subr.bf16.mxu0 %v3718_v0  ;;  %v3723_v5 = vld [vmem:[%s4897_s1 + $0xc8] sm:$0xff]   ;;  %v3727_v9 = vld [vmem:[%s4897_s1 + $0xd0] sm:$0xff]  }
   0x3   :  { %v3720_v2 = vld [vmem:[%s4897_s1] sm:$0xff]   ;;  %3270 = vmatprep.subr.bf16.mxu1 %v3719_v1  ;;  %v3724_v6 = vld [vmem:[%s4897_s1 + $0x8] sm:$0xff]   ;;  %v3728_v10 = vld [vmem:[%s4897_s1 + $0x10] sm:$0xff]  }
   0x4   :  { %v3721_v3 = vld [vmem:[%s4897_s1 + $0x80] sm:$0xff]   ;;  %3207 = vmatpush3.bf16.msra.mxu0 %v3720_v2  ;;  %v3725_v7 = vld [vmem:[%s4897_s1 + $0x88] sm:$0xff]   ;;  %v3729_v11 = vld [vmem:[%s4897_s1 + $0x90] sm:$0xff]  }
   0x5   :  { %3271 = vmatpush3.bf16.msra.mxu1 %v3721_v3  ;;  %3208 = vmatprep.subr.bf16.mxu0 %v3722_v4  ;;  %v3730_v12 = vld [vmem:[%s4897_s1 + $0x58] sm:$0xff]   ;;  %v3734_v16 = vld [vmem:[%s4897_s1 + $0x60] sm:$0xff]   ;;  %v3738_v20 = vld [vmem:[%s4897_s1 + $0x68] sm:$0xff]  }
   0x6   :  { %3272 = vmatprep.subr.bf16.mxu1 %v3723_v5  ;;  %v3731_v13 = vld [vmem:[%s4897_s1 + $0xd8] sm:$0xff]   ;;  %v3735_v17 = vld [vmem:[%s4897_s1 + $0xe0] sm:$0xff]   ;;  %v3739_v21 = vld [vmem:[%s4897_s1 + $0xe8] sm:$0xff]  }
   0x7   :  { %v3732_v14 = vld [vmem:[%s4897_s1 + $0x18] sm:$0xff]   ;;  %v3736_v18 = vld [vmem:[%s4897_s1 + $0x20] sm:$0xff]   ;;  %v3740_v22 = vld [vmem:[%s4897_s1 + $0x28] sm:$0xff]  }
   0x8   :  { %3209 = vmatpush3.bf16.msra.mxu0 %v3724_v6  ;;  %v3733_v15 = vld [vmem:[%s4897_s1 + $0x98] sm:$0xff]   ;;  %v3737_v19 = vld [vmem:[%s4897_s1 + $0xa0] sm:$0xff]   ;;  %v3741_v23 = vld [vmem:[%s4897_s1 + $0xa8] sm:$0xff]  }
   0x9   :  { %3273 = vmatpush3.bf16.msra.mxu1 %v3725_v7  ;;  %3210 = vmatprep.subr.bf16.mxu0 %v3726_v8  ;;  %v3742_v24 = vld [vmem:[%s4897_s1 + $0x70] sm:$0xff]   ;;  %v3746_v28 = vld [vmem:[%s4897_s1 + $0x78] sm:$0xff]   ;;  %v21_v32 = vld [vmem:[%s4898_s0] sm:$0xff] }
   0xa   :  { %3274 = vmatprep.subr.bf16.mxu1 %v3727_v9  ;;  %v3743_v25 = vld [vmem:[%s4897_s1 + $0xf0] sm:$0xff]   ;;  %v3747_v29 = vld [vmem:[%s4897_s1 + $0xf8] sm:$0xff]   ;;  %v29_v33 = vld [vmem:[%s4898_s0 + $0x40] sm:$0xff] }
   0xb   :  { %v3744_v26 = vld [vmem:[%s4897_s1 + $0x30] sm:$0xff]   ;;  %v3748_v30 = vld [vmem:[%s4897_s1 + $0x38] sm:$0xff]   ;;  %v22_v34 = vld [vmem:[%s4898_s0 + $0x8] sm:$0xff]  ;;  %v2869_v35 = vcombine.low %v21_v32, %v29_v33  ;;  %v2870_v36 = vcombine.high %v21_v32, %v29_v33 }
   0xc   :  { %3211 = vmatpush3.bf16.msra.mxu0 %v3728_v10  ;;  %v3745_v27 = vld [vmem:[%s4897_s1 + $0xb0] sm:$0xff]   ;;  %v3749_v31 = vld [vmem:[%s4897_s1 + $0xb8] sm:$0xff]   ;;  %v30_v37 = vld [vmem:[%s4898_s0 + $0x48] sm:$0xff] }
   0xd   :  { %3275 = vmatpush3.bf16.msra.mxu1 %v3729_v11  ;;  %3212 = vmatprep.subr.bf16.mxu0 %v3730_v12  ;;  %v2871_v38 = vcombine.low %v22_v34, %v30_v37  ;;  %v2872_v39 = vcombine.high %v22_v34, %v30_v37  ;;  %v3750_v40 = vld [vmem:[%s4897_s1 + $0x140] sm:$0xff]   ;;  %v38_v47 = vld [vmem:[%s4898_s0 + $0x88] sm:$0xff]  ;;  %v3758_v62 = vld [vmem:[%s4897_s1 + $0x150] sm:$0xff]  }
   0xe   :  { %3276 = vmatprep.subr.bf16.mxu1 %v3731_v13  ;;  %1852 = vmatprep.mubr.bf16.mxu0 %v2870_v36  ;;  %v3751_v41 = vld [vmem:[%s4897_s1 + $0x100] sm:$0xff]   ;;  %v46_v48 = vld [vmem:[%s4898_s0 + $0xc8] sm:$0xff]  ;;  %v3759_v63 = vld [vmem:[%s4897_s1 + $0x110] sm:$0xff]  }
   0xf   :  { %1949 = vmatprep.mubr.bf16.mxu1 %v2872_v39  ;;  %v3752_v42 = vld [vmem:[%s4897_s1 + $0x1c0] sm:$0xff]   ;;  %v2888_v49 = vcombine.high %v38_v47, %v46_v48  ;;  %v3754_v50 = vld [vmem:[%s4897_s1 + $0x148] sm:$0xff]   ;;  %v2887_v53 = vcombine.low %v38_v47, %v46_v48  ;;  %v3760_v0 = vld [vmem:[%s4897_s1 + $0x1d0] sm:$0xff]  }
  0x10   :  { %3213 = vmatpush3.bf16.msra.mxu0 %v3732_v14  ;;  %v3753_v43 = vld [vmem:[%s4897_s1 + $0x180] sm:$0xff]   ;;  %v3755_v52 = vld [vmem:[%s4897_s1 + $0x108] sm:$0xff]   ;;  %v3761_v1 = vld [vmem:[%s4897_s1 + $0x190] sm:$0xff]  }
  0x11   :  { %3277 = vmatpush3.bf16.msra.mxu1 %v3733_v15  ;;  %3214 = vmatprep.subr.bf16.mxu0 %v3734_v16  ;;  %v37_v44 = vld [vmem:[%s4898_s0 + $0x80] sm:$0xff]  ;;  %v3756_v54 = vld [vmem:[%s4897_s1 + $0x1c8] sm:$0xff]   ;;  %v3762_v10 = vld [vmem:[%s4897_s1 + $0x158] sm:$0xff]  }
  0x12   :  { %3278 = vmatprep.subr.bf16.mxu1 %v3735_v17  ;;  %v45_v45 = vld [vmem:[%s4898_s0 + $0xc0] sm:$0xff]  ;;  %v3757_v55 = vld [vmem:[%s4897_s1 + $0x188] sm:$0xff]   ;;  %v3763_v11 = vld [vmem:[%s4897_s1 + $0x118] sm:$0xff]  }
  0x13   :  { %v2886_v46 = vcombine.high %v37_v44, %v45_v45  ;;  %v2885_v51 = vcombine.low %v37_v44, %v45_v45  ;;  %v53_v56 = vld [vmem:[%s4898_s0 + $0x100] sm:$0xff]  ;;  %v54_v58 = vld [vmem:[%s4898_s0 + $0x108] sm:$0xff]  ;;  %v3764_v12 = vld [vmem:[%s4897_s1 + $0x1d8] sm:$0xff]  }
  0x14   :  { %3215 = vmatpush3.bf16.msra.mxu0 %v3736_v18  ;;  %v61_v57 = vld [vmem:[%s4898_s0 + $0x140] sm:$0xff]  ;;  %v62_v59 = vld [vmem:[%s4898_s0 + $0x148] sm:$0xff]  ;;  %v3765_v13 = vld [vmem:[%s4897_s1 + $0x198] sm:$0xff]  }
  0x15   :  { %3279 = vmatpush3.bf16.msra.mxu1 %v3737_v19  ;;  %3216 = vmatprep.subr.bf16.mxu0 %v3738_v20  ;;  %v2902_v60 = vcombine.high %v53_v56, %v61_v57  ;;  %v2904_v61 = vcombine.high %v54_v58, %v62_v59  ;;  %v2901_v2 = vcombine.low %v53_v56, %v61_v57  ;;  %v69_v3 = vld [vmem:[%s4898_s0 + $0x180] sm:$0xff]  ;;  %v70_v5 = vld [vmem:[%s4898_s0 + $0x188] sm:$0xff]  ;;  %v3775_v39 = vld [vmem:[%s4897_s1 + $0x130] sm:$0xff]  }
  0x16   :  { %3280 = vmatprep.subr.bf16.mxu1 %v3739_v21  ;;  %v77_v4 = vld [vmem:[%s4898_s0 + $0x1c0] sm:$0xff]  ;;  %v2903_v6 = vcombine.low %v54_v58, %v62_v59  ;;  %v78_v8 = vld [vmem:[%s4898_s0 + $0x1c8] sm:$0xff]  ;;  %v3779_v48 = vld [vmem:[%s4897_s1 + $0x138] sm:$0xff]  }
  0x17   :  { %v2918_v7 = vcombine.high %v69_v3, %v77_v4  ;;  %v2920_v9 = vcombine.high %v70_v5, %v78_v8  ;;  %v85_v14 = vld [vmem:[%s4898_s0 + $0x200] sm:$0xff]  ;;  %v86_v16 = vld [vmem:[%s4898_s0 + $0x208] sm:$0xff]  ;;  %v2917_v19 = vcombine.low %v69_v3, %v77_v4  ;;  %v2919_v21 = vcombine.low %v70_v5, %v78_v8  ;;  %v32_v3 = vld [vmem:[%s4898_s0 + $0x58] sm:$0xff] }
  0x18   :  { %3217 = vmatpush3.bf16.msra.mxu0 %v3740_v22  ;;  %v93_v15 = vld [vmem:[%s4898_s0 + $0x240] sm:$0xff]  ;;  %v94_v17 = vld [vmem:[%s4898_s0 + $0x248] sm:$0xff]  ;;  %v39_v8 = vld [vmem:[%s4898_s0 + $0x90] sm:$0xff] }
  0x19   :  { %3281 = vmatpush3.bf16.msra.mxu1 %v3741_v23  ;;  %3218 = vmatprep.subr.bf16.mxu0 %v3742_v24  ;;  %v3766_v18 = vld [vmem:[%s4897_s1 + $0x160] sm:$0xff]   ;;  %v2934_v22 = vcombine.high %v85_v14, %v93_v15  ;;  %v2936_v24 = vcombine.high %v86_v16, %v94_v17  ;;  %v3772_v32 = vld [vmem:[%s4897_s1 + $0x1e8] sm:$0xff]   ;;  %v2933_v34 = vcombine.low %v85_v14, %v93_v15 }
  0x1a   :  { %3282 = vmatprep.subr.bf16.mxu1 %v3743_v25  ;;  %v3767_v20 = vld [vmem:[%s4897_s1 + $0x120] sm:$0xff]   ;;  %v3773_v33 = vld [vmem:[%s4897_s1 + $0x1a8] sm:$0xff]  }
  0x1b   :  { %v3768_v23 = vld [vmem:[%s4897_s1 + $0x1e0] sm:$0xff]   ;;  %v118_v44 = vld [vmem:[%s4898_s0 + $0x308] sm:$0xff] }
  0x1c   :  { %3219 = vmatpush3.bf16.msra.mxu0 %v3744_v26  ;;  %v3769_v25 = vld [vmem:[%s4897_s1 + $0x1a0] sm:$0xff]   ;;  %v126_v45 = vld [vmem:[%s4898_s0 + $0x348] sm:$0xff] }
  0x1d   :  { %3283 = vmatpush3.bf16.msra.mxu1 %v3745_v27  ;;  %3220 = vmatprep.subr.bf16.mxu0 %v3746_v28  ;;  %v101_v26 = vld [vmem:[%s4898_s0 + $0x280] sm:$0xff]  ;;  %v3770_v28 = vld [vmem:[%s4897_s1 + $0x168] sm:$0xff]  }
  0x1e   :  { %3284 = vmatprep.subr.bf16.mxu1 %v3747_v29  ;;  %v109_v27 = vld [vmem:[%s4898_s0 + $0x2c0] sm:$0xff]  ;;  %v102_v29 = vld [vmem:[%s4898_s0 + $0x288] sm:$0xff] }
  0x1f   :  { %v2950_v36 = vcombine.high %v101_v26, %v109_v27  ;;  %v2949_v47 = vcombine.low %v101_v26, %v109_v27  ;;  %v3782_v56 = vld [vmem:[%s4897_s1 + $0x240] sm:$0xff]   ;;  %v134_v57 = vld [vmem:[%s4898_s0 + $0x388] sm:$0xff]  ;;  %v3790_v26 = vld [vmem:[%s4897_s1 + $0x250] sm:$0xff]  }
  0x20   :  { %3221 = vmatpush3.bf16.msra.mxu0 %v3748_v30  ;;  %v110_v30 = vld [vmem:[%s4898_s0 + $0x2c8] sm:$0xff]  ;;  %v3784_v58 = vld [vmem:[%s4897_s1 + $0x2c0] sm:$0xff]   ;;  %v3792_v27 = vld [vmem:[%s4897_s1 + $0x2d0] sm:$0xff]  }
  0x21   :  { %3285 = vmatpush3.bf16.msra.mxu1 %v3749_v31  ;;  %3334 = vmatprep.subr.bf16.mxu0 %v3750_v40  ;;  %v3771_v31 = vld [vmem:[%s4897_s1 + $0x128] sm:$0xff]   ;;  %v2952_v37 = vcombine.high %v102_v29, %v110_v30  ;;  %v3776_v40 = vld [vmem:[%s4897_s1 + $0x1f0] sm:$0xff]   ;;  %v3785_v15 = vld [vmem:[%s4897_s1 + $0x280] sm:$0xff]  }
  0x22   :  { %3398 = vmatprep.subr.bf16.mxu1 %v3752_v42  ;;  %v125_v42 = vld [vmem:[%s4898_s0 + $0x340] sm:$0xff]  ;;  %v142_v59 = vld [vmem:[%s4898_s0 + $0x3c8] sm:$0xff] }
  0x23   :  { %1853 = vmatmul.mubr.bf16.vlgmr.msra.gmra.mrb[0].mxu0 %v2869_v35  ;;  %v2935_v35 = vcombine.low %v86_v16, %v94_v17  ;;  %v2983_v5 = vcombine.low %v134_v57, %v142_v59  ;;  %v3786_v17 = vld [vmem:[%s4897_s1 + $0x248] sm:$0xff]  }
  0x24   :  { %1950 = vmatmul.mubr.bf16.vlgmr.msra.gmra.mrb[0].mxu1 %v2871_v38  ;;  %3335 = vmatpush3.bf16.msra.mxu0 %v3751_v41  ;;  %v3774_v38 = vld [vmem:[%s4897_s1 + $0x170] sm:$0xff]   ;;  %v117_v41 = vld [vmem:[%s4898_s0 + $0x300] sm:$0xff] }
  0x25   :  { %3399 = vmatpush3.bf16.msra.mxu1 %v3753_v43  ;;  %1860 = vmatprep.mubr.bf16.mxu0 %v2886_v46  ;;  %v3777_v43 = vld [vmem:[%s4897_s1 + $0x1b0] sm:$0xff]   ;;  %v3778_v46 = vld [vmem:[%s4897_s1 + $0x178] sm:$0xff]  }
  0x26   :  { %1957 = vmatprep.mubr.bf16.mxu1 %v2888_v49  ;;  %3336 = vmatprep.subr.bf16.mxu0 %v3754_v50  ;;  %v2951_v49 = vcombine.low %v102_v29, %v110_v30  ;;  %v2966_v50 = vcombine.high %v117_v41, %v125_v42 }
  0x27   :  { %3400 = vmatprep.subr.bf16.mxu1 %v3756_v54  ;;  %v133_v54 = vld [vmem:[%s4898_s0 + $0x380] sm:$0xff] }
  0x28   :  { %3337 = vmatpush3.bf16.msra.mxu0 %v3755_v52  ;;  %v2968_v52 = vcombine.high %v118_v44, %v126_v45 }
  0x29   :  { %3401 = vmatpush3.bf16.msra.mxu1 %v3757_v55  ;;  %3338 = vmatprep.subr.bf16.mxu0 %v3758_v62  ;;  %v141_v55 = vld [vmem:[%s4898_s0 + $0x3c0] sm:$0xff] }
  0x2a   :  { %3402 = vmatprep.subr.bf16.mxu1 %v3760_v0  ;;  %v2982_v62 = vcombine.high %v133_v54, %v141_v55  ;;  %v23_v0 = vld [vmem:[%s4898_s0 + $0x10] sm:$0xff]  ;;  %v2981_v4 = vcombine.low %v133_v54, %v141_v55  ;;  %v88_v54 = vld [vmem:[%s4898_s0 + $0x218] sm:$0xff] }
  0x2b   :  { %1861 = vmatmul.mubr.bf16.gmra.mrb[4].mxu0 %v2885_v51  ;;  %v3780_v51 = vld [vmem:[%s4897_s1 + $0x1f8] sm:$0xff]  }
  0x2c   :  { %1958 = vmatmul.mubr.bf16.gmra.mrb[4].mxu1 %v2887_v53  ;;  %1868 = vmatprep.mubr.bf16.mxu0 %v2902_v60  ;;  %v3781_v53 = vld [vmem:[%s4897_s1 + $0x1b8] sm:$0xff]   ;;  %v2965_v60 = vcombine.low %v117_v41, %v125_v42  ;;  %v3798_v42 = vld [vmem:[%s4897_s1 + $0x260] sm:$0xff]  }
  0x2d   :  { %1965 = vmatprep.mubr.bf16.mxu1 %v2904_v61  ;;  %3339 = vmatpush3.bf16.msra.mxu0 %v3759_v63  ;;  %v2967_v61 = vcombine.low %v118_v44, %v126_v45  ;;  %v2984_v63 = vcombine.high %v134_v57, %v142_v59  ;;  %v3797_v41 = vld [vmem:[%s4897_s1 + $0x298] sm:$0xff]   ;;  %v3800_v44 = vld [vmem:[%s4897_s1 + $0x2e0] sm:$0xff]   ;;  %v3805_v57 = vld [vmem:[%s4897_s1 + $0x2a8] sm:$0xff]  }
  0x2e   :  { %3403 = vmatpush3.bf16.msra.mxu1 %v3761_v1  ;;  %3340 = vmatprep.subr.bf16.mxu0 %v3762_v10  ;;  %v31_v1 = vld [vmem:[%s4898_s0 + $0x50] sm:$0xff]  ;;  %v96_v55 = vld [vmem:[%s4898_s0 + $0x258] sm:$0xff] }
  0x2f   :  { %3404 = vmatprep.subr.bf16.mxu1 %v3764_v12  ;;  %v2873_v10 = vcombine.low %v23_v0, %v31_v1  ;;  %v40_v12 = vld [vmem:[%s4898_s0 + $0x98] sm:$0xff] }
  0x31   :  { %3341 = vmatpush3.bf16.msra.mxu0 %v3763_v11  ;;  %v3783_v11 = vld [vmem:[%s4897_s1 + $0x200] sm:$0xff]  }
  0x32   :  { %3405 = vmatpush3.bf16.msra.mxu1 %v3765_v13  ;;  %3342 = vmatprep.subr.bf16.mxu0 %v3766_v18  ;;  %v48_v13 = vld [vmem:[%s4898_s0 + $0xd8] sm:$0xff] }
  0x33   :  { %1869 = vmatmul.mubr.bf16.gmra.mrb[8].mxu0 %v2901_v2  ;;  %3406 = vmatprep.subr.bf16.mxu1 %v3768_v23  ;;  %v24_v2 = vld [vmem:[%s4898_s0 + $0x18] sm:$0xff]  ;;  %v2892_v18 = vcombine.high %v40_v12, %v48_v13  ;;  %v63_v23 = vld [vmem:[%s4898_s0 + $0x150] sm:$0xff]  ;;  %v2891_v29 = vcombine.low %v40_v12, %v48_v13  ;;  %v3816_v12 = vld [vmem:[%s4897_s1 + $0x3c0] sm:$0xff]   ;;  %v2939_v13 = vcombine.low %v88_v54, %v96_v55 }
  0x34   :  { %1966 = vmatmul.mubr.bf16.gmra.mrb[8].mxu1 %v2903_v6  ;;  %1876 = vmatprep.mubr.bf16.mxu0 %v2918_v7  ;;  %v2874_v6 = vcombine.high %v23_v0, %v31_v1  ;;  %v2876_v7 = vcombine.high %v24_v2, %v32_v3  ;;  %v2875_v14 = vcombine.low %v24_v2, %v32_v3  ;;  %v3807_v0 = vld [vmem:[%s4897_s1 + $0x230] sm:$0xff]   ;;  %v3810_v2 = vld [vmem:[%s4897_s1 + $0x278] sm:$0xff]  }
  0x35   :  { %1973 = vmatprep.mubr.bf16.mxu1 %v2920_v9  ;;  %3343 = vmatpush3.bf16.msra.mxu0 %v3767_v20  ;;  %v47_v9 = vld [vmem:[%s4898_s0 + $0xd0] sm:$0xff]  ;;  %v3788_v20 = vld [vmem:[%s4897_s1 + $0x2c8] sm:$0xff]  }
  0x36   :  { %3407 = vmatpush3.bf16.msra.mxu1 %v3769_v25  ;;  %3344 = vmatprep.subr.bf16.mxu0 %v3770_v28  ;;  %v2890_v16 = vcombine.high %v39_v8, %v47_v9  ;;  %v64_v25 = vld [vmem:[%s4898_s0 + $0x158] sm:$0xff]  ;;  %v2889_v28 = vcombine.low %v39_v8, %v47_v9  ;;  %v3809_v1 = vld [vmem:[%s4897_s1 + $0x2b0] sm:$0xff]  }
  0x37   :  { %3408 = vmatprep.subr.bf16.mxu1 %v3772_v32  ;;  %v3791_v32 = vld [vmem:[%s4897_s1 + $0x210] sm:$0xff]   ;;  %v3811_v8 = vld [vmem:[%s4897_s1 + $0x238] sm:$0xff]  }
  0x38   :  { %v103_v3 = vld [vmem:[%s4898_s0 + $0x290] sm:$0xff]  ;;  %v3813_v9 = vld [vmem:[%s4897_s1 + $0x2b8] sm:$0xff]  }
  0x39   :  { %3345 = vmatpush3.bf16.msra.mxu0 %v3771_v31 }
  0x3a   :  { %3409 = vmatpush3.bf16.msra.mxu1 %v3773_v33  ;;  %3346 = vmatprep.subr.bf16.mxu0 %v3774_v38  ;;  %v3793_v33 = vld [vmem:[%s4897_s1 + $0x290] sm:$0xff]   ;;  %v72_v38 = vld [vmem:[%s4898_s0 + $0x198] sm:$0xff] }
  0x3b   :  { %1877 = vmatmul.mubr.bf16.gmra.mrb[12].mxu0 %v2917_v19  ;;  %3410 = vmatprep.subr.bf16.mxu1 %v3776_v40  ;;  %v3787_v19 = vld [vmem:[%s4897_s1 + $0x208] sm:$0xff]   ;;  %v3795_v40 = vld [vmem:[%s4897_s1 + $0x218] sm:$0xff]  }
  0x3c   :  { %1974 = vmatmul.mubr.bf16.gmra.mrb[12].mxu1 %v2919_v21  ;;  %1884 = vmatprep.mubr.bf16.mxu0 %v2934_v22  ;;  %v3789_v21 = vld [vmem:[%s4897_s1 + $0x288] sm:$0xff]   ;;  %v55_v22 = vld [vmem:[%s4898_s0 + $0x110] sm:$0xff] }
  0x3d   :  { %1981 = vmatprep.mubr.bf16.mxu1 %v2936_v24  ;;  %3347 = vmatpush3.bf16.msra.mxu0 %v3775_v39  ;;  %v56_v24 = vld [vmem:[%s4898_s0 + $0x118] sm:$0xff]  ;;  %v2906_v30 = vcombine.high %v55_v22, %v63_v23 }
  0x3e   :  { %3411 = vmatpush3.bf16.msra.mxu1 %v3777_v43  ;;  %3348 = vmatprep.subr.bf16.mxu0 %v3778_v46  ;;  %v2908_v31 = vcombine.high %v56_v24, %v64_v25  ;;  %v80_v39 = vld [vmem:[%s4898_s0 + $0x1d8] sm:$0xff]  ;;  %v2905_v43 = vcombine.low %v55_v22, %v63_v23  ;;  %v2907_v45 = vcombine.low %v56_v24, %v64_v25  ;;  %v135_v24 = vld [vmem:[%s4898_s0 + $0x390] sm:$0xff] }
  0x3f   :  { %3412 = vmatprep.subr.bf16.mxu1 %v3780_v51  ;;  %v87_v51 = vld [vmem:[%s4898_s0 + $0x210] sm:$0xff] }
  0x40   :  { %v143_v25 = vld [vmem:[%s4898_s0 + $0x3d0] sm:$0xff] }
  0x41   :  { %3349 = vmatpush3.bf16.msra.mxu0 %v3779_v48  ;;  %v2924_v48 = vcombine.high %v72_v38, %v80_v39 }
  0x42   :  { %3413 = vmatpush3.bf16.msra.mxu1 %v3781_v53  ;;  %3462 = vmatprep.subr.bf16.mxu0 %v3782_v56  ;;  %v95_v53 = vld [vmem:[%s4898_s0 + $0x250] sm:$0xff]  ;;  %v3803_v56 = vld [vmem:[%s4897_s1 + $0x228] sm:$0xff]  }
  0x43   :  { %1885 = vmatmul.mubr.bf16.gmra.mrb[16].mxu0 %v2933_v34  ;;  %3526 = vmatprep.subr.bf16.mxu1 %v3784_v58  ;;  %v3794_v34 = vld [vmem:[%s4897_s1 + $0x258] sm:$0xff]   ;;  %v3806_v58 = vld [vmem:[%s4897_s1 + $0x270] sm:$0xff]  }
  0x44   :  { %1982 = vmatmul.mubr.bf16.gmra.mrb[16].mxu1 %v2935_v35  ;;  %1892 = vmatprep.mubr.bf16.mxu0 %v2950_v36  ;;  %v71_v35 = vld [vmem:[%s4898_s0 + $0x190] sm:$0xff] }
  0x45   :  { %1989 = vmatprep.mubr.bf16.mxu1 %v2952_v37  ;;  %v79_v36 = vld [vmem:[%s4898_s0 + $0x1d0] sm:$0xff]  ;;  %v3796_v37 = vld [vmem:[%s4897_s1 + $0x2d8] sm:$0xff]  }
  0x46   :  { %v2922_v46 = vcombine.high %v71_v35, %v79_v36  ;;  %v2921_v59 = vcombine.low %v71_v35, %v79_v36  ;;  %v34_v35 = vld [vmem:[%s4898_s0 + $0x68] sm:$0xff]  ;;  %v2985_v36 = vcombine.low %v135_v24, %v143_v25 }
  0x4b   :  { %1893 = vmatmul.mubr.bf16.gmra.mrb[20].mxu0 %v2949_v47  ;;  %v3799_v47 = vld [vmem:[%s4897_s1 + $0x220] sm:$0xff]  }
  0x4c   :  { %1990 = vmatmul.mubr.bf16.gmra.mrb[20].mxu1 %v2951_v49  ;;  %1900 = vmatprep.mubr.bf16.mxu0 %v2966_v50  ;;  %v3801_v49 = vld [vmem:[%s4897_s1 + $0x2a0] sm:$0xff]   ;;  %v3802_v50 = vld [vmem:[%s4897_s1 + $0x268] sm:$0xff]  }
  0x4d   :  { %1997 = vmatprep.mubr.bf16.mxu1 %v2968_v52  ;;  %v3804_v52 = vld [vmem:[%s4897_s1 + $0x2e8] sm:$0xff]  }
  0x53   :  { %1901 = vmatmul.mubr.bf16.gmra.mrb[24].mxu0 %v2965_v60  ;;  %v3808_v60 = vld [vmem:[%s4897_s1 + $0x2f0] sm:$0xff]  }
  0x54   :  { %1998 = vmatmul.mubr.bf16.gmra.mrb[24].mxu1 %v2967_v61  ;;  %1908 = vmatprep.mubr.bf16.mxu0 %v2982_v62  ;;  %v2923_v61 = vcombine.low %v72_v38, %v80_v39  ;;  %v2938_v62 = vcombine.high %v87_v51, %v95_v53 }
  0x55   :  { %2005 = vmatprep.mubr.bf16.mxu1 %v2984_v63  ;;  %v2940_v63 = vcombine.high %v88_v54, %v96_v55  ;;  %v57_v54 = vld [vmem:[%s4898_s0 + $0x120] sm:$0xff] }
  0x56   :  { %v65_v55 = vld [vmem:[%s4898_s0 + $0x160] sm:$0xff] }
  0x5b   :  { %1909 = vmatmul.mubr.bf16.gmra.mrb[28].mxu0 %v2981_v4  ;;  %v111_v4 = vld [vmem:[%s4898_s0 + $0x2d0] sm:$0xff] }
  0x5c   :  { %2006 = vmatmul.mubr.bf16.gmra.mrb[28].mxu1 %v2983_v5  ;;  %2046 = vmatprep.mubr.bf16.mxu0 %v2874_v6  ;;  %v3812_v5 = vld [vmem:[%s4897_s1 + $0x2f8] sm:$0xff]  }
  0x5d   :  { %2143 = vmatprep.mubr.bf16.mxu1 %v2876_v7  ;;  %v104_v6 = vld [vmem:[%s4898_s0 + $0x298] sm:$0xff] }
  0x5e   :  { %v112_v7 = vld [vmem:[%s4898_s0 + $0x2d8] sm:$0xff] }
  0x63   :  { %2047 = vmatmul.mubr.bf16.vlgmr.msra.gmra.mrb[32].mxu0 %v2873_v10  ;;  %v3814_v10 = vld [vmem:[%s4897_s1 + $0x340] sm:$0xff]  }
  0x64   :  { %2144 = vmatmul.mubr.bf16.vlgmr.msra.gmra.mrb[32].mxu1 %v2875_v14  ;;  %3463 = vmatpush3.bf16.msra.mxu0 %v3783_v11  ;;  %v2937_v11 = vcombine.low %v87_v51, %v95_v53  ;;  %v2954_v14 = vcombine.high %v103_v3, %v111_v4  ;;  %v3820_v51 = vld [vmem:[%s4897_s1 + $0x3c8] sm:$0xff]  }
  0x65   :  { %3527 = vmatpush3.bf16.msra.mxu1 %v3785_v15  ;;  %2054 = vmatprep.mubr.bf16.mxu0 %v2890_v16  ;;  %v2956_v15 = vcombine.high %v104_v6, %v112_v7  ;;  %v119_v16 = vld [vmem:[%s4898_s0 + $0x310] sm:$0xff]  ;;  %v3821_v53 = vld [vmem:[%s4897_s1 + $0x388] sm:$0xff]  }
  0x66   :  { %2151 = vmatprep.mubr.bf16.mxu1 %v2892_v18  ;;  %3464 = vmatprep.subr.bf16.mxu0 %v3786_v17  ;;  %v127_v17 = vld [vmem:[%s4898_s0 + $0x350] sm:$0xff]  ;;  %v120_v18 = vld [vmem:[%s4898_s0 + $0x318] sm:$0xff] }
  0x67   :  { %3528 = vmatprep.subr.bf16.mxu1 %v3788_v20  ;;  %v2953_v20 = vcombine.low %v103_v3, %v111_v4  ;;  %v2970_v22 = vcombine.high %v119_v16, %v127_v17  ;;  %v3828_v3 = vld [vmem:[%s4897_s1 + $0x3d8] sm:$0xff]   ;;  %v73_v4 = vld [vmem:[%s4898_s0 + $0x1a0] sm:$0xff] }
  0x68   :  { %3465 = vmatpush3.bf16.msra.mxu0 %v3787_v19  ;;  %v128_v19 = vld [vmem:[%s4898_s0 + $0x358] sm:$0xff] }
  0x69   :  { %3529 = vmatpush3.bf16.msra.mxu1 %v3789_v21  ;;  %3466 = vmatprep.subr.bf16.mxu0 %v3790_v26  ;;  %v2955_v21 = vcombine.low %v104_v6, %v112_v7  ;;  %v2972_v23 = vcombine.high %v120_v18, %v128_v19  ;;  %v136_v26 = vld [vmem:[%s4898_s0 + $0x398] sm:$0xff]  ;;  %v74_v6 = vld [vmem:[%s4898_s0 + $0x1a8] sm:$0xff] }
  0x6a   :  { %3530 = vmatprep.subr.bf16.mxu1 %v3792_v27  ;;  %v144_v27 = vld [vmem:[%s4898_s0 + $0x3d8] sm:$0xff] }
  0x6b   :  { %2055 = vmatmul.mubr.bf16.gmra.mrb[36].mxu0 %v2889_v28  ;;  %v2969_v28 = vcombine.low %v119_v16, %v127_v17  ;;  %v3827_v7 = vld [vmem:[%s4897_s1 + $0x318] sm:$0xff]   ;;  %v3831_v16 = vld [vmem:[%s4897_s1 + $0x320] sm:$0xff]  }
  0x6c   :  { %2152 = vmatmul.mubr.bf16.gmra.mrb[36].mxu1 %v2891_v29  ;;  %2062 = vmatprep.mubr.bf16.mxu0 %v2906_v30  ;;  %v2971_v29 = vcombine.low %v120_v18, %v128_v19  ;;  %v2986_v30 = vcombine.high %v135_v24, %v143_v25  ;;  %v3833_v17 = vld [vmem:[%s4897_s1 + $0x3a0] sm:$0xff]   ;;  %v3834_v18 = vld [vmem:[%s4897_s1 + $0x368] sm:$0xff]  }
  0x6d   :  { %2159 = vmatprep.mubr.bf16.mxu1 %v2908_v31  ;;  %3467 = vmatpush3.bf16.msra.mxu0 %v3791_v32  ;;  %v2988_v31 = vcombine.high %v136_v26, %v144_v27  ;;  %v25_v32 = vld [vmem:[%s4898_s0 + $0x20] sm:$0xff]  ;;  %v3836_v19 = vld [vmem:[%s4897_s1 + $0x3e8] sm:$0xff]  }
  0x6e   :  { %3531 = vmatpush3.bf16.msra.mxu1 %v3793_v33  ;;  %3468 = vmatprep.subr.bf16.mxu0 %v3794_v34  ;;  %v33_v33 = vld [vmem:[%s4898_s0 + $0x60] sm:$0xff]  ;;  %v26_v34 = vld [vmem:[%s4898_s0 + $0x28] sm:$0xff] }
  0x6f   :  { %3532 = vmatprep.subr.bf16.mxu1 %v3796_v37  ;;  %v2987_v37 = vcombine.low %v136_v26, %v144_v27  ;;  %v2878_v38 = vcombine.high %v25_v32, %v33_v33  ;;  %v2880_v39 = vcombine.high %v26_v34, %v34_v35  ;;  %v98_v24 = vld [vmem:[%s4898_s0 + $0x268] sm:$0xff]  ;;  %v3838_v26 = vld [vmem:[%s4897_s1 + $0x370] sm:$0xff]  }
  0x70   :  { %v3837_v25 = vld [vmem:[%s4897_s1 + $0x3a8] sm:$0xff]  }
  0x71   :  { %3469 = vmatpush3.bf16.msra.mxu0 %v3795_v40  ;;  %v41_v40 = vld [vmem:[%s4898_s0 + $0xa0] sm:$0xff] }
  0x72   :  { %3533 = vmatpush3.bf16.msra.mxu1 %v3797_v41  ;;  %3470 = vmatprep.subr.bf16.mxu0 %v3798_v42  ;;  %v49_v41 = vld [vmem:[%s4898_s0 + $0xe0] sm:$0xff]  ;;  %v2877_v42 = vcombine.low %v25_v32, %v33_v33  ;;  %v3839_v32 = vld [vmem:[%s4897_s1 + $0x330] sm:$0xff]  }
  0x73   :  { %2063 = vmatmul.mubr.bf16.gmra.mrb[40].mxu0 %v2905_v43  ;;  %3534 = vmatprep.subr.bf16.mxu1 %v3800_v44  ;;  %v42_v43 = vld [vmem:[%s4898_s0 + $0xa8] sm:$0xff]  ;;  %v3841_v33 = vld [vmem:[%s4897_s1 + $0x3b0] sm:$0xff]  }
  0x74   :  { %2160 = vmatmul.mubr.bf16.gmra.mrb[40].mxu1 %v2907_v45  ;;  %2070 = vmatprep.mubr.bf16.mxu0 %v2922_v46  ;;  %v50_v44 = vld [vmem:[%s4898_s0 + $0xe8] sm:$0xff]  ;;  %v2879_v45 = vcombine.low %v26_v34, %v34_v35  ;;  %v3815_v46 = vld [vmem:[%s4897_s1 + $0x300] sm:$0xff]   ;;  %v3842_v34 = vld [vmem:[%s4897_s1 + $0x378] sm:$0xff]  }
  0x75   :  { %2167 = vmatprep.mubr.bf16.mxu1 %v2924_v48  ;;  %3471 = vmatpush3.bf16.msra.mxu0 %v3799_v47  ;;  %v3817_v47 = vld [vmem:[%s4897_s1 + $0x380] sm:$0xff]   ;;  %v2894_v48 = vcombine.high %v41_v40, %v49_v41  ;;  %v3844_v35 = vld [vmem:[%s4897_s1 + $0x3f8] sm:$0xff]  }
  0x76   :  { %3535 = vmatpush3.bf16.msra.mxu1 %v3801_v49  ;;  %3472 = vmatprep.subr.bf16.mxu0 %v3802_v50  ;;  %v2896_v49 = vcombine.high %v42_v43, %v50_v44  ;;  %v3818_v50 = vld [vmem:[%s4897_s1 + $0x348] sm:$0xff]  }
  0x77   :  { %3536 = vmatprep.subr.bf16.mxu1 %v3804_v52  ;;  %v3819_v52 = vld [vmem:[%s4897_s1 + $0x308] sm:$0xff]  }
  0x79   :  { %3473 = vmatpush3.bf16.msra.mxu0 %v3803_v56  ;;  %v3822_v56 = vld [vmem:[%s4897_s1 + $0x350] sm:$0xff]  }
  0x7a   :  { %3537 = vmatpush3.bf16.msra.mxu1 %v3805_v57  ;;  %3474 = vmatprep.subr.bf16.mxu0 %v3806_v58  ;;  %v58_v57 = vld [vmem:[%s4898_s0 + $0x128] sm:$0xff] }
  0x7b   :  { %2071 = vmatmul.mubr.bf16.gmra.mrb[44].mxu0 %v2921_v59  ;;  %3538 = vmatprep.subr.bf16.mxu1 %v3808_v60  ;;  %v66_v58 = vld [vmem:[%s4898_s0 + $0x168] sm:$0xff]  ;;  %v3824_v59 = vld [vmem:[%s4897_s1 + $0x3d0] sm:$0xff]   ;;  %v2893_v60 = vcombine.low %v41_v40, %v49_v41  ;;  %v3845_v41 = vld [vmem:[%s4897_s1 + $0x3b8] sm:$0xff]  }
  0x7c   :  { %2168 = vmatmul.mubr.bf16.gmra.mrb[44].mxu1 %v2923_v61  ;;  %2078 = vmatprep.mubr.bf16.mxu0 %v2938_v62  ;;  %v2895_v61 = vcombine.low %v42_v43, %v50_v44  ;;  %v2910_v62 = vcombine.high %v57_v54, %v65_v55  ;;  %v114_v40 = vld [vmem:[%s4898_s0 + $0x2e8] sm:$0xff] }
  0x7d   :  { %2175 = vmatprep.mubr.bf16.mxu1 %v2940_v63  ;;  %3475 = vmatpush3.bf16.msra.mxu0 %v3807_v0  ;;  %v2912_v63 = vcombine.high %v58_v57, %v66_v58  ;;  %v3823_v0 = vld [vmem:[%s4897_s1 + $0x310] sm:$0xff]  }
  0x7e   :  { %3539 = vmatpush3.bf16.msra.mxu1 %v3809_v1  ;;  %3476 = vmatprep.subr.bf16.mxu0 %v3810_v2  ;;  %v3825_v1 = vld [vmem:[%s4897_s1 + $0x390] sm:$0xff]   ;;  %v3826_v2 = vld [vmem:[%s4897_s1 + $0x358] sm:$0xff]  }
  0x7f   :  { %3540 = vmatprep.subr.bf16.mxu1 %v3812_v5  ;;  %v81_v5 = vld [vmem:[%s4898_s0 + $0x1e0] sm:$0xff] }
  0x80   :  { %v2925_v27 = vcombine.low %v73_v4, %v81_v5 }
  0x81   :  { %3477 = vmatpush3.bf16.msra.mxu0 %v3811_v8  ;;  %v82_v8 = vld [vmem:[%s4898_s0 + $0x1e8] sm:$0xff] }
  0x82   :  { %3541 = vmatpush3.bf16.msra.mxu1 %v3813_v9  ;;  %3590 = vmatprep.subr.bf16.mxu0 %v3814_v10  ;;  %v3829_v9 = vld [vmem:[%s4897_s1 + $0x398] sm:$0xff]   ;;  %v3830_v10 = vld [vmem:[%s4897_s1 + $0x360] sm:$0xff]  }
  0x83   :  { %2079 = vmatmul.mubr.bf16.gmra.mrb[48].mxu0 %v2937_v11  ;;  %3654 = vmatprep.subr.bf16.mxu1 %v3816_v12  ;;  %v2909_v11 = vcombine.low %v57_v54, %v65_v55  ;;  %v3832_v12 = vld [vmem:[%s4897_s1 + $0x3e0] sm:$0xff]  }
  0x84   :  { %2176 = vmatmul.mubr.bf16.gmra.mrb[48].mxu1 %v2939_v13  ;;  %2086 = vmatprep.mubr.bf16.mxu0 %v2954_v14  ;;  %v2911_v13 = vcombine.low %v58_v57, %v66_v58  ;;  %v2926_v14 = vcombine.high %v73_v4, %v81_v5  ;;  %v137_v54 = vld [vmem:[%s4898_s0 + $0x3a0] sm:$0xff]  ;;  %v146_v57 = vld [vmem:[%s4898_s0 + $0x3e8] sm:$0xff] }
  0x85   :  { %2183 = vmatprep.mubr.bf16.mxu1 %v2956_v15  ;;  %v2928_v15 = vcombine.high %v74_v6, %v82_v8  ;;  %v145_v55 = vld [vmem:[%s4898_s0 + $0x3e0] sm:$0xff] }
  0x8b   :  { %2087 = vmatmul.mubr.bf16.gmra.mrb[52].mxu0 %v2953_v20  ;;  %v89_v20 = vld [vmem:[%s4898_s0 + $0x220] sm:$0xff] }
  0x8c   :  { %2184 = vmatmul.mubr.bf16.gmra.mrb[52].mxu1 %v2955_v21  ;;  %2094 = vmatprep.mubr.bf16.mxu0 %v2970_v22  ;;  %v97_v21 = vld [vmem:[%s4898_s0 + $0x260] sm:$0xff]  ;;  %v90_v22 = vld [vmem:[%s4898_s0 + $0x228] sm:$0xff] }
  0x8d   :  { %2191 = vmatprep.mubr.bf16.mxu1 %v2972_v23  ;;  %v3835_v23 = vld [vmem:[%s4897_s1 + $0x328] sm:$0xff]   ;;  %v2943_v43 = vcombine.low %v90_v22, %v98_v24 }
  0x93   :  { %2095 = vmatmul.mubr.bf16.gmra.mrb[56].mxu0 %v2969_v28  ;;  %v3840_v28 = vld [vmem:[%s4897_s1 + $0x3f0] sm:$0xff]  }
  0x94   :  { %2192 = vmatmul.mubr.bf16.gmra.mrb[56].mxu1 %v2971_v29  ;;  %2102 = vmatprep.mubr.bf16.mxu0 %v2986_v30  ;;  %v2927_v29 = vcombine.low %v74_v6, %v82_v8  ;;  %v2942_v30 = vcombine.high %v89_v20, %v97_v21  ;;  %v43_v6 = vld [vmem:[%s4898_s0 + $0xb0] sm:$0xff]  ;;  %v44_v8 = vld [vmem:[%s4898_s0 + $0xb8] sm:$0xff] }
  0x95   :  { %2199 = vmatprep.mubr.bf16.mxu1 %v2988_v31  ;;  %v2944_v31 = vcombine.high %v90_v22, %v98_v24  ;;  %v75_v22 = vld [vmem:[%s4898_s0 + $0x1b0] sm:$0xff]  ;;  %v76_v24 = vld [vmem:[%s4898_s0 + $0x1b8] sm:$0xff] }
  0x9b   :  { %2103 = vmatmul.mubr.bf16.gmra.mrb[60].mxu0 %v2985_v36  ;;  %v105_v36 = vld [vmem:[%s4898_s0 + $0x2a0] sm:$0xff] }
  0x9c   :  { %2200 = vmatmul.mubr.bf16.gmra.mrb[60].mxu1 %v2987_v37  ;;  %2240 = vmatprep.mubr.bf16.mxu0 %v2878_v38  ;;  %v113_v37 = vld [vmem:[%s4898_s0 + $0x2e0] sm:$0xff]  ;;  %v3843_v38 = vld [vmem:[%s4897_s1 + $0x338] sm:$0xff]  }
  0x9d   :  { %2337 = vmatprep.mubr.bf16.mxu1 %v2880_v39  ;;  %v106_v39 = vld [vmem:[%s4898_s0 + $0x2a8] sm:$0xff]  ;;  %v2958_v44 = vcombine.high %v105_v36, %v113_v37 }
  0xa3   :  { %2241 = vmatmul.mubr.bf16.vlgmr.msra.gmra.mrb[64].mxu0 %v2877_v42  ;;  %v2941_v42 = vcombine.low %v89_v20, %v97_v21 }
  0xa4   :  { %2338 = vmatmul.mubr.bf16.vlgmr.msra.gmra.mrb[64].mxu1 %v2879_v45  ;;  %3591 = vmatpush3.bf16.msra.mxu0 %v3815_v46  ;;  %v2960_v45 = vcombine.high %v106_v39, %v114_v40  ;;  %v121_v46 = vld [vmem:[%s4898_s0 + $0x320] sm:$0xff] }
  0xa5   :  { %3655 = vmatpush3.bf16.msra.mxu1 %v3817_v47  ;;  %2248 = vmatprep.mubr.bf16.mxu0 %v2894_v48  ;;  %v129_v47 = vld [vmem:[%s4898_s0 + $0x360] sm:$0xff]  ;;  %v122_v48 = vld [vmem:[%s4898_s0 + $0x328] sm:$0xff] }
  0xa6   :  { %2345 = vmatprep.mubr.bf16.mxu1 %v2896_v49  ;;  %3592 = vmatprep.subr.bf16.mxu0 %v3818_v50  ;;  %v130_v49 = vld [vmem:[%s4898_s0 + $0x368] sm:$0xff]  ;;  %v2957_v50 = vcombine.low %v105_v36, %v113_v37  ;;  %v2973_v58 = vcombine.low %v121_v46, %v129_v47  ;;  %v4613_v36 = vld [vmem:[%s4899_s2] ss:$0 sm:$0xff] }
  0xa7   :  { %3656 = vmatprep.subr.bf16.mxu1 %v3820_v51  ;;  %v2959_v51 = vcombine.low %v106_v39, %v114_v40 }
  0xa8   :  { %3593 = vmatpush3.bf16.msra.mxu0 %v3819_v52  ;;  %v2974_v52 = vcombine.high %v121_v46, %v129_v47 }
  0xa9   :  { %3657 = vmatpush3.bf16.msra.mxu1 %v3821_v53  ;;  %3594 = vmatprep.subr.bf16.mxu0 %v3822_v56  ;;  %v2976_v53 = vcombine.high %v122_v48, %v130_v49  ;;  %v138_v56 = vld [vmem:[%s4898_s0 + $0x3a8] sm:$0xff] }
  0xaa   :  { %3658 = vmatprep.subr.bf16.mxu1 %v3824_v59  ;;  %v2975_v59 = vcombine.low %v122_v48, %v130_v49 }
  0xab   :  { %2249 = vmatmul.mubr.bf16.gmra.mrb[68].mxu0 %v2893_v60  ;;  %v2990_v60 = vcombine.high %v137_v54, %v145_v55 }
  0xac   :  { %2346 = vmatmul.mubr.bf16.gmra.mrb[68].mxu1 %v2895_v61  ;;  %2256 = vmatprep.mubr.bf16.mxu0 %v2910_v62  ;;  %v2992_v61 = vcombine.high %v138_v56, %v146_v57  ;;  %v27_v62 = vld [vmem:[%s4898_s0 + $0x30] sm:$0xff] }
  0xad   :  { %2353 = vmatprep.mubr.bf16.mxu1 %v2912_v63  ;;  %3595 = vmatpush3.bf16.msra.mxu0 %v3823_v0  ;;  %v35_v63 = vld [vmem:[%s4898_s0 + $0x70] sm:$0xff]  ;;  %v28_v0 = vld [vmem:[%s4898_s0 + $0x38] sm:$0xff] }
  0xae   :  { %3659 = vmatpush3.bf16.msra.mxu1 %v3825_v1  ;;  %3596 = vmatprep.subr.bf16.mxu0 %v3826_v2  ;;  %v36_v1 = vld [vmem:[%s4898_s0 + $0x78] sm:$0xff]  ;;  %v2989_v2 = vcombine.low %v137_v54, %v145_v55  ;;  %v2882_v4 = vcombine.high %v27_v62, %v35_v63  ;;  %v107_v54 = vld [vmem:[%s4898_s0 + $0x2b0] sm:$0xff] }
  0xaf   :  { %3660 = vmatprep.subr.bf16.mxu1 %v3828_v3  ;;  %v2991_v3 = vcombine.low %v138_v56, %v146_v57  ;;  %v2884_v5 = vcombine.high %v28_v0, %v36_v1  ;;  %v115_v55 = vld [vmem:[%s4898_s0 + $0x2f0] sm:$0xff] }
  0xb1   :  { %3597 = vmatpush3.bf16.msra.mxu0 %v3827_v7  ;;  %v51_v7 = vld [vmem:[%s4898_s0 + $0xf0] sm:$0xff] }
  0xb2   :  { %3661 = vmatpush3.bf16.msra.mxu1 %v3829_v9  ;;  %3598 = vmatprep.subr.bf16.mxu0 %v3830_v10  ;;  %v52_v9 = vld [vmem:[%s4898_s0 + $0xf8] sm:$0xff]  ;;  %v2881_v10 = vcombine.low %v27_v62, %v35_v63 }
  0xb3   :  { %2257 = vmatmul.mubr.bf16.gmra.mrb[72].mxu0 %v2909_v11  ;;  %3662 = vmatprep.subr.bf16.mxu1 %v3832_v12  ;;  %v2883_v11 = vcombine.low %v28_v0, %v36_v1  ;;  %v2898_v12 = vcombine.high %v43_v6, %v51_v7 }
  0xb4   :  { %2354 = vmatmul.mubr.bf16.gmra.mrb[72].mxu1 %v2911_v13  ;;  %2264 = vmatprep.mubr.bf16.mxu0 %v2926_v14  ;;  %v2900_v13 = vcombine.high %v44_v8, %v52_v9  ;;  %v59_v14 = vld [vmem:[%s4898_s0 + $0x130] sm:$0xff] }
  0xb5   :  { %2361 = vmatprep.mubr.bf16.mxu1 %v2928_v15  ;;  %3599 = vmatpush3.bf16.msra.mxu0 %v3831_v16  ;;  %v67_v15 = vld [vmem:[%s4898_s0 + $0x170] sm:$0xff]  ;;  %v60_v16 = vld [vmem:[%s4898_s0 + $0x138] sm:$0xff] }
  0xb6   :  { %3663 = vmatpush3.bf16.msra.mxu1 %v3833_v17  ;;  %3600 = vmatprep.subr.bf16.mxu0 %v3834_v18  ;;  %v68_v17 = vld [vmem:[%s4898_s0 + $0x178] sm:$0xff]  ;;  %v2897_v18 = vcombine.low %v43_v6, %v51_v7  ;;  %v2914_v20 = vcombine.high %v59_v14, %v67_v15 }
  0xb7   :  { %3664 = vmatprep.subr.bf16.mxu1 %v3836_v19  ;;  %v2899_v19 = vcombine.low %v44_v8, %v52_v9  ;;  %v2916_v21 = vcombine.high %v60_v16, %v68_v17 }
  0xb9   :  { %3601 = vmatpush3.bf16.msra.mxu0 %v3835_v23  ;;  %v83_v23 = vld [vmem:[%s4898_s0 + $0x1f0] sm:$0xff] }
  0xba   :  { %3665 = vmatpush3.bf16.msra.mxu1 %v3837_v25  ;;  %3602 = vmatprep.subr.bf16.mxu0 %v3838_v26  ;;  %v84_v25 = vld [vmem:[%s4898_s0 + $0x1f8] sm:$0xff]  ;;  %v2913_v26 = vcombine.low %v59_v14, %v67_v15  ;;  %v123_v14 = vld [vmem:[%s4898_s0 + $0x330] sm:$0xff] }
  0xbb   :  { %2265 = vmatmul.mubr.bf16.gmra.mrb[76].mxu0 %v2925_v27  ;;  %3666 = vmatprep.subr.bf16.mxu1 %v3840_v28  ;;  %v2915_v27 = vcombine.low %v60_v16, %v68_v17  ;;  %v2930_v28 = vcombine.high %v75_v22, %v83_v23  ;;  %v131_v15 = vld [vmem:[%s4898_s0 + $0x370] sm:$0xff] }
  0xbc   :  { %2362 = vmatmul.mubr.bf16.gmra.mrb[76].mxu1 %v2927_v29  ;;  %2272 = vmatprep.mubr.bf16.mxu0 %v2942_v30  ;;  %v2932_v29 = vcombine.high %v76_v24, %v84_v25  ;;  %v91_v30 = vld [vmem:[%s4898_s0 + $0x230] sm:$0xff] }
  0xbd   :  { %2369 = vmatprep.mubr.bf16.mxu1 %v2944_v31  ;;  %3603 = vmatpush3.bf16.msra.mxu0 %v3839_v32  ;;  %v99_v31 = vld [vmem:[%s4898_s0 + $0x270] sm:$0xff] }
  0xbe   :  { %3667 = vmatpush3.bf16.msra.mxu1 %v3841_v33  ;;  %3604 = vmatprep.subr.bf16.mxu0 %v3842_v34  ;;  %v92_v33 = vld [vmem:[%s4898_s0 + $0x238] sm:$0xff]  ;;  %v2945_v62 = vcombine.low %v91_v30, %v99_v31 }
  0xbf   :  { %3668 = vmatprep.subr.bf16.mxu1 %v3844_v35  ;;  %v100_v34 = vld [vmem:[%s4898_s0 + $0x278] sm:$0xff] }
  0xc0   :  { %v2948_v47 = vcombine.high %v92_v33, %v100_v34 }
  0xc1   :  { %3605 = vmatpush3.bf16.msra.mxu0 %v3843_v38  ;;  %v2929_v38 = vcombine.low %v75_v22, %v83_v23  ;;  %v2961_v22 = vcombine.low %v107_v54, %v115_v55 }
  0xc2   :  { %3669 = vmatpush3.bf16.msra.mxu1 %v3845_v41 }
  0xc3   :  { %2273 = vmatmul.mubr.bf16.gmra.mrb[80].mxu0 %v2941_v42  ;;  %v2931_v42 = vcombine.low %v76_v24, %v84_v25 }
  0xc4   :  { %2370 = vmatmul.mubr.bf16.gmra.mrb[80].mxu1 %v2943_v43  ;;  %2280 = vmatprep.mubr.bf16.mxu0 %v2958_v44  ;;  %v2946_v43 = vcombine.high %v91_v30, %v99_v31 }
  0xc5   :  { %2377 = vmatprep.mubr.bf16.mxu1 %v2960_v45 }
  0xcb   :  { %2281 = vmatmul.mubr.bf16.gmra.mrb[84].mxu0 %v2957_v50 }
  0xcc   :  { %2378 = vmatmul.mubr.bf16.gmra.mrb[84].mxu1 %v2959_v51  ;;  %2288 = vmatprep.mubr.bf16.mxu0 %v2974_v52 }
  0xcd   :  { %2385 = vmatprep.mubr.bf16.mxu1 %v2976_v53 }
  0xd3   :  { %2289 = vmatmul.mubr.bf16.gmra.mrb[88].mxu0 %v2973_v58  ;;  %v108_v58 = vld [vmem:[%s4898_s0 + $0x2b8] sm:$0xff] }
  0xd4   :  { %2386 = vmatmul.mubr.bf16.gmra.mrb[88].mxu1 %v2975_v59  ;;  %2296 = vmatprep.mubr.bf16.mxu0 %v2990_v60  ;;  %v116_v59 = vld [vmem:[%s4898_s0 + $0x2f8] sm:$0xff] }
  0xd5   :  { %2393 = vmatprep.mubr.bf16.mxu1 %v2992_v61  ;;  %v2964_v7 = vcombine.high %v108_v58, %v116_v59 }
  0xdb   :  { %2297 = vmatmul.mubr.bf16.gmra.mrb[92].mxu0 %v2989_v2  ;;  %v2947_v2 = vcombine.low %v92_v33, %v100_v34 }
  0xdc   :  { %2394 = vmatmul.mubr.bf16.gmra.mrb[92].mxu1 %v2991_v3  ;;  %2434 = vmatprep.mubr.bf16.mxu0 %v2882_v4  ;;  %v2962_v3 = vcombine.high %v107_v54, %v115_v55 }
  0xdd   :  { %2531 = vmatprep.mubr.bf16.mxu1 %v2884_v5 }
  0xe3   :  { %2435 = vmatmul.mubr.bf16.vlgmr.msra.gmra.mrb[96].mxu0 %v2881_v10 }
  0xe4   :  { %2532 = vmatmul.mubr.bf16.vlgmr.msra.gmra.mrb[96].mxu1 %v2883_v11  ;;  %2442 = vmatprep.mubr.bf16.mxu0 %v2898_v12 }
  0xe5   :  { %2539 = vmatprep.mubr.bf16.mxu1 %v2900_v13 }
  0xeb   :  { %2443 = vmatmul.mubr.bf16.gmra.mrb[100].mxu0 %v2897_v18  ;;  %v124_v18 = vld [vmem:[%s4898_s0 + $0x338] sm:$0xff] }
  0xec   :  { %2540 = vmatmul.mubr.bf16.gmra.mrb[100].mxu1 %v2899_v19  ;;  %2450 = vmatprep.mubr.bf16.mxu0 %v2914_v20  ;;  %v132_v19 = vld [vmem:[%s4898_s0 + $0x378] sm:$0xff] }
  0xed   :  { %2547 = vmatprep.mubr.bf16.mxu1 %v2916_v21  ;;  %v2980_v31 = vcombine.high %v124_v18, %v132_v19 }
  0xf3   :  { %2451 = vmatmul.mubr.bf16.gmra.mrb[104].mxu0 %v2913_v26  ;;  %v2963_v26 = vcombine.low %v108_v58, %v116_v59 }
  0xf4   :  { %2548 = vmatmul.mubr.bf16.gmra.mrb[104].mxu1 %v2915_v27  ;;  %2458 = vmatprep.mubr.bf16.mxu0 %v2930_v28  ;;  %v2978_v27 = vcombine.high %v123_v14, %v131_v15 }
  0xf5   :  { %2555 = vmatprep.mubr.bf16.mxu1 %v2932_v29 }
  0xf6   :  { %v3222_v32 = vpop.f32.mrb[0].mxu0 }
  0xf7   :  { %v3286_v35 = vpop.f32.mrb[0].mxu1  ;;  %v3223_v37 = vpop.f32.mrb[1].mxu0 }
  0xf8   :  { %v3224_v39 = vadd.f32 %v3223_v37, %v3222_v32  ;;  %v3287_v40 = vpop.f32.mrb[1].mxu1  ;;  %v3225_v41 = vpop.f32.mrb[2].mxu0 }
  0xf9   :  { %v3288_v44 = vadd.f32 %v3287_v40, %v3286_v35  ;;  %v3289_v45 = vpop.f32.mrb[2].mxu1  ;;  %v3226_v46 = vpop.f32.mrb[3].mxu0  ;;  %v147_v40 = vld [vmem:[%s4898_s0 + $0x3f0] sm:$0xff] }
  0xfa   :  { %v1855_v48 = vadd.f32 %v3224_v39, %v4613_v36  ;;  %v3227_v49 = vadd.f32 %v3226_v46, %v3225_v41  ;;  %v3290_v50 = vpop.f32.mrb[3].mxu1  ;;  %v139_v39 = vld [vmem:[%s4898_s0 + $0x3b0] sm:$0xff] }
  0xfb   :  { %v3291_v51 = vadd.f32 %v3290_v50, %v3289_v45  ;;  %2459 = vmatmul.mubr.bf16.gmra.mrb[108].mxu0 %v2929_v38 }
  0xfc   :  { %v4616_v52 = vadd.f32 %v3288_v44, %v1855_v48  ;;  %v1858_v53 = vadd.f32 %v3227_v49, %v4613_v36  ;;  %2556 = vmatmul.mubr.bf16.gmra.mrb[108].mxu1 %v2931_v42  ;;  %2466 = vmatprep.mubr.bf16.mxu0 %v2946_v43  ;;  %v140_v43 = vld [vmem:[%s4898_s0 + $0x3b8] sm:$0xff] }
  0xfd   :  { %2563 = vmatprep.mubr.bf16.mxu1 %v2948_v47  ;;  %v148_v44 = vld [vmem:[%s4898_s0 + $0x3f8] sm:$0xff]  ;;  %v2977_v47 = vcombine.low %v123_v14, %v131_v15 }
  0xfe   :  { %v4625_v56 = vadd.f32 %v3291_v51, %v1858_v53  ;;  %v3228_v57 = vpop.f32.mrb[4].mxu0  ;;  %v2979_v51 = vcombine.low %v124_v18, %v132_v19  ;;  %v2994_v53 = vcombine.high %v139_v39, %v147_v40  ;;  %v2996_v58 = vcombine.high %v140_v43, %v148_v44 }
  0xff   :  { %v3292_v60 = vpop.f32.mrb[4].mxu1  ;;  %v3229_v61 = vpop.f32.mrb[5].mxu0 }
 0x100   :  { %v3230_v63 = vadd.f32 %v3229_v61, %v3228_v57  ;;  %v3293_v0 = vpop.f32.mrb[5].mxu1  ;;  %v3231_v1 = vpop.f32.mrb[6].mxu0 }
 0x101   :  { %v3294_v4 = vadd.f32 %v3293_v0, %v3292_v60  ;;  %v3295_v5 = vpop.f32.mrb[6].mxu1  ;;  %v3232_v6 = vpop.f32.mrb[7].mxu0 }
 0x102   :  { %v1863_v8 = vadd.f32 %v3230_v63, %v4613_v36  ;;  %v3233_v9 = vadd.f32 %v3232_v6, %v3231_v1  ;;  %v3296_v10 = vpop.f32.mrb[7].mxu1 }
 0x103   :  { %v3297_v11 = vadd.f32 %v3296_v10, %v3295_v5  ;;  %2467 = vmatmul.mubr.bf16.gmra.mrb[112].mxu0 %v2945_v62  ;;  %v2993_v5 = vcombine.low %v139_v39, %v147_v40 }
 0x104   :  { %v4634_v12 = vadd.f32 %v3294_v4, %v1863_v8  ;;  %v1866_v13 = vadd.f32 %v3233_v9, %v4613_v36  ;;  %2564 = vmatmul.mubr.bf16.gmra.mrb[112].mxu1 %v2947_v2  ;;  %2474 = vmatprep.mubr.bf16.mxu0 %v2962_v3  ;;  %v2995_v9 = vcombine.low %v140_v43, %v148_v44 }
 0x105   :  { %2571 = vmatprep.mubr.bf16.mxu1 %v2964_v7 }
 0x106   :  { %v4643_v16 = vadd.f32 %v3297_v11, %v1866_v13  ;;  %v3234_v17 = vpop.f32.mrb[8].mxu0 }
 0x107   :  { %v3298_v20 = vpop.f32.mrb[8].mxu1  ;;  %v3235_v21 = vpop.f32.mrb[9].mxu0 }
 0x108   :  { %v3236_v23 = vadd.f32 %v3235_v21, %v3234_v17  ;;  %v3299_v24 = vpop.f32.mrb[9].mxu1  ;;  %v3237_v25 = vpop.f32.mrb[10].mxu0 }
 0x109   :  { %v3300_v28 = vadd.f32 %v3299_v24, %v3298_v20  ;;  %v3301_v29 = vpop.f32.mrb[10].mxu1  ;;  %v3238_v30 = vpop.f32.mrb[11].mxu0 }
 0x10a   :  { %v1871_v32 = vadd.f32 %v3236_v23, %v4613_v36  ;;  %v3239_v33 = vadd.f32 %v3238_v30, %v3237_v25  ;;  %v3302_v34 = vpop.f32.mrb[11].mxu1 }
 0x10b   :  { %v3303_v35 = vadd.f32 %v3302_v34, %v3301_v29  ;;  %2475 = vmatmul.mubr.bf16.gmra.mrb[116].mxu0 %v2961_v22 }
 0x10c   :  { %v4652_v37 = vadd.f32 %v3300_v28, %v1871_v32  ;;  %v1874_v38 = vadd.f32 %v3239_v33, %v4613_v36  ;;  %2572 = vmatmul.mubr.bf16.gmra.mrb[116].mxu1 %v2963_v26  ;;  %2482 = vmatprep.mubr.bf16.mxu0 %v2978_v27 }
 0x10d   :  { %2579 = vmatprep.mubr.bf16.mxu1 %v2980_v31 }
 0x10e   :  { %v4661_v41 = vadd.f32 %v3303_v35, %v1874_v38  ;;  %v3240_v42 = vpop.f32.mrb[12].mxu0 }
 0x10f   :  { %v3304_v45 = vpop.f32.mrb[12].mxu1  ;;  %v3241_v46 = vpop.f32.mrb[13].mxu0 }
 0x110   :  { %v3242_v48 = vadd.f32 %v3241_v46, %v3240_v42  ;;  %v3305_v49 = vpop.f32.mrb[13].mxu1  ;;  %v3243_v50 = vpop.f32.mrb[14].mxu0 }
 0x111   :  { %v3306_v54 = vadd.f32 %v3305_v49, %v3304_v45  ;;  %v3307_v55 = vpop.f32.mrb[14].mxu1  ;;  %v3244_v57 = vpop.f32.mrb[15].mxu0 }
 0x112   :  { %v1879_v59 = vadd.f32 %v3242_v48, %v4613_v36  ;;  %v3245_v60 = vadd.f32 %v3244_v57, %v3243_v50  ;;  %v3308_v61 = vpop.f32.mrb[15].mxu1 }
 0x113   :  { %v3309_v62 = vadd.f32 %v3308_v61, %v3307_v55  ;;  %2483 = vmatmul.mubr.bf16.gmra.mrb[120].mxu0 %v2977_v47 }
 0x114   :  { %v4670_v63 = vadd.f32 %v3306_v54, %v1879_v59  ;;  %v1882_v0 = vadd.f32 %v3245_v60, %v4613_v36  ;;  %2580 = vmatmul.mubr.bf16.gmra.mrb[120].mxu1 %v2979_v51  ;;  %2490 = vmatprep.mubr.bf16.mxu0 %v2994_v53 }
 0x115   :  { %2587 = vmatprep.mubr.bf16.mxu1 %v2996_v58 }
 0x116   :  { %v4673_v1 = vadd.f32 %v3309_v62, %v1882_v0  ;;  %v3246_v2 = vpop.f32.mrb[16].mxu0 }
 0x117   :  { %v3310_v3 = vpop.f32.mrb[16].mxu1  ;;  %v3247_v4 = vpop.f32.mrb[17].mxu0 }
 0x118   :  { %v3248_v6 = vadd.f32 %v3247_v4, %v3246_v2  ;;  %v3311_v7 = vpop.f32.mrb[17].mxu1  ;;  %v3249_v8 = vpop.f32.mrb[18].mxu0 }
 0x119   :  { %v3312_v10 = vadd.f32 %v3311_v7, %v3310_v3  ;;  %v3313_v11 = vpop.f32.mrb[18].mxu1  ;;  %v3250_v13 = vpop.f32.mrb[19].mxu0 }
 0x11a   :  { %v1887_v14 = vadd.f32 %v3248_v6, %v4613_v36  ;;  %v3251_v15 = vadd.f32 %v3250_v13, %v3249_v8  ;;  %v3314_v17 = vpop.f32.mrb[19].mxu1 }
 0x11b   :  { %v3315_v18 = vadd.f32 %v3314_v17, %v3313_v11  ;;  %2491 = vmatmul.mubr.bf16.gmra.mrb[124].mxu0 %v2993_v5 }
 0x11c   :  { %v4676_v19 = vadd.f32 %v3312_v10, %v1887_v14  ;;  %v1890_v20 = vadd.f32 %v3251_v15, %v4613_v36  ;;  %2588 = vmatmul.mubr.bf16.gmra.mrb[124].mxu1 %v2995_v9 }
 0x11e   :  { %v4679_v21 = vadd.f32 %v3315_v18, %v1890_v20  ;;  %v3252_v22 = vpop.f32.mrb[20].mxu0 }
 0x11f   :  { %v3316_v23 = vpop.f32.mrb[20].mxu1  ;;  %v3253_v24 = vpop.f32.mrb[21].mxu0 }
 0x120   :  { %v3254_v25 = vadd.f32 %v3253_v24, %v3252_v22  ;;  %v3317_v26 = vpop.f32.mrb[21].mxu1  ;;  %v3255_v27 = vpop.f32.mrb[22].mxu0 }
 0x121   :  { %v3318_v28 = vadd.f32 %v3317_v26, %v3316_v23  ;;  %v3319_v29 = vpop.f32.mrb[22].mxu1  ;;  %v3256_v30 = vpop.f32.mrb[23].mxu0 }
 0x122   :  { %v1895_v31 = vadd.f32 %v3254_v25, %v4613_v36  ;;  %v3257_v32 = vadd.f32 %v3256_v30, %v3255_v27  ;;  %v3320_v33 = vpop.f32.mrb[23].mxu1 }
 0x123   :  { %v3321_v34 = vadd.f32 %v3320_v33, %v3319_v29 }
 0x124   :  { %v4682_v35 = vadd.f32 %v3318_v28, %v1895_v31  ;;  %v1898_v38 = vadd.f32 %v3257_v32, %v4613_v36 }
 0x126   :  { %v4685_v39 = vadd.f32 %v3321_v34, %v1898_v38  ;;  %v3258_v40 = vpop.f32.mrb[24].mxu0 }
 0x127   :  { %v3322_v42 = vpop.f32.mrb[24].mxu1  ;;  %v3259_v43 = vpop.f32.mrb[25].mxu0 }
 0x128   :  { %v3260_v44 = vadd.f32 %v3259_v43, %v3258_v40  ;;  %v3323_v45 = vpop.f32.mrb[25].mxu1  ;;  %v3261_v46 = vpop.f32.mrb[26].mxu0 }
 0x129   :  { %v3324_v47 = vadd.f32 %v3323_v45, %v3322_v42  ;;  %v3325_v48 = vpop.f32.mrb[26].mxu1  ;;  %v3262_v49 = vpop.f32.mrb[27].mxu0 }
 0x12a   :  { %v1903_v50 = vadd.f32 %v3260_v44, %v4613_v36  ;;  %v3263_v51 = vadd.f32 %v3262_v49, %v3261_v46  ;;  %v3326_v53 = vpop.f32.mrb[27].mxu1 }
 0x12b   :  { %v3327_v54 = vadd.f32 %v3326_v53, %v3325_v48 }
 0x12c   :  { %v4688_v55 = vadd.f32 %v3324_v47, %v1903_v50  ;;  %v1906_v57 = vadd.f32 %v3263_v51, %v4613_v36 }
 0x12e   :  { %v4691_v58 = vadd.f32 %v3327_v54, %v1906_v57  ;;  %v3264_v59 = vpop.f32.mrb[28].mxu0 }
 0x12f   :  { %v3328_v60 = vpop.f32.mrb[28].mxu1  ;;  %v3265_v61 = vpop.f32.mrb[29].mxu0 }
 0x130   :  { %v3266_v62 = vadd.f32 %v3265_v61, %v3264_v59  ;;  %v3329_v0 = vpop.f32.mrb[29].mxu1  ;;  %v3267_v2 = vpop.f32.mrb[30].mxu0 }
 0x131   :  { %v3330_v3 = vadd.f32 %v3329_v0, %v3328_v60  ;;  %v3331_v4 = vpop.f32.mrb[30].mxu1  ;;  %v3268_v5 = vpop.f32.mrb[31].mxu0 }
 0x132   :  { %v1911_v6 = vadd.f32 %v3266_v62, %v4613_v36  ;;  %v3269_v7 = vadd.f32 %v3268_v5, %v3267_v2  ;;  %v3332_v8 = vpop.f32.mrb[31].mxu1 }
 0x133   :  { %v3333_v9 = vadd.f32 %v3332_v8, %v3331_v4 }
 0x134   :  { %v4694_v10 = vadd.f32 %v3330_v3, %v1911_v6  ;;  %v1914_v11 = vadd.f32 %v3269_v7, %v4613_v36 }
 0x136   :  { %v4697_v13 = vadd.f32 %v3333_v9, %v1914_v11  ;;  %v3350_v14 = vpop.f32.mrb[32].mxu0 }
 0x137   :  { %v3414_v15 = vpop.f32.mrb[32].mxu1  ;;  %v3351_v17 = vpop.f32.mrb[33].mxu0 }
 0x138   :  { %v3352_v18 = vadd.f32 %v3351_v17, %v3350_v14  ;;  %v3415_v20 = vpop.f32.mrb[33].mxu1  ;;  %v3353_v22 = vpop.f32.mrb[34].mxu0 }
 0x139   :  { %v3416_v23 = vadd.f32 %v3415_v20, %v3414_v15  ;;  %v3417_v24 = vpop.f32.mrb[34].mxu1  ;;  %v3354_v25 = vpop.f32.mrb[35].mxu0 }
 0x13a   :  { %v2049_v26 = vadd.f32 %v3352_v18, %v4616_v52  ;;  %v3355_v27 = vadd.f32 %v3354_v25, %v3353_v22  ;;  %v3418_v28 = vpop.f32.mrb[35].mxu1 }
 0x13b   :  { %v3419_v29 = vadd.f32 %v3418_v28, %v3417_v24 }
 0x13c   :  { %v4700_v30 = vadd.f32 %v3416_v23, %v2049_v26  ;;  %v2052_v36 = vadd.f32 %v3355_v27, %v4625_v56 }
 0x13e   :  { %v4703_v31 = vadd.f32 %v3419_v29, %v2052_v36  ;;  %v3356_v32 = vpop.f32.mrb[36].mxu0 }
 0x13f   :  { %v3420_v33 = vpop.f32.mrb[36].mxu1  ;;  %v3357_v34 = vpop.f32.mrb[37].mxu0 }
 0x140   :  { %v3358_v38 = vadd.f32 %v3357_v34, %v3356_v32  ;;  %v3421_v40 = vpop.f32.mrb[37].mxu1  ;;  %v3359_v42 = vpop.f32.mrb[38].mxu0 }
 0x141   :  { %v3422_v43 = vadd.f32 %v3421_v40, %v3420_v33  ;;  %v3423_v44 = vpop.f32.mrb[38].mxu1  ;;  %v3360_v45 = vpop.f32.mrb[39].mxu0 }
 0x142   :  { %v2057_v52 = vadd.f32 %v3358_v38, %v4634_v12  ;;  %v3361_v46 = vadd.f32 %v3360_v45, %v3359_v42  ;;  %v3424_v47 = vpop.f32.mrb[39].mxu1 }
 0x143   :  { %v3425_v48 = vadd.f32 %v3424_v47, %v3423_v44 }
 0x144   :  { %v4706_v49 = vadd.f32 %v3422_v43, %v2057_v52  ;;  %v2060_v56 = vadd.f32 %v3361_v46, %v4643_v16 }
 0x146   :  { %v4709_v50 = vadd.f32 %v3425_v48, %v2060_v56  ;;  %v3362_v51 = vpop.f32.mrb[40].mxu0 }
 0x147   :  { %v3426_v53 = vpop.f32.mrb[40].mxu1  ;;  %v3363_v54 = vpop.f32.mrb[41].mxu0 }
 0x148   :  { %v3364_v57 = vadd.f32 %v3363_v54, %v3362_v51  ;;  %v3427_v59 = vpop.f32.mrb[41].mxu1  ;;  %v3365_v60 = vpop.f32.mrb[42].mxu0 }
 0x149   :  { %v3428_v61 = vadd.f32 %v3427_v59, %v3426_v53  ;;  %v3429_v62 = vpop.f32.mrb[42].mxu1  ;;  %v3366_v0 = vpop.f32.mrb[43].mxu0 }
 0x14a   :  { %v2065_v12 = vadd.f32 %v3364_v57, %v4652_v37  ;;  %v3367_v2 = vadd.f32 %v3366_v0, %v3365_v60  ;;  %v3430_v3 = vpop.f32.mrb[43].mxu1 }
 0x14b   :  { %v3431_v4 = vadd.f32 %v3430_v3, %v3429_v62 }
 0x14c   :  { %v4712_v5 = vadd.f32 %v3428_v61, %v2065_v12  ;;  %v2068_v16 = vadd.f32 %v3367_v2, %v4661_v41 }
 0x14e   :  { %v4715_v6 = vadd.f32 %v3431_v4, %v2068_v16  ;;  %v3368_v7 = vpop.f32.mrb[44].mxu0 }
 0x14f   :  { %v3432_v8 = vpop.f32.mrb[44].mxu1  ;;  %v3369_v9 = vpop.f32.mrb[45].mxu0 }
 0x150   :  { %v3370_v11 = vadd.f32 %v3369_v9, %v3368_v7  ;;  %v3433_v14 = vpop.f32.mrb[45].mxu1  ;;  %v3371_v15 = vpop.f32.mrb[46].mxu0 }
 0x151   :  { %v3434_v17 = vadd.f32 %v3433_v14, %v3432_v8  ;;  %v3435_v18 = vpop.f32.mrb[46].mxu1  ;;  %v3372_v20 = vpop.f32.mrb[47].mxu0 }
 0x152   :  { %v2073_v37 = vadd.f32 %v3370_v11, %v4670_v63  ;;  %v3373_v22 = vadd.f32 %v3372_v20, %v3371_v15  ;;  %v3436_v23 = vpop.f32.mrb[47].mxu1 }
 0x153   :  { %v3437_v24 = vadd.f32 %v3436_v23, %v3435_v18 }
 0x154   :  { %v4718_v25 = vadd.f32 %v3434_v17, %v2073_v37  ;;  %v2076_v41 = vadd.f32 %v3373_v22, %v4673_v1 }
 0x156   :  { %v4721_v26 = vadd.f32 %v3437_v24, %v2076_v41  ;;  %v3374_v27 = vpop.f32.mrb[48].mxu0 }
 0x157   :  { %v3438_v28 = vpop.f32.mrb[48].mxu1  ;;  %v3375_v29 = vpop.f32.mrb[49].mxu0 }
 0x158   :  { %v3376_v36 = vadd.f32 %v3375_v29, %v3374_v27  ;;  %v3439_v32 = vpop.f32.mrb[49].mxu1  ;;  %v3377_v33 = vpop.f32.mrb[50].mxu0 }
 0x159   :  { %v3440_v34 = vadd.f32 %v3439_v32, %v3438_v28  ;;  %v3441_v38 = vpop.f32.mrb[50].mxu1  ;;  %v3378_v40 = vpop.f32.mrb[51].mxu0 }
 0x15a   :  { %v2081_v63 = vadd.f32 %v3376_v36, %v4676_v19  ;;  %v3379_v42 = vadd.f32 %v3378_v40, %v3377_v33  ;;  %v3442_v43 = vpop.f32.mrb[51].mxu1 }
 0x15b   :  { %v3443_v44 = vadd.f32 %v3442_v43, %v3441_v38 }
 0x15c   :  { %v4724_v45 = vadd.f32 %v3440_v34, %v2081_v63  ;;  %v2084_v1 = vadd.f32 %v3379_v42, %v4679_v21 }
 0x15e   :  { %v4727_v52 = vadd.f32 %v3443_v44, %v2084_v1  ;;  %v3380_v46 = vpop.f32.mrb[52].mxu0 }
 0x15f   :  { %v3444_v47 = vpop.f32.mrb[52].mxu1  ;;  %v3381_v48 = vpop.f32.mrb[53].mxu0 }
 0x160   :  { %v3382_v56 = vadd.f32 %v3381_v48, %v3380_v46  ;;  %v3445_v51 = vpop.f32.mrb[53].mxu1  ;;  %v3383_v53 = vpop.f32.mrb[54].mxu0 }
 0x161   :  { %v3446_v54 = vadd.f32 %v3445_v51, %v3444_v47  ;;  %v3447_v57 = vpop.f32.mrb[54].mxu1  ;;  %v3384_v59 = vpop.f32.mrb[55].mxu0 }
 0x162   :  { %v2089_v19 = vadd.f32 %v3382_v56, %v4682_v35  ;;  %v3385_v60 = vadd.f32 %v3384_v59, %v3383_v53  ;;  %v3448_v61 = vpop.f32.mrb[55].mxu1 }
 0x163   :  { %v3449_v62 = vadd.f32 %v3448_v61, %v3447_v57 }
 0x164   :  { %v4730_v0 = vadd.f32 %v3446_v54, %v2089_v19  ;;  %v2092_v21 = vadd.f32 %v3385_v60, %v4685_v39 }
 0x166   :  { %v4733_v12 = vadd.f32 %v3449_v62, %v2092_v21  ;;  %v3386_v2 = vpop.f32.mrb[56].mxu0 }
 0x167   :  { %v3450_v3 = vpop.f32.mrb[56].mxu1  ;;  %v3387_v4 = vpop.f32.mrb[57].mxu0 }
 0x168   :  { %v3388_v16 = vadd.f32 %v3387_v4, %v3386_v2  ;;  %v3451_v7 = vpop.f32.mrb[57].mxu1  ;;  %v3389_v8 = vpop.f32.mrb[58].mxu0 }
 0x169   :  { %v3452_v9 = vadd.f32 %v3451_v7, %v3450_v3  ;;  %v3453_v11 = vpop.f32.mrb[58].mxu1  ;;  %v3390_v14 = vpop.f32.mrb[59].mxu0 }
 0x16a   :  { %v2097_v35 = vadd.f32 %v3388_v16, %v4688_v55  ;;  %v3391_v15 = vadd.f32 %v3390_v14, %v3389_v8  ;;  %v3454_v17 = vpop.f32.mrb[59].mxu1 }
 0x16b   :  { %v3455_v18 = vadd.f32 %v3454_v17, %v3453_v11 }
 0x16c   :  { %v4736_v20 = vadd.f32 %v3452_v9, %v2097_v35  ;;  %v2100_v39 = vadd.f32 %v3391_v15, %v4691_v58 }
 0x16e   :  { %v4739_v37 = vadd.f32 %v3455_v18, %v2100_v39  ;;  %v3392_v22 = vpop.f32.mrb[60].mxu0 }
 0x16f   :  { %v3456_v23 = vpop.f32.mrb[60].mxu1  ;;  %v3393_v24 = vpop.f32.mrb[61].mxu0 }
 0x170   :  { %v3394_v41 = vadd.f32 %v3393_v24, %v3392_v22  ;;  %v3457_v27 = vpop.f32.mrb[61].mxu1  ;;  %v3395_v28 = vpop.f32.mrb[62].mxu0 }
 0x171   :  { %v3458_v29 = vadd.f32 %v3457_v27, %v3456_v23  ;;  %v3459_v36 = vpop.f32.mrb[62].mxu1  ;;  %v3396_v32 = vpop.f32.mrb[63].mxu0 }
 0x172   :  { %v2105_v55 = vadd.f32 %v3394_v41, %v4694_v10  ;;  %v3397_v33 = vadd.f32 %v3396_v32, %v3395_v28  ;;  %v3460_v34 = vpop.f32.mrb[63].mxu1 }
 0x173   :  { %v3461_v38 = vadd.f32 %v3460_v34, %v3459_v36 }
 0x174   :  { %v4742_v40 = vadd.f32 %v3458_v29, %v2105_v55  ;;  %v2108_v58 = vadd.f32 %v3397_v33, %v4697_v13 }
 0x176   :  { %v4745_v63 = vadd.f32 %v3461_v38, %v2108_v58  ;;  %v3478_v42 = vpop.f32.mrb[64].mxu0 }
 0x177   :  { %v3542_v43 = vpop.f32.mrb[64].mxu1  ;;  %v3479_v44 = vpop.f32.mrb[65].mxu0 }
 0x178   :  { %v3480_v1 = vadd.f32 %v3479_v44, %v3478_v42  ;;  %v3543_v46 = vpop.f32.mrb[65].mxu1  ;;  %v3481_v47 = vpop.f32.mrb[66].mxu0 }
 0x179   :  { %v3544_v48 = vadd.f32 %v3543_v46, %v3542_v43  ;;  %v3545_v56 = vpop.f32.mrb[66].mxu1  ;;  %v3482_v51 = vpop.f32.mrb[67].mxu0 }
 0x17a   :  { %v2243_v10 = vadd.f32 %v3480_v1, %v4700_v30  ;;  %v3483_v53 = vadd.f32 %v3482_v51, %v3481_v47  ;;  %v3546_v54 = vpop.f32.mrb[67].mxu1 }
 0x17b   :  { %v3547_v57 = vadd.f32 %v3546_v54, %v3545_v56 }
 0x17c   :  { %v4748_v59 = vadd.f32 %v3544_v48, %v2243_v10  ;;  %v2246_v13 = vadd.f32 %v3483_v53, %v4703_v31 }
 0x17e   :  { %v4751_v19 = vadd.f32 %v3547_v57, %v2246_v13  ;;  %v3484_v60 = vpop.f32.mrb[68].mxu0 }
 0x17f   :  { %v3548_v61 = vpop.f32.mrb[68].mxu1  ;;  %v3485_v62 = vpop.f32.mrb[69].mxu0 }
 0x180   :  { %v3486_v21 = vadd.f32 %v3485_v62, %v3484_v60  ;;  %v3549_v2 = vpop.f32.mrb[69].mxu1  ;;  %v3487_v3 = vpop.f32.mrb[70].mxu0 }
 0x181   :  { %v3550_v4 = vadd.f32 %v3549_v2, %v3548_v61  ;;  %v3551_v16 = vpop.f32.mrb[70].mxu1  ;;  %v3488_v7 = vpop.f32.mrb[71].mxu0 }
 0x182   :  { %v2251_v30 = vadd.f32 %v3486_v21, %v4706_v49  ;;  %v3489_v8 = vadd.f32 %v3488_v7, %v3487_v3  ;;  %v3552_v9 = vpop.f32.mrb[71].mxu1 }
 0x183   :  { %v3553_v11 = vadd.f32 %v3552_v9, %v3551_v16 }
 0x184   :  { %v4754_v14 = vadd.f32 %v3550_v4, %v2251_v30  ;;  %v2254_v31 = vadd.f32 %v3489_v8, %v4709_v50 }
 0x186   :  { %v4757_v35 = vadd.f32 %v3553_v11, %v2254_v31  ;;  %v3490_v15 = vpop.f32.mrb[72].mxu0 }
 0x187   :  { %v3554_v17 = vpop.f32.mrb[72].mxu1  ;;  %v3491_v18 = vpop.f32.mrb[73].mxu0 }
 0x188   :  { %v3492_v39 = vadd.f32 %v3491_v18, %v3490_v15  ;;  %v3555_v22 = vpop.f32.mrb[73].mxu1  ;;  %v3493_v23 = vpop.f32.mrb[74].mxu0 }
 0x189   :  { %v3556_v24 = vadd.f32 %v3555_v22, %v3554_v17  ;;  %v3557_v41 = vpop.f32.mrb[74].mxu1  ;;  %v3494_v27 = vpop.f32.mrb[75].mxu0 }
 0x18a   :  { %v2259_v49 = vadd.f32 %v3492_v39, %v4712_v5  ;;  %v3495_v28 = vadd.f32 %v3494_v27, %v3493_v23  ;;  %v3558_v29 = vpop.f32.mrb[75].mxu1 }
 0x18b   :  { %v3559_v36 = vadd.f32 %v3558_v29, %v3557_v41 }
 0x18c   :  { %v4760_v32 = vadd.f32 %v3556_v24, %v2259_v49  ;;  %v2262_v50 = vadd.f32 %v3495_v28, %v4715_v6 }
 0x18e   :  { %v4763_v55 = vadd.f32 %v3559_v36, %v2262_v50  ;;  %v3496_v33 = vpop.f32.mrb[76].mxu0 }
 0x18f   :  { %v3560_v34 = vpop.f32.mrb[76].mxu1  ;;  %v3497_v38 = vpop.f32.mrb[77].mxu0 }
 0x190   :  { %v3498_v58 = vadd.f32 %v3497_v38, %v3496_v33  ;;  %v3561_v42 = vpop.f32.mrb[77].mxu1  ;;  %v3499_v43 = vpop.f32.mrb[78].mxu0 }
 0x191   :  { %v3562_v44 = vadd.f32 %v3561_v42, %v3560_v34  ;;  %v3563_v1 = vpop.f32.mrb[78].mxu1  ;;  %v3500_v46 = vpop.f32.mrb[79].mxu0 }
 0x192   :  { %v2267_v5 = vadd.f32 %v3498_v58, %v4718_v25  ;;  %v3501_v47 = vadd.f32 %v3500_v46, %v3499_v43  ;;  %v3564_v48 = vpop.f32.mrb[79].mxu1 }
 0x193   :  { %v3565_v56 = vadd.f32 %v3564_v48, %v3563_v1 }
 0x194   :  { %v4766_v51 = vadd.f32 %v3562_v44, %v2267_v5  ;;  %v2270_v6 = vadd.f32 %v3501_v47, %v4721_v26 }
 0x196   :  { %v4769_v10 = vadd.f32 %v3565_v56, %v2270_v6  ;;  %v3502_v53 = vpop.f32.mrb[80].mxu0 }
 0x197   :  { %v3566_v54 = vpop.f32.mrb[80].mxu1  ;;  %v3503_v57 = vpop.f32.mrb[81].mxu0 }
 0x198   :  { %v3504_v13 = vadd.f32 %v3503_v57, %v3502_v53  ;;  %v3567_v60 = vpop.f32.mrb[81].mxu1  ;;  %v3505_v61 = vpop.f32.mrb[82].mxu0 }
 0x199   :  { %v3568_v62 = vadd.f32 %v3567_v60, %v3566_v54  ;;  %v3569_v21 = vpop.f32.mrb[82].mxu1  ;;  %v3506_v2 = vpop.f32.mrb[83].mxu0 }
 0x19a   :  { %v2275_v25 = vadd.f32 %v3504_v13, %v4724_v45  ;;  %v3507_v3 = vadd.f32 %v3506_v2, %v3505_v61  ;;  %v3570_v4 = vpop.f32.mrb[83].mxu1 }
 0x19b   :  { %v3571_v16 = vadd.f32 %v3570_v4, %v3569_v21 }
 0x19c   :  { %v4772_v7 = vadd.f32 %v3568_v62, %v2275_v25  ;;  %v2278_v26 = vadd.f32 %v3507_v3, %v4727_v52 }
 0x19e   :  { %v4775_v30 = vadd.f32 %v3571_v16, %v2278_v26  ;;  %v3508_v8 = vpop.f32.mrb[84].mxu0 }
 0x19f   :  { %v3572_v9 = vpop.f32.mrb[84].mxu1  ;;  %v3509_v11 = vpop.f32.mrb[85].mxu0 }
 0x1a0   :  { %v3510_v31 = vadd.f32 %v3509_v11, %v3508_v8  ;;  %v3573_v15 = vpop.f32.mrb[85].mxu1  ;;  %v3511_v17 = vpop.f32.mrb[86].mxu0 }
 0x1a1   :  { %v3574_v18 = vadd.f32 %v3573_v15, %v3572_v9  ;;  %v3575_v39 = vpop.f32.mrb[86].mxu1  ;;  %v3512_v22 = vpop.f32.mrb[87].mxu0 }
 0x1a2   :  { %v2283_v45 = vadd.f32 %v3510_v31, %v4730_v0  ;;  %v3513_v23 = vadd.f32 %v3512_v22, %v3511_v17  ;;  %v3576_v24 = vpop.f32.mrb[87].mxu1 }
 0x1a3   :  { %v3577_v41 = vadd.f32 %v3576_v24, %v3575_v39 }
 0x1a4   :  { %v4778_v27 = vadd.f32 %v3574_v18, %v2283_v45  ;;  %v2286_v52 = vadd.f32 %v3513_v23, %v4733_v12 }
 0x1a6   :  { %v4781_v49 = vadd.f32 %v3577_v41, %v2286_v52  ;;  %v3514_v28 = vpop.f32.mrb[88].mxu0 }
 0x1a7   :  { %v3578_v29 = vpop.f32.mrb[88].mxu1  ;;  %v3515_v36 = vpop.f32.mrb[89].mxu0 }
 0x1a8   :  { %v3516_v50 = vadd.f32 %v3515_v36, %v3514_v28  ;;  %v3579_v33 = vpop.f32.mrb[89].mxu1  ;;  %v3517_v34 = vpop.f32.mrb[90].mxu0 }
 0x1a9   :  { %v3580_v38 = vadd.f32 %v3579_v33, %v3578_v29  ;;  %v3581_v58 = vpop.f32.mrb[90].mxu1  ;;  %v3518_v42 = vpop.f32.mrb[91].mxu0 }
 0x1aa   :  { %v2291_v0 = vadd.f32 %v3516_v50, %v4736_v20  ;;  %v3519_v43 = vadd.f32 %v3518_v42, %v3517_v34  ;;  %v3582_v44 = vpop.f32.mrb[91].mxu1 }
 0x1ab   :  { %v3583_v1 = vadd.f32 %v3582_v44, %v3581_v58 }
 0x1ac   :  { %v4784_v46 = vadd.f32 %v3580_v38, %v2291_v0  ;;  %v2294_v12 = vadd.f32 %v3519_v43, %v4739_v37 }
 0x1ae   :  { %v4787_v5 = vadd.f32 %v3583_v1, %v2294_v12  ;;  %v3520_v47 = vpop.f32.mrb[92].mxu0 }
 0x1af   :  { %v3584_v48 = vpop.f32.mrb[92].mxu1  ;;  %v3521_v56 = vpop.f32.mrb[93].mxu0 }
 0x1b0   :  { %v3522_v6 = vadd.f32 %v3521_v56, %v3520_v47  ;;  %v3585_v53 = vpop.f32.mrb[93].mxu1  ;;  %v3523_v54 = vpop.f32.mrb[94].mxu0 }
 0x1b1   :  { %v3586_v57 = vadd.f32 %v3585_v53, %v3584_v48  ;;  %v3587_v13 = vpop.f32.mrb[94].mxu1  ;;  %v3524_v60 = vpop.f32.mrb[95].mxu0 }
 0x1b2   :  { %v2299_v20 = vadd.f32 %v3522_v6, %v4742_v40  ;;  %v3525_v61 = vadd.f32 %v3524_v60, %v3523_v54  ;;  %v3588_v62 = vpop.f32.mrb[95].mxu1 }
 0x1b3   :  { %v3589_v21 = vadd.f32 %v3588_v62, %v3587_v13 }
 0x1b4   :  { %v4790_v2 = vadd.f32 %v3586_v57, %v2299_v20  ;;  %v2302_v37 = vadd.f32 %v3525_v61, %v4745_v63 }
 0x1b6   :  { %v4793_v25 = vadd.f32 %v3589_v21, %v2302_v37  ;;  %v3606_v3 = vpop.f32.mrb[96].mxu0 }
 0x1b7   :  { %v3670_v4 = vpop.f32.mrb[96].mxu1  ;;  %v3607_v16 = vpop.f32.mrb[97].mxu0 }
 0x1b8   :  { %v3608_v26 = vadd.f32 %v3607_v16, %v3606_v3  ;;  %v3671_v8 = vpop.f32.mrb[97].mxu1  ;;  %v3609_v9 = vpop.f32.mrb[98].mxu0 }
 0x1b9   :  { %v3672_v11 = vadd.f32 %v3671_v8, %v3670_v4  ;;  %v3673_v31 = vpop.f32.mrb[98].mxu1  ;;  %v3610_v15 = vpop.f32.mrb[99].mxu0 }
 0x1ba   :  { %v2437_v40 = vadd.f32 %v3608_v26, %v4748_v59  ;;  %v3611_v17 = vadd.f32 %v3610_v15, %v3609_v9  ;;  %v3674_v18 = vpop.f32.mrb[99].mxu1 }
 0x1bb   :  { %v3675_v39 = vadd.f32 %v3674_v18, %v3673_v31 }
 0x1bc   :  { %v4796_v22 = vadd.f32 %v3672_v11, %v2437_v40  ;;  %v2440_v63 = vadd.f32 %v3611_v17, %v4751_v19 }
 0x1be   :  { %v4799_v45 = vadd.f32 %v3675_v39, %v2440_v63  ;;  %v3612_v23 = vpop.f32.mrb[100].mxu0 }
 0x1bf   :  { %v3676_v24 = vpop.f32.mrb[100].mxu1  ;;  %v3613_v41 = vpop.f32.mrb[101].mxu0 }
 0x1c0   :  { %v2596_v52 = vadd.f32 %v4799_v45, %v4796_v22  ;;  %v3614_v28 = vadd.f32 %v3613_v41, %v3612_v23  ;;  %v3677_v29 = vpop.f32.mrb[101].mxu1  ;;  %v3615_v36 = vpop.f32.mrb[102].mxu0 }
 0x1c1   :  { %v3678_v50 = vadd.f32 %v3677_v29, %v3676_v24  ;;  %v3679_v59 = vpop.f32.mrb[102].mxu1  ;;  %v3616_v33 = vpop.f32.mrb[103].mxu0 }
 0x1c2   :  { %v2445_v34 = vadd.f32 %v3614_v28, %v4754_v14  ;;  %v3617_v38 = vadd.f32 %v3616_v33, %v3615_v36  ;;  %v3680_v58 = vpop.f32.mrb[103].mxu1 }
 0x1c3   :  { %v3681_v42 = vadd.f32 %v3680_v58, %v3679_v59 }
 0x1c4   :  { %v4804_v19 = vadd.f32 %v3678_v50, %v2445_v34  ;;  %v2448_v0 = vadd.f32 %v3617_v38, %v4757_v35 }
 0x1c6   :  { %v2597_v43 = vadd.f32 %v2596_v52, %v4804_v19  ;;  %v4808_v44 = vadd.f32 %v3681_v42, %v2448_v0  ;;  %v3618_v1 = vpop.f32.mrb[104].mxu0 }
 0x1c7   :  { %v3682_v12 = vpop.f32.mrb[104].mxu1  ;;  %v3619_v47 = vpop.f32.mrb[105].mxu0 }
 0x1c8   :  { %v2598_v48 = vadd.f32 %v2597_v43, %v4808_v44  ;;  %v3620_v56 = vadd.f32 %v3619_v47, %v3618_v1  ;;  %v3683_v6 = vpop.f32.mrb[105].mxu1  ;;  %v3621_v53 = vpop.f32.mrb[106].mxu0 }
 0x1c9   :  { %v3684_v14 = vadd.f32 %v3683_v6, %v3682_v12  ;;  %v3685_v54 = vpop.f32.mrb[106].mxu1  ;;  %v3622_v57 = vpop.f32.mrb[107].mxu0 }
 0x1ca   :  { %v2453_v13 = vadd.f32 %v3620_v56, %v4760_v32  ;;  %v3623_v60 = vadd.f32 %v3622_v57, %v3621_v53  ;;  %v3686_v20 = vpop.f32.mrb[107].mxu1 }
 0x1cb   :  { %v3687_v35 = vadd.f32 %v3686_v20, %v3685_v54 }
 0x1cc   :  { %v4812_v61 = vadd.f32 %v3684_v14, %v2453_v13  ;;  %v2456_v62 = vadd.f32 %v3623_v60, %v4763_v55 }
 0x1ce   :  { %v2599_v21 = vadd.f32 %v2598_v48, %v4812_v61  ;;  %v4816_v37 = vadd.f32 %v3687_v35, %v2456_v62  ;;  %v3624_v3 = vpop.f32.mrb[108].mxu0 }
 0x1cf   :  { %v3688_v4 = vpop.f32.mrb[108].mxu1  ;;  %v3625_v16 = vpop.f32.mrb[109].mxu0 }
 0x1d0   :  { %v2600_v26 = vadd.f32 %v2599_v21, %v4816_v37  ;;  %v3626_v8 = vadd.f32 %v3625_v16, %v3624_v3  ;;  %v3689_v9 = vpop.f32.mrb[109].mxu1  ;;  %v3627_v11 = vpop.f32.mrb[110].mxu0 }
 0x1d1   :  { %v3690_v32 = vadd.f32 %v3689_v9, %v3688_v4  ;;  %v3691_v31 = vpop.f32.mrb[110].mxu1  ;;  %v3628_v15 = vpop.f32.mrb[111].mxu0 }
 0x1d2   :  { %v2461_v40 = vadd.f32 %v3626_v8, %v4766_v51  ;;  %v3629_v17 = vadd.f32 %v3628_v15, %v3627_v11  ;;  %v3692_v18 = vpop.f32.mrb[111].mxu1 }
 0x1d3   :  { %v3693_v55 = vadd.f32 %v3692_v18, %v3691_v31 }
 0x1d4   :  { %v4820_v39 = vadd.f32 %v3690_v32, %v2461_v40  ;;  %v2464_v63 = vadd.f32 %v3629_v17, %v4769_v10 }
 0x1d6   :  { %v2601_v23 = vadd.f32 %v2600_v26, %v4820_v39  ;;  %v4824_v24 = vadd.f32 %v3693_v55, %v2464_v63  ;;  %v3630_v41 = vpop.f32.mrb[112].mxu0 }
 0x1d7   :  { %v3694_v52 = vpop.f32.mrb[112].mxu1  ;;  %v3631_v28 = vpop.f32.mrb[113].mxu0 }
 0x1d8   :  { %v2602_v29 = vadd.f32 %v2601_v23, %v4824_v24  ;;  %v3632_v36 = vadd.f32 %v3631_v28, %v3630_v41  ;;  %v3695_v50 = vpop.f32.mrb[113].mxu1  ;;  %v3633_v59 = vpop.f32.mrb[114].mxu0 }
 0x1d9   :  { %v3696_v51 = vadd.f32 %v3695_v50, %v3694_v52  ;;  %v3697_v33 = vpop.f32.mrb[114].mxu1  ;;  %v3634_v34 = vpop.f32.mrb[115].mxu0 }
 0x1da   :  { %v2469_v38 = vadd.f32 %v3632_v36, %v4772_v7  ;;  %v3635_v58 = vadd.f32 %v3634_v34, %v3633_v59  ;;  %v3698_v42 = vpop.f32.mrb[115].mxu1 }
 0x1db   :  { %v3699_v10 = vadd.f32 %v3698_v42, %v3697_v33 }
 0x1dc   :  { %v4828_v0 = vadd.f32 %v3696_v51, %v2469_v38  ;;  %v2472_v43 = vadd.f32 %v3635_v58, %v4775_v30 }
 0x1de   :  { %v2603_v1 = vadd.f32 %v2602_v29, %v4828_v0  ;;  %v4832_v12 = vadd.f32 %v3699_v10, %v2472_v43  ;;  %v3636_v47 = vpop.f32.mrb[116].mxu0 }
 0x1df   :  { %v3700_v48 = vpop.f32.mrb[116].mxu1  ;;  %v3637_v56 = vpop.f32.mrb[117].mxu0 }
 0x1e0   :  { %v2604_v6 = vadd.f32 %v2603_v1, %v4832_v12  ;;  %v3638_v53 = vadd.f32 %v3637_v56, %v3636_v47  ;;  %v3701_v14 = vpop.f32.mrb[117].mxu1  ;;  %v3639_v54 = vpop.f32.mrb[118].mxu0 }
 0x1e1   :  { %v3702_v7 = vadd.f32 %v3701_v14, %v3700_v48  ;;  %v3703_v57 = vpop.f32.mrb[118].mxu1  ;;  %v3640_v13 = vpop.f32.mrb[119].mxu0 }
 0x1e2   :  { %v2477_v60 = vadd.f32 %v3638_v53, %v4778_v27  ;;  %v3641_v20 = vadd.f32 %v3640_v13, %v3639_v54  ;;  %v3704_v35 = vpop.f32.mrb[119].mxu1 }
 0x1e3   :  { %v3705_v30 = vadd.f32 %v3704_v35, %v3703_v57 }
 0x1e4   :  { %v2574_v62 = vadd.f32 %v3702_v7, %v2477_v60  ;;  %v2480_v21 = vadd.f32 %v3641_v20, %v4781_v49 }
 0x1e6   :  { %v2605_v3 = vadd.f32 %v2604_v6, %v2574_v62  ;;  %v2577_v4 = vadd.f32 %v3705_v30, %v2480_v21  ;;  %v3642_v16 = vpop.f32.mrb[120].mxu0 }
 0x1e7   :  { %v3706_v26 = vpop.f32.mrb[120].mxu1  ;;  %v3643_v8 = vpop.f32.mrb[121].mxu0 }
 0x1e8   :  { %v2606_v9 = vadd.f32 %v2605_v3, %v2577_v4  ;;  %v3644_v11 = vadd.f32 %v3643_v8, %v3642_v16  ;;  %v3707_v32 = vpop.f32.mrb[121].mxu1  ;;  %v3645_v31 = vpop.f32.mrb[122].mxu0 }
 0x1e9   :  { %v3708_v15 = vadd.f32 %v3707_v32, %v3706_v26  ;;  %v3709_v40 = vpop.f32.mrb[122].mxu1  ;;  %v3646_v17 = vpop.f32.mrb[123].mxu0 }
 0x1ea   :  { %v2485_v27 = vadd.f32 %v3644_v11, %v4784_v46  ;;  %v3647_v18 = vadd.f32 %v3646_v17, %v3645_v31  ;;  %v3710_v55 = vpop.f32.mrb[123].mxu1 }
 0x1eb   :  { %v3711_v63 = vadd.f32 %v3710_v55, %v3709_v40 }
 0x1ec   :  { %v2582_v23 = vadd.f32 %v3708_v15, %v2485_v27  ;;  %v2488_v49 = vadd.f32 %v3647_v18, %v4787_v5 }
 0x1ee   :  { %v2607_v41 = vadd.f32 %v2606_v9, %v2582_v23  ;;  %v2585_v52 = vadd.f32 %v3711_v63, %v2488_v49  ;;  %v3648_v28 = vpop.f32.mrb[124].mxu0 }
 0x1ef   :  { %v3712_v29 = vpop.f32.mrb[124].mxu1  ;;  %v3649_v36 = vpop.f32.mrb[125].mxu0 }
 0x1f0   :  { %v2608_v50 = vadd.f32 %v2607_v41, %v2585_v52  ;;  %v3650_v59 = vadd.f32 %v3649_v36, %v3648_v28  ;;  %v3713_v51 = vpop.f32.mrb[125].mxu1  ;;  %v3651_v33 = vpop.f32.mrb[126].mxu0 }
 0x1f1   :  { %v3714_v34 = vadd.f32 %v3713_v51, %v3712_v29  ;;  %v3715_v38 = vpop.f32.mrb[126].mxu1  ;;  %v3652_v58 = vpop.f32.mrb[127].mxu0 }
 0x1f2   :  { %v2493_v46 = vadd.f32 %v3650_v59, %v4790_v2  ;;  %v3653_v42 = vadd.f32 %v3652_v58, %v3651_v33  ;;  %v3716_v10 = vpop.f32.mrb[127].mxu1 }
 0x1f3   :  { %v3717_v43 = vadd.f32 %v3716_v10, %v3715_v38 }
 0x1f4   :  { %v2590_v1 = vadd.f32 %v3714_v34, %v2493_v46  ;;  %v2496_v5 = vadd.f32 %v3653_v42, %v4793_v25 }
 0x1f6   :  { %v2609_v47 = vadd.f32 %v2608_v50, %v2590_v1  ;;  %v2593_v48 = vadd.f32 %v3717_v43, %v2496_v5 }
 0x1f8   :  { %v2610_v56 = vadd.f32 %v2609_v47, %v2593_v48 }
 0x1fa   :  { %v2611_v6 = vrot.slane %v2610_v56, 4 }
 0x1fc   :  { %v2612_v53 = vadd.f32 %v2611_v6, %v2610_v56 }
 0x1fe   :  { %v2613_v14 = vrot.slane %v2612_v53, 2 }
 0x200   :  { %v2614_v54 = vadd.f32 %v2613_v14, %v2612_v53 }
 0x202   :  { %v2615_v7 = vrot.slane %v2614_v54, 1 }
 0x204   :  { %v2616_v57 = vadd.f32 %v2615_v7, %v2614_v54 }
 0x206   :  { %v2617_v13 = vmul.f32 0.0078125, %v2616_v57 }
 0x208   :  { %v2618_v60 = vsub.f32 %v4796_v22, %v2617_v13  ;;  %v2619_v2 = vsub.f32 %v4799_v45, %v2617_v13  ;;  %v2620_v20 = vsub.f32 %v4804_v19, %v2617_v13  ;;  %v2621_v35 = vsub.f32 %v4808_v44, %v2617_v13 }
 0x209   :  { %v2622_v25 = vsub.f32 %v4812_v61, %v2617_v13  ;;  %v2623_v30 = vsub.f32 %v4816_v37, %v2617_v13  ;;  %v2624_v21 = vsub.f32 %v4820_v39, %v2617_v13  ;;  %v2625_v3 = vsub.f32 %v4824_v24, %v2617_v13 }
 0x20a   :  { %v2626_v16 = vsub.f32 %v4828_v0, %v2617_v13  ;;  %v2627_v26 = vsub.f32 %v4832_v12, %v2617_v13  ;;  %v2628_v8 = vsub.f32 %v2574_v62, %v2617_v13  ;;  %v2629_v22 = vsub.f32 %v2577_v4, %v2617_v13 }
 0x20b   :  { %v2630_v9 = vsub.f32 %v2582_v23, %v2617_v13  ;;  %v2631_v45 = vsub.f32 %v2585_v52, %v2617_v13  ;;  %v2632_v11 = vsub.f32 %v2590_v1, %v2617_v13  ;;  %v2633_v19 = vsub.f32 %v2593_v48, %v2617_v13 }
 0x20c   :  { %v2634_v32 = vmul.f32 %v2618_v60, %v2618_v60  ;;  %v2635_v44 = vmul.f32 %v2619_v2, %v2619_v2  ;;  %v2636_v31 = vmul.f32 %v2620_v20, %v2620_v20  ;;  %v2637_v15 = vmul.f32 %v2621_v35, %v2621_v35 }
 0x20d   :  { %v2638_v40 = vmul.f32 %v2622_v25, %v2622_v25  ;;  %v2639_v17 = vmul.f32 %v2623_v30, %v2623_v30  ;;  %v2640_v27 = vmul.f32 %v2624_v21, %v2624_v21  ;;  %v2641_v18 = vmul.f32 %v2625_v3, %v2625_v3 }
 0x20e   :  { %v2650_v61 = vadd.f32 %v2635_v44, %v2634_v32  ;;  %v2642_v62 = vmul.f32 %v2626_v16, %v2626_v16  ;;  %v2643_v55 = vmul.f32 %v2627_v26, %v2627_v26  ;;  %v2644_v23 = vmul.f32 %v2628_v8, %v2628_v8  ;;  %v3125_v32 = vld [vmem:[%s4900_s3] ss:$0 sm:$0xff] }
 0x20f   :  { %v2645_v41 = vmul.f32 %v2629_v22, %v2629_v22  ;;  %v2646_v28 = vmul.f32 %v2630_v9, %v2630_v9  ;;  %v2647_v36 = vmul.f32 %v2631_v45, %v2631_v45  ;;  %v2648_v59 = vmul.f32 %v2632_v11, %v2632_v11 }
 0x210   :  { %v2651_v37 = vadd.f32 %v2650_v61, %v2636_v31  ;;  %v2649_v33 = vmul.f32 %v2633_v19, %v2633_v19 }
 0x212   :  { %v2652_v39 = vadd.f32 %v2651_v37, %v2637_v15 }
 0x214   :  { %v2653_v24 = vadd.f32 %v2652_v39, %v2638_v40 }
 0x216   :  { %v2654_v0 = vadd.f32 %v2653_v24, %v2639_v17  ;;  %v3126_v24 = vld [vmem:[%s4901_s4] ss:$0 sm:$0xff] }
 0x218   :  { %v2655_v12 = vadd.f32 %v2654_v0, %v2640_v27 }
 0x21a   :  { %v2656_v4 = vadd.f32 %v2655_v12, %v2641_v18 }
 0x21c   :  { %v2657_v63 = vadd.f32 %v2656_v4, %v2642_v62 }
 0x21e   :  { %v2658_v49 = vadd.f32 %v2657_v63, %v2643_v55 }
 0x220   :  { %v2659_v52 = vadd.f32 %v2658_v49, %v2644_v23 }
 0x222   :  { %v2660_v29 = vadd.f32 %v2659_v52, %v2645_v41 }
 0x224   :  { %v2661_v50 = vadd.f32 %v2660_v29, %v2646_v28 }
 0x226   :  { %v2662_v51 = vadd.f32 %v2661_v50, %v2647_v36 }
 0x228   :  { %v2663_v34 = vadd.f32 %v2662_v51, %v2648_v59 }
 0x22a   :  { %v2664_v38 = vadd.f32 %v2663_v34, %v2649_v33 }
 0x22c   :  { %v2665_v58 = vrot.slane %v2664_v38, 4 }
 0x22e   :  { %v2666_v46 = vadd.f32 %v2665_v58, %v2664_v38 }
 0x230   :  { %v2667_v42 = vrot.slane %v2666_v46, 2 }
 0x232   :  { %v2668_v10 = vadd.f32 %v2667_v42, %v2666_v46 }
 0x234   :  { %v2669_v43 = vrot.slane %v2668_v10, 1 }
 0x236   :  { %v2670_v1 = vadd.f32 %v2669_v43, %v2668_v10 }
 0x238   :  { %v2671_v5 = vmul.f32 0.0078125, %v2670_v1 }
 0x23a   :  { %v2672_v47 = vadd.f32 1e-05, %v2671_v5 }
 0x23c   :  { %3846 = vrsqrt.f32 %v2672_v47 }
 0x246   :  { %v3847_v48 = vpop.eup %3846 }
 0x247   :  { %v2674_v56 = vmul.f32 %v3847_v48, %v2618_v60  ;;  %v2675_v6 = vmul.f32 %v3847_v48, %v2619_v2  ;;  %v2676_v53 = vmul.f32 %v3847_v48, %v2620_v20  ;;  %v2677_v14 = vmul.f32 %v3847_v48, %v2621_v35 }
 0x248   :  { %v2678_v54 = vmul.f32 %v3847_v48, %v2622_v25  ;;  %v2679_v7 = vmul.f32 %v3847_v48, %v2623_v30  ;;  %v2680_v57 = vmul.f32 %v3847_v48, %v2624_v21  ;;  %v2681_v13 = vmul.f32 %v3847_v48, %v2625_v3 }
 0x249   :  { %v2682_v44 = vmul.f32 %v3847_v48, %v2626_v16  ;;  %v2683_v31 = vmul.f32 %v3847_v48, %v2627_v26  ;;  %v2684_v61 = vmul.f32 %v3847_v48, %v2628_v8  ;;  %v2685_v15 = vmul.f32 %v3847_v48, %v2629_v22 }
 0x24a   :  { %v2686_v37 = vmul.f32 %v3847_v48, %v2630_v9  ;;  %v2687_v40 = vmul.f32 %v3847_v48, %v2631_v45  ;;  %v2688_v39 = vmul.f32 %v3847_v48, %v2632_v11  ;;  %v2689_v17 = vmul.f32 %v3847_v48, %v2633_v19 }
 0x24b   :  { %v2697_v60 = vmul.f32 %v3125_v32, %v2674_v56  ;;  %v2698_v2 = vmul.f32 %v3125_v32, %v2675_v6  ;;  %v2699_v20 = vmul.f32 %v3125_v32, %v2676_v53  ;;  %v2700_v35 = vmul.f32 %v3125_v32, %v2677_v14 }
 0x24c   :  { %v2701_v25 = vmul.f32 %v3125_v32, %v2678_v54  ;;  %v2702_v30 = vmul.f32 %v3125_v32, %v2679_v7  ;;  %v2703_v21 = vmul.f32 %v3125_v32, %v2680_v57  ;;  %v2704_v3 = vmul.f32 %v3125_v32, %v2681_v13 }
 0x24d   :  { %v2705_v16 = vmul.f32 %v3125_v32, %v2682_v44  ;;  %v2706_v26 = vmul.f32 %v3125_v32, %v2683_v31  ;;  %v2707_v8 = vmul.f32 %v3125_v32, %v2684_v61  ;;  %v2708_v22 = vmul.f32 %v3125_v32, %v2685_v15 }
 0x24e   :  { %v2709_v9 = vmul.f32 %v3125_v32, %v2686_v37  ;;  %v2710_v45 = vmul.f32 %v3125_v32, %v2687_v40  ;;  %v2711_v11 = vmul.f32 %v3125_v32, %v2688_v39  ;;  %v2712_v19 = vmul.f32 %v3125_v32, %v2689_v17 }
 0x24f   :  { %v2720_v27 = vadd.f32 %v3126_v24, %v2697_v60  ;;  %v2721_v0 = vadd.f32 %v3126_v24, %v2698_v2  ;;  %v2722_v18 = vadd.f32 %v3126_v24, %v2699_v20  ;;  %v2723_v12 = vadd.f32 %v3126_v24, %v2700_v35 }
 0x250   :  { %v2724_v62 = vadd.f32 %v3126_v24, %v2701_v25  ;;  %v2725_v4 = vadd.f32 %v3126_v24, %v2702_v30  ;;  %v2726_v55 = vadd.f32 %v3126_v24, %v2703_v21  ;;  %v2727_v63 = vadd.f32 %v3126_v24, %v2704_v3 }
 0x251   :  { %v2728_v23 = vadd.f32 %v3126_v24, %v2705_v16  ;;  %v2729_v49 = vadd.f32 %v3126_v24, %v2706_v26  ;;  %v2730_v41 = vadd.f32 %v3126_v24, %v2707_v8  ;;  %v2731_v52 = vadd.f32 %v3126_v24, %v2708_v22 }
 0x252   :  { %v2732_v28 = vadd.f32 %v3126_v24, %v2709_v9  ;;  %v2733_v29 = vadd.f32 %v3126_v24, %v2710_v45  ;;  %v2734_v36 = vadd.f32 %v3126_v24, %v2711_v11  ;;  %v2735_v50 = vadd.f32 %v3126_v24, %v2712_v19 }
 0x253   :  { %vm2736_vm0 = vcmp.gt.f32.partialorder %v2720_v27, 0.0  ;;  %vm2737_vm1 = vcmp.gt.f32.partialorder %v2721_v0, 0.0  ;;  %vm2738_vm2 = vcmp.gt.f32.partialorder %v2722_v18, 0.0  ;;  %vm2739_vm3 = vcmp.gt.f32.partialorder %v2723_v12, 0.0 }
 0x254   :  { %vm2740_vm4 = vcmp.gt.f32.partialorder %v2724_v62, 0.0  ;;  %vm2741_vm5 = vcmp.gt.f32.partialorder %v2725_v4, 0.0  ;;  %vm2742_vm6 = vcmp.gt.f32.partialorder %v2726_v55, 0.0  ;;  %vm2743_vm7 = vcmp.gt.f32.partialorder %v2727_v63, 0.0 }
 0x255   :  { %vm2744_vm8 = vcmp.gt.f32.partialorder %v2728_v23, 0.0  ;;  %vm2745_vm9 = vcmp.gt.f32.partialorder %v2729_v49, 0.0  ;;  %vm2746_vm10 = vcmp.gt.f32.partialorder %v2730_v41, 0.0  ;;  %vm2747_vm11 = vcmp.gt.f32.partialorder %v2731_v52, 0.0 }
 0x256   :  { %vm2748_vm12 = vcmp.gt.f32.partialorder %v2732_v28, 0.0  ;;  %vm2749_vm13 = vcmp.gt.f32.partialorder %v2733_v29, 0.0  ;;  %vm2750_vm14 = vcmp.gt.f32.partialorder %v2734_v36, 0.0  ;;  %vm2751_vm15 = vcmp.gt.f32.partialorder %v2735_v50, 0.0 }
 0x257   :  { %v2752_v59 = vmul.f32 0.2, %v2720_v27  ;;  %v2753_v51 = vmul.f32 0.2, %v2721_v0  ;;  %v2754_v33 = vmul.f32 0.2, %v2722_v18 }
 0x258   :  { %v2755_v34 = vmul.f32 0.2, %v2723_v12  ;;  %v2756_v38 = vmul.f32 0.2, %v2724_v62  ;;  %v2757_v58 = vmul.f32 0.2, %v2725_v4 }
 0x259   :  { %v2758_v46 = vmul.f32 0.2, %v2726_v55  ;;  %v2759_v42 = vmul.f32 0.2, %v2727_v63  ;;  %v2760_v10 = vmul.f32 0.2, %v2728_v23  ;;  %v2768_v43 = vsel %vm2736_vm0, %v2720_v27, %v2752_v59 }
 0x25a   :  { %v2761_v1 = vmul.f32 0.2, %v2729_v49  ;;  %v2762_v5 = vmul.f32 0.2, %v2730_v41  ;;  %v2763_v47 = vmul.f32 0.2, %v2731_v52  ;;  %v2769_v48 = vsel %vm2737_vm1, %v2721_v0, %v2753_v51 }
 0x25b   :  { %v2764_v56 = vmul.f32 0.2, %v2732_v28  ;;  %v2765_v6 = vmul.f32 0.2, %v2733_v29  ;;  %v2766_v53 = vmul.f32 0.2, %v2734_v36  ;;  %v2770_v14 = vsel %vm2738_vm2, %v2722_v18, %v2754_v33 }
 0x25c   :  { %v2767_v54 = vmul.f32 0.2, %v2735_v50  ;;  %v2771_v7 = vsel %vm2739_vm3, %v2723_v12, %v2755_v34  ;;  %v2772_v57 = vsel %vm2740_vm4, %v2724_v62, %v2756_v38  ;;  %v2773_v13 = vsel %vm2741_vm5, %v2725_v4, %v2757_v58 }
 0x25d   :  { %v2774_v32 = vsel %vm2742_vm6, %v2726_v55, %v2758_v46  ;;  %v2775_v44 = vsel %vm2743_vm7, %v2727_v63, %v2759_v42  ;;  %v2776_v31 = vsel %vm2744_vm8, %v2728_v23, %v2760_v10  ;;  %v2777_v61 = vsel %vm2745_vm9, %v2729_v49, %v2761_v1 }
 0x25e   :  { %v2778_v15 = vsel %vm2746_vm10, %v2730_v41, %v2762_v5  ;;  %v2779_v37 = vsel %vm2747_vm11, %v2731_v52, %v2763_v47  ;;  %v2780_v40 = vsel %vm2748_vm12, %v2732_v28, %v2764_v56  ;;  %v2781_v39 = vsel %vm2749_vm13, %v2733_v29, %v2765_v6 }
 0x25f   :  { %v2782_v17 = vsel %vm2750_vm14, %v2734_v36, %v2766_v53  ;;  %v2783_v60 = vsel %vm2751_vm15, %v2735_v50, %v2767_v54  ;;  %v3162_v2 = vpack.c.bf16 %v2769_v48, %v2768_v43  ;;  %v3167_v20 = vpack.c.bf16 %v2771_v7, %v2770_v14 }
 0x260   :  { %v3172_v35 = vpack.c.bf16 %v2773_v13, %v2772_v57  ;;  %v3177_v25 = vpack.c.bf16 %v2775_v44, %v2774_v32  ;;  %v3182_v30 = vpack.c.bf16 %v2777_v61, %v2776_v31  ;;  %v3187_v21 = vpack.c.bf16 %v2779_v37, %v2778_v15 }
 0x261   :  { %3163 = vst [vmem:[%s4902_s5] sm:$0xff] %v3162_v2   ;;  %3199 = vst [vmem:[%s4902_s5 + $0x8] sm:$0xff] %v3167_v20   ;;  %v3192_v3 = vpack.c.bf16 %v2781_v39, %v2780_v40  ;;  %v3197_v24 = vpack.c.bf16 %v2783_v60, %v2782_v17 }
 0x262   :  { %3200 = vst [vmem:[%s4902_s5 + $0x10] sm:$0xff] %v3172_v35   ;;  %3201 = vst [vmem:[%s4902_s5 + $0x18] sm:$0xff] %v3177_v25  }
 0x263   :  { %3202 = vst [vmem:[%s4902_s5 + $0x20] sm:$0xff] %v3182_v30   ;;  %3203 = vst [vmem:[%s4902_s5 + $0x28] sm:$0xff] %v3187_v21  }
 0x264   :  { %3204 = vst [vmem:[%s4902_s5 + $0x30] sm:$0xff] %v3192_v3   ;;  %3205 = vst [vmem:[%s4902_s5 + $0x38] sm:$0xff] %v3197_v24  }

// kernel: forward.6
= control target key start
LH: loop header
LB: loop body
LE: loop exit
PB: predicated region body
PF: predicated region fallthrough
CT: control target
= control target key end

     0   :  { %s2789_s1 = inlined_call_operand.vmem [shape: bf16[2048,128], index: 1, kind: input, shape index: {}]   ;;  %s2790_s0 = inlined_call_operand.vmem [shape: bf16[32,2048], index: 0, kind: input, shape index: {}]   ;;  %s2791_s2 = inlined_call_operand.vmem [shape: f32[1,128], index: 2, kind: input, shape index: {}]   ;;  %s2792_s3 = inlined_call_operand.vmem [shape: f32[1,128], index: 3, kind: input, shape index: {}]   ;;  %s2793_s4 = inlined_call_operand.vmem [shape: f32[1,128], index: 4, kind: input, shape index: {}]   ;;  %s2794_s5 = inlined_call_operand.vmem [shape: bf16[32,128], index: 5, kind: output, shape index: {}]  }
   0x1   :  { %v2134_v0 = vld [vmem:[%s2789_s1 + $0x40] sm:$0xff]   ;;  %v2138_v4 = vld [vmem:[%s2789_s1 + $0x48] sm:$0xff]   ;;  %v2142_v8 = vld [vmem:[%s2789_s1 + $0x50] sm:$0xff]  }
   0x2   :  { %v2135_v1 = vld [vmem:[%s2789_s1 + $0xc0] sm:$0xff]   ;;  %1910 = vmatprep.subr.bf16.mxu0 %v2134_v0  ;;  %v2139_v5 = vld [vmem:[%s2789_s1 + $0xc8] sm:$0xff]   ;;  %v2143_v9 = vld [vmem:[%s2789_s1 + $0xd0] sm:$0xff]  }
   0x3   :  { %v2136_v2 = vld [vmem:[%s2789_s1] sm:$0xff]   ;;  %1938 = vmatprep.subr.bf16.mxu1 %v2135_v1  ;;  %v2140_v6 = vld [vmem:[%s2789_s1 + $0x8] sm:$0xff]   ;;  %v2144_v10 = vld [vmem:[%s2789_s1 + $0x10] sm:$0xff]  }
   0x4   :  { %v2137_v3 = vld [vmem:[%s2789_s1 + $0x80] sm:$0xff]   ;;  %1911 = vmatpush3.bf16.msra.mxu0 %v2136_v2  ;;  %v2141_v7 = vld [vmem:[%s2789_s1 + $0x88] sm:$0xff]   ;;  %v2145_v11 = vld [vmem:[%s2789_s1 + $0x90] sm:$0xff]  }
   0x5   :  { %1939 = vmatpush3.bf16.msra.mxu1 %v2137_v3  ;;  %1912 = vmatprep.subr.bf16.mxu0 %v2138_v4  ;;  %v2146_v12 = vld [vmem:[%s2789_s1 + $0x58] sm:$0xff]   ;;  %v2150_v16 = vld [vmem:[%s2789_s1 + $0x60] sm:$0xff]   ;;  %v2154_v20 = vld [vmem:[%s2789_s1 + $0x68] sm:$0xff]  }
   0x6   :  { %1940 = vmatprep.subr.bf16.mxu1 %v2139_v5  ;;  %v2147_v13 = vld [vmem:[%s2789_s1 + $0xd8] sm:$0xff]   ;;  %v2151_v17 = vld [vmem:[%s2789_s1 + $0xe0] sm:$0xff]   ;;  %v2155_v21 = vld [vmem:[%s2789_s1 + $0xe8] sm:$0xff]  }
   0x7   :  { %v2148_v14 = vld [vmem:[%s2789_s1 + $0x18] sm:$0xff]   ;;  %v2152_v18 = vld [vmem:[%s2789_s1 + $0x20] sm:$0xff]   ;;  %v2156_v22 = vld [vmem:[%s2789_s1 + $0x28] sm:$0xff]  }
   0x8   :  { %1913 = vmatpush3.bf16.msra.mxu0 %v2140_v6  ;;  %v2149_v15 = vld [vmem:[%s2789_s1 + $0x98] sm:$0xff]   ;;  %v2153_v19 = vld [vmem:[%s2789_s1 + $0xa0] sm:$0xff]   ;;  %v2157_v23 = vld [vmem:[%s2789_s1 + $0xa8] sm:$0xff]  }
   0x9   :  { %1941 = vmatpush3.bf16.msra.mxu1 %v2141_v7  ;;  %1914 = vmatprep.subr.bf16.mxu0 %v2142_v8  ;;  %v2158_v24 = vld [vmem:[%s2789_s1 + $0x70] sm:$0xff]   ;;  %v2162_v28 = vld [vmem:[%s2789_s1 + $0x78] sm:$0xff]   ;;  %v21_v32 = vld [vmem:[%s2790_s0] sm:$0xff] }
   0xa   :  { %1942 = vmatprep.subr.bf16.mxu1 %v2143_v9  ;;  %v2159_v25 = vld [vmem:[%s2789_s1 + $0xf0] sm:$0xff]   ;;  %v2163_v29 = vld [vmem:[%s2789_s1 + $0xf8] sm:$0xff]   ;;  %v29_v33 = vld [vmem:[%s2790_s0 + $0x40] sm:$0xff] }
   0xb   :  { %v2160_v26 = vld [vmem:[%s2789_s1 + $0x30] sm:$0xff]   ;;  %v2164_v30 = vld [vmem:[%s2789_s1 + $0x38] sm:$0xff]   ;;  %v22_v34 = vld [vmem:[%s2790_s0 + $0x8] sm:$0xff]  ;;  %v1729_v35 = vcombine.low %v21_v32, %v29_v33  ;;  %v1730_v36 = vcombine.high %v21_v32, %v29_v33 }
   0xc   :  { %1915 = vmatpush3.bf16.msra.mxu0 %v2144_v10  ;;  %v2161_v27 = vld [vmem:[%s2789_s1 + $0xb0] sm:$0xff]   ;;  %v2165_v31 = vld [vmem:[%s2789_s1 + $0xb8] sm:$0xff]   ;;  %v30_v37 = vld [vmem:[%s2790_s0 + $0x48] sm:$0xff] }
   0xd   :  { %1943 = vmatpush3.bf16.msra.mxu1 %v2145_v11  ;;  %1916 = vmatprep.subr.bf16.mxu0 %v2146_v12  ;;  %v1731_v38 = vcombine.low %v22_v34, %v30_v37  ;;  %v1732_v39 = vcombine.high %v22_v34, %v30_v37  ;;  %v2166_v40 = vld [vmem:[%s2789_s1 + $0x140] sm:$0xff]   ;;  %v2170_v44 = vld [vmem:[%s2789_s1 + $0x148] sm:$0xff]   ;;  %v2174_v48 = vld [vmem:[%s2789_s1 + $0x150] sm:$0xff]  }
   0xe   :  { %1944 = vmatprep.subr.bf16.mxu1 %v2147_v13  ;;  %1276 = vmatprep.mubr.bf16.mxu0 %v1730_v36  ;;  %v2167_v41 = vld [vmem:[%s2789_s1 + $0x1c0] sm:$0xff]   ;;  %v2171_v45 = vld [vmem:[%s2789_s1 + $0x1c8] sm:$0xff]   ;;  %v2175_v49 = vld [vmem:[%s2789_s1 + $0x1d0] sm:$0xff]  }
   0xf   :  { %1325 = vmatprep.mubr.bf16.mxu1 %v1732_v39  ;;  %v2168_v42 = vld [vmem:[%s2789_s1 + $0x100] sm:$0xff]   ;;  %v2172_v46 = vld [vmem:[%s2789_s1 + $0x108] sm:$0xff]   ;;  %v2176_v50 = vld [vmem:[%s2789_s1 + $0x110] sm:$0xff]  }
  0x10   :  { %1917 = vmatpush3.bf16.msra.mxu0 %v2148_v14  ;;  %v2169_v43 = vld [vmem:[%s2789_s1 + $0x180] sm:$0xff]   ;;  %v2173_v47 = vld [vmem:[%s2789_s1 + $0x188] sm:$0xff]   ;;  %v2177_v51 = vld [vmem:[%s2789_s1 + $0x190] sm:$0xff]  }
  0x11   :  { %1945 = vmatpush3.bf16.msra.mxu1 %v2149_v15  ;;  %1918 = vmatprep.subr.bf16.mxu0 %v2150_v16  ;;  %v2178_v52 = vld [vmem:[%s2789_s1 + $0x158] sm:$0xff]   ;;  %v2182_v56 = vld [vmem:[%s2789_s1 + $0x160] sm:$0xff]   ;;  %v2186_v60 = vld [vmem:[%s2789_s1 + $0x168] sm:$0xff]  }
  0x12   :  { %1946 = vmatprep.subr.bf16.mxu1 %v2151_v17  ;;  %v2179_v53 = vld [vmem:[%s2789_s1 + $0x1d8] sm:$0xff]   ;;  %v2183_v57 = vld [vmem:[%s2789_s1 + $0x1e0] sm:$0xff]   ;;  %v2187_v61 = vld [vmem:[%s2789_s1 + $0x1e8] sm:$0xff]  }
  0x13   :  { %v2180_v54 = vld [vmem:[%s2789_s1 + $0x118] sm:$0xff]   ;;  %v2184_v58 = vld [vmem:[%s2789_s1 + $0x120] sm:$0xff]   ;;  %v2188_v1 = vld [vmem:[%s2789_s1 + $0x128] sm:$0xff]  }
  0x14   :  { %1919 = vmatpush3.bf16.msra.mxu0 %v2152_v18  ;;  %v2181_v55 = vld [vmem:[%s2789_s1 + $0x198] sm:$0xff]   ;;  %v2185_v59 = vld [vmem:[%s2789_s1 + $0x1a0] sm:$0xff]   ;;  %v2189_v3 = vld [vmem:[%s2789_s1 + $0x1a8] sm:$0xff]  }
  0x15   :  { %1947 = vmatpush3.bf16.msra.mxu1 %v2153_v19  ;;  %1920 = vmatprep.subr.bf16.mxu0 %v2154_v20  ;;  %v37_v62 = vld [vmem:[%s2790_s0 + $0x80] sm:$0xff]  ;;  %v38_v4 = vld [vmem:[%s2790_s0 + $0x88] sm:$0xff]  ;;  %v2190_v8 = vld [vmem:[%s2789_s1 + $0x170] sm:$0xff]  }
  0x16   :  { %1948 = vmatprep.subr.bf16.mxu1 %v2155_v21  ;;  %v45_v63 = vld [vmem:[%s2790_s0 + $0xc0] sm:$0xff]  ;;  %v46_v5 = vld [vmem:[%s2790_s0 + $0xc8] sm:$0xff]  ;;  %v2191_v9 = vld [vmem:[%s2789_s1 + $0x1f0] sm:$0xff]  }
  0x17   :  { %v1746_v0 = vcombine.high %v37_v62, %v45_v63  ;;  %v1745_v2 = vcombine.low %v37_v62, %v45_v63  ;;  %v1748_v6 = vcombine.high %v38_v4, %v46_v5  ;;  %v1747_v7 = vcombine.low %v38_v4, %v46_v5  ;;  %v2192_v10 = vld [vmem:[%s2789_s1 + $0x130] sm:$0xff]   ;;  %v2194_v12 = vld [vmem:[%s2789_s1 + $0x178] sm:$0xff]   ;;  %v26_v4 = vld [vmem:[%s2790_s0 + $0x28] sm:$0xff] }
  0x18   :  { %1921 = vmatpush3.bf16.msra.mxu0 %v2156_v22  ;;  %v2193_v11 = vld [vmem:[%s2789_s1 + $0x1b0] sm:$0xff]   ;;  %v2195_v13 = vld [vmem:[%s2789_s1 + $0x1f8] sm:$0xff]   ;;  %v34_v5 = vld [vmem:[%s2790_s0 + $0x68] sm:$0xff] }
  0x19   :  { %1949 = vmatpush3.bf16.msra.mxu1 %v2157_v23  ;;  %1922 = vmatprep.subr.bf16.mxu0 %v2158_v24  ;;  %v2196_v14 = vld [vmem:[%s2789_s1 + $0x138] sm:$0xff]   ;;  %v23_v16 = vld [vmem:[%s2790_s0 + $0x10] sm:$0xff]  ;;  %v2198_v24 = vld [vmem:[%s2789_s1 + $0x240] sm:$0xff]  }
  0x1a   :  { %1950 = vmatprep.subr.bf16.mxu1 %v2159_v25  ;;  %v2197_v15 = vld [vmem:[%s2789_s1 + $0x1b8] sm:$0xff]   ;;  %v31_v17 = vld [vmem:[%s2790_s0 + $0x50] sm:$0xff]  ;;  %v2199_v25 = vld [vmem:[%s2789_s1 + $0x2c0] sm:$0xff]  }
  0x1b   :  { %v24_v18 = vld [vmem:[%s2790_s0 + $0x18] sm:$0xff]  ;;  %v1733_v20 = vcombine.low %v23_v16, %v31_v17  ;;  %v1734_v21 = vcombine.high %v23_v16, %v31_v17  ;;  %v39_v32 = vld [vmem:[%s2790_s0 + $0x90] sm:$0xff]  ;;  %v41_v16 = vld [vmem:[%s2790_s0 + $0xa0] sm:$0xff] }
  0x1c   :  { %1923 = vmatpush3.bf16.msra.mxu0 %v2160_v26  ;;  %v32_v19 = vld [vmem:[%s2790_s0 + $0x58] sm:$0xff]  ;;  %v2200_v26 = vld [vmem:[%s2789_s1 + $0x200] sm:$0xff]   ;;  %v47_v33 = vld [vmem:[%s2790_s0 + $0xd0] sm:$0xff] }
  0x1d   :  { %1951 = vmatpush3.bf16.msra.mxu1 %v2161_v27  ;;  %1924 = vmatprep.subr.bf16.mxu0 %v2162_v28  ;;  %v1735_v22 = vcombine.low %v24_v18, %v32_v19  ;;  %v1736_v23 = vcombine.high %v24_v18, %v32_v19  ;;  %v2201_v27 = vld [vmem:[%s2789_s1 + $0x280] sm:$0xff]   ;;  %v2202_v28 = vld [vmem:[%s2789_s1 + $0x248] sm:$0xff]   ;;  %v1750_v34 = vcombine.high %v39_v32, %v47_v33  ;;  %v2206_v36 = vld [vmem:[%s2789_s1 + $0x250] sm:$0xff]  }
  0x1e   :  { %1952 = vmatprep.subr.bf16.mxu1 %v2163_v29  ;;  %v2203_v29 = vld [vmem:[%s2789_s1 + $0x2c8] sm:$0xff]   ;;  %v2207_v37 = vld [vmem:[%s2789_s1 + $0x2d0] sm:$0xff]   ;;  %v48_v39 = vld [vmem:[%s2790_s0 + $0xd8] sm:$0xff] }
  0x1f   :  { %v2228_v62 = vld [vmem:[%s2789_s1 + $0x238] sm:$0xff]   ;;  %v49_v17 = vld [vmem:[%s2790_s0 + $0xe0] sm:$0xff] }
  0x20   :  { %1925 = vmatpush3.bf16.msra.mxu0 %v2164_v30  ;;  %v2204_v30 = vld [vmem:[%s2789_s1 + $0x208] sm:$0xff]   ;;  %v2229_v63 = vld [vmem:[%s2789_s1 + $0x2b8] sm:$0xff]   ;;  %v1754_v18 = vcombine.high %v41_v16, %v49_v17  ;;  %v1753_v19 = vcombine.low %v41_v16, %v49_v17 }
  0x21   :  { %1953 = vmatpush3.bf16.msra.mxu1 %v2165_v31  ;;  %1966 = vmatprep.subr.bf16.mxu0 %v2166_v40  ;;  %v2205_v31 = vld [vmem:[%s2789_s1 + $0x288] sm:$0xff]  }
  0x22   :  { %1994 = vmatprep.subr.bf16.mxu1 %v2167_v41  ;;  %v2208_v41 = vld [vmem:[%s2789_s1 + $0x210] sm:$0xff]  }
  0x23   :  { %1277 = vmatmul.mubr.bf16.vlgmr.msra.gmra.mrb[0].mxu0 %v1729_v35  ;;  %v1749_v35 = vcombine.low %v39_v32, %v47_v33  ;;  %v2246_v32 = vld [vmem:[%s2789_s1 + $0x360] sm:$0xff]  }
  0x24   :  { %1326 = vmatmul.mubr.bf16.vlgmr.msra.gmra.mrb[0].mxu1 %v1731_v38  ;;  %1967 = vmatpush3.bf16.msra.mxu0 %v2168_v42  ;;  %v40_v38 = vld [vmem:[%s2790_s0 + $0x98] sm:$0xff]  ;;  %v2247_v33 = vld [vmem:[%s2789_s1 + $0x3e0] sm:$0xff]  }
  0x25   :  { %1995 = vmatpush3.bf16.msra.mxu1 %v2169_v43  ;;  %1968 = vmatprep.subr.bf16.mxu0 %v2170_v44  ;;  %v1752_v40 = vcombine.high %v40_v38, %v48_v39  ;;  %v1751_v42 = vcombine.low %v40_v38, %v48_v39  ;;  %v2209_v43 = vld [vmem:[%s2789_s1 + $0x290] sm:$0xff]   ;;  %v2210_v44 = vld [vmem:[%s2789_s1 + $0x258] sm:$0xff]   ;;  %v2252_v38 = vld [vmem:[%s2789_s1 + $0x328] sm:$0xff]  }
  0x26   :  { %1996 = vmatprep.subr.bf16.mxu1 %v2171_v45  ;;  %1284 = vmatprep.mubr.bf16.mxu0 %v1746_v0  ;;  %v2211_v45 = vld [vmem:[%s2789_s1 + $0x2d8] sm:$0xff]   ;;  %v25_v0 = vld [vmem:[%s2790_s0 + $0x20] sm:$0xff]  ;;  %v2253_v39 = vld [vmem:[%s2789_s1 + $0x3a8] sm:$0xff]  }
  0x27   :  { %1333 = vmatprep.mubr.bf16.mxu1 %v1748_v6  ;;  %v1739_v6 = vcombine.low %v26_v4, %v34_v5 }
  0x28   :  { %1969 = vmatpush3.bf16.msra.mxu0 %v2172_v46  ;;  %v2212_v46 = vld [vmem:[%s2789_s1 + $0x218] sm:$0xff]  }
  0x29   :  { %1997 = vmatpush3.bf16.msra.mxu1 %v2173_v47  ;;  %1970 = vmatprep.subr.bf16.mxu0 %v2174_v48  ;;  %v2213_v47 = vld [vmem:[%s2789_s1 + $0x298] sm:$0xff]   ;;  %v2214_v48 = vld [vmem:[%s2789_s1 + $0x260] sm:$0xff]  }
  0x2a   :  { %1998 = vmatprep.subr.bf16.mxu1 %v2175_v49  ;;  %v2215_v49 = vld [vmem:[%s2789_s1 + $0x2e0] sm:$0xff]  }
  0x2b   :  { %1285 = vmatmul.mubr.bf16.gmra.mrb[4].mxu0 %v1745_v2 }
  0x2c   :  { %1971 = vmatpush3.bf16.msra.mxu0 %v2176_v50  ;;  %1334 = vmatmul.mubr.bf16.gmra.mrb[4].mxu1 %v1747_v7  ;;  %v2216_v50 = vld [vmem:[%s2789_s1 + $0x220] sm:$0xff]   ;;  %v1740_v7 = vcombine.high %v26_v4, %v34_v5 }
  0x2d   :  { %1999 = vmatpush3.bf16.msra.mxu1 %v2177_v51  ;;  %1972 = vmatprep.subr.bf16.mxu0 %v2178_v52  ;;  %v2217_v51 = vld [vmem:[%s2789_s1 + $0x2a0] sm:$0xff]   ;;  %v2218_v52 = vld [vmem:[%s2789_s1 + $0x268] sm:$0xff]  }
  0x2e   :  { %2000 = vmatprep.subr.bf16.mxu1 %v2179_v53  ;;  %1374 = vmatprep.mubr.bf16.mxu0 %v1734_v21  ;;  %v2219_v53 = vld [vmem:[%s2789_s1 + $0x2e8] sm:$0xff]   ;;  %v2239_v21 = vld [vmem:[%s2789_s1 + $0x3d0] sm:$0xff]  }
  0x2f   :  { %1423 = vmatprep.mubr.bf16.mxu1 %v1736_v23  ;;  %v50_v23 = vld [vmem:[%s2790_s0 + $0xe8] sm:$0xff] }
  0x30   :  { %1973 = vmatpush3.bf16.msra.mxu0 %v2180_v54  ;;  %v2220_v54 = vld [vmem:[%s2789_s1 + $0x228] sm:$0xff]  }
  0x31   :  { %2001 = vmatpush3.bf16.msra.mxu1 %v2181_v55  ;;  %1974 = vmatprep.subr.bf16.mxu0 %v2182_v56  ;;  %v2221_v55 = vld [vmem:[%s2789_s1 + $0x2a8] sm:$0xff]   ;;  %v2222_v56 = vld [vmem:[%s2789_s1 + $0x270] sm:$0xff]  }
  0x32   :  { %2002 = vmatprep.subr.bf16.mxu1 %v2183_v57  ;;  %v2223_v57 = vld [vmem:[%s2789_s1 + $0x2f0] sm:$0xff]  }
  0x34   :  { %1975 = vmatpush3.bf16.msra.mxu0 %v2184_v58  ;;  %v2224_v58 = vld [vmem:[%s2789_s1 + $0x230] sm:$0xff]  }
  0x35   :  { %2003 = vmatpush3.bf16.msra.mxu1 %v2185_v59  ;;  %1976 = vmatprep.subr.bf16.mxu0 %v2186_v60  ;;  %v2225_v59 = vld [vmem:[%s2789_s1 + $0x2b0] sm:$0xff]   ;;  %v2226_v60 = vld [vmem:[%s2789_s1 + $0x278] sm:$0xff]  }
  0x36   :  { %2004 = vmatprep.subr.bf16.mxu1 %v2187_v61  ;;  %v2227_v61 = vld [vmem:[%s2789_s1 + $0x2f8] sm:$0xff]  }
  0x38   :  { %1977 = vmatpush3.bf16.msra.mxu0 %v2188_v1  ;;  %v33_v1 = vld [vmem:[%s2790_s0 + $0x60] sm:$0xff] }
  0x39   :  { %2005 = vmatpush3.bf16.msra.mxu1 %v2189_v3  ;;  %1978 = vmatprep.subr.bf16.mxu0 %v2190_v8  ;;  %v1737_v2 = vcombine.low %v25_v0, %v33_v1  ;;  %v1738_v3 = vcombine.high %v25_v0, %v33_v1  ;;  %v2230_v8 = vld [vmem:[%s2789_s1 + $0x340] sm:$0xff]  }
  0x3a   :  { %2006 = vmatprep.subr.bf16.mxu1 %v2191_v9  ;;  %v2231_v9 = vld [vmem:[%s2789_s1 + $0x3c0] sm:$0xff]  }
  0x3c   :  { %1979 = vmatpush3.bf16.msra.mxu0 %v2192_v10  ;;  %v2232_v10 = vld [vmem:[%s2789_s1 + $0x300] sm:$0xff]  }
  0x3d   :  { %2007 = vmatpush3.bf16.msra.mxu1 %v2193_v11  ;;  %1980 = vmatprep.subr.bf16.mxu0 %v2194_v12  ;;  %v2233_v11 = vld [vmem:[%s2789_s1 + $0x380] sm:$0xff]   ;;  %v2234_v12 = vld [vmem:[%s2789_s1 + $0x348] sm:$0xff]  }
  0x3e   :  { %2008 = vmatprep.subr.bf16.mxu1 %v2195_v13  ;;  %v2235_v13 = vld [vmem:[%s2789_s1 + $0x3c8] sm:$0xff]  }
  0x40   :  { %1981 = vmatpush3.bf16.msra.mxu0 %v2196_v14  ;;  %v2236_v14 = vld [vmem:[%s2789_s1 + $0x308] sm:$0xff]  }
  0x41   :  { %2009 = vmatpush3.bf16.msra.mxu1 %v2197_v15  ;;  %2022 = vmatprep.subr.bf16.mxu0 %v2198_v24  ;;  %v2237_v15 = vld [vmem:[%s2789_s1 + $0x388] sm:$0xff]  }
  0x42   :  { %2050 = vmatprep.subr.bf16.mxu1 %v2199_v25  ;;  %v2240_v25 = vld [vmem:[%s2789_s1 + $0x310] sm:$0xff]  }
  0x43   :  { %1375 = vmatmul.mubr.bf16.vlgmr.msra.gmra.mrb[8].mxu0 %v1733_v20  ;;  %v2238_v20 = vld [vmem:[%s2789_s1 + $0x350] sm:$0xff]  }
  0x44   :  { %1424 = vmatmul.mubr.bf16.vlgmr.msra.gmra.mrb[8].mxu1 %v1735_v22  ;;  %2023 = vmatpush3.bf16.msra.mxu0 %v2200_v26  ;;  %v42_v22 = vld [vmem:[%s2790_s0 + $0xa8] sm:$0xff] }
  0x45   :  { %2051 = vmatpush3.bf16.msra.mxu1 %v2201_v27  ;;  %2024 = vmatprep.subr.bf16.mxu0 %v2202_v28  ;;  %v1756_v24 = vcombine.high %v42_v22, %v50_v23  ;;  %v1755_v26 = vcombine.low %v42_v22, %v50_v23  ;;  %v2241_v27 = vld [vmem:[%s2789_s1 + $0x390] sm:$0xff]   ;;  %v2242_v28 = vld [vmem:[%s2789_s1 + $0x358] sm:$0xff]  }
  0x46   :  { %2052 = vmatprep.subr.bf16.mxu1 %v2203_v29  ;;  %1382 = vmatprep.mubr.bf16.mxu0 %v1750_v34  ;;  %v2243_v29 = vld [vmem:[%s2789_s1 + $0x3d8] sm:$0xff]   ;;  %v2248_v34 = vld [vmem:[%s2789_s1 + $0x320] sm:$0xff]  }
  0x47   :  { %1431 = vmatprep.mubr.bf16.mxu1 %v1752_v40  ;;  %v2254_v40 = vld [vmem:[%s2789_s1 + $0x370] sm:$0xff]  }
  0x48   :  { %2025 = vmatpush3.bf16.msra.mxu0 %v2204_v30  ;;  %v2244_v30 = vld [vmem:[%s2789_s1 + $0x318] sm:$0xff]  }
  0x49   :  { %2053 = vmatpush3.bf16.msra.mxu1 %v2205_v31  ;;  %2026 = vmatprep.subr.bf16.mxu0 %v2206_v36  ;;  %v2245_v31 = vld [vmem:[%s2789_s1 + $0x398] sm:$0xff]   ;;  %v2250_v36 = vld [vmem:[%s2789_s1 + $0x368] sm:$0xff]  }
  0x4a   :  { %2054 = vmatprep.subr.bf16.mxu1 %v2207_v37  ;;  %v2251_v37 = vld [vmem:[%s2789_s1 + $0x3e8] sm:$0xff]  }
  0x4b   :  { %1383 = vmatmul.mubr.bf16.gmra.mrb[12].mxu0 %v1749_v35  ;;  %v2249_v35 = vld [vmem:[%s2789_s1 + $0x3a0] sm:$0xff]  }
  0x4c   :  { %2027 = vmatpush3.bf16.msra.mxu0 %v2208_v41  ;;  %1432 = vmatmul.mubr.bf16.gmra.mrb[12].mxu1 %v1751_v42  ;;  %v2255_v41 = vld [vmem:[%s2789_s1 + $0x3f0] sm:$0xff]  }
  0x4d   :  { %2055 = vmatpush3.bf16.msra.mxu1 %v2209_v43  ;;  %2028 = vmatprep.subr.bf16.mxu0 %v2210_v44  ;;  %v2256_v42 = vld [vmem:[%s2789_s1 + $0x330] sm:$0xff]   ;;  %v2258_v44 = vld [vmem:[%s2789_s1 + $0x378] sm:$0xff]  }
  0x4e   :  { %2056 = vmatprep.subr.bf16.mxu1 %v2211_v45  ;;  %1472 = vmatprep.mubr.bf16.mxu0 %v1738_v3  ;;  %v2257_v43 = vld [vmem:[%s2789_s1 + $0x3b0] sm:$0xff]   ;;  %v2259_v45 = vld [vmem:[%s2789_s1 + $0x3f8] sm:$0xff]  }
  0x4f   :  { %1521 = vmatprep.mubr.bf16.mxu1 %v1740_v7 }
  0x50   :  { %2029 = vmatpush3.bf16.msra.mxu0 %v2212_v46  ;;  %v2260_v46 = vld [vmem:[%s2789_s1 + $0x338] sm:$0xff]  }
  0x51   :  { %2057 = vmatpush3.bf16.msra.mxu1 %v2213_v47  ;;  %2030 = vmatprep.subr.bf16.mxu0 %v2214_v48  ;;  %v2261_v47 = vld [vmem:[%s2789_s1 + $0x3b8] sm:$0xff]   ;;  %v27_v48 = vld [vmem:[%s2790_s0 + $0x30] sm:$0xff] }
  0x52   :  { %2058 = vmatprep.subr.bf16.mxu1 %v2215_v49  ;;  %v35_v49 = vld [vmem:[%s2790_s0 + $0x70] sm:$0xff] }
  0x54   :  { %2031 = vmatpush3.bf16.msra.mxu0 %v2216_v50  ;;  %v28_v50 = vld [vmem:[%s2790_s0 + $0x38] sm:$0xff] }
  0x55   :  { %2059 = vmatpush3.bf16.msra.mxu1 %v2217_v51  ;;  %2032 = vmatprep.subr.bf16.mxu0 %v2218_v52  ;;  %v1741_v51 = vcombine.low %v27_v48, %v35_v49  ;;  %v1742_v52 = vcombine.high %v27_v48, %v35_v49 }
  0x56   :  { %2060 = vmatprep.subr.bf16.mxu1 %v2219_v53  ;;  %v36_v53 = vld [vmem:[%s2790_s0 + $0x78] sm:$0xff] }
  0x58   :  { %2033 = vmatpush3.bf16.msra.mxu0 %v2220_v54  ;;  %v43_v54 = vld [vmem:[%s2790_s0 + $0xb0] sm:$0xff] }
  0x59   :  { %2061 = vmatpush3.bf16.msra.mxu1 %v2221_v55  ;;  %2034 = vmatprep.subr.bf16.mxu0 %v2222_v56  ;;  %v51_v55 = vld [vmem:[%s2790_s0 + $0xf0] sm:$0xff]  ;;  %v1743_v56 = vcombine.low %v28_v50, %v36_v53 }
  0x5a   :  { %2062 = vmatprep.subr.bf16.mxu1 %v2223_v57  ;;  %v1744_v57 = vcombine.high %v28_v50, %v36_v53 }
  0x5c   :  { %2035 = vmatpush3.bf16.msra.mxu0 %v2224_v58  ;;  %v1758_v58 = vcombine.high %v43_v54, %v51_v55 }
  0x5d   :  { %2063 = vmatpush3.bf16.msra.mxu1 %v2225_v59  ;;  %2036 = vmatprep.subr.bf16.mxu0 %v2226_v60  ;;  %v44_v59 = vld [vmem:[%s2790_s0 + $0xb8] sm:$0xff] }
  0x5e   :  { %2064 = vmatprep.subr.bf16.mxu1 %v2227_v61  ;;  %v52_v60 = vld [vmem:[%s2790_s0 + $0xf8] sm:$0xff] }
  0x5f   :  { %v1760_v61 = vcombine.high %v44_v59, %v52_v60 }
  0x60   :  { %2037 = vmatpush3.bf16.msra.mxu0 %v2228_v62  ;;  %v1757_v62 = vcombine.low %v43_v54, %v51_v55 }
  0x61   :  { %2065 = vmatpush3.bf16.msra.mxu1 %v2229_v63  ;;  %2078 = vmatprep.subr.bf16.mxu0 %v2230_v8  ;;  %v1759_v63 = vcombine.low %v44_v59, %v52_v60 }
  0x62   :  { %2106 = vmatprep.subr.bf16.mxu1 %v2231_v9 }
  0x63   :  { %1473 = vmatmul.mubr.bf16.vlgmr.msra.gmra.mrb[16].mxu0 %v1737_v2  ;;  %v1728_v2 = vld [vmem:[%s2791_s2] ss:$0 sm:$0xff] }
  0x64   :  { %1522 = vmatmul.mubr.bf16.vlgmr.msra.gmra.mrb[16].mxu1 %v1739_v6  ;;  %2079 = vmatpush3.bf16.msra.mxu0 %v2232_v10 }
  0x65   :  { %2107 = vmatpush3.bf16.msra.mxu1 %v2233_v11  ;;  %2080 = vmatprep.subr.bf16.mxu0 %v2234_v12 }
  0x66   :  { %2108 = vmatprep.subr.bf16.mxu1 %v2235_v13  ;;  %1480 = vmatprep.mubr.bf16.mxu0 %v1754_v18 }
  0x67   :  { %1529 = vmatprep.mubr.bf16.mxu1 %v1756_v24 }
  0x68   :  { %2081 = vmatpush3.bf16.msra.mxu0 %v2236_v14 }
  0x69   :  { %2109 = vmatpush3.bf16.msra.mxu1 %v2237_v15  ;;  %2082 = vmatprep.subr.bf16.mxu0 %v2238_v20 }
  0x6a   :  { %2110 = vmatprep.subr.bf16.mxu1 %v2239_v21 }
  0x6b   :  { %1481 = vmatmul.mubr.bf16.gmra.mrb[20].mxu0 %v1753_v19 }
  0x6c   :  { %2083 = vmatpush3.bf16.msra.mxu0 %v2240_v25  ;;  %1530 = vmatmul.mubr.bf16.gmra.mrb[20].mxu1 %v1755_v26 }
  0x6d   :  { %2111 = vmatpush3.bf16.msra.mxu1 %v2241_v27  ;;  %2084 = vmatprep.subr.bf16.mxu0 %v2242_v28 }
  0x6e   :  { %2112 = vmatprep.subr.bf16.mxu1 %v2243_v29  ;;  %1570 = vmatprep.mubr.bf16.mxu0 %v1742_v52 }
  0x6f   :  { %1619 = vmatprep.mubr.bf16.mxu1 %v1744_v57 }
  0x70   :  { %2085 = vmatpush3.bf16.msra.mxu0 %v2244_v30 }
  0x71   :  { %2113 = vmatpush3.bf16.msra.mxu1 %v2245_v31  ;;  %2086 = vmatprep.subr.bf16.mxu0 %v2246_v32 }
  0x72   :  { %2114 = vmatprep.subr.bf16.mxu1 %v2247_v33 }
  0x74   :  { %2087 = vmatpush3.bf16.msra.mxu0 %v2248_v34 }
  0x75   :  { %2115 = vmatpush3.bf16.msra.mxu1 %v2249_v35  ;;  %2088 = vmatprep.subr.bf16.mxu0 %v2250_v36 }
  0x76   :  { %2116 = vmatprep.subr.bf16.mxu1 %v2251_v37 }
  0x78   :  { %2089 = vmatpush3.bf16.msra.mxu0 %v2252_v38 }
  0x79   :  { %2117 = vmatpush3.bf16.msra.mxu1 %v2253_v39  ;;  %2090 = vmatprep.subr.bf16.mxu0 %v2254_v40 }
  0x7a   :  { %2118 = vmatprep.subr.bf16.mxu1 %v2255_v41 }
  0x7c   :  { %2091 = vmatpush3.bf16.msra.mxu0 %v2256_v42 }
  0x7d   :  { %2119 = vmatpush3.bf16.msra.mxu1 %v2257_v43  ;;  %2092 = vmatprep.subr.bf16.mxu0 %v2258_v44 }
  0x7e   :  { %2120 = vmatprep.subr.bf16.mxu1 %v2259_v45 }
  0x80   :  { %2093 = vmatpush3.bf16.msra.mxu0 %v2260_v46 }
  0x81   :  { %2121 = vmatpush3.bf16.msra.mxu1 %v2261_v47 }
  0x83   :  { %1571 = vmatmul.mubr.bf16.vlgmr.msra.gmra.mrb[24].mxu0 %v1741_v51 }
  0x84   :  { %1620 = vmatmul.mubr.bf16.vlgmr.msra.gmra.mrb[24].mxu1 %v1743_v56  ;;  %1578 = vmatprep.mubr.bf16.mxu0 %v1758_v58 }
  0x85   :  { %1627 = vmatprep.mubr.bf16.mxu1 %v1760_v61 }
  0x8b   :  { %1579 = vmatmul.mubr.bf16.gmra.mrb[28].mxu0 %v1757_v62 }
  0x8c   :  { %1628 = vmatmul.mubr.bf16.gmra.mrb[28].mxu1 %v1759_v63 }
  0xf6   :  { %v1926_v0 = vpop.f32.mrb[0].mxu0 }
  0xf7   :  { %v1954_v1 = vpop.f32.mrb[0].mxu1  ;;  %v1927_v3 = vpop.f32.mrb[1].mxu0 }
  0xf8   :  { %v1928_v4 = vadd.f32 %v1927_v3, %v1926_v0  ;;  %v1955_v5 = vpop.f32.mrb[1].mxu1  ;;  %v1929_v6 = vpop.f32.mrb[2].mxu0 }
  0xf9   :  { %v1956_v7 = vadd.f32 %v1955_v5, %v1954_v1  ;;  %v1957_v8 = vpop.f32.mrb[2].mxu1  ;;  %v1930_v9 = vpop.f32.mrb[3].mxu0 }
  0xfa   :  { %v1279_v10 = vadd.f32 %v1928_v4, %v1728_v2  ;;  %v1931_v11 = vadd.f32 %v1930_v9, %v1929_v6  ;;  %v1958_v12 = vpop.f32.mrb[3].mxu1 }
  0xfb   :  { %v1959_v13 = vadd.f32 %v1958_v12, %v1957_v8 }
  0xfc   :  { %v1328_v14 = vadd.f32 %v1956_v7, %v1279_v10  ;;  %v1282_v15 = vadd.f32 %v1931_v11, %v1728_v2 }
  0xfe   :  { %v1331_v16 = vadd.f32 %v1959_v13, %v1282_v15  ;;  %v1932_v17 = vpop.f32.mrb[4].mxu0 }
  0xff   :  { %v1933_v18 = vpop.f32.mrb[5].mxu0  ;;  %v1960_v21 = vpop.f32.mrb[4].mxu1 }
 0x100   :  { %v1934_v19 = vadd.f32 %v1933_v18, %v1932_v17  ;;  %v1935_v20 = vpop.f32.mrb[6].mxu0  ;;  %v1961_v25 = vpop.f32.mrb[5].mxu1 }
 0x101   :  { %v1936_v22 = vpop.f32.mrb[7].mxu0  ;;  %v1962_v26 = vadd.f32 %v1961_v25, %v1960_v21  ;;  %v1963_v27 = vpop.f32.mrb[6].mxu1 }
 0x102   :  { %v1287_v23 = vadd.f32 %v1934_v19, %v1728_v2  ;;  %v1937_v24 = vadd.f32 %v1936_v22, %v1935_v20  ;;  %v1964_v29 = vpop.f32.mrb[7].mxu1 }
 0x103   :  { %v1965_v31 = vadd.f32 %v1964_v29, %v1963_v27 }
 0x104   :  { %v1290_v28 = vadd.f32 %v1937_v24, %v1728_v2  ;;  %v1336_v30 = vadd.f32 %v1962_v26, %v1287_v23 }
 0x106   :  { %v1339_v32 = vadd.f32 %v1965_v31, %v1290_v28 }
 0x116   :  { %v1982_v33 = vpop.f32.mrb[8].mxu0 }
 0x117   :  { %v2010_v34 = vpop.f32.mrb[8].mxu1  ;;  %v1983_v35 = vpop.f32.mrb[9].mxu0 }
 0x118   :  { %v2011_v36 = vpop.f32.mrb[9].mxu1  ;;  %v1984_v37 = vadd.f32 %v1983_v35, %v1982_v33  ;;  %v1985_v39 = vpop.f32.mrb[10].mxu0 }
 0x119   :  { %v2012_v38 = vadd.f32 %v2011_v36, %v2010_v34  ;;  %v2013_v40 = vpop.f32.mrb[10].mxu1  ;;  %v1986_v41 = vpop.f32.mrb[11].mxu0 }
 0x11a   :  { %v2014_v42 = vpop.f32.mrb[11].mxu1  ;;  %v1377_v43 = vadd.f32 %v1984_v37, %v1328_v14  ;;  %v1987_v44 = vadd.f32 %v1986_v41, %v1985_v39 }
 0x11b   :  { %v2015_v45 = vadd.f32 %v2014_v42, %v2013_v40 }
 0x11c   :  { %v1426_v46 = vadd.f32 %v2012_v38, %v1377_v43  ;;  %v1380_v47 = vadd.f32 %v1987_v44, %v1331_v16 }
 0x11e   :  { %v1429_v48 = vadd.f32 %v2015_v45, %v1380_v47  ;;  %v1988_v49 = vpop.f32.mrb[12].mxu0 }
 0x11f   :  { %v1989_v50 = vpop.f32.mrb[13].mxu0  ;;  %v2016_v55 = vpop.f32.mrb[12].mxu1 }
 0x120   :  { %v1990_v51 = vadd.f32 %v1989_v50, %v1988_v49  ;;  %v1991_v52 = vpop.f32.mrb[14].mxu0  ;;  %v2017_v57 = vpop.f32.mrb[13].mxu1 }
 0x121   :  { %v1992_v53 = vpop.f32.mrb[15].mxu0  ;;  %v2018_v59 = vadd.f32 %v2017_v57, %v2016_v55  ;;  %v2019_v60 = vpop.f32.mrb[14].mxu1 }
 0x122   :  { %v1385_v54 = vadd.f32 %v1990_v51, %v1336_v30  ;;  %v1993_v56 = vadd.f32 %v1992_v53, %v1991_v52  ;;  %v2020_v61 = vpop.f32.mrb[15].mxu1 }
 0x123   :  { %v2021_v63 = vadd.f32 %v2020_v61, %v2019_v60 }
 0x124   :  { %v1388_v58 = vadd.f32 %v1993_v56, %v1339_v32  ;;  %v1434_v62 = vadd.f32 %v2018_v59, %v1385_v54 }
 0x126   :  { %v1437_v0 = vadd.f32 %v2021_v63, %v1388_v58 }
 0x136   :  { %v2038_v1 = vpop.f32.mrb[16].mxu0 }
 0x137   :  { %v2066_v2 = vpop.f32.mrb[16].mxu1  ;;  %v2039_v3 = vpop.f32.mrb[17].mxu0 }
 0x138   :  { %v2040_v4 = vadd.f32 %v2039_v3, %v2038_v1  ;;  %v2067_v5 = vpop.f32.mrb[17].mxu1  ;;  %v2041_v6 = vpop.f32.mrb[18].mxu0 }
 0x139   :  { %v2068_v7 = vadd.f32 %v2067_v5, %v2066_v2  ;;  %v2069_v8 = vpop.f32.mrb[18].mxu1  ;;  %v2042_v9 = vpop.f32.mrb[19].mxu0 }
 0x13a   :  { %v1475_v10 = vadd.f32 %v2040_v4, %v1426_v46  ;;  %v2043_v11 = vadd.f32 %v2042_v9, %v2041_v6  ;;  %v2070_v12 = vpop.f32.mrb[19].mxu1 }
 0x13b   :  { %v2071_v13 = vadd.f32 %v2070_v12, %v2069_v8 }
 0x13c   :  { %v1524_v14 = vadd.f32 %v2068_v7, %v1475_v10  ;;  %v1478_v15 = vadd.f32 %v2043_v11, %v1429_v48 }
 0x13e   :  { %v1527_v16 = vadd.f32 %v2071_v13, %v1478_v15  ;;  %v2044_v17 = vpop.f32.mrb[20].mxu0 }
 0x13f   :  { %v2045_v18 = vpop.f32.mrb[21].mxu0  ;;  %v2072_v21 = vpop.f32.mrb[20].mxu1 }
 0x140   :  { %v2046_v19 = vadd.f32 %v2045_v18, %v2044_v17  ;;  %v2047_v20 = vpop.f32.mrb[22].mxu0  ;;  %v2073_v25 = vpop.f32.mrb[21].mxu1 }
 0x141   :  { %v2048_v22 = vpop.f32.mrb[23].mxu0  ;;  %v2074_v26 = vadd.f32 %v2073_v25, %v2072_v21  ;;  %v2075_v27 = vpop.f32.mrb[22].mxu1 }
 0x142   :  { %v1483_v23 = vadd.f32 %v2046_v19, %v1434_v62  ;;  %v2049_v24 = vadd.f32 %v2048_v22, %v2047_v20  ;;  %v2076_v29 = vpop.f32.mrb[23].mxu1 }
 0x143   :  { %v2077_v31 = vadd.f32 %v2076_v29, %v2075_v27 }
 0x144   :  { %v1486_v28 = vadd.f32 %v2049_v24, %v1437_v0  ;;  %v1532_v30 = vadd.f32 %v2074_v26, %v1483_v23 }
 0x146   :  { %v1535_v32 = vadd.f32 %v2077_v31, %v1486_v28  ;;  %v1889_v31 = vld [vmem:[%s2792_s3] ss:$0 sm:$0xff] }
 0x156   :  { %v2094_v33 = vpop.f32.mrb[24].mxu0 }
 0x157   :  { %v2122_v34 = vpop.f32.mrb[24].mxu1  ;;  %v2095_v35 = vpop.f32.mrb[25].mxu0 }
 0x158   :  { %v2096_v36 = vadd.f32 %v2095_v35, %v2094_v33  ;;  %v2123_v37 = vpop.f32.mrb[25].mxu1  ;;  %v2097_v38 = vpop.f32.mrb[26].mxu0 }
 0x159   :  { %v2124_v39 = vadd.f32 %v2123_v37, %v2122_v34  ;;  %v2125_v40 = vpop.f32.mrb[26].mxu1  ;;  %v2098_v41 = vpop.f32.mrb[27].mxu0 }
 0x15a   :  { %v1573_v42 = vadd.f32 %v2096_v36, %v1524_v14  ;;  %v2099_v43 = vadd.f32 %v2098_v41, %v2097_v38  ;;  %v2126_v44 = vpop.f32.mrb[27].mxu1  ;;  %v1890_v36 = vld [vmem:[%s2793_s4] ss:$0 sm:$0xff] }
 0x15b   :  { %v2127_v45 = vadd.f32 %v2126_v44, %v2125_v40 }
 0x15c   :  { %v1622_v46 = vadd.f32 %v2124_v39, %v1573_v42  ;;  %v1576_v47 = vadd.f32 %v2099_v43, %v1527_v16 }
 0x15e   :  { %v1625_v48 = vadd.f32 %v2127_v45, %v1576_v47  ;;  %v2100_v49 = vpop.f32.mrb[28].mxu0 }
 0x15f   :  { %v2128_v50 = vpop.f32.mrb[28].mxu1  ;;  %v2101_v51 = vpop.f32.mrb[29].mxu0 }
 0x160   :  { %v1636_v52 = vadd.f32 %v1625_v48, %v1622_v46  ;;  %v2102_v53 = vadd.f32 %v2101_v51, %v2100_v49  ;;  %v2129_v54 = vpop.f32.mrb[29].mxu1  ;;  %v2103_v55 = vpop.f32.mrb[30].mxu0 }
 0x161   :  { %v2130_v56 = vadd.f32 %v2129_v54, %v2128_v50  ;;  %v2131_v57 = vpop.f32.mrb[30].mxu1  ;;  %v2104_v58 = vpop.f32.mrb[31].mxu0 }
 0x162   :  { %v1581_v59 = vadd.f32 %v2102_v53, %v1532_v30  ;;  %v2105_v60 = vadd.f32 %v2104_v58, %v2103_v55  ;;  %v2132_v61 = vpop.f32.mrb[31].mxu1 }
 0x163   :  { %v2133_v62 = vadd.f32 %v2132_v61, %v2131_v57 }
 0x164   :  { %v1630_v63 = vadd.f32 %v2130_v56, %v1581_v59  ;;  %v1584_v0 = vadd.f32 %v2105_v60, %v1535_v32 }
 0x166   :  { %v1637_v1 = vadd.f32 %v1636_v52, %v1630_v63  ;;  %v1633_v2 = vadd.f32 %v2133_v62, %v1584_v0 }
 0x168   :  { %v1638_v3 = vadd.f32 %v1637_v1, %v1633_v2 }
 0x16a   :  { %v1639_v4 = vrot.slane %v1638_v3, 4 }
 0x16c   :  { %v1640_v5 = vadd.f32 %v1639_v4, %v1638_v3 }
 0x16e   :  { %v1641_v6 = vrot.slane %v1640_v5, 2 }
 0x170   :  { %v1642_v7 = vadd.f32 %v1641_v6, %v1640_v5 }
 0x172   :  { %v1643_v8 = vrot.slane %v1642_v7, 1 }
 0x174   :  { %v1644_v9 = vadd.f32 %v1643_v8, %v1642_v7 }
 0x176   :  { %v1645_v10 = vmul.f32 0.03125, %v1644_v9 }
 0x178   :  { %v1646_v11 = vsub.f32 %v1622_v46, %v1645_v10  ;;  %v1647_v12 = vsub.f32 %v1625_v48, %v1645_v10  ;;  %v1648_v13 = vsub.f32 %v1630_v63, %v1645_v10  ;;  %v1649_v14 = vsub.f32 %v1633_v2, %v1645_v10 }
 0x17a   :  { %v1650_v15 = vmul.f32 %v1646_v11, %v1646_v11  ;;  %v1651_v16 = vmul.f32 %v1647_v12, %v1647_v12  ;;  %v1652_v17 = vmul.f32 %v1648_v13, %v1648_v13  ;;  %v1653_v19 = vmul.f32 %v1649_v14, %v1649_v14 }
 0x17c   :  { %v1654_v18 = vadd.f32 %v1651_v16, %v1650_v15 }
 0x17e   :  { %v1655_v20 = vadd.f32 %v1654_v18, %v1652_v17 }
 0x180   :  { %v1656_v21 = vadd.f32 %v1655_v20, %v1653_v19 }
 0x182   :  { %v1657_v22 = vrot.slane %v1656_v21, 4 }
 0x184   :  { %v1658_v23 = vadd.f32 %v1657_v22, %v1656_v21 }
 0x186   :  { %v1659_v24 = vrot.slane %v1658_v23, 2 }
 0x188   :  { %v1660_v25 = vadd.f32 %v1659_v24, %v1658_v23 }
 0x18a   :  { %v1661_v26 = vrot.slane %v1660_v25, 1 }
 0x18c   :  { %v1662_v27 = vadd.f32 %v1661_v26, %v1660_v25 }
 0x18e   :  { %v1663_v28 = vmul.f32 0.03125, %v1662_v27 }
 0x190   :  { %v1664_v29 = vadd.f32 1e-05, %v1663_v28 }
 0x192   :  { %2262 = vrsqrt.f32 %v1664_v29 }
 0x19c   :  { %v2263_v30 = vpop.eup %2262 }
 0x19d   :  { %v1666_v32 = vmul.f32 %v2263_v30, %v1646_v11  ;;  %v1667_v33 = vmul.f32 %v2263_v30, %v1647_v12  ;;  %v1668_v34 = vmul.f32 %v2263_v30, %v1648_v13  ;;  %v1669_v35 = vmul.f32 %v2263_v30, %v1649_v14 }
 0x19f   :  { %v1677_v37 = vmul.f32 %v1889_v31, %v1666_v32  ;;  %v1678_v38 = vmul.f32 %v1889_v31, %v1667_v33  ;;  %v1679_v39 = vmul.f32 %v1889_v31, %v1668_v34  ;;  %v1680_v40 = vmul.f32 %v1889_v31, %v1669_v35 }
 0x1a1   :  { %v1688_v41 = vadd.f32 %v1890_v36, %v1677_v37  ;;  %v1689_v42 = vadd.f32 %v1890_v36, %v1678_v38  ;;  %v1690_v43 = vadd.f32 %v1890_v36, %v1679_v39  ;;  %v1691_v44 = vadd.f32 %v1890_v36, %v1680_v40 }
 0x1a3   :  { %vm1692_vm0 = vcmp.gt.f32.partialorder %v1688_v41, 0.0  ;;  %vm1693_vm1 = vcmp.gt.f32.partialorder %v1689_v42, 0.0  ;;  %vm1694_vm2 = vcmp.gt.f32.partialorder %v1690_v43, 0.0  ;;  %vm1695_vm3 = vcmp.gt.f32.partialorder %v1691_v44, 0.0 }
 0x1a4   :  { %v1696_v45 = vmul.f32 0.2, %v1688_v41  ;;  %v1697_v46 = vmul.f32 0.2, %v1689_v42  ;;  %v1698_v47 = vmul.f32 0.2, %v1690_v43 }
 0x1a5   :  { %v1699_v48 = vmul.f32 0.2, %v1691_v44 }
 0x1a6   :  { %v1700_v49 = vsel %vm1692_vm0, %v1688_v41, %v1696_v45  ;;  %v1701_v50 = vsel %vm1693_vm1, %v1689_v42, %v1697_v46  ;;  %v1702_v51 = vsel %vm1694_vm2, %v1690_v43, %v1698_v47 }
 0x1a7   :  { %v1703_v52 = vsel %vm1695_vm3, %v1691_v44, %v1699_v48  ;;  %v1902_v53 = vpack.c.bf16 %v1701_v50, %v1700_v49 }
 0x1a8   :  { %v1907_v54 = vpack.c.bf16 %v1703_v52, %v1702_v51 }
 0x1a9   :  { %1903 = vst [vmem:[%s2794_s5] sm:$0xff] %v1902_v53  }
 0x1aa   :  { %1909 = vst [vmem:[%s2794_s5 + $0x8] sm:$0xff] %v1907_v54  }

// kernel: forward.7
= control target key start
LH: loop header
LB: loop body
LE: loop exit
PB: predicated region body
PF: predicated region fallthrough
CT: control target
= control target key end

     0   :  { %s2614_s1 = inlined_call_operand.vmem [shape: bf16[2048,128], index: 1, kind: input, shape index: {}]   ;;  %s2615_s0 = inlined_call_operand.vmem [shape: bf16[18,2048], index: 0, kind: input, shape index: {}]   ;;  %s2616_s2 = inlined_call_operand.vmem [shape: f32[1,128], index: 2, kind: input, shape index: {}]   ;;  %s2617_s3 = inlined_call_operand.vmem [shape: f32[18,128], index: 3, kind: output, shape index: {}]  }
   0x1   :  { %v1982_v0 = vld [vmem:[%s2614_s1 + $0x40] sm:$0xff]   ;;  %v1986_v4 = vld [vmem:[%s2614_s1 + $0x48] sm:$0xff]   ;;  %v1990_v8 = vld [vmem:[%s2614_s1 + $0x50] sm:$0xff]  }
   0x2   :  { %v1983_v1 = vld [vmem:[%s2614_s1 + $0xc0] sm:$0xff]   ;;  %1758 = vmatprep.subr.bf16.mxu0 %v1982_v0  ;;  %v1987_v5 = vld [vmem:[%s2614_s1 + $0xc8] sm:$0xff]   ;;  %v1991_v9 = vld [vmem:[%s2614_s1 + $0xd0] sm:$0xff]  }
   0x3   :  { %v1984_v2 = vld [vmem:[%s2614_s1] sm:$0xff]   ;;  %1786 = vmatprep.subr.bf16.mxu1 %v1983_v1  ;;  %v1988_v6 = vld [vmem:[%s2614_s1 + $0x8] sm:$0xff]   ;;  %v1992_v10 = vld [vmem:[%s2614_s1 + $0x10] sm:$0xff]  }
   0x4   :  { %v1985_v3 = vld [vmem:[%s2614_s1 + $0x80] sm:$0xff]   ;;  %1759 = vmatpush3.bf16.msra.mxu0 %v1984_v2  ;;  %v1989_v7 = vld [vmem:[%s2614_s1 + $0x88] sm:$0xff]   ;;  %v1993_v11 = vld [vmem:[%s2614_s1 + $0x90] sm:$0xff]  }
   0x5   :  { %1787 = vmatpush3.bf16.msra.mxu1 %v1985_v3  ;;  %1760 = vmatprep.subr.bf16.mxu0 %v1986_v4  ;;  %v1994_v12 = vld [vmem:[%s2614_s1 + $0x58] sm:$0xff]   ;;  %v1998_v16 = vld [vmem:[%s2614_s1 + $0x60] sm:$0xff]   ;;  %v2002_v20 = vld [vmem:[%s2614_s1 + $0x68] sm:$0xff]  }
   0x6   :  { %1788 = vmatprep.subr.bf16.mxu1 %v1987_v5  ;;  %v1995_v13 = vld [vmem:[%s2614_s1 + $0xd8] sm:$0xff]   ;;  %v1999_v17 = vld [vmem:[%s2614_s1 + $0xe0] sm:$0xff]   ;;  %v2003_v21 = vld [vmem:[%s2614_s1 + $0xe8] sm:$0xff]  }
   0x7   :  { %v1996_v14 = vld [vmem:[%s2614_s1 + $0x18] sm:$0xff]   ;;  %v2000_v18 = vld [vmem:[%s2614_s1 + $0x20] sm:$0xff]   ;;  %v2004_v22 = vld [vmem:[%s2614_s1 + $0x28] sm:$0xff]  }
   0x8   :  { %1761 = vmatpush3.bf16.msra.mxu0 %v1988_v6  ;;  %v1997_v15 = vld [vmem:[%s2614_s1 + $0x98] sm:$0xff]   ;;  %v2001_v19 = vld [vmem:[%s2614_s1 + $0xa0] sm:$0xff]   ;;  %v2005_v23 = vld [vmem:[%s2614_s1 + $0xa8] sm:$0xff]  }
   0x9   :  { %1789 = vmatpush3.bf16.msra.mxu1 %v1989_v7  ;;  %1762 = vmatprep.subr.bf16.mxu0 %v1990_v8  ;;  %v2006_v24 = vld [vmem:[%s2614_s1 + $0x70] sm:$0xff]   ;;  %v2010_v28 = vld [vmem:[%s2614_s1 + $0x78] sm:$0xff]   ;;  %v15_v32 = vld [vmem:[%s2615_s0] sm:$0xff] }
   0xa   :  { %1790 = vmatprep.subr.bf16.mxu1 %v1991_v9  ;;  %v2007_v25 = vld [vmem:[%s2614_s1 + $0xf0] sm:$0xff]   ;;  %v2011_v29 = vld [vmem:[%s2614_s1 + $0xf8] sm:$0xff]   ;;  %v23_v33 = vld [vmem:[%s2615_s0 + $0x40] sm:$0xff] }
   0xb   :  { %v2008_v26 = vld [vmem:[%s2614_s1 + $0x30] sm:$0xff]   ;;  %v2012_v30 = vld [vmem:[%s2614_s1 + $0x38] sm:$0xff]   ;;  %v16_v34 = vld [vmem:[%s2615_s0 + $0x8] sm:$0xff]  ;;  %v1598_v35 = vcombine.low %v15_v32, %v23_v33  ;;  %v1599_v36 = vcombine.high %v15_v32, %v23_v33 }
   0xc   :  { %1763 = vmatpush3.bf16.msra.mxu0 %v1992_v10  ;;  %v2009_v27 = vld [vmem:[%s2614_s1 + $0xb0] sm:$0xff]   ;;  %v2013_v31 = vld [vmem:[%s2614_s1 + $0xb8] sm:$0xff]   ;;  %v24_v37 = vld [vmem:[%s2615_s0 + $0x48] sm:$0xff] }
   0xd   :  { %1791 = vmatpush3.bf16.msra.mxu1 %v1993_v11  ;;  %1764 = vmatprep.subr.bf16.mxu0 %v1994_v12  ;;  %v1600_v38 = vcombine.low %v16_v34, %v24_v37  ;;  %v1601_v39 = vcombine.high %v16_v34, %v24_v37  ;;  %v2014_v40 = vld [vmem:[%s2614_s1 + $0x140] sm:$0xff]   ;;  %v2018_v44 = vld [vmem:[%s2614_s1 + $0x148] sm:$0xff]   ;;  %v2022_v48 = vld [vmem:[%s2614_s1 + $0x150] sm:$0xff]  }
   0xe   :  { %1792 = vmatprep.subr.bf16.mxu1 %v1995_v13  ;;  %1238 = vmatprep.mubr.bf16.mxu0 %v1599_v36  ;;  %v2015_v41 = vld [vmem:[%s2614_s1 + $0x1c0] sm:$0xff]   ;;  %v2019_v45 = vld [vmem:[%s2614_s1 + $0x1c8] sm:$0xff]   ;;  %v2023_v49 = vld [vmem:[%s2614_s1 + $0x1d0] sm:$0xff]  }
   0xf   :  { %1286 = vmatprep.mubr.bf16.mxu1 %v1601_v39  ;;  %v2016_v42 = vld [vmem:[%s2614_s1 + $0x100] sm:$0xff]   ;;  %v2020_v46 = vld [vmem:[%s2614_s1 + $0x108] sm:$0xff]   ;;  %v2024_v50 = vld [vmem:[%s2614_s1 + $0x110] sm:$0xff]  }
  0x10   :  { %1765 = vmatpush3.bf16.msra.mxu0 %v1996_v14  ;;  %v2017_v43 = vld [vmem:[%s2614_s1 + $0x180] sm:$0xff]   ;;  %v2021_v47 = vld [vmem:[%s2614_s1 + $0x188] sm:$0xff]   ;;  %v2025_v51 = vld [vmem:[%s2614_s1 + $0x190] sm:$0xff]  }
  0x11   :  { %1793 = vmatpush3.bf16.msra.mxu1 %v1997_v15  ;;  %1766 = vmatprep.subr.bf16.mxu0 %v1998_v16  ;;  %v2026_v52 = vld [vmem:[%s2614_s1 + $0x158] sm:$0xff]   ;;  %v2030_v56 = vld [vmem:[%s2614_s1 + $0x160] sm:$0xff]   ;;  %v2034_v60 = vld [vmem:[%s2614_s1 + $0x168] sm:$0xff]  }
  0x12   :  { %1794 = vmatprep.subr.bf16.mxu1 %v1999_v17  ;;  %v2027_v53 = vld [vmem:[%s2614_s1 + $0x1d8] sm:$0xff]   ;;  %v2031_v57 = vld [vmem:[%s2614_s1 + $0x1e0] sm:$0xff]   ;;  %v2035_v61 = vld [vmem:[%s2614_s1 + $0x1e8] sm:$0xff]  }
  0x13   :  { %v2028_v54 = vld [vmem:[%s2614_s1 + $0x118] sm:$0xff]   ;;  %v2032_v58 = vld [vmem:[%s2614_s1 + $0x120] sm:$0xff]   ;;  %v2037_v0 = vld [vmem:[%s2614_s1 + $0x128] sm:$0xff]  }
  0x14   :  { %1767 = vmatpush3.bf16.msra.mxu0 %v2000_v18  ;;  %v2029_v55 = vld [vmem:[%s2614_s1 + $0x198] sm:$0xff]   ;;  %v2033_v59 = vld [vmem:[%s2614_s1 + $0x1a0] sm:$0xff]   ;;  %v2038_v2 = vld [vmem:[%s2614_s1 + $0x1a8] sm:$0xff]  }
  0x15   :  { %1795 = vmatpush3.bf16.msra.mxu1 %v2001_v19  ;;  %1768 = vmatprep.subr.bf16.mxu0 %v2002_v20  ;;  %v31_v62 = vld [vmem:[%s2615_s0 + $0x80] sm:$0x11]  ;;  %v32_v3 = vld [vmem:[%s2615_s0 + $0x88] sm:$0x11]  ;;  %v2042_v6 = vld [vmem:[%s2614_s1 + $0x170] sm:$0xff]  }
  0x16   :  { %1796 = vmatprep.subr.bf16.mxu1 %v2003_v21  ;;  %v1615_v63 = vcombine.high %v31_v62, %v31_v62  ;;  %v1614_v1 = vcombine.low %v31_v62, %v31_v62  ;;  %v1617_v4 = vcombine.high %v32_v3, %v32_v3  ;;  %v1616_v5 = vcombine.low %v32_v3, %v32_v3  ;;  %v2043_v7 = vld [vmem:[%s2614_s1 + $0x1f0] sm:$0xff]   ;;  %v2046_v10 = vld [vmem:[%s2614_s1 + $0x178] sm:$0xff]   ;;  %v20_v62 = vld [vmem:[%s2615_s0 + $0x28] sm:$0xff] }
  0x17   :  { %v2044_v8 = vld [vmem:[%s2614_s1 + $0x130] sm:$0xff]   ;;  %v2047_v11 = vld [vmem:[%s2614_s1 + $0x1f8] sm:$0xff]  }
  0x18   :  { %1769 = vmatpush3.bf16.msra.mxu0 %v2004_v22  ;;  %v2045_v9 = vld [vmem:[%s2614_s1 + $0x1b0] sm:$0xff]   ;;  %v2048_v12 = vld [vmem:[%s2614_s1 + $0x138] sm:$0xff]   ;;  %v2050_v22 = vld [vmem:[%s2614_s1 + $0x240] sm:$0xff]  }
  0x19   :  { %1797 = vmatpush3.bf16.msra.mxu1 %v2005_v23  ;;  %1770 = vmatprep.subr.bf16.mxu0 %v2006_v24  ;;  %v2049_v13 = vld [vmem:[%s2614_s1 + $0x1b8] sm:$0xff]   ;;  %v17_v14 = vld [vmem:[%s2615_s0 + $0x10] sm:$0xff]  ;;  %v2051_v23 = vld [vmem:[%s2614_s1 + $0x2c0] sm:$0xff]  }
  0x1a   :  { %1798 = vmatprep.subr.bf16.mxu1 %v2007_v25  ;;  %v25_v15 = vld [vmem:[%s2615_s0 + $0x50] sm:$0xff]  ;;  %v18_v16 = vld [vmem:[%s2615_s0 + $0x18] sm:$0xff]  ;;  %v2052_v24 = vld [vmem:[%s2614_s1 + $0x200] sm:$0xff]  }
  0x1b   :  { %v1602_v17 = vcombine.low %v17_v14, %v25_v15  ;;  %v1603_v18 = vcombine.high %v17_v14, %v25_v15  ;;  %v26_v19 = vld [vmem:[%s2615_s0 + $0x58] sm:$0xff]  ;;  %v2053_v25 = vld [vmem:[%s2614_s1 + $0x280] sm:$0xff]   ;;  %v2060_v33 = vld [vmem:[%s2614_s1 + $0x250] sm:$0xff]  }
  0x1c   :  { %1771 = vmatpush3.bf16.msra.mxu0 %v2008_v26  ;;  %v1604_v20 = vcombine.low %v18_v16, %v26_v19  ;;  %v1605_v21 = vcombine.high %v18_v16, %v26_v19  ;;  %v2054_v26 = vld [vmem:[%s2614_s1 + $0x248] sm:$0xff]   ;;  %v2061_v34 = vld [vmem:[%s2614_s1 + $0x2d0] sm:$0xff]  }
  0x1d   :  { %1799 = vmatpush3.bf16.msra.mxu1 %v2009_v27  ;;  %1772 = vmatprep.subr.bf16.mxu0 %v2010_v28  ;;  %v2055_v27 = vld [vmem:[%s2614_s1 + $0x2c8] sm:$0xff]   ;;  %v2063_v37 = vld [vmem:[%s2614_s1 + $0x210] sm:$0xff]  }
  0x1e   :  { %1800 = vmatprep.subr.bf16.mxu1 %v2011_v29  ;;  %v2056_v28 = vld [vmem:[%s2614_s1 + $0x208] sm:$0xff]   ;;  %v2064_v39 = vld [vmem:[%s2614_s1 + $0x290] sm:$0xff]  }
  0x1f   :  { %v2057_v29 = vld [vmem:[%s2614_s1 + $0x288] sm:$0xff]   ;;  %v2096_v15 = vld [vmem:[%s2614_s1 + $0x350] sm:$0xff]  }
  0x20   :  { %1773 = vmatpush3.bf16.msra.mxu0 %v2012_v30  ;;  %v33_v30 = vld [vmem:[%s2615_s0 + $0x90] sm:$0x11] }
  0x21   :  { %1801 = vmatpush3.bf16.msra.mxu1 %v2013_v31  ;;  %1814 = vmatprep.subr.bf16.mxu0 %v2014_v40  ;;  %v1619_v31 = vcombine.high %v33_v30, %v33_v30  ;;  %v1618_v32 = vcombine.low %v33_v30, %v33_v30  ;;  %v2066_v40 = vld [vmem:[%s2614_s1 + $0x258] sm:$0xff]   ;;  %v2097_v16 = vld [vmem:[%s2614_s1 + $0x3d0] sm:$0xff]   ;;  %v2110_v30 = vld [vmem:[%s2614_s1 + $0x368] sm:$0xff]  }
  0x22   :  { %1842 = vmatprep.subr.bf16.mxu1 %v2015_v41  ;;  %v2067_v41 = vld [vmem:[%s2614_s1 + $0x2d8] sm:$0xff]   ;;  %v2099_v19 = vld [vmem:[%s2614_s1 + $0x310] sm:$0xff]  }
  0x23   :  { %1239 = vmatmul.mubr.bf16.vlgmr.msra.gmra.mrb[0].mxu0 %v1598_v35  ;;  %v34_v35 = vld [vmem:[%s2615_s0 + $0x98] sm:$0x11] }
  0x24   :  { %1287 = vmatmul.mubr.bf16.vlgmr.msra.gmra.mrb[0].mxu1 %v1600_v38  ;;  %1815 = vmatpush3.bf16.msra.mxu0 %v2016_v42  ;;  %v1621_v36 = vcombine.high %v34_v35, %v34_v35  ;;  %v1620_v38 = vcombine.low %v34_v35, %v34_v35  ;;  %v2068_v42 = vld [vmem:[%s2614_s1 + $0x218] sm:$0xff]   ;;  %v2115_v35 = vld [vmem:[%s2614_s1 + $0x3f0] sm:$0xff]  }
  0x25   :  { %1843 = vmatpush3.bf16.msra.mxu1 %v2017_v43  ;;  %1816 = vmatprep.subr.bf16.mxu0 %v2018_v44  ;;  %v2069_v43 = vld [vmem:[%s2614_s1 + $0x298] sm:$0xff]   ;;  %v2070_v44 = vld [vmem:[%s2614_s1 + $0x260] sm:$0xff]  }
  0x26   :  { %1844 = vmatprep.subr.bf16.mxu1 %v2019_v45  ;;  %1246 = vmatprep.mubr.bf16.mxu0 %v1615_v63  ;;  %v2071_v45 = vld [vmem:[%s2614_s1 + $0x2e0] sm:$0xff]  }
  0x27   :  { %1294 = vmatprep.mubr.bf16.mxu1 %v1617_v4  ;;  %v2086_v4 = vld [vmem:[%s2614_s1 + $0x340] sm:$0xff]  }
  0x28   :  { %1817 = vmatpush3.bf16.msra.mxu0 %v2020_v46  ;;  %v2072_v46 = vld [vmem:[%s2614_s1 + $0x220] sm:$0xff]  }
  0x29   :  { %1845 = vmatpush3.bf16.msra.mxu1 %v2021_v47  ;;  %1818 = vmatprep.subr.bf16.mxu0 %v2022_v48  ;;  %v2073_v47 = vld [vmem:[%s2614_s1 + $0x2a0] sm:$0xff]   ;;  %v2074_v48 = vld [vmem:[%s2614_s1 + $0x268] sm:$0xff]  }
  0x2a   :  { %1846 = vmatprep.subr.bf16.mxu1 %v2023_v49  ;;  %v2075_v49 = vld [vmem:[%s2614_s1 + $0x2e8] sm:$0xff]  }
  0x2b   :  { %1247 = vmatmul.mubr.bf16.gmra.mrb[4].mxu0 %v1614_v1  ;;  %v28_v1 = vld [vmem:[%s2615_s0 + $0x68] sm:$0xff] }
  0x2c   :  { %1819 = vmatpush3.bf16.msra.mxu0 %v2024_v50  ;;  %1295 = vmatmul.mubr.bf16.gmra.mrb[4].mxu1 %v1616_v5  ;;  %v2076_v50 = vld [vmem:[%s2614_s1 + $0x228] sm:$0xff]   ;;  %v1609_v3 = vcombine.high %v20_v62, %v28_v1  ;;  %v2087_v5 = vld [vmem:[%s2614_s1 + $0x3c0] sm:$0xff]  }
  0x2d   :  { %1847 = vmatpush3.bf16.msra.mxu1 %v2025_v51  ;;  %1820 = vmatprep.subr.bf16.mxu0 %v2026_v52  ;;  %v2077_v51 = vld [vmem:[%s2614_s1 + $0x2a8] sm:$0xff]   ;;  %v2078_v52 = vld [vmem:[%s2614_s1 + $0x270] sm:$0xff]  }
  0x2e   :  { %1848 = vmatprep.subr.bf16.mxu1 %v2027_v53  ;;  %1334 = vmatprep.mubr.bf16.mxu0 %v1603_v18  ;;  %v2079_v53 = vld [vmem:[%s2614_s1 + $0x2f0] sm:$0xff]  }
  0x2f   :  { %1382 = vmatprep.mubr.bf16.mxu1 %v1605_v21  ;;  %v2100_v21 = vld [vmem:[%s2614_s1 + $0x390] sm:$0xff]  }
  0x30   :  { %1821 = vmatpush3.bf16.msra.mxu0 %v2028_v54  ;;  %v2080_v54 = vld [vmem:[%s2614_s1 + $0x230] sm:$0xff]  }
  0x31   :  { %1849 = vmatpush3.bf16.msra.mxu1 %v2029_v55  ;;  %1822 = vmatprep.subr.bf16.mxu0 %v2030_v56  ;;  %v2081_v55 = vld [vmem:[%s2614_s1 + $0x2b0] sm:$0xff]   ;;  %v2082_v56 = vld [vmem:[%s2614_s1 + $0x278] sm:$0xff]  }
  0x32   :  { %1850 = vmatprep.subr.bf16.mxu1 %v2031_v57  ;;  %v2083_v57 = vld [vmem:[%s2614_s1 + $0x2f8] sm:$0xff]  }
  0x34   :  { %1823 = vmatpush3.bf16.msra.mxu0 %v2032_v58  ;;  %v2084_v58 = vld [vmem:[%s2614_s1 + $0x238] sm:$0xff]  }
  0x35   :  { %1851 = vmatpush3.bf16.msra.mxu1 %v2033_v59  ;;  %1824 = vmatprep.subr.bf16.mxu0 %v2034_v60  ;;  %v2085_v59 = vld [vmem:[%s2614_s1 + $0x2b8] sm:$0xff]   ;;  %v19_v60 = vld [vmem:[%s2615_s0 + $0x20] sm:$0xff] }
  0x36   :  { %1852 = vmatprep.subr.bf16.mxu1 %v2035_v61  ;;  %v27_v61 = vld [vmem:[%s2615_s0 + $0x60] sm:$0xff] }
  0x37   :  { %v1606_v63 = vcombine.low %v19_v60, %v27_v61 }
  0x38   :  { %1825 = vmatpush3.bf16.msra.mxu0 %v2037_v0  ;;  %v1607_v0 = vcombine.high %v19_v60, %v27_v61 }
  0x39   :  { %1853 = vmatpush3.bf16.msra.mxu1 %v2038_v2  ;;  %1826 = vmatprep.subr.bf16.mxu0 %v2042_v6  ;;  %v1608_v2 = vcombine.low %v20_v62, %v28_v1  ;;  %v2088_v6 = vld [vmem:[%s2614_s1 + $0x300] sm:$0xff]  }
  0x3a   :  { %1854 = vmatprep.subr.bf16.mxu1 %v2043_v7  ;;  %v2089_v7 = vld [vmem:[%s2614_s1 + $0x380] sm:$0xff]  }
  0x3c   :  { %1827 = vmatpush3.bf16.msra.mxu0 %v2044_v8  ;;  %v2090_v8 = vld [vmem:[%s2614_s1 + $0x348] sm:$0xff]  }
  0x3d   :  { %1855 = vmatpush3.bf16.msra.mxu1 %v2045_v9  ;;  %1828 = vmatprep.subr.bf16.mxu0 %v2046_v10  ;;  %v2091_v9 = vld [vmem:[%s2614_s1 + $0x3c8] sm:$0xff]  }
  0x3e   :  { %1856 = vmatprep.subr.bf16.mxu1 %v2047_v11  ;;  %v2092_v10 = vld [vmem:[%s2614_s1 + $0x308] sm:$0xff]  }
  0x3f   :  { %v2093_v11 = vld [vmem:[%s2614_s1 + $0x388] sm:$0xff]  }
  0x40   :  { %1829 = vmatpush3.bf16.msra.mxu0 %v2048_v12  ;;  %v35_v12 = vld [vmem:[%s2615_s0 + $0xa0] sm:$0x11] }
  0x41   :  { %1857 = vmatpush3.bf16.msra.mxu1 %v2049_v13  ;;  %1870 = vmatprep.subr.bf16.mxu0 %v2050_v22  ;;  %v1623_v13 = vcombine.high %v35_v12, %v35_v12  ;;  %v1622_v14 = vcombine.low %v35_v12, %v35_v12  ;;  %v2102_v22 = vld [vmem:[%s2614_s1 + $0x358] sm:$0xff]  }
  0x42   :  { %1898 = vmatprep.subr.bf16.mxu1 %v2051_v23  ;;  %v2103_v23 = vld [vmem:[%s2614_s1 + $0x3d8] sm:$0xff]  }
  0x43   :  { %1335 = vmatmul.mubr.bf16.vlgmr.msra.gmra.mrb[8].mxu0 %v1602_v17  ;;  %v36_v17 = vld [vmem:[%s2615_s0 + $0xa8] sm:$0x11] }
  0x44   :  { %1383 = vmatmul.mubr.bf16.vlgmr.msra.gmra.mrb[8].mxu1 %v1604_v20  ;;  %1871 = vmatpush3.bf16.msra.mxu0 %v2052_v24  ;;  %v1625_v18 = vcombine.high %v36_v17, %v36_v17  ;;  %v1624_v20 = vcombine.low %v36_v17, %v36_v17  ;;  %v2104_v24 = vld [vmem:[%s2614_s1 + $0x318] sm:$0xff]  }
  0x45   :  { %1899 = vmatpush3.bf16.msra.mxu1 %v2053_v25  ;;  %1872 = vmatprep.subr.bf16.mxu0 %v2054_v26  ;;  %v2105_v25 = vld [vmem:[%s2614_s1 + $0x398] sm:$0xff]   ;;  %v2106_v26 = vld [vmem:[%s2614_s1 + $0x360] sm:$0xff]  }
  0x46   :  { %1900 = vmatprep.subr.bf16.mxu1 %v2055_v27  ;;  %1342 = vmatprep.mubr.bf16.mxu0 %v1619_v31  ;;  %v2107_v27 = vld [vmem:[%s2614_s1 + $0x3e0] sm:$0xff]   ;;  %v2111_v31 = vld [vmem:[%s2614_s1 + $0x3e8] sm:$0xff]  }
  0x47   :  { %1390 = vmatprep.mubr.bf16.mxu1 %v1621_v36  ;;  %v2116_v36 = vld [vmem:[%s2614_s1 + $0x330] sm:$0xff]  }
  0x48   :  { %1873 = vmatpush3.bf16.msra.mxu0 %v2056_v28  ;;  %v2108_v28 = vld [vmem:[%s2614_s1 + $0x320] sm:$0xff]  }
  0x49   :  { %1901 = vmatpush3.bf16.msra.mxu1 %v2057_v29  ;;  %1874 = vmatprep.subr.bf16.mxu0 %v2060_v33  ;;  %v2109_v29 = vld [vmem:[%s2614_s1 + $0x3a0] sm:$0xff]   ;;  %v2113_v33 = vld [vmem:[%s2614_s1 + $0x3a8] sm:$0xff]  }
  0x4a   :  { %1902 = vmatprep.subr.bf16.mxu1 %v2061_v34  ;;  %v2114_v34 = vld [vmem:[%s2614_s1 + $0x370] sm:$0xff]  }
  0x4b   :  { %1343 = vmatmul.mubr.bf16.gmra.mrb[12].mxu0 %v1618_v32  ;;  %v2112_v32 = vld [vmem:[%s2614_s1 + $0x328] sm:$0xff]  }
  0x4c   :  { %1875 = vmatpush3.bf16.msra.mxu0 %v2063_v37  ;;  %1391 = vmatmul.mubr.bf16.gmra.mrb[12].mxu1 %v1620_v38  ;;  %v2117_v37 = vld [vmem:[%s2614_s1 + $0x3b0] sm:$0xff]   ;;  %v2118_v38 = vld [vmem:[%s2614_s1 + $0x378] sm:$0xff]  }
  0x4d   :  { %1903 = vmatpush3.bf16.msra.mxu1 %v2064_v39  ;;  %1876 = vmatprep.subr.bf16.mxu0 %v2066_v40  ;;  %v2119_v39 = vld [vmem:[%s2614_s1 + $0x3f8] sm:$0xff]  }
  0x4e   :  { %1904 = vmatprep.subr.bf16.mxu1 %v2067_v41  ;;  %1430 = vmatprep.mubr.bf16.mxu0 %v1607_v0  ;;  %v2120_v40 = vld [vmem:[%s2614_s1 + $0x338] sm:$0xff]  }
  0x4f   :  { %1478 = vmatprep.mubr.bf16.mxu1 %v1609_v3  ;;  %v2121_v41 = vld [vmem:[%s2614_s1 + $0x3b8] sm:$0xff]  }
  0x50   :  { %1877 = vmatpush3.bf16.msra.mxu0 %v2068_v42  ;;  %v21_v42 = vld [vmem:[%s2615_s0 + $0x30] sm:$0xff] }
  0x51   :  { %1905 = vmatpush3.bf16.msra.mxu1 %v2069_v43  ;;  %1878 = vmatprep.subr.bf16.mxu0 %v2070_v44  ;;  %v29_v43 = vld [vmem:[%s2615_s0 + $0x70] sm:$0xff]  ;;  %v22_v44 = vld [vmem:[%s2615_s0 + $0x38] sm:$0xff] }
  0x52   :  { %1906 = vmatprep.subr.bf16.mxu1 %v2071_v45  ;;  %v1610_v45 = vcombine.low %v21_v42, %v29_v43 }
  0x54   :  { %1879 = vmatpush3.bf16.msra.mxu0 %v2072_v46  ;;  %v1611_v46 = vcombine.high %v21_v42, %v29_v43 }
  0x55   :  { %1907 = vmatpush3.bf16.msra.mxu1 %v2073_v47  ;;  %1880 = vmatprep.subr.bf16.mxu0 %v2074_v48  ;;  %v30_v47 = vld [vmem:[%s2615_s0 + $0x78] sm:$0xff]  ;;  %v37_v48 = vld [vmem:[%s2615_s0 + $0xb0] sm:$0x11] }
  0x56   :  { %1908 = vmatprep.subr.bf16.mxu1 %v2075_v49  ;;  %v38_v49 = vld [vmem:[%s2615_s0 + $0xb8] sm:$0x11] }
  0x58   :  { %1881 = vmatpush3.bf16.msra.mxu0 %v2076_v50  ;;  %v1612_v50 = vcombine.low %v22_v44, %v30_v47 }
  0x59   :  { %1909 = vmatpush3.bf16.msra.mxu1 %v2077_v51  ;;  %1882 = vmatprep.subr.bf16.mxu0 %v2078_v52  ;;  %v1613_v51 = vcombine.high %v22_v44, %v30_v47  ;;  %v1627_v52 = vcombine.high %v37_v48, %v37_v48 }
  0x5a   :  { %1910 = vmatprep.subr.bf16.mxu1 %v2079_v53  ;;  %v1629_v53 = vcombine.high %v38_v49, %v38_v49 }
  0x5c   :  { %1883 = vmatpush3.bf16.msra.mxu0 %v2080_v54  ;;  %v1626_v54 = vcombine.low %v37_v48, %v37_v48 }
  0x5d   :  { %1911 = vmatpush3.bf16.msra.mxu1 %v2081_v55  ;;  %1884 = vmatprep.subr.bf16.mxu0 %v2082_v56  ;;  %v1628_v55 = vcombine.low %v38_v49, %v38_v49 }
  0x5e   :  { %1912 = vmatprep.subr.bf16.mxu1 %v2083_v57 }
  0x60   :  { %1885 = vmatpush3.bf16.msra.mxu0 %v2084_v58  ;;  %v1597_v58 = vld [vmem:[%s2616_s2] ss:$0 sm:$0xff] }
  0x61   :  { %1913 = vmatpush3.bf16.msra.mxu1 %v2085_v59  ;;  %1926 = vmatprep.subr.bf16.mxu0 %v2086_v4 }
  0x62   :  { %1954 = vmatprep.subr.bf16.mxu1 %v2087_v5 }
  0x63   :  { %1431 = vmatmul.mubr.bf16.vlgmr.msra.gmra.mrb[16].mxu0 %v1606_v63 }
  0x64   :  { %1479 = vmatmul.mubr.bf16.vlgmr.msra.gmra.mrb[16].mxu1 %v1608_v2  ;;  %1927 = vmatpush3.bf16.msra.mxu0 %v2088_v6 }
  0x65   :  { %1955 = vmatpush3.bf16.msra.mxu1 %v2089_v7  ;;  %1928 = vmatprep.subr.bf16.mxu0 %v2090_v8 }
  0x66   :  { %1956 = vmatprep.subr.bf16.mxu1 %v2091_v9  ;;  %1438 = vmatprep.mubr.bf16.mxu0 %v1623_v13 }
  0x67   :  { %1486 = vmatprep.mubr.bf16.mxu1 %v1625_v18 }
  0x68   :  { %1929 = vmatpush3.bf16.msra.mxu0 %v2092_v10 }
  0x69   :  { %1957 = vmatpush3.bf16.msra.mxu1 %v2093_v11  ;;  %1930 = vmatprep.subr.bf16.mxu0 %v2096_v15 }
  0x6a   :  { %1958 = vmatprep.subr.bf16.mxu1 %v2097_v16 }
  0x6b   :  { %1439 = vmatmul.mubr.bf16.gmra.mrb[20].mxu0 %v1622_v14 }
  0x6c   :  { %1931 = vmatpush3.bf16.msra.mxu0 %v2099_v19  ;;  %1487 = vmatmul.mubr.bf16.gmra.mrb[20].mxu1 %v1624_v20 }
  0x6d   :  { %1959 = vmatpush3.bf16.msra.mxu1 %v2100_v21  ;;  %1932 = vmatprep.subr.bf16.mxu0 %v2102_v22 }
  0x6e   :  { %1960 = vmatprep.subr.bf16.mxu1 %v2103_v23  ;;  %1526 = vmatprep.mubr.bf16.mxu0 %v1611_v46 }
  0x6f   :  { %1574 = vmatprep.mubr.bf16.mxu1 %v1613_v51 }
  0x70   :  { %1933 = vmatpush3.bf16.msra.mxu0 %v2104_v24 }
  0x71   :  { %1961 = vmatpush3.bf16.msra.mxu1 %v2105_v25  ;;  %1934 = vmatprep.subr.bf16.mxu0 %v2106_v26 }
  0x72   :  { %1962 = vmatprep.subr.bf16.mxu1 %v2107_v27 }
  0x74   :  { %1935 = vmatpush3.bf16.msra.mxu0 %v2108_v28 }
  0x75   :  { %1963 = vmatpush3.bf16.msra.mxu1 %v2109_v29  ;;  %1936 = vmatprep.subr.bf16.mxu0 %v2110_v30 }
  0x76   :  { %1964 = vmatprep.subr.bf16.mxu1 %v2111_v31 }
  0x78   :  { %1937 = vmatpush3.bf16.msra.mxu0 %v2112_v32 }
  0x79   :  { %1965 = vmatpush3.bf16.msra.mxu1 %v2113_v33  ;;  %1938 = vmatprep.subr.bf16.mxu0 %v2114_v34 }
  0x7a   :  { %1966 = vmatprep.subr.bf16.mxu1 %v2115_v35 }
  0x7c   :  { %1939 = vmatpush3.bf16.msra.mxu0 %v2116_v36 }
  0x7d   :  { %1967 = vmatpush3.bf16.msra.mxu1 %v2117_v37  ;;  %1940 = vmatprep.subr.bf16.mxu0 %v2118_v38 }
  0x7e   :  { %1968 = vmatprep.subr.bf16.mxu1 %v2119_v39 }
  0x80   :  { %1941 = vmatpush3.bf16.msra.mxu0 %v2120_v40 }
  0x81   :  { %1969 = vmatpush3.bf16.msra.mxu1 %v2121_v41 }
  0x83   :  { %1527 = vmatmul.mubr.bf16.vlgmr.msra.gmra.mrb[24].mxu0 %v1610_v45 }
  0x84   :  { %1575 = vmatmul.mubr.bf16.vlgmr.msra.gmra.mrb[24].mxu1 %v1612_v50  ;;  %1534 = vmatprep.mubr.bf16.mxu0 %v1627_v52 }
  0x85   :  { %1582 = vmatprep.mubr.bf16.mxu1 %v1629_v53 }
  0x8b   :  { %1535 = vmatmul.mubr.bf16.gmra.mrb[28].mxu0 %v1626_v54 }
  0x8c   :  { %1583 = vmatmul.mubr.bf16.gmra.mrb[28].mxu1 %v1628_v55 }
  0xf6   :  { %v1774_v56 = vpop.f32.mrb[0].mxu0 }
  0xf7   :  { %v1802_v57 = vpop.f32.mrb[0].mxu1  ;;  %v1775_v59 = vpop.f32.mrb[1].mxu0 }
  0xf8   :  { %v1776_v60 = vadd.f32 %v1775_v59, %v1774_v56  ;;  %v1803_v61 = vpop.f32.mrb[1].mxu1  ;;  %v1777_v62 = vpop.f32.mrb[2].mxu0 }
  0xf9   :  { %v1804_v63 = vadd.f32 %v1803_v61, %v1802_v57  ;;  %v1805_v0 = vpop.f32.mrb[2].mxu1  ;;  %v1778_v1 = vpop.f32.mrb[3].mxu0 }
  0xfa   :  { %v1241_v2 = vadd.f32 %v1776_v60, %v1597_v58  ;;  %v1779_v3 = vadd.f32 %v1778_v1, %v1777_v62  ;;  %v1806_v4 = vpop.f32.mrb[3].mxu1 }
  0xfb   :  { %v1807_v5 = vadd.f32 %v1806_v4, %v1805_v0 }
  0xfc   :  { %v1289_v6 = vadd.f32 %v1804_v63, %v1241_v2  ;;  %v1244_v7 = vadd.f32 %v1779_v3, %v1597_v58 }
  0xfe   :  { %v1292_v8 = vadd.f32 %v1807_v5, %v1244_v7  ;;  %v1780_v9 = vpop.f32.mrb[4].mxu0 }
  0xff   :  { %v1781_v10 = vpop.f32.mrb[5].mxu0  ;;  %v1808_v13 = vpop.f32.mrb[4].mxu1 }
 0x100   :  { %v1782_v11 = vadd.f32 %v1781_v10, %v1780_v9  ;;  %v1783_v12 = vpop.f32.mrb[6].mxu0  ;;  %v1809_v15 = vpop.f32.mrb[5].mxu1 }
 0x101   :  { %v1784_v14 = vpop.f32.mrb[7].mxu0  ;;  %v1810_v17 = vadd.f32 %v1809_v15, %v1808_v13  ;;  %v1811_v18 = vpop.f32.mrb[6].mxu1 }
 0x102   :  { %v1249_v16 = vadd.f32 %v1782_v11, %v1597_v58  ;;  %v1812_v19 = vpop.f32.mrb[7].mxu1 }
 0x104   :  { %v1297_v20 = vadd.f32 %v1810_v17, %v1249_v16 }
 0x116   :  { %v1830_v21 = vpop.f32.mrb[8].mxu0 }
 0x117   :  { %v1858_v22 = vpop.f32.mrb[8].mxu1  ;;  %v1831_v23 = vpop.f32.mrb[9].mxu0 }
 0x118   :  { %v1832_v24 = vadd.f32 %v1831_v23, %v1830_v21  ;;  %v1859_v25 = vpop.f32.mrb[9].mxu1  ;;  %v1833_v26 = vpop.f32.mrb[10].mxu0 }
 0x119   :  { %v1860_v27 = vadd.f32 %v1859_v25, %v1858_v22  ;;  %v1861_v28 = vpop.f32.mrb[10].mxu1  ;;  %v1834_v29 = vpop.f32.mrb[11].mxu0 }
 0x11a   :  { %v1337_v30 = vadd.f32 %v1832_v24, %v1289_v6  ;;  %v1835_v31 = vadd.f32 %v1834_v29, %v1833_v26  ;;  %v1862_v32 = vpop.f32.mrb[11].mxu1 }
 0x11b   :  { %v1863_v33 = vadd.f32 %v1862_v32, %v1861_v28 }
 0x11c   :  { %v1385_v34 = vadd.f32 %v1860_v27, %v1337_v30  ;;  %v1340_v35 = vadd.f32 %v1835_v31, %v1292_v8 }
 0x11e   :  { %v1388_v36 = vadd.f32 %v1863_v33, %v1340_v35  ;;  %v1836_v37 = vpop.f32.mrb[12].mxu0 }
 0x11f   :  { %v1837_v38 = vpop.f32.mrb[13].mxu0  ;;  %v1864_v41 = vpop.f32.mrb[12].mxu1 }
 0x120   :  { %v1838_v39 = vadd.f32 %v1837_v38, %v1836_v37  ;;  %v1839_v40 = vpop.f32.mrb[14].mxu0  ;;  %v1865_v44 = vpop.f32.mrb[13].mxu1 }
 0x121   :  { %v1840_v42 = vpop.f32.mrb[15].mxu0  ;;  %v1866_v45 = vadd.f32 %v1865_v44, %v1864_v41  ;;  %v1867_v46 = vpop.f32.mrb[14].mxu1 }
 0x122   :  { %v1345_v43 = vadd.f32 %v1838_v39, %v1297_v20  ;;  %v1868_v47 = vpop.f32.mrb[15].mxu1 }
 0x124   :  { %v1393_v48 = vadd.f32 %v1866_v45, %v1345_v43 }
 0x136   :  { %v1886_v49 = vpop.f32.mrb[16].mxu0 }
 0x137   :  { %v1914_v50 = vpop.f32.mrb[16].mxu1  ;;  %v1887_v51 = vpop.f32.mrb[17].mxu0 }
 0x138   :  { %v1888_v52 = vadd.f32 %v1887_v51, %v1886_v49  ;;  %v1915_v53 = vpop.f32.mrb[17].mxu1  ;;  %v1889_v54 = vpop.f32.mrb[18].mxu0 }
 0x139   :  { %v1916_v55 = vadd.f32 %v1915_v53, %v1914_v50  ;;  %v1917_v56 = vpop.f32.mrb[18].mxu1  ;;  %v1890_v57 = vpop.f32.mrb[19].mxu0 }
 0x13a   :  { %v1433_v58 = vadd.f32 %v1888_v52, %v1385_v34  ;;  %v1891_v59 = vadd.f32 %v1890_v57, %v1889_v54  ;;  %v1918_v60 = vpop.f32.mrb[19].mxu1 }
 0x13b   :  { %v1919_v61 = vadd.f32 %v1918_v60, %v1917_v56 }
 0x13c   :  { %v1481_v62 = vadd.f32 %v1916_v55, %v1433_v58  ;;  %v1436_v63 = vadd.f32 %v1891_v59, %v1388_v36 }
 0x13e   :  { %v1484_v0 = vadd.f32 %v1919_v61, %v1436_v63  ;;  %v1892_v1 = vpop.f32.mrb[20].mxu0 }
 0x13f   :  { %v1893_v2 = vpop.f32.mrb[21].mxu0  ;;  %v1920_v5 = vpop.f32.mrb[20].mxu1 }
 0x140   :  { %v1894_v3 = vadd.f32 %v1893_v2, %v1892_v1  ;;  %v1895_v4 = vpop.f32.mrb[22].mxu0  ;;  %v1921_v8 = vpop.f32.mrb[21].mxu1 }
 0x141   :  { %v1896_v6 = vpop.f32.mrb[23].mxu0  ;;  %v1922_v9 = vadd.f32 %v1921_v8, %v1920_v5  ;;  %v1923_v10 = vpop.f32.mrb[22].mxu1 }
 0x142   :  { %v1441_v7 = vadd.f32 %v1894_v3, %v1393_v48  ;;  %v1924_v11 = vpop.f32.mrb[23].mxu1 }
 0x144   :  { %v1489_v12 = vadd.f32 %v1922_v9, %v1441_v7 }
 0x156   :  { %v1942_v13 = vpop.f32.mrb[24].mxu0 }
 0x157   :  { %v1970_v14 = vpop.f32.mrb[24].mxu1  ;;  %v1943_v15 = vpop.f32.mrb[25].mxu0 }
 0x158   :  { %v1944_v16 = vadd.f32 %v1943_v15, %v1942_v13  ;;  %v1971_v17 = vpop.f32.mrb[25].mxu1  ;;  %v1945_v18 = vpop.f32.mrb[26].mxu0 }
 0x159   :  { %v1972_v19 = vadd.f32 %v1971_v17, %v1970_v14  ;;  %v1973_v20 = vpop.f32.mrb[26].mxu1  ;;  %v1946_v21 = vpop.f32.mrb[27].mxu0 }
 0x15a   :  { %v1529_v22 = vadd.f32 %v1944_v16, %v1481_v62  ;;  %v1947_v23 = vadd.f32 %v1946_v21, %v1945_v18  ;;  %v1974_v24 = vpop.f32.mrb[27].mxu1 }
 0x15b   :  { %v1975_v25 = vadd.f32 %v1974_v24, %v1973_v20 }
 0x15c   :  { %v1577_v26 = vadd.f32 %v1972_v19, %v1529_v22  ;;  %v1532_v27 = vadd.f32 %v1947_v23, %v1484_v0 }
 0x15e   :  { %1590 = vst [vmem:[%s2617_s3] sm:$0xff] %v1577_v26  ;;  %v1580_v28 = vadd.f32 %v1975_v25, %v1532_v27  ;;  %v1948_v29 = vpop.f32.mrb[28].mxu0 }
 0x15f   :  { %v1976_v30 = vpop.f32.mrb[28].mxu1  ;;  %v1949_v31 = vpop.f32.mrb[29].mxu0 }
 0x160   :  { %1591 = vst [vmem:[%s2617_s3 + $0x8] sm:$0xff] %v1580_v28  ;;  %v1950_v32 = vadd.f32 %v1949_v31, %v1948_v29  ;;  %v1977_v33 = vpop.f32.mrb[29].mxu1  ;;  %v1951_v34 = vpop.f32.mrb[30].mxu0 }
 0x161   :  { %v1978_v35 = vadd.f32 %v1977_v33, %v1976_v30  ;;  %v1979_v36 = vpop.f32.mrb[30].mxu1  ;;  %v1952_v37 = vpop.f32.mrb[31].mxu0 }
 0x162   :  { %v1537_v38 = vadd.f32 %v1950_v32, %v1489_v12  ;;  %v1980_v39 = vpop.f32.mrb[31].mxu1 }
 0x164   :  { %v1585_v40 = vadd.f32 %v1978_v35, %v1537_v38 }
 0x166   :  { %1592 = vst [vmem:[%s2617_s3 + $0x10] sm:$0x3] %v1585_v40 }

</bundles_post_ra>
